<compile_context>
chip_gen: v5e
topology: v5e:2x2
jax: 0.10.0
libtpu: 0.0.40
codegen_flags: <defaults>
</compile_context>

<pallas_src>
import math

import jax
import jax.numpy as jnp
from jax.experimental import pallas as pl
from jax.experimental.pallas import tpu as pltpu


# ----------------------------------------------------------------------------
# helpers
# ----------------------------------------------------------------------------
def _tile(full, target, align):
    """Largest tile <= target that is a multiple of `align` and divides `full`.
    Falls back to the full extent (always a legal block shape)."""
    if full <= target:
        return full
    t = (target // align) * align
    while t >= align:
        if full % t == 0:
            return t
        t -= align
    return full


# ----------------------------------------------------------------------------
# Tiled matmul (fused QKV projection and output projection)
# ----------------------------------------------------------------------------
def _matmul_kernel(x_ref, w_ref, o_ref, acc_ref):
    @pl.when(pl.program_id(2) == 0)
    def _():
        acc_ref[...] = jnp.zeros_like(acc_ref)

    acc_ref[...] += jnp.dot(x_ref[...], w_ref[...],
                            preferred_element_type=jnp.float32)

    @pl.when(pl.program_id(2) == pl.num_programs(2) - 1)
    def _():
        o_ref[...] = acc_ref[...].astype(o_ref.dtype)


def linear(x2d, w, *, tm=512, tn=512, tk=1024):
    """x2d: (M, K), w: (K, N) -> (M, N). Tiled, pipelined, f32 accumulation.
    Large tm amortizes weight re-reads; blocks stay well under scoped VMEM."""
    M, K = x2d.shape
    K2, N = w.shape
    assert K == K2
    tm = _tile(M, tm, 8)
    tn = _tile(N, tn, 128)
    tk = _tile(K, tk, 128)
    return pl.pallas_call(
        _matmul_kernel,
        out_shape=jax.ShapeDtypeStruct((M, N), x2d.dtype),
        grid=(M // tm, N // tn, K // tk),
        in_specs=[
            pl.BlockSpec((tm, tk), lambda i, j, kk: (i, kk)),
            pl.BlockSpec((tk, tn), lambda i, j, kk: (kk, j)),
        ],
        out_specs=pl.BlockSpec((tm, tn), lambda i, j, kk: (i, j)),
        scratch_shapes=[pltpu.VMEM((tm, tn), jnp.float32)],
        compiler_params=pltpu.CompilerParams(
            dimension_semantics=("parallel", "parallel", "arbitrary")),
    )(x2d, w)


# ----------------------------------------------------------------------------
# K pre-rotation: one cheap pass over the (narrow) K columns of the qkv slab
# ----------------------------------------------------------------------------
def _rope_k_kernel(k_ref, cos_ref, sin_ref, o_ref):
    half = cos_ref.shape[1]
    D = 2 * half
    Hkv = k_ref.shape[1] // D
    cos = cos_ref[...]
    sin = sin_ref[...]
    k = k_ref[...]
    outs = []
    for h in range(Hkv):                                    # static unroll
        kh = k[:, h * D:(h + 1) * D]
        k1, k2 = kh[:, :half], kh[:, half:]
        outs.append(jnp.concatenate([k1 * cos - k2 * sin,
                                     k1 * sin + k2 * cos], axis=-1))
    o_ref[...] = jnp.concatenate(outs, axis=-1).astype(o_ref.dtype)


def rope_k(qkv, cos, sin, *, B, S, n_heads, n_kv_heads, tm=512):
    """Reads the K section of the fused qkv slab and writes RoPE-rotated K
    (B*S, Hkv*D). Removes the S/tq-redundant K rotation from the flash loop."""
    BS, _ = qkv.shape
    half = cos.shape[1]
    D = 2 * half
    nk = n_kv_heads * D
    n_rep = n_heads // n_kv_heads           # K section starts at column n_rep*nk
    t = _tile(S, tm, 8)
    nt = S // t
    return pl.pallas_call(
        _rope_k_kernel,
        out_shape=jax.ShapeDtypeStruct((BS, nk), qkv.dtype),
        grid=(B, nt),
        in_specs=[
            pl.BlockSpec((t, nk), lambda b, si: (b * nt + si, n_rep)),
            pl.BlockSpec((t, half), lambda b, si: (si, 0)),
            pl.BlockSpec((t, half), lambda b, si: (si, 0)),
        ],
        out_specs=pl.BlockSpec((t, nk), lambda b, si: (b * nt + si, 0)),
        compiler_params=pltpu.CompilerParams(
            dimension_semantics=("parallel", "parallel")),
    )(qkv, cos, sin)


# ----------------------------------------------------------------------------
# Flash attention: fused qkv consumption, GQA-batched matmuls, in-kernel
# causal mask on diagonal tiles only, DMA-skip of fully masked KV tiles.
# ----------------------------------------------------------------------------
def _flash_attn_kernel(q_ref, k_ref, v_ref, cos_ref, sin_ref, o_ref,
                       q_scr, m_scr, l_scr, acc_scr):
    tq, G = q_ref.shape
    tk, D = k_ref.shape
    n_rep = G // D
    half = D // 2
    scale = 1.0 / math.sqrt(D)

    qi = pl.program_id(2)
    ki = pl.program_id(3)

    # Once per q tile (ki == 0): RoPE-rotate + scale the whole GQA query group
    # into the (n_rep*tq, D) batched-rows layout and reset the softmax state.
    @pl.when(ki == 0)
    def _init():
        cos = cos_ref[...]
        sin = sin_ref[...]
        q = q_ref[...]
        for r in range(n_rep):                              # static unroll
            qh = q[:, r * D:(r + 1) * D]
            q1, q2 = qh[:, :half], qh[:, half:]
            qr = jnp.concatenate([q1 * cos - q2 * sin,
                                  q1 * sin + q2 * cos], axis=-1)
            q_scr[r * tq:(r + 1) * tq, :] = (qr * scale).astype(q_scr.dtype)
        m_scr[...] = jnp.full_like(m_scr, -jnp.inf)
        l_scr[...] = jnp.zeros_like(l_scr)
        acc_scr[...] = jnp.zeros_like(acc_scr)

    def _tile_body(masked):
        q_all = q_scr[...]                                  # (n_rep*tq, D)
        k_blk = k_ref[...]                                  # (tk, D) pre-rotated
        # One batched scores matmul for all n_rep heads of the group.
        s = jax.lax.dot_general(q_all, k_blk, (((1,), (1,)), ((), ())),
                                preferred_element_type=jnp.float32)
        if masked:
            # Diagonal tile (ki == qi, tq == tk): within-tile causal mask.
            row = jax.lax.broadcasted_iota(jnp.int32, (tq, tk), 0)
            row = jnp.concatenate([row] * n_rep, axis=0)    # (n_rep*tq, tk)
            col = jax.lax.broadcasted_iota(jnp.int32, (n_rep * tq, tk), 1)
            s = jnp.where(col > row, -1e30, s)
        m_prev = m_scr[...]
        m_new = jnp.maximum(m_prev, jnp.max(s, axis=-1, keepdims=True))
        alpha = jnp.exp(m_prev - m_new)
        p = jnp.exp(s - m_new)
        l_scr[...] = alpha * l_scr[...] + jnp.sum(p, axis=-1, keepdims=True)
        acc_scr[...] = alpha * acc_scr[...] + jnp.dot(
            p.astype(v_ref.dtype), v_ref[...],
            preferred_element_type=jnp.float32)
        m_scr[...] = m_new

    @pl.when(ki < qi)          # interior tile: no mask work at all
    def _interior():
        _tile_body(masked=False)

    @pl.when(ki == qi)         # diagonal tile: build + apply the causal mask
    def _diag():
        _tile_body(masked=True)

    # ki > qi tiles: fully masked — no compute, and their K/V DMA is skipped
    # by the clamped index maps.

    @pl.when(ki == pl.num_programs(3) - 1)
    def _finalize():
        l = l_scr[...]
        inv_l = pl.reciprocal(l, approx=True)               # EUP slot
        inv_l = inv_l * (2.0 - l * inv_l)                   # one Newton step
        out = acc_scr[...] * inv_l                          # (n_rep*tq, D)
        for r in range(n_rep):
            o_ref[:, r * D:(r + 1) * D] = (
                out[r * tq:(r + 1) * tq, :].astype(o_ref.dtype))


def attention_core(qkv, k_rot, cos, sin, *, B, S, n_heads, n_kv_heads, tq=256):
    """qkv: (B*S, (H+2*Hkv)*D) fused projection output, k_rot: (B*S, Hkv*D)
    pre-rotated keys -> (B*S, H*D) attention output (head-major per row)."""
    BS, _ = qkv.shape
    Hkv = n_kv_heads
    n_rep = n_heads // Hkv
    half = cos.shape[1]
    D = 2 * half
    G = n_rep * D
    nq = n_heads * D
    assert D % 128 == 0, "head_dim must be a multiple of 128 for this layout"
    t = _tile(S, tq, 128)      # same q/kv tile => diagonal tile iff ki == qi
    nt = S // t
    grid = (B, Hkv, nt, nt)

    return pl.pallas_call(
        _flash_attn_kernel,
        out_shape=jax.ShapeDtypeStruct((BS, nq), qkv.dtype),
        grid=grid,
        in_specs=[
            # Q group: (t, n_rep*D) column slab of the fused qkv activations.
            pl.BlockSpec((t, G), lambda b, h, qi, ki: (b * nt + qi, h)),
            # K (pre-rotated): clamp ki to qi so fully-masked tiles are
            # DMA-free revisits of the resident block.
            pl.BlockSpec((t, D),
                         lambda b, h, qi, ki: (b * nt + jnp.minimum(ki, qi), h)),
            # V: same clamp; read straight from the fused qkv slab.
            pl.BlockSpec((t, D),
                         lambda b, h, qi, ki: (b * nt + jnp.minimum(ki, qi),
                                               n_heads + Hkv + h)),
            pl.BlockSpec((t, half), lambda b, h, qi, ki: (qi, 0)),   # cos (q rows)
            pl.BlockSpec((t, half), lambda b, h, qi, ki: (qi, 0)),   # sin (q rows)
        ],
        out_specs=pl.BlockSpec((t, G), lambda b, h, qi, ki: (b * nt + qi, h)),
        scratch_shapes=[
            pltpu.VMEM((n_rep * t, D), qkv.dtype),      # rotated + scaled Q
            pltpu.VMEM((n_rep * t, 1), jnp.float32),    # running max
            pltpu.VMEM((n_rep * t, 1), jnp.float32),    # running sum
            pltpu.VMEM((n_rep * t, D), jnp.float32),    # output accumulator
        ],
        compiler_params=pltpu.CompilerParams(
            dimension_semantics=("parallel", "parallel", "parallel",
                                 "arbitrary")),
    )(qkv, k_rot, qkv, cos, sin)


# ----------------------------------------------------------------------------
# Parameter prep (one-time, weights only) and module forward
# ----------------------------------------------------------------------------
def prepare_params(wq, wk, wv, wo, n_heads, n_kv_heads, head_dim):
    """Fold the RoPE deinterleave permutation into wq/wk output columns and
    fuse wq|wk|wv into a single projection matrix."""
    def deint_cols(w, H):
        w3 = w.reshape(w.shape[0], H, head_dim)
        w3 = jnp.concatenate([w3[..., 0::2], w3[..., 1::2]], axis=-1)
        return w3.reshape(w.shape[0], H * head_dim)

    wq_p = deint_cols(wq, n_heads)
    wk_p = deint_cols(wk, n_kv_heads)
    return {"w_qkv": jnp.concatenate([wq_p, wk_p, wv], axis=1), "wo": wo}


def attention_forward(params, x, cos, sin, n_heads, n_kv_heads):
    B, S, dim = x.shape
    x2d = x.reshape(B * S, dim)                       # free reshape

    # 1) Fused QKV projection: x read from HBM once.
    qkv = linear(x2d, params["w_qkv"])                # (B*S, (H + 2*Hkv)*D)

    # 2) Pre-rotate K (tiny pass over the narrow K columns only).
    k_rot = rope_k(qkv, cos, sin, B=B, S=S,
                   n_heads=n_heads, n_kv_heads=n_kv_heads)

    # 3) Flash attention consuming the fused slab directly (no slices or
    #    transposes); output is already the (B*S, H*D) layout wo expects.
    o2d = attention_core(qkv, k_rot, cos, sin, B=B, S=S,
                         n_heads=n_heads, n_kv_heads=n_kv_heads)

    # 4) Output projection = plain big-K tiled matmul.
    return linear(o2d, params["wo"]).reshape(B, S, dim)


# ----------------------------------------------------------------------------
# Pure-JAX reference mirroring the PyTorch module (interleaved complex RoPE)
# ----------------------------------------------------------------------------
def reference_forward(params, x, angles, mask, n_heads, n_kv_heads):
    B, S, dim = x.shape
    D = dim // n_heads
    n_rep = n_heads // n_kv_heads

    xq = (x.reshape(B * S, dim) @ params["wq"]).reshape(B, S, n_heads, D)
    xk = (x.reshape(B * S, dim) @ params["wk"]).reshape(B, S, n_kv_heads, D)
    xv = (x.reshape(B * S, dim) @ params["wv"]).reshape(B, S, n_kv_heads, D)

    freqs_cis = jnp.exp(1j * angles.astype(jnp.float32))  # (S, D//2) complex64

    def rope(t):
        tr = t.astype(jnp.float32).reshape(*t.shape[:-1], -1, 2)
        tc = jax.lax.complex(tr[..., 0], tr[..., 1])
        tc = tc * freqs_cis[None, :, None, :]
        return jnp.stack([jnp.real(tc), jnp.imag(tc)], axis=-1).reshape(t.shape)

    xq, xk = rope(xq), rope(xk)
    keys = jnp.repeat(xk, n_rep, axis=2)
    values = jnp.repeat(xv, n_rep, axis=2)

    q = jnp.transpose(xq, (0, 2, 1, 3))
    kt = jnp.transpose(keys, (0, 2, 1, 3))
    vt = jnp.transpose(values, (0, 2, 1, 3))
    scores = jnp.einsum("bhqd,bhkd->bhqk", q, kt) / math.sqrt(D)
    scores = scores + mask
    scores = jax.nn.softmax(scores.astype(jnp.float32), axis=-1)
    out = jnp.einsum("bhqk,bhkd->bhqd", scores, vt)
    out = jnp.transpose(out, (0, 2, 1, 3)).reshape(B, S, n_heads * D)
    return (out.reshape(B * S, -1) @ params["wo"]).reshape(B, S, dim)


# ----------------------------------------------------------------------------
if __name__ == "__main__":
    # Small ModelArgs-consistent config (head_dim = 128 like real llama3).
    B, S = 2, 512
    n_heads, n_kv_heads, head_dim = 4, 2, 128
    dim = n_heads * head_dim                 # 512
    rope_theta = 50000.0

    key = jax.random.PRNGKey(0)
    k_x, k_q, k_k, k_v, k_o = jax.random.split(key, 5)

    def init_linear(k, fan_in, fan_out):
        bound = 1.0 / math.sqrt(fan_in)
        return jax.random.uniform(
            k, (fan_in, fan_out), jnp.float32, minval=-bound, maxval=bound)

    raw = {
        "wq": init_linear(k_q, dim, n_heads * head_dim),
        "wk": init_linear(k_k, dim, n_kv_heads * head_dim),
        "wv": init_linear(k_v, dim, n_kv_heads * head_dim),
        "wo": init_linear(k_o, n_heads * head_dim, dim),
    }
    params = prepare_params(raw["wq"], raw["wk"], raw["wv"], raw["wo"],
                            n_heads, n_kv_heads, head_dim)

    x = jax.random.normal(k_x, (B, S, dim), jnp.float32)

    # RoPE angles (equivalent to precompute_freqs_cis)
    freqs = 1.0 / (rope_theta ** (
        jnp.arange(0, head_dim, 2, dtype=jnp.float32) / head_dim))
    angles = jnp.outer(jnp.arange(S, dtype=jnp.float32), freqs)   # (S, D//2)
    cos, sin = jnp.cos(angles), jnp.sin(angles)

    out = attention_forward(params, x, cos, sin, n_heads, n_kv_heads)
    out = jax.block_until_ready(out)

    mask = jnp.triu(jnp.full((S, S), -1e30, dtype=jnp.float32), k=1)
    with jax.default_matmul_precision("highest"):
        ref = reference_forward(raw, x, angles, mask, n_heads, n_kv_heads)
    err = jnp.max(jnp.abs(out - ref))
    if not jnp.allclose(out, ref, atol=2e-3, rtol=2e-3):
        raise AssertionError(f"Pallas output mismatch: max abs err {err}")

    print("KERNEL_OK")
</pallas_src>

<mosaic_0001>
module attributes {stable_mosaic.version = 11 : i64} {
  func.func @_matmul_kernel(%arg0: i32, %arg1: i32, %arg2: i32, %arg3: memref<512x512xf32, #tpu.memory_space<vmem>>, %arg4: memref<512x512xf32, #tpu.memory_space<vmem>>, %arg5: memref<512x512xf32, #tpu.memory_space<vmem>>, %arg6: memref<512x512xf32, #tpu.memory_space<vmem>>) attributes {dimension_semantics = [#tpu.dimension_semantics<parallel>, #tpu.dimension_semantics<parallel>, #tpu.dimension_semantics<arbitrary>], iteration_bounds = array<i64: 2, 2, 1>, scalar_prefetch = 0 : i64, scratch_operands = 1 : i64, tpu.core_type = #tpu.core_type<tc>, window_params = [{transform_indices = @transform_0, window_bounds = array<i64: 512, 512>}, {transform_indices = @transform_1, window_bounds = array<i64: 512, 512>}, {transform_indices = @transform_2, window_bounds = array<i64: 512, 512>}]} {
    %c0_i32 = arith.constant 0 : i32
    %0 = arith.cmpi eq, %arg2, %c0_i32 : i32
    %1 = arith.extui %0 : i1 to i32
    %c0_i32_0 = arith.constant 0 : i32
    %2 = arith.cmpi ne, %1, %c0_i32_0 : i32
    scf.if %2 {
      %cst_10 = arith.constant 0.000000e+00 : f32
      %12 = vector.broadcast %cst_10 : f32 to vector<512x512xf32>
      %c0_11 = arith.constant 0 : index
      %c0_12 = arith.constant 0 : index
      %13 = vector.load %arg6[%c0_11, %c0_12] : memref<512x512xf32, #tpu.memory_space<vmem>>, vector<512x512xf32>
      tpu.vector_store %arg6[%c0_11, %c0_12], %12 {strides = array<i32>} : memref<512x512xf32, #tpu.memory_space<vmem>>, vector<512x512xf32>,
    } else {
    }
    %c0 = arith.constant 0 : index
    %c0_1 = arith.constant 0 : index
    %3 = vector.load %arg6[%c0, %c0_1] : memref<512x512xf32, #tpu.memory_space<vmem>>, vector<512x512xf32>
    %c0_2 = arith.constant 0 : index
    %c0_3 = arith.constant 0 : index
    %4 = vector.load %arg3[%c0_2, %c0_3] : memref<512x512xf32, #tpu.memory_space<vmem>>, vector<512x512xf32>
    %c0_4 = arith.constant 0 : index
    %c0_5 = arith.constant 0 : index
    %5 = vector.load %arg4[%c0_4, %c0_5] : memref<512x512xf32, #tpu.memory_space<vmem>>, vector<512x512xf32>
    %cst = arith.constant dense<0.000000e+00> : vector<512x512xf32>
    %6 = tpu.matmul %4, %5, %cst {dimension_numbers = #tpu.dot_dimension_numbers<[1], [0], [0], [1], [0, 0, 1, 1], [], []>} : vector<512x512xf32>, vector<512x512xf32>, vector<512x512xf32> -> vector<512x512xf32>
    %7 = arith.addf %3, %6 : vector<512x512xf32>
    %c0_6 = arith.constant 0 : index
    %c0_7 = arith.constant 0 : index
    %8 = vector.load %arg6[%c0_6, %c0_7] : memref<512x512xf32, #tpu.memory_space<vmem>>, vector<512x512xf32>
    tpu.vector_store %arg6[%c0_6, %c0_7], %7 {strides = array<i32>} : memref<512x512xf32, #tpu.memory_space<vmem>>, vector<512x512xf32>,
    %c0_i32_8 = arith.constant 0 : i32
    %9 = arith.cmpi eq, %arg2, %c0_i32_8 : i32
    %10 = arith.extui %9 : i1 to i32
    %c0_i32_9 = arith.constant 0 : i32
    %11 = arith.cmpi ne, %10, %c0_i32_9 : i32
    scf.if %11 {
      %c0_10 = arith.constant 0 : index
      %c0_11 = arith.constant 0 : index
      %12 = vector.load %arg6[%c0_10, %c0_11] : memref<512x512xf32, #tpu.memory_space<vmem>>, vector<512x512xf32>
      %c0_12 = arith.constant 0 : index
      %c0_13 = arith.constant 0 : index
      %13 = vector.load %arg5[%c0_12, %c0_13] : memref<512x512xf32, #tpu.memory_space<vmem>>, vector<512x512xf32>
      tpu.vector_store %arg5[%c0_12, %c0_13], %12 {strides = array<i32>} : memref<512x512xf32, #tpu.memory_space<vmem>>, vector<512x512xf32>,
    } else {
    }
    return
  }
  func.func @transform_0(%arg0: i32, %arg1: i32, %arg2: i32) -> (i32, i32) {
    %c0_i32 = arith.constant 0 : i32
    return %arg0, %arg2 : i32, i32
  }
  func.func @transform_1(%arg0: i32, %arg1: i32, %arg2: i32) -> (i32, i32) {
    %c0_i32 = arith.constant 0 : i32
    return %arg2, %arg1 : i32, i32
  }
  func.func @transform_2(%arg0: i32, %arg1: i32, %arg2: i32) -> (i32, i32) {
    %c0_i32 = arith.constant 0 : i32
    return %arg0, %arg1 : i32, i32
  }
}

</mosaic_0001>

<bundles_post_ra>
// kernel: tpu_custom_call.1
= control target key start
LH: loop header
LB: loop body
LE: loop exit
PB: predicated region body
PF: predicated region fallthrough
CT: control target
= control target key end

     0   :  { %s8746_s0 = inlined_call_operand.hbm [shape: f32[1024,512], index: 0, kind: input, shape index: {}]   ;;  %s8747_s1 = inlined_call_operand.hbm [shape: f32[512,1024], index: 1, kind: input, shape index: {}]   ;;  %s8748_s2 = inlined_call_operand.hbm [shape: f32[1024,1024], index: 2, kind: output, shape index: {}]  }
   0x1   :  { %8757 = sst [smem:[#allocation18_spill]] %s8746_s0 }
   0x2   :  { %8758 = sst [smem:[#allocation19_spill]] %s8748_s2 }
   0x3   :  { %7 = vsyncpa [#allocation4], 0 }
   0x4   :  { %9 = vsyncpa [#allocation4 + $0x1], 0 }
   0x5   :  { %10 = vsyncpa [#allocation7], 0 }
   0x6   :  { %12 = vsyncpa [#allocation7 + $0x1], 0 }
   0x7   :  { %13 = vsyncpa [#allocation5], 0 }
   0x8   :  { %15 = vsyncpa [#allocation5 + $0x1], 0  ;;  %s6944_s9 = smov 0   ;;  %s6946_s10 = smov 0  }
   0x9   :  { %s6948_s11 = smov 0   ;;  %s6950_s12 = smov 0  }
   0xa   :  { %s6952_s13 = smov 0   ;;  %s6954_s14 = smov 0  }
   0xb   :  { %s6956_s15 = smov 0   ;;  %s6958_s16 = smov 0  }
   0xc   :  { %s6960_s17 = smov 0   ;;  %s6962_s18 = smov 0  }
   0xd   :  { %s6964_s19 = smov 0   ;;  %s6966_s20 = smov 0  }
   0xe   :  { %s6968_s21 = smov 0   ;;  %s6970_s22 = smov 0  }
   0xf LB: > { %8759 = sst [smem:[#allocation12_spill]] %s6909_s19  ;;  %s5780_s23 = sadd.s32 4294967295, %s6921_s22   ;;  %s6921_s22 = sphi %s6970_s22, %s21_s22   ;;  %s6917_s21 = sphi %s6968_s21, %s8783_s21   ;;  %s6913_s20 = sphi %s6966_s20, %s8794_s20   ;;  %s6909_s19 = sphi %s6964_s19, %s8781_s19   ;;  %s6905_s18 = sphi %s6962_s18, %s8793_s18   ;;  %s6901_s17 = sphi %s6960_s17, %s8792_s17   ;;  %s6897_s16 = sphi %s6958_s16, %s8791_s16   ;;  %s6893_s15 = sphi %s6956_s15, %s8790_s15   ;;  %s6889_s14 = sphi %s6954_s14, %s8789_s14   ;;  %s6885_s13 = sphi %s6952_s13, %s8788_s13   ;;  %s6881_s12 = sphi %s6950_s12, %s8787_s12   ;;  %s6877_s11 = sphi %s6948_s11, %s8786_s11   ;;  %s6873_s10 = sphi %s6946_s10, %s8785_s10   ;;  %s6869_s9 = sphi %s6944_s9, %s8784_s9  }
  0x10   : > { %8760 = sst [smem:[#allocation13_spill]] %s6917_s21  ;;  %s40_s24 = sadd.s32 1, %s6917_s21 }
  0x11   : > { %s49_s25 = sadd.s32 1, %s6901_s17  ;;  %p56_p0 = scmp.ne.s32.totalorder %s6901_s17, %s6897_s16 }
  0x12   : > { %p57_p1 = scmp.eq.s32.totalorder %s6921_s22, 0  ;;  %p62_p2 = scmp.ne.s32.totalorder %s6897_s16, %s6893_s15 }
  0x13   : > { %p7019_p3 = scmp.eq.s32.totalorder %s5780_s23, 0  ;;  %p7023_p4 = scmp.eq.s32.totalorder %s5780_s23, 3 }
  0x14   : > { %p58_p5 = por %p57_p1, %p56_p0  ;;  %p5823_p7 = scmp.lt.s32.totalorder %s6921_s22, 4 }
  0x15   : > { %p7031_p6 = por %p7019_p3, %p62_p2  ;;  %s142_s29 = sand.u32 1, %s6901_s17  }
  0x16   : > { %s5803_s30 = sshll.u32 %s6917_s21, 11  ;;  %s5784_s3 = sshll.u32 %s142_s29, 11 }
  0x17   : > { %s8764_s0 = sld [smem:[#allocation18_spill]]  ;;  %s146_s8 = scalar_lea.vmem [#allocation3], %s5784_s3 }
  0x18   : > { %s157_s15 = sshll.u32 %s146_s8, 4  ;;  %p5813_p8 = pnand %p5823_p7, %p58_p5  ;;  %s158_s15 = int_to_ptr.vmem [resolvable:$true] %s157_s15 }
  0x19   : > { %p5791_p9 = scmp.ge.s32.totalorder %s6921_s22, 1  ;;  %p190_p10 = scmp.lt.s32.totalorder %s6921_s22, 5 }
  0x1a   : > { %s143_s23 = scalar_lea.sflag [#allocation4], %s142_s29  ;;  %s8750_s4 = smov 32  }
  0x1b   : > { %p7048_p11 = pnand %p5791_p9, %p190_p10  ;;  %s5781_s5 = sadd.s32 4294967294, %s6921_s22  }
  0x1c   : > { %s77_s8 = sadd.s32 1, %s6889_s14  ;;  %p84_p13 = scmp.ne.s32.totalorder %s6889_s14, %s6885_s13 }
  0x1d   : > { %s154_s6 = scalar_lea.hbm %s8764_s0, %s5803_s30  ;;  %s8749_s30 = smov 512  }
  0x1e   : > { %s155_s7 = sshll.u32 %s154_s6, 4  ;;  %s36_s6 = sadd.s32 1, %s6913_s20  ;;  %s156_s7 = int_to_ptr.hbm [resolvable:$true] %s155_s7 }
  0x1f   : > { %5815 = dma.hbm_to_vmem [thread:$0]  (!%p5813_p8), %s156_s7, 32768, %s158_s15, %s143_s23, %s8749_s30, %s8749_s30, %s8750_s4  }
  0x20   : > { %p38_p12 = scmp.ge.s32.totalorder %s36_s6, 2  ;;  %p90_p0 = scmp.ne.s32.totalorder %s6885_s13, %s6881_s12 }
  0x21   : > { %s105_s29 = sadd.s32 1, %s6877_s11  ;;  %p7069_p2 = por %p84_p13, %p57_p1 }
  0x22   : > { %s8796_s6 = smov (%p38_p12, %s36_s6), 0  ;;  %s8798_s24 = smov (!%p38_p12, %s40_s24), %s6917_s21 }
  0x23   : > { %8766 = sst [smem:[#allocation14_spill]] %s8796_s6  ;;  %s73_s7 = ssub.s32 %s6913_s20, %s8796_s6 }
  0x24   : > { %p42_p5 = scmp.ge.s32.totalorder %s8798_s24, 2  ;;  %p75_p8 = scmp.eq.s32.totalorder %s73_s7, 0 }
  0x25   : > { %p7075_p9 = por %p90_p0, %p7019_p3  ;;  %p115_p10 = scmp.ne.s32.totalorder %s6877_s11, %s6873_s10 }
  0x26   : > { %s8800_s24 = smov (%p42_p5, %s8798_s24), 0  ;;  %p121_p13 = scmp.ne.s32.totalorder %s6873_s10, %s6869_s9 }
  0x27   : > { %8769 = sst [smem:[#allocation15_spill]] %s8800_s24  ;;  %s44_s30 = ssub.s32 %s6917_s21, %s8800_s24 }
  0x28   : > { %s7084_s23 = scalar_select %p75_p8, %s6889_s14, %s77_s8  }
  0x29   : > { %p7090_p1 = por %p7023_p4, %p115_p10  ;;  %p47_p12 = scmp.eq.s32.totalorder %s44_s30, 0 }
  0x2a   : > { %8770 = sst [smem:[#allocation16_spill]] %s7084_s23  ;;  %s102_s26 = sor.u32 %s73_s7, %s44_s30 }
  0x2b   : > { %s8771_s4 = scalar_select %p7090_p1, 1, 0 }
  0x2c   : > { %p103_p3 = scmp.eq.s32.totalorder %s102_s26, 0  ;;  %p122_p0 = scmp.eq.s32.totalorder %s5781_s5, 3 }
  0x2d   : > { %8772 = sst [smem:[#allocation17_spill]] %s8771_s4  ;;  %s167_s8 = sand.u32 1, %s6889_s14  }
  0x2e   : > { %s7099_s0 = scalar_select %p47_p12, %s6901_s17, %s49_s25  }
  0x2f   : > { %s7102_s6 = scalar_select %p103_p3, %s6877_s11, %s105_s29  }
  0x30   : > { %s5788_s23 = sshll.u32 %s167_s8, 11  ;;  %p7105_p5 = por %p122_p0, %p121_p13 }
  0x31   : > { %s5804_s24 = sshll.u32 %s6913_s20, 5  ;;  %s171_s21 = scalar_lea.vmem [#allocation6], %s5788_s23 }
  0x32   : > { %s182_s4 = sshll.u32 %s171_s21, 4  ;;  %s179_s30 = scalar_lea.hbm %s8747_s1, %s5804_s24  ;;  %s183_s4 = int_to_ptr.vmem [resolvable:$true] %s182_s4 }
  0x33   : > { %s180_s7 = sshll.u32 %s179_s30, 4  ;;  %p5816_p4 = pnand %p5823_p7, %p7069_p2  ;;  %s181_s7 = int_to_ptr.hbm [resolvable:$true] %s180_s7 }
  0x34   : > { %s168_s25 = scalar_lea.sflag [#allocation7], %s167_s8  ;;  %s6925_s5 = smov 1024  }
  0x35   : > { %s8774_s29 = smov 32   ;;  %s8775_s26 = smov 512  }
  0x36   : > { %5818 = dma.hbm_to_vmem [thread:$0]  (!%p5816_p4), %s181_s7, 32768, %s183_s4, %s168_s25, %s6925_s5, %s8775_s26, %s8774_s29  }
  0x37   : > { %194 = sbr.rel (%p7048_p11) target bundleno = 2308 (0x904), region = 28  ;;  %s196_s21 = sand.u32 (!%p7048_p11), 1, %s6897_s16  }
  0x38   : > { %s5792_s23 = sshll.u32 (!%p7048_p11), %s196_s21, 11  ;;  %s197_s2 = scalar_lea.sflag (!%p7048_p11), [#allocation4], %s196_s21 }
  0x39   : > { %s7122_s19 = scalar_lea.vmem (!%p7048_p11), [#allocation3], %s5792_s23 }
  0x3c   : > { %6856 = dma.done.wait (%p7031_p6), %s197_s2, 32768  }
  0x3d   : > { %6858 = vsyncadd (%p7031_p6), %s197_s2, 4294934528  ;;  %s206_s24 = sand.u32 1, %s6885_s13  }
  0x3e   : > { %s5793_s15 = sshll.u32 %s206_s24, 11  ;;  %s207_s4 = scalar_lea.sflag [#allocation7], %s206_s24 }
  0x3f   : > { %s7129_s8 = scalar_lea.vmem [#allocation6], %s5793_s15 }
  0x40   : > { %6860 = dma.done.wait (%p7075_p9), %s207_s4, 32768  }
  0x41   : > { %6862 = vsyncadd (%p7075_p9), %s207_s4, 4294934528  ;;  %v1203_v0 = vld [vmem:[%s7129_s8 + $0x5e0] sm:$0xff]  ;;  %v761_v62 = vld [vmem:[%s7122_s19 + $0x10] sm:$0xff]  ;;  %s234_s28 = sand.u32 1, %s6873_s10   ;;  %s8776_s30 = sld [smem:[#allocation12_spill]] }
  0x42   : > { %v1199_v1 = vld [vmem:[%s7129_s8 + $0x5c0] sm:$0xff]  ;;  %1689 = vmatpush.msra.mxu2 %v1203_v0  ;;  %v762_v63 = vld [vmem:[%s7122_s19 + $0x18] sm:$0xff]  ;;  %v1204_v0 = vld [vmem:[%s7129_s8 + $0x5e8] sm:$0xff]  ;;  %s5794_s3 = sshll.u32 %s234_s28, 11  ;;  %s5797_s7 = sshll.u32 %s6905_s18, 2 }
  0x43   : > { %v1267_v2 = vld [vmem:[%s7129_s8 + $0x7e0] sm:$0xff]  ;;  %s7296_s12 = scalar_lea.vmem [#allocation8], %s5794_s3  ;;  %s8777_s23 = sld [smem:[#allocation19_spill]] }
  0x44   : > { %1898 = vmatpush.msra.mxu3 %v1267_v2  ;;  %v1075_v3 = vld [vmem:[%s7129_s8 + $0x1e0] sm:$0xff]  ;;  %1690 = vmatpush.msra.mxu2 %v1199_v1  ;;  %v1268_v1 = vld [vmem:[%s7129_s8 + $0x7e8] sm:$0xff]  ;;  %s5643_s15 = scalar_lea.sflag [#allocation5], %s234_s28 }
  0x45   : > { %v1139_v4 = vld [vmem:[%s7129_s8 + $0x3e0] sm:$0xff]  ;;  %1271 = vmatpush.msra.mxu0 %v1075_v3 }
  0x46   : > { %v1195_v5 = vld [vmem:[%s7129_s8 + $0x5a0] sm:$0xff]  ;;  %1480 = vmatpush.msra.mxu1 %v1139_v4 }
  0x47   : > { %v1263_v6 = vld [vmem:[%s7129_s8 + $0x7c0] sm:$0xff]  ;;  %1691 = vmatpush.msra.mxu2 %v1195_v5  ;;  %v760_v5 = vld [vmem:[%s7122_s19 + $0x8] sm:$0xff]  ;;  %s5805_s25 = sshll.u32 %s8776_s30, 9 }
  0x48   : > { %v1071_v7 = vld [vmem:[%s7129_s8 + $0x1c0] sm:$0xff]  ;;  %1899 = vmatpush.msra.mxu3 %v1263_v6  ;;  %v1076_v6 = vld [vmem:[%s7129_s8 + $0x1e8] sm:$0xff]  ;;  %s5655_s5 = sadd.s32 %s5805_s25, %s5797_s7 }
  0x49   : > { %v1135_v8 = vld [vmem:[%s7129_s8 + $0x3c0] sm:$0xff]  ;;  %1272 = vmatpush.msra.mxu0 %v1071_v7  ;;  %v1140_v7 = vld [vmem:[%s7129_s8 + $0x3e8] sm:$0xff]  ;;  %s5799_s29 = sshll.u32 %s5655_s5, 3  ;;  %s6791_s7 = scalar_lea.hbm %s8777_s23, 8192 }
  0x4a   : > { %v1259_v9 = vld [vmem:[%s7129_s8 + $0x7a0] sm:$0xff]  ;;  %1481 = vmatpush.msra.mxu1 %v1135_v8  ;;  %v1200_v8 = vld [vmem:[%s7129_s8 + $0x5c8] sm:$0xff]  ;;  %s5657_s2 = scalar_lea.hbm %s8777_s23, %s5799_s29 }
  0x4b   : > { %v1067_v10 = vld [vmem:[%s7129_s8 + $0x1a0] sm:$0xff]  ;;  %1900 = vmatpush.msra.mxu3 %v1259_v9  ;;  %v1264_v9 = vld [vmem:[%s7129_s8 + $0x7c8] sm:$0xff]  ;;  %s5660_s24 = sshll.u32 %s5657_s2, 4  ;;  %s5661_s24 = int_to_ptr.hbm [resolvable:$true] %s5660_s24 }
  0x4c   : > { %v1191_v11 = vld [vmem:[%s7129_s8 + $0x580] sm:$0xff]  ;;  %1273 = vmatpush.msra.mxu0 %v1067_v10  ;;  %v1072_v10 = vld [vmem:[%s7129_s8 + $0x1c8] sm:$0xff]  ;;  %s6785_s4 = sshra.s32 %s5661_s24, 4  ;;  %s6786_s4 = int_to_ptr.hbm [resolvable:$true] %s6785_s4 }
  0x4d   : > { %v1131_v12 = vld [vmem:[%s7129_s8 + $0x3a0] sm:$0xff]  ;;  %1692 = vmatpush.msra.mxu2 %v1191_v11  ;;  %v1136_v11 = vld [vmem:[%s7129_s8 + $0x3c8] sm:$0xff]  ;;  %p6792_p2 = scmp.lt.s32.totalorder %s6786_s4, %s8777_s23 }
  0x4e   : > { %v1255_v13 = vld [vmem:[%s7129_s8 + $0x780] sm:$0xff]  ;;  %1482 = vmatpush.msra.mxu1 %v1131_v12  ;;  %v765_v12 = vld [vmem:[%s7122_s19 + $0x30] sm:$0xff] }
  0x4f   : > { %v1063_v14 = vld [vmem:[%s7129_s8 + $0x180] sm:$0xff]  ;;  %1901 = vmatpush.msra.mxu3 %v1255_v13  ;;  %v766_v13 = vld [vmem:[%s7122_s19 + $0x38] sm:$0xff] }
  0x50   : > { %v1127_v15 = vld [vmem:[%s7129_s8 + $0x380] sm:$0xff]  ;;  %1274 = vmatpush.msra.mxu0 %v1063_v14 }
  0x51   : > { %v1187_v16 = vld [vmem:[%s7129_s8 + $0x560] sm:$0xff]  ;;  %1483 = vmatpush.msra.mxu1 %v1127_v15  ;;  %v764_v15 = vld [vmem:[%s7122_s19 + $0x28] sm:$0xff] }
  0x52   : > { %v1251_v17 = vld [vmem:[%s7129_s8 + $0x760] sm:$0xff]  ;;  %1693 = vmatpush.msra.mxu2 %v1187_v16  ;;  %v769_v16 = vld [vmem:[%s7122_s19 + $0x50] sm:$0xff] }
  0x53   : > { %v1059_v18 = vld [vmem:[%s7129_s8 + $0x160] sm:$0xff]  ;;  %1902 = vmatpush.msra.mxu3 %v1251_v17  ;;  %v770_v17 = vld [vmem:[%s7122_s19 + $0x58] sm:$0xff] }
  0x54   : > { %v1123_v19 = vld [vmem:[%s7129_s8 + $0x360] sm:$0xff]  ;;  %1275 = vmatpush.msra.mxu0 %v1059_v18 }
  0x55   : > { %v1183_v20 = vld [vmem:[%s7129_s8 + $0x540] sm:$0xff]  ;;  %1484 = vmatpush.msra.mxu1 %v1123_v19  ;;  %v768_v19 = vld [vmem:[%s7122_s19 + $0x48] sm:$0xff] }
  0x56   : > { %v1247_v21 = vld [vmem:[%s7129_s8 + $0x740] sm:$0xff]  ;;  %1694 = vmatpush.msra.mxu2 %v1183_v20  ;;  %v773_v20 = vld [vmem:[%s7122_s19 + $0x70] sm:$0xff] }
  0x57   : > { %v1055_v22 = vld [vmem:[%s7129_s8 + $0x140] sm:$0xff]  ;;  %1903 = vmatpush.msra.mxu3 %v1247_v21  ;;  %v774_v21 = vld [vmem:[%s7122_s19 + $0x78] sm:$0xff] }
  0x58   : > { %v1119_v23 = vld [vmem:[%s7129_s8 + $0x340] sm:$0xff]  ;;  %1276 = vmatpush.msra.mxu0 %v1055_v22 }
  0x59   : > { %v1179_v24 = vld [vmem:[%s7129_s8 + $0x520] sm:$0xff]  ;;  %1485 = vmatpush.msra.mxu1 %v1119_v23  ;;  %v772_v23 = vld [vmem:[%s7122_s19 + $0x68] sm:$0xff] }
  0x5a   : > { %v1243_v25 = vld [vmem:[%s7129_s8 + $0x720] sm:$0xff]  ;;  %1695 = vmatpush.msra.mxu2 %v1179_v24  ;;  %v777_v24 = vld [vmem:[%s7122_s19 + $0x90] sm:$0xff] }
  0x5b   : > { %v1051_v26 = vld [vmem:[%s7129_s8 + $0x120] sm:$0xff]  ;;  %1904 = vmatpush.msra.mxu3 %v1243_v25  ;;  %v778_v25 = vld [vmem:[%s7122_s19 + $0x98] sm:$0xff] }
  0x5c   : > { %v1115_v27 = vld [vmem:[%s7129_s8 + $0x320] sm:$0xff]  ;;  %1277 = vmatpush.msra.mxu0 %v1051_v26 }
  0x5d   : > { %v1175_v28 = vld [vmem:[%s7129_s8 + $0x500] sm:$0xff]  ;;  %1486 = vmatpush.msra.mxu1 %v1115_v27  ;;  %v776_v27 = vld [vmem:[%s7122_s19 + $0x88] sm:$0xff] }
  0x5e   : > { %v1239_v29 = vld [vmem:[%s7129_s8 + $0x700] sm:$0xff]  ;;  %1696 = vmatpush.msra.mxu2 %v1175_v28  ;;  %v1196_v28 = vld [vmem:[%s7129_s8 + $0x5a8] sm:$0xff] }
  0x5f   : > { %v1047_v30 = vld [vmem:[%s7129_s8 + $0x100] sm:$0xff]  ;;  %1905 = vmatpush.msra.mxu3 %v1239_v29  ;;  %v1260_v29 = vld [vmem:[%s7129_s8 + $0x7a8] sm:$0xff] }
  0x60   : > { %v1111_v31 = vld [vmem:[%s7129_s8 + $0x300] sm:$0xff]  ;;  %1278 = vmatpush.msra.mxu0 %v1047_v30  ;;  %v1068_v30 = vld [vmem:[%s7129_s8 + $0x1a8] sm:$0xff] }
  0x61   : > { %v1171_v32 = vld [vmem:[%s7129_s8 + $0x4e0] sm:$0xff]  ;;  %1487 = vmatpush.msra.mxu1 %v1111_v31  ;;  %v1132_v31 = vld [vmem:[%s7129_s8 + $0x3a8] sm:$0xff] }
  0x62   : > { %v1235_v33 = vld [vmem:[%s7129_s8 + $0x6e0] sm:$0xff]  ;;  %1697 = vmatpush.msra.mxu2 %v1171_v32  ;;  %v781_v32 = vld [vmem:[%s7122_s19 + $0xb0] sm:$0xff] }
  0x63   : > { %v1043_v34 = vld [vmem:[%s7129_s8 + $0xe0] sm:$0xff]  ;;  %1906 = vmatpush.msra.mxu3 %v1235_v33  ;;  %v782_v33 = vld [vmem:[%s7122_s19 + $0xb8] sm:$0xff] }
  0x64   : > { %v1107_v35 = vld [vmem:[%s7129_s8 + $0x2e0] sm:$0xff]  ;;  %1279 = vmatpush.msra.mxu0 %v1043_v34 }
  0x65   : > { %v1167_v36 = vld [vmem:[%s7129_s8 + $0x4c0] sm:$0xff]  ;;  %1488 = vmatpush.msra.mxu1 %v1107_v35  ;;  %v780_v35 = vld [vmem:[%s7122_s19 + $0xa8] sm:$0xff] }
  0x66   : > { %v1231_v37 = vld [vmem:[%s7129_s8 + $0x6c0] sm:$0xff]  ;;  %1698 = vmatpush.msra.mxu2 %v1167_v36  ;;  %v785_v36 = vld [vmem:[%s7122_s19 + $0xd0] sm:$0xff] }
  0x67   : > { %v1039_v38 = vld [vmem:[%s7129_s8 + $0xc0] sm:$0xff]  ;;  %1907 = vmatpush.msra.mxu3 %v1231_v37  ;;  %v786_v37 = vld [vmem:[%s7122_s19 + $0xd8] sm:$0xff] }
  0x68   : > { %v1103_v39 = vld [vmem:[%s7129_s8 + $0x2c0] sm:$0xff]  ;;  %1280 = vmatpush.msra.mxu0 %v1039_v38 }
  0x69   : > { %v1163_v40 = vld [vmem:[%s7129_s8 + $0x4a0] sm:$0xff]  ;;  %1489 = vmatpush.msra.mxu1 %v1103_v39  ;;  %v784_v39 = vld [vmem:[%s7122_s19 + $0xc8] sm:$0xff] }
  0x6a   : > { %v1227_v41 = vld [vmem:[%s7129_s8 + $0x6a0] sm:$0xff]  ;;  %1699 = vmatpush.msra.mxu2 %v1163_v40  ;;  %v789_v40 = vld [vmem:[%s7122_s19 + $0xf0] sm:$0xff] }
  0x6b   : > { %v1035_v42 = vld [vmem:[%s7129_s8 + $0xa0] sm:$0xff]  ;;  %1908 = vmatpush.msra.mxu3 %v1227_v41  ;;  %v790_v41 = vld [vmem:[%s7122_s19 + $0xf8] sm:$0xff] }
  0x6c   : > { %v1099_v43 = vld [vmem:[%s7129_s8 + $0x2a0] sm:$0xff]  ;;  %1281 = vmatpush.msra.mxu0 %v1035_v42 }
  0x6d   : > { %v1159_v44 = vld [vmem:[%s7129_s8 + $0x480] sm:$0xff]  ;;  %1490 = vmatpush.msra.mxu1 %v1099_v43  ;;  %v788_v43 = vld [vmem:[%s7122_s19 + $0xe8] sm:$0xff] }
  0x6e   : > { %v1223_v45 = vld [vmem:[%s7129_s8 + $0x680] sm:$0xff]  ;;  %1700 = vmatpush.msra.mxu2 %v1159_v44  ;;  %v793_v44 = vld [vmem:[%s7122_s19 + $0x110] sm:$0xff] }
  0x6f   : > { %v1031_v46 = vld [vmem:[%s7129_s8 + $0x80] sm:$0xff]  ;;  %1909 = vmatpush.msra.mxu3 %v1223_v45  ;;  %v794_v45 = vld [vmem:[%s7122_s19 + $0x118] sm:$0xff] }
  0x70   : > { %v1095_v47 = vld [vmem:[%s7129_s8 + $0x280] sm:$0xff]  ;;  %1282 = vmatpush.msra.mxu0 %v1031_v46 }
  0x71   : > { %v1155_v48 = vld [vmem:[%s7129_s8 + $0x460] sm:$0xff]  ;;  %1491 = vmatpush.msra.mxu1 %v1095_v47  ;;  %v792_v47 = vld [vmem:[%s7122_s19 + $0x108] sm:$0xff] }
  0x72   : > { %v1219_v49 = vld [vmem:[%s7129_s8 + $0x660] sm:$0xff]  ;;  %1701 = vmatpush.msra.mxu2 %v1155_v48  ;;  %v1192_v48 = vld [vmem:[%s7129_s8 + $0x588] sm:$0xff] }
  0x73   : > { %v1027_v50 = vld [vmem:[%s7129_s8 + $0x60] sm:$0xff]  ;;  %1910 = vmatpush.msra.mxu3 %v1219_v49  ;;  %v1256_v49 = vld [vmem:[%s7129_s8 + $0x788] sm:$0xff] }
  0x74   : > { %v1091_v51 = vld [vmem:[%s7129_s8 + $0x260] sm:$0xff]  ;;  %1283 = vmatpush.msra.mxu0 %v1027_v50  ;;  %v1064_v50 = vld [vmem:[%s7129_s8 + $0x188] sm:$0xff] }
  0x75   : > { %v1151_v52 = vld [vmem:[%s7129_s8 + $0x440] sm:$0xff]  ;;  %1492 = vmatpush.msra.mxu1 %v1091_v51  ;;  %v1128_v51 = vld [vmem:[%s7129_s8 + $0x388] sm:$0xff] }
  0x76   : > { %v1215_v53 = vld [vmem:[%s7129_s8 + $0x640] sm:$0xff]  ;;  %1702 = vmatpush.msra.mxu2 %v1151_v52  ;;  %v797_v52 = vld [vmem:[%s7122_s19 + $0x130] sm:$0xff] }
  0x77   : > { %v1023_v54 = vld [vmem:[%s7129_s8 + $0x40] sm:$0xff]  ;;  %1911 = vmatpush.msra.mxu3 %v1215_v53  ;;  %v798_v53 = vld [vmem:[%s7122_s19 + $0x138] sm:$0xff] }
  0x78   : > { %v1087_v55 = vld [vmem:[%s7129_s8 + $0x240] sm:$0xff]  ;;  %1284 = vmatpush.msra.mxu0 %v1023_v54 }
  0x79   : > { %v1147_v56 = vld [vmem:[%s7129_s8 + $0x420] sm:$0xff]  ;;  %1493 = vmatpush.msra.mxu1 %v1087_v55  ;;  %v796_v55 = vld [vmem:[%s7122_s19 + $0x128] sm:$0xff] }
  0x7a   : > { %v1211_v57 = vld [vmem:[%s7129_s8 + $0x620] sm:$0xff]  ;;  %1703 = vmatpush.msra.mxu2 %v1147_v56  ;;  %v801_v56 = vld [vmem:[%s7122_s19 + $0x150] sm:$0xff] }
  0x7b   : > { %v1019_v58 = vld [vmem:[%s7129_s8 + $0x20] sm:$0xff]  ;;  %1912 = vmatpush.msra.mxu3 %v1211_v57  ;;  %v802_v57 = vld [vmem:[%s7122_s19 + $0x158] sm:$0xff] }
  0x7c   : > { %v1083_v59 = vld [vmem:[%s7129_s8 + $0x220] sm:$0xff]  ;;  %1285 = vmatpush.msra.mxu0 %v1019_v58 }
  0x7d   : > { %v1143_v60 = vld [vmem:[%s7129_s8 + $0x400] sm:$0xff]  ;;  %1494 = vmatpush.msra.mxu1 %v1083_v59  ;;  %v800_v59 = vld [vmem:[%s7122_s19 + $0x148] sm:$0xff] }
  0x7e   : > { %v1207_v61 = vld [vmem:[%s7129_s8 + $0x600] sm:$0xff]  ;;  %1704 = vmatpush.msra.mxu2 %v1143_v60  ;;  %v805_v60 = vld [vmem:[%s7122_s19 + $0x170] sm:$0xff] }
  0x7f   : > { %1913 = vmatpush.msra.mxu3 %v1207_v61  ;;  %v1015_v2 = vld [vmem:[%s7129_s8] sm:$0xff]  ;;  %1705 = vmatmul.f32.vlgmr.msra.gmra.mxu2 %v761_v62  ;;  %v806_v61 = vld [vmem:[%s7122_s19 + $0x178] sm:$0xff] }
  0x80   : > { %v1079_v3 = vld [vmem:[%s7129_s8 + $0x200] sm:$0xff]  ;;  %1914 = vmatmul.f32.vlgmr.msra.gmra.mxu3 %v762_v63  ;;  %2525 = vmatpush.msrb.mxu2 %v1204_v0  ;;  %v804_v63 = vld [vmem:[%s7122_s19 + $0x168] sm:$0xff]  ;;  %v809_v0 = vld [vmem:[%s7122_s19 + $0x190] sm:$0xff] }
  0x81   : > { %v759_v4 = vld [vmem:[%s7122_s19] sm:$0xff]  ;;  %2734 = vmatpush.msrb.mxu3 %v1268_v1  ;;  %1286 = vmatpush.msra.mxu0 %v1015_v2  ;;  %v810_v1 = vld [vmem:[%s7122_s19 + $0x198] sm:$0xff] }
  0x82   : > { %1495 = vmatpush.msra.mxu1 %v1079_v3  ;;  %1287 = vmatmul.f32.vlgmr.msra.gmra.mxu0 %v759_v4  ;;  %v763_v14 = vld [vmem:[%s7122_s19 + $0x20] sm:$0xff]  ;;  %v808_v3 = vld [vmem:[%s7122_s19 + $0x188] sm:$0xff] }
  0x83   : > { %1496 = vmatmul.f32.vlgmr.msra.gmra.mxu1 %v760_v5  ;;  %2107 = vmatpush.msrb.mxu0 %v1076_v6  ;;  %v767_v18 = vld [vmem:[%s7122_s19 + $0x40] sm:$0xff]  ;;  %v1188_v4 = vld [vmem:[%s7129_s8 + $0x568] sm:$0xff] }
  0x84   : > { %2316 = vmatpush.msrb.mxu1 %v1140_v7  ;;  %2526 = vmatpush.msrb.mxu2 %v1200_v8  ;;  %v771_v22 = vld [vmem:[%s7122_s19 + $0x60] sm:$0xff]  ;;  %v1252_v5 = vld [vmem:[%s7129_s8 + $0x768] sm:$0xff]  ;;  %v813_v8 = vld [vmem:[%s7122_s19 + $0x1b0] sm:$0xff] }
  0x85   : > { %2735 = vmatpush.msrb.mxu3 %v1264_v9  ;;  %2108 = vmatpush.msrb.mxu0 %v1072_v10  ;;  %v775_v26 = vld [vmem:[%s7122_s19 + $0x80] sm:$0xff]  ;;  %v1060_v6 = vld [vmem:[%s7129_s8 + $0x168] sm:$0xff]  ;;  %v814_v9 = vld [vmem:[%s7122_s19 + $0x1b8] sm:$0xff] }
  0x86   : > { %2317 = vmatpush.msrb.mxu1 %v1136_v11  ;;  %2527 = vmatpush.msrb.mxu2 %v1196_v28  ;;  %v779_v34 = vld [vmem:[%s7122_s19 + $0xa0] sm:$0xff]  ;;  %v1124_v7 = vld [vmem:[%s7129_s8 + $0x368] sm:$0xff] }
  0x87   : > { %1708 = vmatmul.f32.gmra.mxu2 %v765_v12  ;;  %2736 = vmatpush.msrb.mxu3 %v1260_v29  ;;  %v783_v38 = vld [vmem:[%s7122_s19 + $0xc0] sm:$0xff]  ;;  %v812_v11 = vld [vmem:[%s7122_s19 + $0x1a8] sm:$0xff]  ;;  %v817_v12 = vld [vmem:[%s7122_s19 + $0x1d0] sm:$0xff] }
  0x88   : > { %1917 = vmatmul.f32.gmra.mxu3 %v766_v13  ;;  %2109 = vmatpush.msrb.mxu0 %v1068_v30  ;;  %v787_v42 = vld [vmem:[%s7122_s19 + $0xe0] sm:$0xff]  ;;  %v818_v13 = vld [vmem:[%s7122_s19 + $0x1d8] sm:$0xff]  ;;  %v1248_v28 = vld [vmem:[%s7129_s8 + $0x748] sm:$0xff] }
  0x89   : > { %2318 = vmatpush.msrb.mxu1 %v1132_v31  ;;  %v791_v46 = vld [vmem:[%s7122_s19 + $0x100] sm:$0xff]  ;;  %2528 = vmatpush.msrb.mxu2 %v1192_v48 }
  0x8a   : > { %1290 = vmatmul.f32.gmra.mxu0 %v763_v14  ;;  %2737 = vmatpush.msrb.mxu3 %v1256_v49  ;;  %v795_v54 = vld [vmem:[%s7122_s19 + $0x120] sm:$0xff] }
  0x8b   : > { %1499 = vmatmul.f32.gmra.mxu1 %v764_v15  ;;  %2110 = vmatpush.msrb.mxu0 %v1064_v50  ;;  %v799_v58 = vld [vmem:[%s7122_s19 + $0x140] sm:$0xff]  ;;  %v816_v15 = vld [vmem:[%s7122_s19 + $0x1c8] sm:$0xff] }
  0x8c   : > { %2319 = vmatpush.msrb.mxu1 %v1128_v51  ;;  %v803_v62 = vld [vmem:[%s7122_s19 + $0x160] sm:$0xff]  ;;  %2529 = vmatpush.msrb.mxu2 %v1188_v4  ;;  %v832_v51 = vld [vmem:[%s7122_s19 + $0x248] sm:$0xff]  ;;  %v842_v4 = vld [vmem:[%s7122_s19 + $0x298] sm:$0xff] }
  0x8d   : > { %v807_v2 = vld [vmem:[%s7122_s19 + $0x180] sm:$0xff]  ;;  %2738 = vmatpush.msrb.mxu3 %v1252_v5  ;;  %2111 = vmatpush.msrb.mxu0 %v1060_v6 }
  0x8e   : > { %2320 = vmatpush.msrb.mxu1 %v1124_v7  ;;  %v811_v10 = vld [vmem:[%s7122_s19 + $0x1a0] sm:$0xff] }
  0x8f   : > { %1711 = vmatmul.f32.gmra.mxu2 %v769_v16  ;;  %v815_v14 = vld [vmem:[%s7122_s19 + $0x1c0] sm:$0xff]  ;;  %v821_v16 = vld [vmem:[%s7122_s19 + $0x1f0] sm:$0xff]  ;;  %2739 = vmatpush.msrb.mxu3 %v1248_v28 }
  0x90   : > { %1920 = vmatmul.f32.gmra.mxu3 %v770_v17  ;;  %v822_v17 = vld [vmem:[%s7122_s19 + $0x1f8] sm:$0xff]  ;;  %v831_v50 = vld [vmem:[%s7122_s19 + $0x240] sm:$0xff] }
  0x92   : > { %1293 = vmatmul.f32.gmra.mxu0 %v767_v18  ;;  %v819_v18 = vld [vmem:[%s7122_s19 + $0x1e0] sm:$0xff] }
  0x93   : > { %1502 = vmatmul.f32.gmra.mxu1 %v768_v19  ;;  %v820_v19 = vld [vmem:[%s7122_s19 + $0x1e8] sm:$0xff] }
  0x97   : > { %1714 = vmatmul.f32.gmra.mxu2 %v773_v20  ;;  %v825_v20 = vld [vmem:[%s7122_s19 + $0x210] sm:$0xff] }
  0x98   : > { %1923 = vmatmul.f32.gmra.mxu3 %v774_v21  ;;  %v826_v21 = vld [vmem:[%s7122_s19 + $0x218] sm:$0xff] }
  0x9a   : > { %1296 = vmatmul.f32.gmra.mxu0 %v771_v22 }
  0x9b   : > { %1505 = vmatmul.f32.gmra.mxu1 %v772_v23 }
  0x9f   : > { %1717 = vmatmul.f32.gmra.mxu2 %v777_v24  ;;  %v823_v24 = vld [vmem:[%s7122_s19 + $0x200] sm:$0xff] }
  0xa0   : > { %1926 = vmatmul.f32.gmra.mxu3 %v778_v25  ;;  %v824_v25 = vld [vmem:[%s7122_s19 + $0x208] sm:$0xff] }
  0xa2   : > { %1299 = vmatmul.f32.gmra.mxu0 %v775_v26  ;;  %v1184_v26 = vld [vmem:[%s7129_s8 + $0x548] sm:$0xff] }
  0xa3   : > { %1508 = vmatmul.f32.gmra.mxu1 %v776_v27  ;;  %2530 = vmatpush.msrb.mxu2 %v1184_v26 }
  0xa7   : > { %1720 = vmatmul.f32.gmra.mxu2 %v781_v32  ;;  %v1056_v32 = vld [vmem:[%s7129_s8 + $0x148] sm:$0xff] }
  0xa8   : > { %1929 = vmatmul.f32.gmra.mxu3 %v782_v33  ;;  %v1120_v33 = vld [vmem:[%s7129_s8 + $0x348] sm:$0xff]  ;;  %2112 = vmatpush.msrb.mxu0 %v1056_v32 }
  0xa9   : > { %2321 = vmatpush.msrb.mxu1 %v1120_v33 }
  0xaa   : > { %1302 = vmatmul.f32.gmra.mxu0 %v779_v34  ;;  %v829_v34 = vld [vmem:[%s7122_s19 + $0x230] sm:$0xff] }
  0xab   : > { %1511 = vmatmul.f32.gmra.mxu1 %v780_v35  ;;  %v830_v35 = vld [vmem:[%s7122_s19 + $0x238] sm:$0xff] }
  0xaf   : > { %1723 = vmatmul.f32.gmra.mxu2 %v785_v36 }
  0xb0   : > { %1932 = vmatmul.f32.gmra.mxu3 %v786_v37 }
  0xb2   : > { %1305 = vmatmul.f32.gmra.mxu0 %v783_v38 }
  0xb3   : > { %1514 = vmatmul.f32.gmra.mxu1 %v784_v39  ;;  %v827_v39 = vld [vmem:[%s7122_s19 + $0x220] sm:$0xff] }
  0xb7   : > { %1726 = vmatmul.f32.gmra.mxu2 %v789_v40  ;;  %v828_v40 = vld [vmem:[%s7122_s19 + $0x228] sm:$0xff] }
  0xb8   : > { %1935 = vmatmul.f32.gmra.mxu3 %v790_v41 }
  0xba   : > { %1308 = vmatmul.f32.gmra.mxu0 %v787_v42 }
  0xbb   : > { %1517 = vmatmul.f32.gmra.mxu1 %v788_v43 }
  0xbf   : > { %1729 = vmatmul.f32.gmra.mxu2 %v793_v44 }
  0xc0   : > { %1938 = vmatmul.f32.gmra.mxu3 %v794_v45  ;;  %v833_v45 = vld [vmem:[%s7122_s19 + $0x250] sm:$0xff] }
  0xc2   : > { %1311 = vmatmul.f32.gmra.mxu0 %v791_v46  ;;  %v834_v46 = vld [vmem:[%s7122_s19 + $0x258] sm:$0xff] }
  0xc3   : > { %1520 = vmatmul.f32.gmra.mxu1 %v792_v47 }
  0xc7   : > { %1732 = vmatmul.f32.gmra.mxu2 %v797_v52 }
  0xc8   : > { %1941 = vmatmul.f32.gmra.mxu3 %v798_v53 }
  0xca   : > { %1314 = vmatmul.f32.gmra.mxu0 %v795_v54 }
  0xcb   : > { %1523 = vmatmul.f32.gmra.mxu1 %v796_v55 }
  0xcf   : > { %1735 = vmatmul.f32.gmra.mxu2 %v801_v56  ;;  %v837_v56 = vld [vmem:[%s7122_s19 + $0x270] sm:$0xff] }
  0xd0   : > { %1944 = vmatmul.f32.gmra.mxu3 %v802_v57  ;;  %v838_v57 = vld [vmem:[%s7122_s19 + $0x278] sm:$0xff] }
  0xd2   : > { %1317 = vmatmul.f32.gmra.mxu0 %v799_v58 }
  0xd3   : > { %1526 = vmatmul.f32.gmra.mxu1 %v800_v59 }
  0xd7   : > { %1738 = vmatmul.f32.gmra.mxu2 %v805_v60 }
  0xd8   : > { %1947 = vmatmul.f32.gmra.mxu3 %v806_v61  ;;  %v835_v61 = vld [vmem:[%s7122_s19 + $0x260] sm:$0xff] }
  0xda   : > { %1320 = vmatmul.f32.gmra.mxu0 %v803_v62  ;;  %v836_v62 = vld [vmem:[%s7122_s19 + $0x268] sm:$0xff] }
  0xdb   : > { %1529 = vmatmul.f32.gmra.mxu1 %v804_v63 }
  0xdf   : > { %1741 = vmatmul.f32.gmra.mxu2 %v809_v0 }
  0xe0   : > { %1950 = vmatmul.f32.gmra.mxu3 %v810_v1 }
  0xe2   : > { %1323 = vmatmul.f32.gmra.mxu0 %v807_v2 }
  0xe3   : > { %1532 = vmatmul.f32.gmra.mxu1 %v808_v3  ;;  %v841_v3 = vld [vmem:[%s7122_s19 + $0x290] sm:$0xff] }
  0xe7   : > { %1744 = vmatmul.f32.gmra.mxu2 %v813_v8  ;;  %v839_v8 = vld [vmem:[%s7122_s19 + $0x280] sm:$0xff] }
  0xe8   : > { %1953 = vmatmul.f32.gmra.mxu3 %v814_v9  ;;  %v840_v9 = vld [vmem:[%s7122_s19 + $0x288] sm:$0xff] }
  0xea   : > { %1326 = vmatmul.f32.gmra.mxu0 %v811_v10  ;;  %v1180_v10 = vld [vmem:[%s7129_s8 + $0x528] sm:$0xff] }
  0xeb   : > { %1535 = vmatmul.f32.gmra.mxu1 %v812_v11  ;;  %2531 = vmatpush.msrb.mxu2 %v1180_v10 }
  0xef   : > { %1747 = vmatmul.f32.gmra.mxu2 %v817_v12  ;;  %v1244_v12 = vld [vmem:[%s7129_s8 + $0x728] sm:$0xff] }
  0xf0   : > { %1956 = vmatmul.f32.gmra.mxu3 %v818_v13 }
  0xf1   : > { %2740 = vmatpush.msrb.mxu3 %v1244_v12 }
  0xf2   : > { %1329 = vmatmul.f32.gmra.mxu0 %v815_v14 }
  0xf3   : > { %1538 = vmatmul.f32.gmra.mxu1 %v816_v15 }
  0xf7   : > { %1750 = vmatmul.f32.gmra.mxu2 %v821_v16  ;;  %v1052_v16 = vld [vmem:[%s7129_s8 + $0x128] sm:$0xff] }
  0xf8   : > { %1959 = vmatmul.f32.gmra.mxu3 %v822_v17  ;;  %v1116_v17 = vld [vmem:[%s7129_s8 + $0x328] sm:$0xff]  ;;  %2113 = vmatpush.msrb.mxu0 %v1052_v16 }
  0xf9   : > { %2322 = vmatpush.msrb.mxu1 %v1116_v17 }
  0xfa   : > { %1332 = vmatmul.f32.gmra.mxu0 %v819_v18  ;;  %v845_v18 = vld [vmem:[%s7122_s19 + $0x2b0] sm:$0xff] }
  0xfb   : > { %1541 = vmatmul.f32.gmra.mxu1 %v820_v19  ;;  %v846_v19 = vld [vmem:[%s7122_s19 + $0x2b8] sm:$0xff] }
  0xff   : > { %1753 = vmatmul.f32.gmra.mxu2 %v825_v20  ;;  %v1288_v22 = vpop.f32.mrf.mxu0 }
 0x100   : > { %v1497_v23 = vpop.f32.mrf.mxu1  ;;  %1962 = vmatmul.f32.gmra.mxu3 %v826_v21 }
 0x101   : > { %v1498_v27 = vadd.f32 %v1497_v23, %v1288_v22  ;;  %v843_v23 = vld [vmem:[%s7122_s19 + $0x2a0] sm:$0xff] }
 0x102   : > { %v1706_v29 = vpop.f32.mrf.mxu2  ;;  %1335 = vmatmul.f32.gmra.mxu0 %v823_v24  ;;  %v844_v24 = vld [vmem:[%s7122_s19 + $0x2a8] sm:$0xff] }
 0x103   : > { %1544 = vmatmul.f32.gmra.mxu1 %v824_v25  ;;  %v1915_v30 = vpop.f32.mrf.mxu3  ;;  %v1707_v31 = vadd.f32 %v1706_v29, %v1498_v27  ;;  %v849_v29 = vld [vmem:[%s7122_s19 + $0x2d0] sm:$0xff] }
 0x105   : > { %v1916_v36 = vadd.f32 %v1915_v30, %v1707_v31  ;;  %v850_v30 = vld [vmem:[%s7122_s19 + $0x2d8] sm:$0xff] }
 0x107   : > { %5386 = vst [vmem:[%s7296_s12] sm:$0xff] %v1916_v36  ;;  %1756 = vmatmul.f32.gmra.mxu2 %v829_v34  ;;  %v1291_v37 = vpop.f32.mrf.mxu0  ;;  %v847_v34 = vld [vmem:[%s7122_s19 + $0x2c0] sm:$0xff] }
 0x108   : > { %v1500_v38 = vpop.f32.mrf.mxu1  ;;  %1965 = vmatmul.f32.gmra.mxu3 %v830_v35  ;;  %v848_v35 = vld [vmem:[%s7122_s19 + $0x2c8] sm:$0xff] }
 0x109   : > { %v1501_v41 = vadd.f32 %v1500_v38, %v1291_v37 }
 0x10a   : > { %v1709_v42 = vpop.f32.mrf.mxu2  ;;  %1338 = vmatmul.f32.gmra.mxu0 %v827_v39 }
 0x10b   : > { %1547 = vmatmul.f32.gmra.mxu1 %v828_v40  ;;  %v1918_v43 = vpop.f32.mrf.mxu3  ;;  %v1710_v44 = vadd.f32 %v1709_v42, %v1501_v41  ;;  %v853_v40 = vld [vmem:[%s7122_s19 + $0x2f0] sm:$0xff]  ;;  %v854_v41 = vld [vmem:[%s7122_s19 + $0x2f8] sm:$0xff] }
 0x10d   : > { %v1919_v47 = vadd.f32 %v1918_v43, %v1710_v44 }
 0x10f   : > { %5390 = vst [vmem:[%s7296_s12 + $0x20] sm:$0xff] %v1919_v47  ;;  %1759 = vmatmul.f32.gmra.mxu2 %v833_v45  ;;  %v1294_v48 = vpop.f32.mrf.mxu0  ;;  %v851_v45 = vld [vmem:[%s7122_s19 + $0x2e0] sm:$0xff] }
 0x110   : > { %v1503_v49 = vpop.f32.mrf.mxu1  ;;  %1968 = vmatmul.f32.gmra.mxu3 %v834_v46  ;;  %v852_v46 = vld [vmem:[%s7122_s19 + $0x2e8] sm:$0xff] }
 0x111   : > { %v1504_v52 = vadd.f32 %v1503_v49, %v1294_v48 }
 0x112   : > { %v1712_v53 = vpop.f32.mrf.mxu2  ;;  %1341 = vmatmul.f32.gmra.mxu0 %v831_v50 }
 0x113   : > { %1550 = vmatmul.f32.gmra.mxu1 %v832_v51  ;;  %v1921_v54 = vpop.f32.mrf.mxu3  ;;  %v1713_v55 = vadd.f32 %v1712_v53, %v1504_v52  ;;  %v857_v51 = vld [vmem:[%s7122_s19 + $0x310] sm:$0xff]  ;;  %v858_v52 = vld [vmem:[%s7122_s19 + $0x318] sm:$0xff] }
 0x115   : > { %v1922_v58 = vadd.f32 %v1921_v54, %v1713_v55 }
 0x117   : > { %5394 = vst [vmem:[%s7296_s12 + $0x40] sm:$0xff] %v1922_v58  ;;  %1762 = vmatmul.f32.gmra.mxu2 %v837_v56  ;;  %v1297_v59 = vpop.f32.mrf.mxu0  ;;  %v855_v56 = vld [vmem:[%s7122_s19 + $0x300] sm:$0xff]  ;;  %v1176_v58 = vld [vmem:[%s7129_s8 + $0x508] sm:$0xff] }
 0x118   : > { %v1506_v60 = vpop.f32.mrf.mxu1  ;;  %1971 = vmatmul.f32.gmra.mxu3 %v838_v57  ;;  %v856_v57 = vld [vmem:[%s7122_s19 + $0x308] sm:$0xff]  ;;  %2532 = vmatpush.msrb.mxu2 %v1176_v58 }
 0x119   : > { %v1507_v63 = vadd.f32 %v1506_v60, %v1297_v59  ;;  %v1240_v60 = vld [vmem:[%s7129_s8 + $0x708] sm:$0xff] }
 0x11a   : > { %v1715_v0 = vpop.f32.mrf.mxu2  ;;  %1344 = vmatmul.f32.gmra.mxu0 %v835_v61  ;;  %2741 = vmatpush.msrb.mxu3 %v1240_v60 }
 0x11b   : > { %1553 = vmatmul.f32.gmra.mxu1 %v836_v62  ;;  %v1924_v1 = vpop.f32.mrf.mxu3  ;;  %v1716_v2 = vadd.f32 %v1715_v0, %v1507_v63  ;;  %v1048_v0 = vld [vmem:[%s7129_s8 + $0x108] sm:$0xff] }
 0x11c   : > { %2114 = vmatpush.msrb.mxu0 %v1048_v0 }
 0x11d   : > { %v1925_v5 = vadd.f32 %v1924_v1, %v1716_v2  ;;  %v1112_v1 = vld [vmem:[%s7129_s8 + $0x308] sm:$0xff]  ;;  %v861_v2 = vld [vmem:[%s7122_s19 + $0x330] sm:$0xff] }
 0x11e   : > { %2323 = vmatpush.msrb.mxu1 %v1112_v1 }
 0x11f   : > { %5398 = vst [vmem:[%s7296_s12 + $0x60] sm:$0xff] %v1925_v5  ;;  %1765 = vmatmul.f32.gmra.mxu2 %v841_v3  ;;  %v1300_v6 = vpop.f32.mrf.mxu0  ;;  %v862_v3 = vld [vmem:[%s7122_s19 + $0x338] sm:$0xff] }
 0x120   : > { %v1509_v7 = vpop.f32.mrf.mxu1  ;;  %1974 = vmatmul.f32.gmra.mxu3 %v842_v4 }
 0x121   : > { %v1510_v11 = vadd.f32 %v1509_v7, %v1300_v6  ;;  %v859_v7 = vld [vmem:[%s7122_s19 + $0x320] sm:$0xff] }
 0x122   : > { %v1718_v13 = vpop.f32.mrf.mxu2  ;;  %1347 = vmatmul.f32.gmra.mxu0 %v839_v8  ;;  %v860_v8 = vld [vmem:[%s7122_s19 + $0x328] sm:$0xff] }
 0x123   : > { %1556 = vmatmul.f32.gmra.mxu1 %v840_v9  ;;  %v1927_v14 = vpop.f32.mrf.mxu3  ;;  %v1719_v15 = vadd.f32 %v1718_v13, %v1510_v11  ;;  %v865_v13 = vld [vmem:[%s7122_s19 + $0x350] sm:$0xff] }
 0x125   : > { %v1928_v20 = vadd.f32 %v1927_v14, %v1719_v15  ;;  %v866_v14 = vld [vmem:[%s7122_s19 + $0x358] sm:$0xff] }
 0x127   : > { %5402 = vst [vmem:[%s7296_s12 + $0x80] sm:$0xff] %v1928_v20  ;;  %1768 = vmatmul.f32.gmra.mxu2 %v845_v18  ;;  %v1303_v21 = vpop.f32.mrf.mxu0  ;;  %v863_v18 = vld [vmem:[%s7122_s19 + $0x340] sm:$0xff] }
 0x128   : > { %v1512_v22 = vpop.f32.mrf.mxu1  ;;  %1977 = vmatmul.f32.gmra.mxu3 %v846_v19  ;;  %v864_v19 = vld [vmem:[%s7122_s19 + $0x348] sm:$0xff] }
 0x129   : > { %v1513_v25 = vadd.f32 %v1512_v22, %v1303_v21 }
 0x12a   : > { %v1721_v26 = vpop.f32.mrf.mxu2  ;;  %1350 = vmatmul.f32.gmra.mxu0 %v843_v23 }
 0x12b   : > { %1559 = vmatmul.f32.gmra.mxu1 %v844_v24  ;;  %v1930_v27 = vpop.f32.mrf.mxu3  ;;  %v1722_v28 = vadd.f32 %v1721_v26, %v1513_v25  ;;  %v869_v24 = vld [vmem:[%s7122_s19 + $0x370] sm:$0xff]  ;;  %v870_v25 = vld [vmem:[%s7122_s19 + $0x378] sm:$0xff] }
 0x12d   : > { %v1931_v31 = vadd.f32 %v1930_v27, %v1722_v28 }
 0x12f   : > { %5406 = vst [vmem:[%s7296_s12 + $0xa0] sm:$0xff] %v1931_v31  ;;  %1771 = vmatmul.f32.gmra.mxu2 %v849_v29  ;;  %v1306_v32 = vpop.f32.mrf.mxu0  ;;  %v867_v29 = vld [vmem:[%s7122_s19 + $0x360] sm:$0xff] }
 0x130   : > { %v1515_v33 = vpop.f32.mrf.mxu1  ;;  %1980 = vmatmul.f32.gmra.mxu3 %v850_v30  ;;  %v868_v30 = vld [vmem:[%s7122_s19 + $0x368] sm:$0xff] }
 0x131   : > { %v1516_v36 = vadd.f32 %v1515_v33, %v1306_v32 }
 0x132   : > { %v1724_v37 = vpop.f32.mrf.mxu2  ;;  %1353 = vmatmul.f32.gmra.mxu0 %v847_v34 }
 0x133   : > { %1562 = vmatmul.f32.gmra.mxu1 %v848_v35  ;;  %v1933_v38 = vpop.f32.mrf.mxu3  ;;  %v1725_v39 = vadd.f32 %v1724_v37, %v1516_v36  ;;  %v873_v35 = vld [vmem:[%s7122_s19 + $0x390] sm:$0xff]  ;;  %v874_v36 = vld [vmem:[%s7122_s19 + $0x398] sm:$0xff] }
 0x135   : > { %v1934_v42 = vadd.f32 %v1933_v38, %v1725_v39 }
 0x137   : > { %5410 = vst [vmem:[%s7296_s12 + $0xc0] sm:$0xff] %v1934_v42  ;;  %1774 = vmatmul.f32.gmra.mxu2 %v853_v40  ;;  %v1309_v43 = vpop.f32.mrf.mxu0  ;;  %v871_v40 = vld [vmem:[%s7122_s19 + $0x380] sm:$0xff]  ;;  %v1172_v42 = vld [vmem:[%s7129_s8 + $0x4e8] sm:$0xff] }
 0x138   : > { %v1518_v44 = vpop.f32.mrf.mxu1  ;;  %1983 = vmatmul.f32.gmra.mxu3 %v854_v41  ;;  %v872_v41 = vld [vmem:[%s7122_s19 + $0x388] sm:$0xff]  ;;  %2533 = vmatpush.msrb.mxu2 %v1172_v42 }
 0x139   : > { %v1519_v47 = vadd.f32 %v1518_v44, %v1309_v43  ;;  %v1236_v44 = vld [vmem:[%s7129_s8 + $0x6e8] sm:$0xff] }
 0x13a   : > { %v1727_v48 = vpop.f32.mrf.mxu2  ;;  %1356 = vmatmul.f32.gmra.mxu0 %v851_v45  ;;  %2742 = vmatpush.msrb.mxu3 %v1236_v44 }
 0x13b   : > { %1565 = vmatmul.f32.gmra.mxu1 %v852_v46  ;;  %v1936_v49 = vpop.f32.mrf.mxu3  ;;  %v1728_v50 = vadd.f32 %v1727_v48, %v1519_v47  ;;  %v1044_v48 = vld [vmem:[%s7129_s8 + $0xe8] sm:$0xff] }
 0x13c   : > { %2115 = vmatpush.msrb.mxu0 %v1044_v48 }
 0x13d   : > { %v1937_v53 = vadd.f32 %v1936_v49, %v1728_v50  ;;  %v1108_v49 = vld [vmem:[%s7129_s8 + $0x2e8] sm:$0xff]  ;;  %v877_v50 = vld [vmem:[%s7122_s19 + $0x3b0] sm:$0xff] }
 0x13e   : > { %2324 = vmatpush.msrb.mxu1 %v1108_v49 }
 0x13f   : > { %5414 = vst [vmem:[%s7296_s12 + $0xe0] sm:$0xff] %v1937_v53  ;;  %1777 = vmatmul.f32.gmra.mxu2 %v857_v51  ;;  %v1312_v54 = vpop.f32.mrf.mxu0  ;;  %v878_v51 = vld [vmem:[%s7122_s19 + $0x3b8] sm:$0xff] }
 0x140   : > { %v1521_v55 = vpop.f32.mrf.mxu1  ;;  %1986 = vmatmul.f32.gmra.mxu3 %v858_v52 }
 0x141   : > { %v1522_v59 = vadd.f32 %v1521_v55, %v1312_v54  ;;  %v875_v55 = vld [vmem:[%s7122_s19 + $0x3a0] sm:$0xff] }
 0x142   : > { %v1730_v61 = vpop.f32.mrf.mxu2  ;;  %1359 = vmatmul.f32.gmra.mxu0 %v855_v56  ;;  %v876_v56 = vld [vmem:[%s7122_s19 + $0x3a8] sm:$0xff] }
 0x143   : > { %1568 = vmatmul.f32.gmra.mxu1 %v856_v57  ;;  %v1939_v62 = vpop.f32.mrf.mxu3  ;;  %v1731_v63 = vadd.f32 %v1730_v61, %v1522_v59  ;;  %v881_v61 = vld [vmem:[%s7122_s19 + $0x3d0] sm:$0xff] }
 0x145   : > { %v1940_v4 = vadd.f32 %v1939_v62, %v1731_v63  ;;  %v882_v62 = vld [vmem:[%s7122_s19 + $0x3d8] sm:$0xff] }
 0x147   : > { %5418 = vst [vmem:[%s7296_s12 + $0x100] sm:$0xff] %v1940_v4  ;;  %1780 = vmatmul.f32.gmra.mxu2 %v861_v2  ;;  %v1315_v5 = vpop.f32.mrf.mxu0  ;;  %v879_v2 = vld [vmem:[%s7122_s19 + $0x3c0] sm:$0xff] }
 0x148   : > { %v1524_v6 = vpop.f32.mrf.mxu1  ;;  %1989 = vmatmul.f32.gmra.mxu3 %v862_v3  ;;  %v880_v3 = vld [vmem:[%s7122_s19 + $0x3c8] sm:$0xff] }
 0x149   : > { %v1525_v9 = vadd.f32 %v1524_v6, %v1315_v5 }
 0x14a   : > { %v1733_v10 = vpop.f32.mrf.mxu2  ;;  %1362 = vmatmul.f32.gmra.mxu0 %v859_v7 }
 0x14b   : > { %1571 = vmatmul.f32.gmra.mxu1 %v860_v8  ;;  %v1942_v11 = vpop.f32.mrf.mxu3  ;;  %v1734_v12 = vadd.f32 %v1733_v10, %v1525_v9  ;;  %v885_v8 = vld [vmem:[%s7122_s19 + $0x3f0] sm:$0xff]  ;;  %v886_v9 = vld [vmem:[%s7122_s19 + $0x3f8] sm:$0xff] }
 0x14d   : > { %v1943_v15 = vadd.f32 %v1942_v11, %v1734_v12 }
 0x14f   : > { %5422 = vst [vmem:[%s7296_s12 + $0x120] sm:$0xff] %v1943_v15  ;;  %1783 = vmatmul.f32.gmra.mxu2 %v865_v13  ;;  %v1318_v16 = vpop.f32.mrf.mxu0  ;;  %v883_v13 = vld [vmem:[%s7122_s19 + $0x3e0] sm:$0xff] }
 0x150   : > { %v1527_v17 = vpop.f32.mrf.mxu1  ;;  %1992 = vmatmul.f32.gmra.mxu3 %v866_v14  ;;  %v884_v14 = vld [vmem:[%s7122_s19 + $0x3e8] sm:$0xff] }
 0x151   : > { %v1528_v20 = vadd.f32 %v1527_v17, %v1318_v16 }
 0x152   : > { %v1736_v21 = vpop.f32.mrf.mxu2  ;;  %1365 = vmatmul.f32.gmra.mxu0 %v863_v18 }
 0x153   : > { %1574 = vmatmul.f32.gmra.mxu1 %v864_v19  ;;  %v1945_v22 = vpop.f32.mrf.mxu3  ;;  %v1737_v23 = vadd.f32 %v1736_v21, %v1528_v20  ;;  %v889_v19 = vld [vmem:[%s7122_s19 + $0x410] sm:$0xff]  ;;  %v890_v20 = vld [vmem:[%s7122_s19 + $0x418] sm:$0xff] }
 0x155   : > { %v1946_v26 = vadd.f32 %v1945_v22, %v1737_v23 }
 0x157   : > { %5426 = vst [vmem:[%s7296_s12 + $0x140] sm:$0xff] %v1946_v26  ;;  %1786 = vmatmul.f32.gmra.mxu2 %v869_v24  ;;  %v1321_v27 = vpop.f32.mrf.mxu0  ;;  %v887_v24 = vld [vmem:[%s7122_s19 + $0x400] sm:$0xff]  ;;  %v1168_v26 = vld [vmem:[%s7129_s8 + $0x4c8] sm:$0xff] }
 0x158   : > { %v1530_v28 = vpop.f32.mrf.mxu1  ;;  %1995 = vmatmul.f32.gmra.mxu3 %v870_v25  ;;  %v888_v25 = vld [vmem:[%s7122_s19 + $0x408] sm:$0xff]  ;;  %2534 = vmatpush.msrb.mxu2 %v1168_v26 }
 0x159   : > { %v1531_v31 = vadd.f32 %v1530_v28, %v1321_v27  ;;  %v1232_v28 = vld [vmem:[%s7129_s8 + $0x6c8] sm:$0xff] }
 0x15a   : > { %v1739_v32 = vpop.f32.mrf.mxu2  ;;  %1368 = vmatmul.f32.gmra.mxu0 %v867_v29  ;;  %2743 = vmatpush.msrb.mxu3 %v1232_v28 }
 0x15b   : > { %1577 = vmatmul.f32.gmra.mxu1 %v868_v30  ;;  %v1948_v33 = vpop.f32.mrf.mxu3  ;;  %v1740_v34 = vadd.f32 %v1739_v32, %v1531_v31  ;;  %v1040_v32 = vld [vmem:[%s7129_s8 + $0xc8] sm:$0xff] }
 0x15c   : > { %2116 = vmatpush.msrb.mxu0 %v1040_v32 }
 0x15d   : > { %v1949_v37 = vadd.f32 %v1948_v33, %v1740_v34  ;;  %v1104_v33 = vld [vmem:[%s7129_s8 + $0x2c8] sm:$0xff]  ;;  %v893_v34 = vld [vmem:[%s7122_s19 + $0x430] sm:$0xff] }
 0x15e   : > { %2325 = vmatpush.msrb.mxu1 %v1104_v33 }
 0x15f   : > { %5430 = vst [vmem:[%s7296_s12 + $0x160] sm:$0xff] %v1949_v37  ;;  %1789 = vmatmul.f32.gmra.mxu2 %v873_v35  ;;  %v1324_v38 = vpop.f32.mrf.mxu0  ;;  %v894_v35 = vld [vmem:[%s7122_s19 + $0x438] sm:$0xff] }
 0x160   : > { %v1533_v39 = vpop.f32.mrf.mxu1  ;;  %1998 = vmatmul.f32.gmra.mxu3 %v874_v36 }
 0x161   : > { %v1534_v43 = vadd.f32 %v1533_v39, %v1324_v38  ;;  %v891_v39 = vld [vmem:[%s7122_s19 + $0x420] sm:$0xff] }
 0x162   : > { %v1742_v45 = vpop.f32.mrf.mxu2  ;;  %1371 = vmatmul.f32.gmra.mxu0 %v871_v40  ;;  %v892_v40 = vld [vmem:[%s7122_s19 + $0x428] sm:$0xff] }
 0x163   : > { %1580 = vmatmul.f32.gmra.mxu1 %v872_v41  ;;  %v1951_v46 = vpop.f32.mrf.mxu3  ;;  %v1743_v47 = vadd.f32 %v1742_v45, %v1534_v43  ;;  %v897_v45 = vld [vmem:[%s7122_s19 + $0x450] sm:$0xff] }
 0x165   : > { %v1952_v52 = vadd.f32 %v1951_v46, %v1743_v47  ;;  %v898_v46 = vld [vmem:[%s7122_s19 + $0x458] sm:$0xff] }
 0x167   : > { %5434 = vst [vmem:[%s7296_s12 + $0x180] sm:$0xff] %v1952_v52  ;;  %1792 = vmatmul.f32.gmra.mxu2 %v877_v50  ;;  %v1327_v53 = vpop.f32.mrf.mxu0  ;;  %v895_v50 = vld [vmem:[%s7122_s19 + $0x440] sm:$0xff] }
 0x168   : > { %v1536_v54 = vpop.f32.mrf.mxu1  ;;  %2001 = vmatmul.f32.gmra.mxu3 %v878_v51  ;;  %v896_v51 = vld [vmem:[%s7122_s19 + $0x448] sm:$0xff] }
 0x169   : > { %v1537_v57 = vadd.f32 %v1536_v54, %v1327_v53 }
 0x16a   : > { %v1745_v58 = vpop.f32.mrf.mxu2  ;;  %1374 = vmatmul.f32.gmra.mxu0 %v875_v55 }
 0x16b   : > { %1583 = vmatmul.f32.gmra.mxu1 %v876_v56  ;;  %v1954_v59 = vpop.f32.mrf.mxu3  ;;  %v1746_v60 = vadd.f32 %v1745_v58, %v1537_v57  ;;  %v901_v56 = vld [vmem:[%s7122_s19 + $0x470] sm:$0xff]  ;;  %v902_v57 = vld [vmem:[%s7122_s19 + $0x478] sm:$0xff] }
 0x16d   : > { %v1955_v63 = vadd.f32 %v1954_v59, %v1746_v60 }
 0x16f   : > { %5438 = vst [vmem:[%s7296_s12 + $0x1a0] sm:$0xff] %v1955_v63  ;;  %1795 = vmatmul.f32.gmra.mxu2 %v881_v61  ;;  %v1330_v0 = vpop.f32.mrf.mxu0  ;;  %v899_v61 = vld [vmem:[%s7122_s19 + $0x460] sm:$0xff] }
 0x170   : > { %v1539_v1 = vpop.f32.mrf.mxu1  ;;  %2004 = vmatmul.f32.gmra.mxu3 %v882_v62  ;;  %v900_v62 = vld [vmem:[%s7122_s19 + $0x468] sm:$0xff] }
 0x171   : > { %v1540_v4 = vadd.f32 %v1539_v1, %v1330_v0 }
 0x172   : > { %v1748_v5 = vpop.f32.mrf.mxu2  ;;  %1377 = vmatmul.f32.gmra.mxu0 %v879_v2 }
 0x173   : > { %1586 = vmatmul.f32.gmra.mxu1 %v880_v3  ;;  %v1957_v6 = vpop.f32.mrf.mxu3  ;;  %v1749_v7 = vadd.f32 %v1748_v5, %v1540_v4  ;;  %v905_v3 = vld [vmem:[%s7122_s19 + $0x490] sm:$0xff]  ;;  %v906_v4 = vld [vmem:[%s7122_s19 + $0x498] sm:$0xff] }
 0x175   : > { %v1958_v10 = vadd.f32 %v1957_v6, %v1749_v7 }
 0x177   : > { %5442 = vst [vmem:[%s7296_s12 + $0x1c0] sm:$0xff] %v1958_v10  ;;  %1798 = vmatmul.f32.gmra.mxu2 %v885_v8  ;;  %v1333_v11 = vpop.f32.mrf.mxu0  ;;  %v903_v8 = vld [vmem:[%s7122_s19 + $0x480] sm:$0xff]  ;;  %v1164_v10 = vld [vmem:[%s7129_s8 + $0x4a8] sm:$0xff] }
 0x178   : > { %v1542_v12 = vpop.f32.mrf.mxu1  ;;  %2007 = vmatmul.f32.gmra.mxu3 %v886_v9  ;;  %v904_v9 = vld [vmem:[%s7122_s19 + $0x488] sm:$0xff]  ;;  %2535 = vmatpush.msrb.mxu2 %v1164_v10 }
 0x179   : > { %v1543_v15 = vadd.f32 %v1542_v12, %v1333_v11  ;;  %v1228_v12 = vld [vmem:[%s7129_s8 + $0x6a8] sm:$0xff] }
 0x17a   : > { %v1751_v16 = vpop.f32.mrf.mxu2  ;;  %1380 = vmatmul.f32.gmra.mxu0 %v883_v13  ;;  %2744 = vmatpush.msrb.mxu3 %v1228_v12 }
 0x17b   : > { %1589 = vmatmul.f32.gmra.mxu1 %v884_v14  ;;  %v1960_v17 = vpop.f32.mrf.mxu3  ;;  %v1752_v18 = vadd.f32 %v1751_v16, %v1543_v15  ;;  %v1036_v16 = vld [vmem:[%s7129_s8 + $0xa8] sm:$0xff] }
 0x17c   : > { %2117 = vmatpush.msrb.mxu0 %v1036_v16 }
 0x17d   : > { %v1961_v21 = vadd.f32 %v1960_v17, %v1752_v18  ;;  %v1100_v17 = vld [vmem:[%s7129_s8 + $0x2a8] sm:$0xff]  ;;  %v909_v18 = vld [vmem:[%s7122_s19 + $0x4b0] sm:$0xff] }
 0x17e   : > { %2326 = vmatpush.msrb.mxu1 %v1100_v17 }
 0x17f   : > { %5446 = vst [vmem:[%s7296_s12 + $0x1e0] sm:$0xff] %v1961_v21  ;;  %1801 = vmatmul.f32.gmra.mxu2 %v889_v19  ;;  %v1336_v22 = vpop.f32.mrf.mxu0  ;;  %v910_v19 = vld [vmem:[%s7122_s19 + $0x4b8] sm:$0xff] }
 0x180   : > { %v1545_v23 = vpop.f32.mrf.mxu1  ;;  %2010 = vmatmul.f32.gmra.mxu3 %v890_v20 }
 0x181   : > { %v1546_v27 = vadd.f32 %v1545_v23, %v1336_v22  ;;  %v907_v23 = vld [vmem:[%s7122_s19 + $0x4a0] sm:$0xff] }
 0x182   : > { %v1754_v29 = vpop.f32.mrf.mxu2  ;;  %1383 = vmatmul.f32.gmra.mxu0 %v887_v24  ;;  %v908_v24 = vld [vmem:[%s7122_s19 + $0x4a8] sm:$0xff] }
 0x183   : > { %1592 = vmatmul.f32.gmra.mxu1 %v888_v25  ;;  %v1963_v30 = vpop.f32.mrf.mxu3  ;;  %v1755_v31 = vadd.f32 %v1754_v29, %v1546_v27  ;;  %v913_v29 = vld [vmem:[%s7122_s19 + $0x4d0] sm:$0xff] }
 0x185   : > { %v1964_v36 = vadd.f32 %v1963_v30, %v1755_v31  ;;  %v914_v30 = vld [vmem:[%s7122_s19 + $0x4d8] sm:$0xff] }
 0x187   : > { %5450 = vst [vmem:[%s7296_s12 + $0x200] sm:$0xff] %v1964_v36  ;;  %1804 = vmatmul.f32.gmra.mxu2 %v893_v34  ;;  %v1339_v37 = vpop.f32.mrf.mxu0  ;;  %v911_v34 = vld [vmem:[%s7122_s19 + $0x4c0] sm:$0xff] }
 0x188   : > { %v1548_v38 = vpop.f32.mrf.mxu1  ;;  %2013 = vmatmul.f32.gmra.mxu3 %v894_v35  ;;  %v912_v35 = vld [vmem:[%s7122_s19 + $0x4c8] sm:$0xff] }
 0x189   : > { %v1549_v41 = vadd.f32 %v1548_v38, %v1339_v37 }
 0x18a   : > { %v1757_v42 = vpop.f32.mrf.mxu2  ;;  %1386 = vmatmul.f32.gmra.mxu0 %v891_v39 }
 0x18b   : > { %1595 = vmatmul.f32.gmra.mxu1 %v892_v40  ;;  %v1966_v43 = vpop.f32.mrf.mxu3  ;;  %v1758_v44 = vadd.f32 %v1757_v42, %v1549_v41  ;;  %v917_v40 = vld [vmem:[%s7122_s19 + $0x4f0] sm:$0xff]  ;;  %v918_v41 = vld [vmem:[%s7122_s19 + $0x4f8] sm:$0xff] }
 0x18d   : > { %v1967_v47 = vadd.f32 %v1966_v43, %v1758_v44 }
 0x18f   : > { %5454 = vst [vmem:[%s7296_s12 + $0x220] sm:$0xff] %v1967_v47  ;;  %1807 = vmatmul.f32.gmra.mxu2 %v897_v45  ;;  %v1342_v48 = vpop.f32.mrf.mxu0  ;;  %v915_v45 = vld [vmem:[%s7122_s19 + $0x4e0] sm:$0xff] }
 0x190   : > { %v1551_v49 = vpop.f32.mrf.mxu1  ;;  %2016 = vmatmul.f32.gmra.mxu3 %v898_v46  ;;  %v916_v46 = vld [vmem:[%s7122_s19 + $0x4e8] sm:$0xff] }
 0x191   : > { %v1552_v52 = vadd.f32 %v1551_v49, %v1342_v48 }
 0x192   : > { %v1760_v53 = vpop.f32.mrf.mxu2  ;;  %1389 = vmatmul.f32.gmra.mxu0 %v895_v50 }
 0x193   : > { %1598 = vmatmul.f32.gmra.mxu1 %v896_v51  ;;  %v1969_v54 = vpop.f32.mrf.mxu3  ;;  %v1761_v55 = vadd.f32 %v1760_v53, %v1552_v52  ;;  %v921_v51 = vld [vmem:[%s7122_s19 + $0x510] sm:$0xff]  ;;  %v922_v52 = vld [vmem:[%s7122_s19 + $0x518] sm:$0xff] }
 0x195   : > { %v1970_v58 = vadd.f32 %v1969_v54, %v1761_v55 }
 0x197   : > { %5458 = vst [vmem:[%s7296_s12 + $0x240] sm:$0xff] %v1970_v58  ;;  %1810 = vmatmul.f32.gmra.mxu2 %v901_v56  ;;  %v1345_v59 = vpop.f32.mrf.mxu0  ;;  %v919_v56 = vld [vmem:[%s7122_s19 + $0x500] sm:$0xff]  ;;  %v1160_v58 = vld [vmem:[%s7129_s8 + $0x488] sm:$0xff] }
 0x198   : > { %v1554_v60 = vpop.f32.mrf.mxu1  ;;  %2019 = vmatmul.f32.gmra.mxu3 %v902_v57  ;;  %v920_v57 = vld [vmem:[%s7122_s19 + $0x508] sm:$0xff]  ;;  %2536 = vmatpush.msrb.mxu2 %v1160_v58 }
 0x199   : > { %v1555_v63 = vadd.f32 %v1554_v60, %v1345_v59  ;;  %v1224_v60 = vld [vmem:[%s7129_s8 + $0x688] sm:$0xff] }
 0x19a   : > { %v1763_v0 = vpop.f32.mrf.mxu2  ;;  %1392 = vmatmul.f32.gmra.mxu0 %v899_v61  ;;  %2745 = vmatpush.msrb.mxu3 %v1224_v60 }
 0x19b   : > { %1601 = vmatmul.f32.gmra.mxu1 %v900_v62  ;;  %v1972_v1 = vpop.f32.mrf.mxu3  ;;  %v1764_v2 = vadd.f32 %v1763_v0, %v1555_v63  ;;  %v1032_v0 = vld [vmem:[%s7129_s8 + $0x88] sm:$0xff] }
 0x19c   : > { %2118 = vmatpush.msrb.mxu0 %v1032_v0 }
 0x19d   : > { %v1973_v5 = vadd.f32 %v1972_v1, %v1764_v2  ;;  %v1096_v1 = vld [vmem:[%s7129_s8 + $0x288] sm:$0xff]  ;;  %v925_v2 = vld [vmem:[%s7122_s19 + $0x530] sm:$0xff] }
 0x19e   : > { %2327 = vmatpush.msrb.mxu1 %v1096_v1 }
 0x19f   : > { %5462 = vst [vmem:[%s7296_s12 + $0x260] sm:$0xff] %v1973_v5  ;;  %1813 = vmatmul.f32.gmra.mxu2 %v905_v3  ;;  %v1348_v6 = vpop.f32.mrf.mxu0  ;;  %v926_v3 = vld [vmem:[%s7122_s19 + $0x538] sm:$0xff] }
 0x1a0   : > { %v1557_v7 = vpop.f32.mrf.mxu1  ;;  %2022 = vmatmul.f32.gmra.mxu3 %v906_v4 }
 0x1a1   : > { %v1558_v11 = vadd.f32 %v1557_v7, %v1348_v6  ;;  %v923_v7 = vld [vmem:[%s7122_s19 + $0x520] sm:$0xff] }
 0x1a2   : > { %v1766_v13 = vpop.f32.mrf.mxu2  ;;  %1395 = vmatmul.f32.gmra.mxu0 %v903_v8  ;;  %v924_v8 = vld [vmem:[%s7122_s19 + $0x528] sm:$0xff] }
 0x1a3   : > { %1604 = vmatmul.f32.gmra.mxu1 %v904_v9  ;;  %v1975_v14 = vpop.f32.mrf.mxu3  ;;  %v1767_v15 = vadd.f32 %v1766_v13, %v1558_v11  ;;  %v929_v13 = vld [vmem:[%s7122_s19 + $0x550] sm:$0xff] }
 0x1a5   : > { %v1976_v20 = vadd.f32 %v1975_v14, %v1767_v15  ;;  %v930_v14 = vld [vmem:[%s7122_s19 + $0x558] sm:$0xff] }
 0x1a7   : > { %5466 = vst [vmem:[%s7296_s12 + $0x280] sm:$0xff] %v1976_v20  ;;  %1816 = vmatmul.f32.gmra.mxu2 %v909_v18  ;;  %v1351_v21 = vpop.f32.mrf.mxu0  ;;  %v927_v18 = vld [vmem:[%s7122_s19 + $0x540] sm:$0xff] }
 0x1a8   : > { %v1560_v22 = vpop.f32.mrf.mxu1  ;;  %2025 = vmatmul.f32.gmra.mxu3 %v910_v19  ;;  %v928_v19 = vld [vmem:[%s7122_s19 + $0x548] sm:$0xff] }
 0x1a9   : > { %v1561_v25 = vadd.f32 %v1560_v22, %v1351_v21 }
 0x1aa   : > { %v1769_v26 = vpop.f32.mrf.mxu2  ;;  %1398 = vmatmul.f32.gmra.mxu0 %v907_v23 }
 0x1ab   : > { %1607 = vmatmul.f32.gmra.mxu1 %v908_v24  ;;  %v1978_v27 = vpop.f32.mrf.mxu3  ;;  %v1770_v28 = vadd.f32 %v1769_v26, %v1561_v25  ;;  %v933_v24 = vld [vmem:[%s7122_s19 + $0x570] sm:$0xff]  ;;  %v934_v25 = vld [vmem:[%s7122_s19 + $0x578] sm:$0xff] }
 0x1ad   : > { %v1979_v31 = vadd.f32 %v1978_v27, %v1770_v28 }
 0x1af   : > { %5470 = vst [vmem:[%s7296_s12 + $0x2a0] sm:$0xff] %v1979_v31  ;;  %1819 = vmatmul.f32.gmra.mxu2 %v913_v29  ;;  %v1354_v32 = vpop.f32.mrf.mxu0  ;;  %v931_v29 = vld [vmem:[%s7122_s19 + $0x560] sm:$0xff] }
 0x1b0   : > { %v1563_v33 = vpop.f32.mrf.mxu1  ;;  %2028 = vmatmul.f32.gmra.mxu3 %v914_v30  ;;  %v932_v30 = vld [vmem:[%s7122_s19 + $0x568] sm:$0xff] }
 0x1b1   : > { %v1564_v36 = vadd.f32 %v1563_v33, %v1354_v32 }
 0x1b2   : > { %v1772_v37 = vpop.f32.mrf.mxu2  ;;  %1401 = vmatmul.f32.gmra.mxu0 %v911_v34 }
 0x1b3   : > { %1610 = vmatmul.f32.gmra.mxu1 %v912_v35  ;;  %v1981_v38 = vpop.f32.mrf.mxu3  ;;  %v1773_v39 = vadd.f32 %v1772_v37, %v1564_v36  ;;  %v937_v35 = vld [vmem:[%s7122_s19 + $0x590] sm:$0xff]  ;;  %v938_v36 = vld [vmem:[%s7122_s19 + $0x598] sm:$0xff] }
 0x1b5   : > { %v1982_v42 = vadd.f32 %v1981_v38, %v1773_v39 }
 0x1b7   : > { %5474 = vst [vmem:[%s7296_s12 + $0x2c0] sm:$0xff] %v1982_v42  ;;  %1822 = vmatmul.f32.gmra.mxu2 %v917_v40  ;;  %v1357_v43 = vpop.f32.mrf.mxu0  ;;  %v935_v40 = vld [vmem:[%s7122_s19 + $0x580] sm:$0xff]  ;;  %v1156_v42 = vld [vmem:[%s7129_s8 + $0x468] sm:$0xff] }
 0x1b8   : > { %v1566_v44 = vpop.f32.mrf.mxu1  ;;  %2031 = vmatmul.f32.gmra.mxu3 %v918_v41  ;;  %v936_v41 = vld [vmem:[%s7122_s19 + $0x588] sm:$0xff]  ;;  %2537 = vmatpush.msrb.mxu2 %v1156_v42 }
 0x1b9   : > { %v1567_v47 = vadd.f32 %v1566_v44, %v1357_v43  ;;  %v1220_v44 = vld [vmem:[%s7129_s8 + $0x668] sm:$0xff] }
 0x1ba   : > { %v1775_v48 = vpop.f32.mrf.mxu2  ;;  %1404 = vmatmul.f32.gmra.mxu0 %v915_v45  ;;  %2746 = vmatpush.msrb.mxu3 %v1220_v44 }
 0x1bb   : > { %1613 = vmatmul.f32.gmra.mxu1 %v916_v46  ;;  %v1984_v49 = vpop.f32.mrf.mxu3  ;;  %v1776_v50 = vadd.f32 %v1775_v48, %v1567_v47  ;;  %v1028_v48 = vld [vmem:[%s7129_s8 + $0x68] sm:$0xff] }
 0x1bc   : > { %2119 = vmatpush.msrb.mxu0 %v1028_v48 }
 0x1bd   : > { %v1985_v53 = vadd.f32 %v1984_v49, %v1776_v50  ;;  %v1092_v49 = vld [vmem:[%s7129_s8 + $0x268] sm:$0xff]  ;;  %v941_v50 = vld [vmem:[%s7122_s19 + $0x5b0] sm:$0xff] }
 0x1be   : > { %2328 = vmatpush.msrb.mxu1 %v1092_v49 }
 0x1bf   : > { %5478 = vst [vmem:[%s7296_s12 + $0x2e0] sm:$0xff] %v1985_v53  ;;  %1825 = vmatmul.f32.gmra.mxu2 %v921_v51  ;;  %v1360_v54 = vpop.f32.mrf.mxu0  ;;  %v942_v51 = vld [vmem:[%s7122_s19 + $0x5b8] sm:$0xff] }
 0x1c0   : > { %v1569_v55 = vpop.f32.mrf.mxu1  ;;  %2034 = vmatmul.f32.gmra.mxu3 %v922_v52 }
 0x1c1   : > { %v1570_v59 = vadd.f32 %v1569_v55, %v1360_v54  ;;  %v939_v55 = vld [vmem:[%s7122_s19 + $0x5a0] sm:$0xff] }
 0x1c2   : > { %v1778_v61 = vpop.f32.mrf.mxu2  ;;  %1407 = vmatmul.f32.gmra.mxu0 %v919_v56  ;;  %v940_v56 = vld [vmem:[%s7122_s19 + $0x5a8] sm:$0xff] }
 0x1c3   : > { %1616 = vmatmul.f32.gmra.mxu1 %v920_v57  ;;  %v1987_v62 = vpop.f32.mrf.mxu3  ;;  %v1779_v63 = vadd.f32 %v1778_v61, %v1570_v59  ;;  %v945_v61 = vld [vmem:[%s7122_s19 + $0x5d0] sm:$0xff] }
 0x1c5   : > { %v1988_v4 = vadd.f32 %v1987_v62, %v1779_v63  ;;  %v946_v62 = vld [vmem:[%s7122_s19 + $0x5d8] sm:$0xff] }
 0x1c7   : > { %5482 = vst [vmem:[%s7296_s12 + $0x300] sm:$0xff] %v1988_v4  ;;  %1828 = vmatmul.f32.gmra.mxu2 %v925_v2  ;;  %v1363_v5 = vpop.f32.mrf.mxu0  ;;  %v943_v2 = vld [vmem:[%s7122_s19 + $0x5c0] sm:$0xff] }
 0x1c8   : > { %v1572_v6 = vpop.f32.mrf.mxu1  ;;  %2037 = vmatmul.f32.gmra.mxu3 %v926_v3  ;;  %v944_v3 = vld [vmem:[%s7122_s19 + $0x5c8] sm:$0xff] }
 0x1c9   : > { %v1573_v9 = vadd.f32 %v1572_v6, %v1363_v5 }
 0x1ca   : > { %v1781_v10 = vpop.f32.mrf.mxu2  ;;  %1410 = vmatmul.f32.gmra.mxu0 %v923_v7 }
 0x1cb   : > { %1619 = vmatmul.f32.gmra.mxu1 %v924_v8  ;;  %v1990_v11 = vpop.f32.mrf.mxu3  ;;  %v1782_v12 = vadd.f32 %v1781_v10, %v1573_v9  ;;  %v949_v8 = vld [vmem:[%s7122_s19 + $0x5f0] sm:$0xff]  ;;  %v950_v9 = vld [vmem:[%s7122_s19 + $0x5f8] sm:$0xff] }
 0x1cd   : > { %v1991_v15 = vadd.f32 %v1990_v11, %v1782_v12 }
 0x1cf   : > { %5486 = vst [vmem:[%s7296_s12 + $0x320] sm:$0xff] %v1991_v15  ;;  %1831 = vmatmul.f32.gmra.mxu2 %v929_v13  ;;  %v1366_v16 = vpop.f32.mrf.mxu0  ;;  %v947_v13 = vld [vmem:[%s7122_s19 + $0x5e0] sm:$0xff] }
 0x1d0   : > { %v1575_v17 = vpop.f32.mrf.mxu1  ;;  %2040 = vmatmul.f32.gmra.mxu3 %v930_v14  ;;  %v948_v14 = vld [vmem:[%s7122_s19 + $0x5e8] sm:$0xff] }
 0x1d1   : > { %v1576_v20 = vadd.f32 %v1575_v17, %v1366_v16 }
 0x1d2   : > { %v1784_v21 = vpop.f32.mrf.mxu2  ;;  %1413 = vmatmul.f32.gmra.mxu0 %v927_v18 }
 0x1d3   : > { %1622 = vmatmul.f32.gmra.mxu1 %v928_v19  ;;  %v1993_v22 = vpop.f32.mrf.mxu3  ;;  %v1785_v23 = vadd.f32 %v1784_v21, %v1576_v20  ;;  %v953_v19 = vld [vmem:[%s7122_s19 + $0x610] sm:$0xff]  ;;  %v954_v20 = vld [vmem:[%s7122_s19 + $0x618] sm:$0xff] }
 0x1d5   : > { %v1994_v26 = vadd.f32 %v1993_v22, %v1785_v23 }
 0x1d7   : > { %5490 = vst [vmem:[%s7296_s12 + $0x340] sm:$0xff] %v1994_v26  ;;  %1834 = vmatmul.f32.gmra.mxu2 %v933_v24  ;;  %v1369_v27 = vpop.f32.mrf.mxu0  ;;  %v951_v24 = vld [vmem:[%s7122_s19 + $0x600] sm:$0xff]  ;;  %v1152_v26 = vld [vmem:[%s7129_s8 + $0x448] sm:$0xff] }
 0x1d8   : > { %v1578_v28 = vpop.f32.mrf.mxu1  ;;  %2043 = vmatmul.f32.gmra.mxu3 %v934_v25  ;;  %v952_v25 = vld [vmem:[%s7122_s19 + $0x608] sm:$0xff]  ;;  %2538 = vmatpush.msrb.mxu2 %v1152_v26 }
 0x1d9   : > { %v1579_v31 = vadd.f32 %v1578_v28, %v1369_v27  ;;  %v1216_v28 = vld [vmem:[%s7129_s8 + $0x648] sm:$0xff] }
 0x1da   : > { %v1787_v32 = vpop.f32.mrf.mxu2  ;;  %1416 = vmatmul.f32.gmra.mxu0 %v931_v29  ;;  %2747 = vmatpush.msrb.mxu3 %v1216_v28 }
 0x1db   : > { %1625 = vmatmul.f32.gmra.mxu1 %v932_v30  ;;  %v1996_v33 = vpop.f32.mrf.mxu3  ;;  %v1788_v34 = vadd.f32 %v1787_v32, %v1579_v31  ;;  %v1024_v32 = vld [vmem:[%s7129_s8 + $0x48] sm:$0xff] }
 0x1dc   : > { %2120 = vmatpush.msrb.mxu0 %v1024_v32 }
 0x1dd   : > { %v1997_v37 = vadd.f32 %v1996_v33, %v1788_v34  ;;  %v1088_v33 = vld [vmem:[%s7129_s8 + $0x248] sm:$0xff]  ;;  %v957_v34 = vld [vmem:[%s7122_s19 + $0x630] sm:$0xff] }
 0x1de   : > { %2329 = vmatpush.msrb.mxu1 %v1088_v33 }
 0x1df   : > { %5494 = vst [vmem:[%s7296_s12 + $0x360] sm:$0xff] %v1997_v37  ;;  %1837 = vmatmul.f32.gmra.mxu2 %v937_v35  ;;  %v1372_v38 = vpop.f32.mrf.mxu0  ;;  %v958_v35 = vld [vmem:[%s7122_s19 + $0x638] sm:$0xff] }
 0x1e0   : > { %v1581_v39 = vpop.f32.mrf.mxu1  ;;  %2046 = vmatmul.f32.gmra.mxu3 %v938_v36 }
 0x1e1   : > { %v1582_v43 = vadd.f32 %v1581_v39, %v1372_v38  ;;  %v955_v39 = vld [vmem:[%s7122_s19 + $0x620] sm:$0xff] }
 0x1e2   : > { %v1790_v45 = vpop.f32.mrf.mxu2  ;;  %1419 = vmatmul.f32.gmra.mxu0 %v935_v40  ;;  %v956_v40 = vld [vmem:[%s7122_s19 + $0x628] sm:$0xff] }
 0x1e3   : > { %1628 = vmatmul.f32.gmra.mxu1 %v936_v41  ;;  %v1999_v46 = vpop.f32.mrf.mxu3  ;;  %v1791_v47 = vadd.f32 %v1790_v45, %v1582_v43  ;;  %v961_v45 = vld [vmem:[%s7122_s19 + $0x650] sm:$0xff] }
 0x1e5   : > { %v2000_v52 = vadd.f32 %v1999_v46, %v1791_v47  ;;  %v962_v46 = vld [vmem:[%s7122_s19 + $0x658] sm:$0xff] }
 0x1e7   : > { %5498 = vst [vmem:[%s7296_s12 + $0x380] sm:$0xff] %v2000_v52  ;;  %1840 = vmatmul.f32.gmra.mxu2 %v941_v50  ;;  %v1375_v53 = vpop.f32.mrf.mxu0  ;;  %v959_v50 = vld [vmem:[%s7122_s19 + $0x640] sm:$0xff] }
 0x1e8   : > { %v1584_v54 = vpop.f32.mrf.mxu1  ;;  %2049 = vmatmul.f32.gmra.mxu3 %v942_v51  ;;  %v960_v51 = vld [vmem:[%s7122_s19 + $0x648] sm:$0xff] }
 0x1e9   : > { %v1585_v57 = vadd.f32 %v1584_v54, %v1375_v53 }
 0x1ea   : > { %v1793_v58 = vpop.f32.mrf.mxu2  ;;  %1422 = vmatmul.f32.gmra.mxu0 %v939_v55 }
 0x1eb   : > { %1631 = vmatmul.f32.gmra.mxu1 %v940_v56  ;;  %v2002_v59 = vpop.f32.mrf.mxu3  ;;  %v1794_v60 = vadd.f32 %v1793_v58, %v1585_v57  ;;  %v965_v56 = vld [vmem:[%s7122_s19 + $0x670] sm:$0xff]  ;;  %v966_v57 = vld [vmem:[%s7122_s19 + $0x678] sm:$0xff] }
 0x1ed   : > { %v2003_v63 = vadd.f32 %v2002_v59, %v1794_v60 }
 0x1ef   : > { %5502 = vst [vmem:[%s7296_s12 + $0x3a0] sm:$0xff] %v2003_v63  ;;  %1843 = vmatmul.f32.gmra.mxu2 %v945_v61  ;;  %v1378_v0 = vpop.f32.mrf.mxu0  ;;  %v963_v61 = vld [vmem:[%s7122_s19 + $0x660] sm:$0xff] }
 0x1f0   : > { %v1587_v1 = vpop.f32.mrf.mxu1  ;;  %2052 = vmatmul.f32.gmra.mxu3 %v946_v62  ;;  %v964_v62 = vld [vmem:[%s7122_s19 + $0x668] sm:$0xff] }
 0x1f1   : > { %v1588_v4 = vadd.f32 %v1587_v1, %v1378_v0 }
 0x1f2   : > { %v1796_v5 = vpop.f32.mrf.mxu2  ;;  %1425 = vmatmul.f32.gmra.mxu0 %v943_v2 }
 0x1f3   : > { %1634 = vmatmul.f32.gmra.mxu1 %v944_v3  ;;  %v2005_v6 = vpop.f32.mrf.mxu3  ;;  %v1797_v7 = vadd.f32 %v1796_v5, %v1588_v4  ;;  %v969_v3 = vld [vmem:[%s7122_s19 + $0x690] sm:$0xff]  ;;  %v970_v4 = vld [vmem:[%s7122_s19 + $0x698] sm:$0xff] }
 0x1f5   : > { %v2006_v10 = vadd.f32 %v2005_v6, %v1797_v7 }
 0x1f7   : > { %5506 = vst [vmem:[%s7296_s12 + $0x3c0] sm:$0xff] %v2006_v10  ;;  %1846 = vmatmul.f32.gmra.mxu2 %v949_v8  ;;  %v1381_v11 = vpop.f32.mrf.mxu0  ;;  %v967_v8 = vld [vmem:[%s7122_s19 + $0x680] sm:$0xff]  ;;  %v1148_v10 = vld [vmem:[%s7129_s8 + $0x428] sm:$0xff] }
 0x1f8   : > { %v1590_v12 = vpop.f32.mrf.mxu1  ;;  %2055 = vmatmul.f32.gmra.mxu3 %v950_v9  ;;  %v968_v9 = vld [vmem:[%s7122_s19 + $0x688] sm:$0xff]  ;;  %2539 = vmatpush.msrb.mxu2 %v1148_v10 }
 0x1f9   : > { %v1591_v15 = vadd.f32 %v1590_v12, %v1381_v11  ;;  %v1212_v12 = vld [vmem:[%s7129_s8 + $0x628] sm:$0xff] }
 0x1fa   : > { %v1799_v16 = vpop.f32.mrf.mxu2  ;;  %1428 = vmatmul.f32.gmra.mxu0 %v947_v13  ;;  %2748 = vmatpush.msrb.mxu3 %v1212_v12 }
 0x1fb   : > { %1637 = vmatmul.f32.gmra.mxu1 %v948_v14  ;;  %v2008_v17 = vpop.f32.mrf.mxu3  ;;  %v1800_v18 = vadd.f32 %v1799_v16, %v1591_v15  ;;  %v1020_v16 = vld [vmem:[%s7129_s8 + $0x28] sm:$0xff] }
 0x1fc   : > { %2121 = vmatpush.msrb.mxu0 %v1020_v16 }
 0x1fd   : > { %v2009_v21 = vadd.f32 %v2008_v17, %v1800_v18  ;;  %v1084_v17 = vld [vmem:[%s7129_s8 + $0x228] sm:$0xff]  ;;  %v973_v18 = vld [vmem:[%s7122_s19 + $0x6b0] sm:$0xff] }
 0x1fe   : > { %2330 = vmatpush.msrb.mxu1 %v1084_v17 }
 0x1ff   : > { %5510 = vst [vmem:[%s7296_s12 + $0x3e0] sm:$0xff] %v2009_v21  ;;  %1849 = vmatmul.f32.gmra.mxu2 %v953_v19  ;;  %v1384_v22 = vpop.f32.mrf.mxu0  ;;  %v974_v19 = vld [vmem:[%s7122_s19 + $0x6b8] sm:$0xff] }
 0x200   : > { %v1593_v23 = vpop.f32.mrf.mxu1  ;;  %2058 = vmatmul.f32.gmra.mxu3 %v954_v20 }
 0x201   : > { %v1594_v27 = vadd.f32 %v1593_v23, %v1384_v22  ;;  %v971_v23 = vld [vmem:[%s7122_s19 + $0x6a0] sm:$0xff] }
 0x202   : > { %v1802_v29 = vpop.f32.mrf.mxu2  ;;  %1431 = vmatmul.f32.gmra.mxu0 %v951_v24  ;;  %v972_v24 = vld [vmem:[%s7122_s19 + $0x6a8] sm:$0xff] }
 0x203   : > { %1640 = vmatmul.f32.gmra.mxu1 %v952_v25  ;;  %v2011_v30 = vpop.f32.mrf.mxu3  ;;  %v1803_v31 = vadd.f32 %v1802_v29, %v1594_v27  ;;  %v977_v29 = vld [vmem:[%s7122_s19 + $0x6d0] sm:$0xff] }
 0x205   : > { %v2012_v36 = vadd.f32 %v2011_v30, %v1803_v31  ;;  %v978_v30 = vld [vmem:[%s7122_s19 + $0x6d8] sm:$0xff] }
 0x207   : > { %5514 = vst [vmem:[%s7296_s12 + $0x400] sm:$0xff] %v2012_v36  ;;  %1852 = vmatmul.f32.gmra.mxu2 %v957_v34  ;;  %v1387_v37 = vpop.f32.mrf.mxu0  ;;  %v975_v34 = vld [vmem:[%s7122_s19 + $0x6c0] sm:$0xff] }
 0x208   : > { %v1596_v38 = vpop.f32.mrf.mxu1  ;;  %2061 = vmatmul.f32.gmra.mxu3 %v958_v35  ;;  %v976_v35 = vld [vmem:[%s7122_s19 + $0x6c8] sm:$0xff] }
 0x209   : > { %v1597_v41 = vadd.f32 %v1596_v38, %v1387_v37 }
 0x20a   : > { %v1805_v42 = vpop.f32.mrf.mxu2  ;;  %1434 = vmatmul.f32.gmra.mxu0 %v955_v39 }
 0x20b   : > { %1643 = vmatmul.f32.gmra.mxu1 %v956_v40  ;;  %v2014_v43 = vpop.f32.mrf.mxu3  ;;  %v1806_v44 = vadd.f32 %v1805_v42, %v1597_v41  ;;  %v981_v40 = vld [vmem:[%s7122_s19 + $0x6f0] sm:$0xff]  ;;  %v982_v41 = vld [vmem:[%s7122_s19 + $0x6f8] sm:$0xff] }
 0x20d   : > { %v2015_v47 = vadd.f32 %v2014_v43, %v1806_v44 }
 0x20f   : > { %5518 = vst [vmem:[%s7296_s12 + $0x420] sm:$0xff] %v2015_v47  ;;  %1855 = vmatmul.f32.gmra.mxu2 %v961_v45  ;;  %v1390_v48 = vpop.f32.mrf.mxu0  ;;  %v979_v45 = vld [vmem:[%s7122_s19 + $0x6e0] sm:$0xff] }
 0x210   : > { %v1599_v49 = vpop.f32.mrf.mxu1  ;;  %2064 = vmatmul.f32.gmra.mxu3 %v962_v46  ;;  %v980_v46 = vld [vmem:[%s7122_s19 + $0x6e8] sm:$0xff] }
 0x211   : > { %v1600_v52 = vadd.f32 %v1599_v49, %v1390_v48 }
 0x212   : > { %v1808_v53 = vpop.f32.mrf.mxu2  ;;  %1437 = vmatmul.f32.gmra.mxu0 %v959_v50 }
 0x213   : > { %1646 = vmatmul.f32.gmra.mxu1 %v960_v51  ;;  %v2017_v54 = vpop.f32.mrf.mxu3  ;;  %v1809_v55 = vadd.f32 %v1808_v53, %v1600_v52  ;;  %v985_v51 = vld [vmem:[%s7122_s19 + $0x710] sm:$0xff]  ;;  %v986_v52 = vld [vmem:[%s7122_s19 + $0x718] sm:$0xff] }
 0x215   : > { %v2018_v58 = vadd.f32 %v2017_v54, %v1809_v55 }
 0x217   : > { %5522 = vst [vmem:[%s7296_s12 + $0x440] sm:$0xff] %v2018_v58  ;;  %1858 = vmatmul.f32.gmra.mxu2 %v965_v56  ;;  %v1393_v59 = vpop.f32.mrf.mxu0  ;;  %v983_v56 = vld [vmem:[%s7122_s19 + $0x700] sm:$0xff]  ;;  %v1144_v58 = vld [vmem:[%s7129_s8 + $0x408] sm:$0xff] }
 0x218   : > { %v1602_v60 = vpop.f32.mrf.mxu1  ;;  %2067 = vmatmul.f32.gmra.mxu3 %v966_v57  ;;  %v984_v57 = vld [vmem:[%s7122_s19 + $0x708] sm:$0xff]  ;;  %2540 = vmatpush.msrb.mxu2 %v1144_v58 }
 0x219   : > { %v1603_v63 = vadd.f32 %v1602_v60, %v1393_v59  ;;  %v1208_v60 = vld [vmem:[%s7129_s8 + $0x608] sm:$0xff] }
 0x21a   : > { %v1811_v0 = vpop.f32.mrf.mxu2  ;;  %1440 = vmatmul.f32.gmra.mxu0 %v963_v61  ;;  %2749 = vmatpush.msrb.mxu3 %v1208_v60 }
 0x21b   : > { %1649 = vmatmul.f32.gmra.mxu1 %v964_v62  ;;  %v2020_v1 = vpop.f32.mrf.mxu3  ;;  %v1812_v2 = vadd.f32 %v1811_v0, %v1603_v63  ;;  %v1016_v0 = vld [vmem:[%s7129_s8 + $0x8] sm:$0xff] }
 0x21c   : > { %2122 = vmatpush.msrb.mxu0 %v1016_v0 }
 0x21d   : > { %v2021_v5 = vadd.f32 %v2020_v1, %v1812_v2  ;;  %v1080_v1 = vld [vmem:[%s7129_s8 + $0x208] sm:$0xff]  ;;  %v989_v2 = vld [vmem:[%s7122_s19 + $0x730] sm:$0xff] }
 0x21e   : > { %2331 = vmatpush.msrb.mxu1 %v1080_v1 }
 0x21f   : > { %5526 = vst [vmem:[%s7296_s12 + $0x460] sm:$0xff] %v2021_v5  ;;  %1861 = vmatmul.f32.gmra.mxu2 %v969_v3  ;;  %v1396_v6 = vpop.f32.mrf.mxu0  ;;  %v990_v3 = vld [vmem:[%s7122_s19 + $0x738] sm:$0xff] }
 0x220   : > { %v1605_v7 = vpop.f32.mrf.mxu1  ;;  %2070 = vmatmul.f32.gmra.mxu3 %v970_v4 }
 0x221   : > { %v1606_v11 = vadd.f32 %v1605_v7, %v1396_v6  ;;  %v987_v7 = vld [vmem:[%s7122_s19 + $0x720] sm:$0xff] }
 0x222   : > { %v1814_v13 = vpop.f32.mrf.mxu2  ;;  %1443 = vmatmul.f32.gmra.mxu0 %v967_v8  ;;  %v988_v8 = vld [vmem:[%s7122_s19 + $0x728] sm:$0xff] }
 0x223   : > { %1652 = vmatmul.f32.gmra.mxu1 %v968_v9  ;;  %v2023_v14 = vpop.f32.mrf.mxu3  ;;  %v1815_v15 = vadd.f32 %v1814_v13, %v1606_v11  ;;  %v993_v13 = vld [vmem:[%s7122_s19 + $0x750] sm:$0xff] }
 0x225   : > { %v2024_v20 = vadd.f32 %v2023_v14, %v1815_v15  ;;  %v994_v14 = vld [vmem:[%s7122_s19 + $0x758] sm:$0xff] }
 0x227   : > { %5530 = vst [vmem:[%s7296_s12 + $0x480] sm:$0xff] %v2024_v20  ;;  %1864 = vmatmul.f32.gmra.mxu2 %v973_v18  ;;  %v1399_v21 = vpop.f32.mrf.mxu0  ;;  %v991_v18 = vld [vmem:[%s7122_s19 + $0x740] sm:$0xff] }
 0x228   : > { %v1608_v22 = vpop.f32.mrf.mxu1  ;;  %2073 = vmatmul.f32.gmra.mxu3 %v974_v19  ;;  %v992_v19 = vld [vmem:[%s7122_s19 + $0x748] sm:$0xff] }
 0x229   : > { %v1609_v25 = vadd.f32 %v1608_v22, %v1399_v21 }
 0x22a   : > { %v1817_v26 = vpop.f32.mrf.mxu2  ;;  %1446 = vmatmul.f32.gmra.mxu0 %v971_v23 }
 0x22b   : > { %1655 = vmatmul.f32.gmra.mxu1 %v972_v24  ;;  %v2026_v27 = vpop.f32.mrf.mxu3  ;;  %v1818_v28 = vadd.f32 %v1817_v26, %v1609_v25  ;;  %v997_v24 = vld [vmem:[%s7122_s19 + $0x770] sm:$0xff]  ;;  %v998_v25 = vld [vmem:[%s7122_s19 + $0x778] sm:$0xff] }
 0x22d   : > { %v2027_v31 = vadd.f32 %v2026_v27, %v1818_v28 }
 0x22f   : > { %5534 = vst [vmem:[%s7296_s12 + $0x4a0] sm:$0xff] %v2027_v31  ;;  %1867 = vmatmul.f32.gmra.mxu2 %v977_v29  ;;  %v1402_v32 = vpop.f32.mrf.mxu0  ;;  %v995_v29 = vld [vmem:[%s7122_s19 + $0x760] sm:$0xff] }
 0x230   : > { %v1611_v33 = vpop.f32.mrf.mxu1  ;;  %2076 = vmatmul.f32.gmra.mxu3 %v978_v30  ;;  %v996_v30 = vld [vmem:[%s7122_s19 + $0x768] sm:$0xff] }
 0x231   : > { %v1612_v36 = vadd.f32 %v1611_v33, %v1402_v32 }
 0x232   : > { %v1820_v37 = vpop.f32.mrf.mxu2  ;;  %1449 = vmatmul.f32.gmra.mxu0 %v975_v34 }
 0x233   : > { %1658 = vmatmul.f32.gmra.mxu1 %v976_v35  ;;  %v2029_v38 = vpop.f32.mrf.mxu3  ;;  %v1821_v39 = vadd.f32 %v1820_v37, %v1612_v36  ;;  %v1001_v35 = vld [vmem:[%s7122_s19 + $0x790] sm:$0xff]  ;;  %v1002_v36 = vld [vmem:[%s7122_s19 + $0x798] sm:$0xff] }
 0x235   : > { %v2030_v42 = vadd.f32 %v2029_v38, %v1821_v39 }
 0x237   : > { %5538 = vst [vmem:[%s7296_s12 + $0x4c0] sm:$0xff] %v2030_v42  ;;  %1870 = vmatmul.f32.gmra.mxu2 %v981_v40  ;;  %v1405_v43 = vpop.f32.mrf.mxu0  ;;  %v999_v40 = vld [vmem:[%s7122_s19 + $0x780] sm:$0xff]  ;;  %v1205_v42 = vld [vmem:[%s7129_s8 + $0x5f0] sm:$0xff] }
 0x238   : > { %v1614_v44 = vpop.f32.mrf.mxu1  ;;  %2079 = vmatmul.f32.gmra.mxu3 %v982_v41  ;;  %v1000_v41 = vld [vmem:[%s7122_s19 + $0x788] sm:$0xff]  ;;  %3361 = vmatpush.msra.mxu2 %v1205_v42 }
 0x239   : > { %v1615_v47 = vadd.f32 %v1614_v44, %v1405_v43  ;;  %v1269_v44 = vld [vmem:[%s7129_s8 + $0x7f0] sm:$0xff]  ;;  %v5950_v42 = vld [vmem:[%s7122_s19 + $0x28] sm:$0xff] }
 0x23a   : > { %v1823_v48 = vpop.f32.mrf.mxu2  ;;  %1452 = vmatmul.f32.gmra.mxu0 %v979_v45  ;;  %3570 = vmatpush.msra.mxu3 %v1269_v44 }
 0x23b   : > { %1661 = vmatmul.f32.gmra.mxu1 %v980_v46  ;;  %v2032_v49 = vpop.f32.mrf.mxu3  ;;  %v1824_v50 = vadd.f32 %v1823_v48, %v1615_v47  ;;  %v1077_v48 = vld [vmem:[%s7129_s8 + $0x1f0] sm:$0xff] }
 0x23c   : > { %2943 = vmatpush.msra.mxu0 %v1077_v48 }
 0x23d   : > { %v2033_v53 = vadd.f32 %v2032_v49, %v1824_v50  ;;  %v1141_v49 = vld [vmem:[%s7129_s8 + $0x3f0] sm:$0xff] }
 0x23e   : > { %v1005_v50 = vld [vmem:[%s7122_s19 + $0x7b0] sm:$0xff]  ;;  %3152 = vmatpush.msra.mxu1 %v1141_v49  ;;  %v5952_v49 = vld [vmem:[%s7122_s19 + $0x58] sm:$0xff] }
 0x23f   : > { %5542 = vst [vmem:[%s7296_s12 + $0x4e0] sm:$0xff] %v2033_v53  ;;  %1873 = vmatmul.f32.gmra.mxu2 %v985_v51  ;;  %v1408_v54 = vpop.f32.mrf.mxu0  ;;  %v1006_v51 = vld [vmem:[%s7122_s19 + $0x7b8] sm:$0xff] }
 0x240   : > { %v1617_v55 = vpop.f32.mrf.mxu1  ;;  %2082 = vmatmul.f32.gmra.mxu3 %v986_v52 }
 0x241   : > { %v1618_v59 = vadd.f32 %v1617_v55, %v1408_v54  ;;  %v1003_v55 = vld [vmem:[%s7122_s19 + $0x7a0] sm:$0xff] }
 0x242   : > { %v1826_v61 = vpop.f32.mrf.mxu2  ;;  %1455 = vmatmul.f32.gmra.mxu0 %v983_v56  ;;  %v1004_v56 = vld [vmem:[%s7122_s19 + $0x7a8] sm:$0xff] }
 0x243   : > { %1664 = vmatmul.f32.gmra.mxu1 %v984_v57  ;;  %v2035_v62 = vpop.f32.mrf.mxu3  ;;  %v1827_v63 = vadd.f32 %v1826_v61, %v1618_v59  ;;  %v1009_v61 = vld [vmem:[%s7122_s19 + $0x7d0] sm:$0xff] }
 0x245   : > { %v2036_v4 = vadd.f32 %v2035_v62, %v1827_v63  ;;  %v1010_v62 = vld [vmem:[%s7122_s19 + $0x7d8] sm:$0xff] }
 0x247   : > { %5546 = vst [vmem:[%s7296_s12 + $0x500] sm:$0xff] %v2036_v4  ;;  %1876 = vmatmul.f32.gmra.mxu2 %v989_v2  ;;  %v1411_v5 = vpop.f32.mrf.mxu0  ;;  %v1007_v2 = vld [vmem:[%s7122_s19 + $0x7c0] sm:$0xff] }
 0x248   : > { %v1620_v6 = vpop.f32.mrf.mxu1  ;;  %2085 = vmatmul.f32.gmra.mxu3 %v990_v3  ;;  %v1008_v3 = vld [vmem:[%s7122_s19 + $0x7c8] sm:$0xff] }
 0x249   : > { %v1621_v9 = vadd.f32 %v1620_v6, %v1411_v5 }
 0x24a   : > { %v1829_v10 = vpop.f32.mrf.mxu2  ;;  %1458 = vmatmul.f32.gmra.mxu0 %v987_v7 }
 0x24b   : > { %1667 = vmatmul.f32.gmra.mxu1 %v988_v8  ;;  %v2038_v11 = vpop.f32.mrf.mxu3  ;;  %v1830_v12 = vadd.f32 %v1829_v10, %v1621_v9  ;;  %v1013_v8 = vld [vmem:[%s7122_s19 + $0x7f0] sm:$0xff]  ;;  %v1014_v9 = vld [vmem:[%s7122_s19 + $0x7f8] sm:$0xff] }
 0x24d   : > { %v2039_v15 = vadd.f32 %v2038_v11, %v1830_v12 }
 0x24f   : > { %5550 = vst [vmem:[%s7296_s12 + $0x520] sm:$0xff] %v2039_v15  ;;  %1879 = vmatmul.f32.gmra.mxu2 %v993_v13  ;;  %v1414_v16 = vpop.f32.mrf.mxu0  ;;  %v1011_v13 = vld [vmem:[%s7122_s19 + $0x7e0] sm:$0xff] }
 0x250   : > { %v1623_v17 = vpop.f32.mrf.mxu1  ;;  %2088 = vmatmul.f32.gmra.mxu3 %v994_v14  ;;  %v1012_v14 = vld [vmem:[%s7122_s19 + $0x7e8] sm:$0xff] }
 0x251   : > { %v1624_v20 = vadd.f32 %v1623_v17, %v1414_v16 }
 0x252   : > { %v1832_v21 = vpop.f32.mrf.mxu2  ;;  %1461 = vmatmul.f32.gmra.mxu0 %v991_v18 }
 0x253   : > { %1670 = vmatmul.f32.gmra.mxu1 %v992_v19  ;;  %v2041_v22 = vpop.f32.mrf.mxu3  ;;  %v1833_v23 = vadd.f32 %v1832_v21, %v1624_v20  ;;  %v5943_v20 = vld [vmem:[%s7122_s19 + $0x10] sm:$0xff] }
 0x255   : > { %v2042_v26 = vadd.f32 %v2041_v22, %v1833_v23  ;;  %v5944_v23 = vld [vmem:[%s7122_s19 + $0x18] sm:$0xff] }
 0x257   : > { %5554 = vst [vmem:[%s7296_s12 + $0x540] sm:$0xff] %v2042_v26  ;;  %1882 = vmatmul.f32.gmra.mxu2 %v997_v24  ;;  %v1417_v27 = vpop.f32.mrf.mxu0  ;;  %v1201_v24 = vld [vmem:[%s7129_s8 + $0x5d0] sm:$0xff] }
 0x258   : > { %v1626_v28 = vpop.f32.mrf.mxu1  ;;  %2091 = vmatmul.f32.gmra.mxu3 %v998_v25  ;;  %3362 = vmatpush.msra.mxu2 %v1201_v24  ;;  %v1265_v26 = vld [vmem:[%s7129_s8 + $0x7d0] sm:$0xff] }
 0x259   : > { %v1627_v31 = vadd.f32 %v1626_v28, %v1417_v27  ;;  %3571 = vmatpush.msra.mxu3 %v1265_v26  ;;  %v5945_v28 = vld [vmem:[%s7122_s19] sm:$0xff]  ;;  %v5966_v26 = vld [vmem:[%s7122_s19 + $0xa8] sm:$0xff] }
 0x25a   : > { %v1835_v32 = vpop.f32.mrf.mxu2  ;;  %1464 = vmatmul.f32.gmra.mxu0 %v995_v29  ;;  %v5946_v29 = vld [vmem:[%s7122_s19 + $0x8] sm:$0xff] }
 0x25b   : > { %1673 = vmatmul.f32.gmra.mxu1 %v996_v30  ;;  %v2044_v33 = vpop.f32.mrf.mxu3  ;;  %v1836_v34 = vadd.f32 %v1835_v32, %v1627_v31  ;;  %v1073_v32 = vld [vmem:[%s7129_s8 + $0x1d0] sm:$0xff] }
 0x25c   : > { %2944 = vmatpush.msra.mxu0 %v1073_v32 }
 0x25d   : > { %v2045_v37 = vadd.f32 %v2044_v33, %v1836_v34  ;;  %v1137_v33 = vld [vmem:[%s7129_s8 + $0x3d0] sm:$0xff] }
 0x25e   : > { %3153 = vmatpush.msra.mxu1 %v1137_v33  ;;  %v5968_v33 = vld [vmem:[%s7122_s19 + $0xd8] sm:$0xff] }
 0x25f   : > { %5558 = vst [vmem:[%s7296_s12 + $0x560] sm:$0xff] %v2045_v37  ;;  %1885 = vmatmul.f32.gmra.mxu2 %v1001_v35  ;;  %v1420_v38 = vpop.f32.mrf.mxu0  ;;  %v5947_v35 = vld [vmem:[%s7122_s19 + $0x30] sm:$0xff] }
 0x260   : > { %v1629_v39 = vpop.f32.mrf.mxu1  ;;  %2094 = vmatmul.f32.gmra.mxu3 %v1002_v36 }
 0x261   : > { %v1630_v43 = vadd.f32 %v1629_v39, %v1420_v38  ;;  %v5948_v38 = vld [vmem:[%s7122_s19 + $0x38] sm:$0xff] }
 0x262   : > { %v1838_v45 = vpop.f32.mrf.mxu2  ;;  %1467 = vmatmul.f32.gmra.mxu0 %v999_v40 }
 0x263   : > { %1676 = vmatmul.f32.gmra.mxu1 %v1000_v41  ;;  %v2047_v46 = vpop.f32.mrf.mxu3  ;;  %v1839_v47 = vadd.f32 %v1838_v45, %v1630_v43  ;;  %v5949_v41 = vld [vmem:[%s7122_s19 + $0x20] sm:$0xff] }
 0x265   : > { %v2048_v52 = vadd.f32 %v2047_v46, %v1839_v47  ;;  %v5951_v46 = vld [vmem:[%s7122_s19 + $0x50] sm:$0xff] }
 0x267   : > { %5562 = vst [vmem:[%s7296_s12 + $0x580] sm:$0xff] %v2048_v52  ;;  %1888 = vmatmul.f32.gmra.mxu2 %v1005_v50  ;;  %v1423_v53 = vpop.f32.mrf.mxu0  ;;  %v5953_v52 = vld [vmem:[%s7122_s19 + $0x40] sm:$0xff] }
 0x268   : > { %v1632_v54 = vpop.f32.mrf.mxu1  ;;  %2097 = vmatmul.f32.gmra.mxu3 %v1006_v51 }
 0x269   : > { %v1633_v57 = vadd.f32 %v1632_v54, %v1423_v53  ;;  %v5954_v53 = vld [vmem:[%s7122_s19 + $0x48] sm:$0xff] }
 0x26a   : > { %v1841_v58 = vpop.f32.mrf.mxu2  ;;  %1470 = vmatmul.f32.gmra.mxu0 %v1003_v55 }
 0x26b   : > { %1679 = vmatmul.f32.gmra.mxu1 %v1004_v56  ;;  %v2050_v59 = vpop.f32.mrf.mxu3  ;;  %v1842_v60 = vadd.f32 %v1841_v58, %v1633_v57  ;;  %v5955_v57 = vld [vmem:[%s7122_s19 + $0x70] sm:$0xff] }
 0x26d   : > { %v2051_v63 = vadd.f32 %v2050_v59, %v1842_v60  ;;  %v5956_v60 = vld [vmem:[%s7122_s19 + $0x78] sm:$0xff] }
 0x26f   : > { %5566 = vst [vmem:[%s7296_s12 + $0x5a0] sm:$0xff] %v2051_v63  ;;  %1891 = vmatmul.f32.gmra.mxu2 %v1009_v61  ;;  %v1426_v0 = vpop.f32.mrf.mxu0  ;;  %v5957_v63 = vld [vmem:[%s7122_s19 + $0x60] sm:$0xff] }
 0x270   : > { %v1635_v1 = vpop.f32.mrf.mxu1  ;;  %2100 = vmatmul.f32.gmra.mxu3 %v1010_v62 }
 0x271   : > { %v1636_v4 = vadd.f32 %v1635_v1, %v1426_v0  ;;  %v5958_v0 = vld [vmem:[%s7122_s19 + $0x68] sm:$0xff] }
 0x272   : > { %v1844_v5 = vpop.f32.mrf.mxu2  ;;  %1473 = vmatmul.f32.gmra.mxu0 %v1007_v2 }
 0x273   : > { %1682 = vmatmul.f32.gmra.mxu1 %v1008_v3  ;;  %v2053_v6 = vpop.f32.mrf.mxu3  ;;  %v1845_v7 = vadd.f32 %v1844_v5, %v1636_v4  ;;  %v5959_v4 = vld [vmem:[%s7122_s19 + $0x90] sm:$0xff] }
 0x275   : > { %v2054_v10 = vadd.f32 %v2053_v6, %v1845_v7  ;;  %v5960_v7 = vld [vmem:[%s7122_s19 + $0x98] sm:$0xff] }
 0x277   : > { %5570 = vst [vmem:[%s7296_s12 + $0x5c0] sm:$0xff] %v2054_v10  ;;  %1894 = vmatmul.f32.gmra.mxu2 %v1013_v8  ;;  %v1429_v11 = vpop.f32.mrf.mxu0  ;;  %v1197_v8 = vld [vmem:[%s7129_s8 + $0x5b0] sm:$0xff] }
 0x278   : > { %v1638_v12 = vpop.f32.mrf.mxu1  ;;  %2103 = vmatmul.f32.gmra.mxu3 %v1014_v9  ;;  %3363 = vmatpush.msra.mxu2 %v1197_v8  ;;  %v1261_v10 = vld [vmem:[%s7129_s8 + $0x7b0] sm:$0xff] }
 0x279   : > { %v1639_v15 = vadd.f32 %v1638_v12, %v1429_v11  ;;  %3572 = vmatpush.msra.mxu3 %v1261_v10  ;;  %v5961_v12 = vld [vmem:[%s7122_s19 + $0x80] sm:$0xff]  ;;  %v5982_v10 = vld [vmem:[%s7122_s19 + $0x128] sm:$0xff] }
 0x27a   : > { %v1847_v16 = vpop.f32.mrf.mxu2  ;;  %1476 = vmatmul.f32.gmra.mxu0 %v1011_v13  ;;  %v5962_v13 = vld [vmem:[%s7122_s19 + $0x88] sm:$0xff] }
 0x27b   : > { %1685 = vmatmul.f32.gmra.mxu1 %v1012_v14  ;;  %v2056_v17 = vpop.f32.mrf.mxu3  ;;  %v1848_v18 = vadd.f32 %v1847_v16, %v1639_v15  ;;  %v1069_v16 = vld [vmem:[%s7129_s8 + $0x1b0] sm:$0xff] }
 0x27c   : > { %2945 = vmatpush.msra.mxu0 %v1069_v16 }
 0x27d   : > { %v2057_v19 = vadd.f32 %v2056_v17, %v1848_v18  ;;  %v1133_v17 = vld [vmem:[%s7129_s8 + $0x3b0] sm:$0xff] }
 0x27e   : > { %3154 = vmatpush.msra.mxu1 %v1133_v17  ;;  %v5984_v17 = vld [vmem:[%s7122_s19 + $0x158] sm:$0xff] }
 0x27f   : > { %5574 = vst [vmem:[%s7296_s12 + $0x5e0] sm:$0xff] %v2057_v19  ;;  %2541 = vmatmul.f32.vlgmr.msrb.gmra.mxu2 %v5943_v20  ;;  %v1432_v21 = vpop.f32.mrf.mxu0  ;;  %v5963_v19 = vld [vmem:[%s7122_s19 + $0xb0] sm:$0xff] }
 0x280   : > { %v1641_v22 = vpop.f32.mrf.mxu1  ;;  %2750 = vmatmul.f32.vlgmr.msrb.gmra.mxu3 %v5944_v23 }
 0x281   : > { %v1642_v25 = vadd.f32 %v1641_v22, %v1432_v21  ;;  %v5964_v22 = vld [vmem:[%s7122_s19 + $0xb8] sm:$0xff] }
 0x282   : > { %v1850_v27 = vpop.f32.mrf.mxu2  ;;  %2123 = vmatmul.f32.vlgmr.msrb.gmra.mxu0 %v5945_v28 }
 0x283   : > { %2332 = vmatmul.f32.vlgmr.msrb.gmra.mxu1 %v5946_v29  ;;  %v2059_v30 = vpop.f32.mrf.mxu3  ;;  %v1851_v31 = vadd.f32 %v1850_v27, %v1642_v25  ;;  %v5965_v25 = vld [vmem:[%s7122_s19 + $0xa0] sm:$0xff] }
 0x285   : > { %v2060_v34 = vadd.f32 %v2059_v30, %v1851_v31  ;;  %v5967_v30 = vld [vmem:[%s7122_s19 + $0xd0] sm:$0xff] }
 0x287   : > { %5578 = vst [vmem:[%s7296_s12 + $0x600] sm:$0xff] %v2060_v34  ;;  %2544 = vmatmul.f32.gmra.mxu2 %v5947_v35  ;;  %v1435_v36 = vpop.f32.mrf.mxu0 }
 0x288   : > { %v1644_v37 = vpop.f32.mrf.mxu1  ;;  %2753 = vmatmul.f32.gmra.mxu3 %v5948_v38 }
 0x289   : > { %v1645_v39 = vadd.f32 %v1644_v37, %v1435_v36  ;;  %v5969_v36 = vld [vmem:[%s7122_s19 + $0xc0] sm:$0xff]  ;;  %v5970_v37 = vld [vmem:[%s7122_s19 + $0xc8] sm:$0xff] }
 0x28a   : > { %v1853_v40 = vpop.f32.mrf.mxu2  ;;  %2126 = vmatmul.f32.gmra.mxu0 %v5949_v41  ;;  %v5971_v41 = vld [vmem:[%s7122_s19 + $0xf0] sm:$0xff] }
 0x28b   : > { %2335 = vmatmul.f32.gmra.mxu1 %v5950_v42  ;;  %v2062_v43 = vpop.f32.mrf.mxu3  ;;  %v1854_v44 = vadd.f32 %v1853_v40, %v1645_v39 }
 0x28d   : > { %v2063_v45 = vadd.f32 %v2062_v43, %v1854_v44  ;;  %v5972_v44 = vld [vmem:[%s7122_s19 + $0xf8] sm:$0xff] }
 0x28f   : > { %5582 = vst [vmem:[%s7296_s12 + $0x620] sm:$0xff] %v2063_v45  ;;  %2547 = vmatmul.f32.gmra.mxu2 %v5951_v46  ;;  %v1438_v47 = vpop.f32.mrf.mxu0 }
 0x290   : > { %v1647_v48 = vpop.f32.mrf.mxu1  ;;  %2756 = vmatmul.f32.gmra.mxu3 %v5952_v49 }
 0x291   : > { %v1648_v50 = vadd.f32 %v1647_v48, %v1438_v47  ;;  %v5973_v47 = vld [vmem:[%s7122_s19 + $0xe0] sm:$0xff]  ;;  %v5974_v48 = vld [vmem:[%s7122_s19 + $0xe8] sm:$0xff] }
 0x292   : > { %v1856_v51 = vpop.f32.mrf.mxu2  ;;  %2129 = vmatmul.f32.gmra.mxu0 %v5953_v52  ;;  %v5975_v52 = vld [vmem:[%s7122_s19 + $0x110] sm:$0xff] }
 0x293   : > { %2338 = vmatmul.f32.gmra.mxu1 %v5954_v53  ;;  %v2065_v54 = vpop.f32.mrf.mxu3  ;;  %v1857_v55 = vadd.f32 %v1856_v51, %v1648_v50 }
 0x295   : > { %v2066_v56 = vadd.f32 %v2065_v54, %v1857_v55  ;;  %v5976_v55 = vld [vmem:[%s7122_s19 + $0x118] sm:$0xff] }
 0x297   : > { %5586 = vst [vmem:[%s7296_s12 + $0x640] sm:$0xff] %v2066_v56  ;;  %2550 = vmatmul.f32.gmra.mxu2 %v5955_v57  ;;  %v1441_v58 = vpop.f32.mrf.mxu0  ;;  %v1193_v56 = vld [vmem:[%s7129_s8 + $0x590] sm:$0xff] }
 0x298   : > { %v1650_v59 = vpop.f32.mrf.mxu1  ;;  %2759 = vmatmul.f32.gmra.mxu3 %v5956_v60  ;;  %3364 = vmatpush.msra.mxu2 %v1193_v56  ;;  %v5977_v60 = vld [vmem:[%s7122_s19 + $0x100] sm:$0xff] }
 0x299   : > { %v1651_v61 = vadd.f32 %v1650_v59, %v1441_v58  ;;  %v1257_v58 = vld [vmem:[%s7129_s8 + $0x790] sm:$0xff] }
 0x29a   : > { %v1859_v62 = vpop.f32.mrf.mxu2  ;;  %2132 = vmatmul.f32.gmra.mxu0 %v5957_v63  ;;  %3573 = vmatpush.msra.mxu3 %v1257_v58  ;;  %v5998_v58 = vld [vmem:[%s7122_s19 + $0x1a8] sm:$0xff] }
 0x29b   : > { %2341 = vmatmul.f32.gmra.mxu1 %v5958_v0  ;;  %v2068_v1 = vpop.f32.mrf.mxu3  ;;  %v1860_v2 = vadd.f32 %v1859_v62, %v1651_v61  ;;  %v5978_v61 = vld [vmem:[%s7122_s19 + $0x108] sm:$0xff]  ;;  %v1065_v0 = vld [vmem:[%s7129_s8 + $0x190] sm:$0xff] }
 0x29c   : > { %2946 = vmatpush.msra.mxu0 %v1065_v0 }
 0x29d   : > { %v2069_v3 = vadd.f32 %v2068_v1, %v1860_v2  ;;  %v1129_v1 = vld [vmem:[%s7129_s8 + $0x390] sm:$0xff] }
 0x29e   : > { %3155 = vmatpush.msra.mxu1 %v1129_v1  ;;  %v6000_v1 = vld [vmem:[%s7122_s19 + $0x1d8] sm:$0xff] }
 0x29f   : > { %5590 = vst [vmem:[%s7296_s12 + $0x660] sm:$0xff] %v2069_v3  ;;  %2553 = vmatmul.f32.gmra.mxu2 %v5959_v4  ;;  %v1444_v5 = vpop.f32.mrf.mxu0  ;;  %v5979_v3 = vld [vmem:[%s7122_s19 + $0x130] sm:$0xff] }
 0x2a0   : > { %v1653_v6 = vpop.f32.mrf.mxu1  ;;  %2762 = vmatmul.f32.gmra.mxu3 %v5960_v7 }
 0x2a1   : > { %v1654_v9 = vadd.f32 %v1653_v6, %v1444_v5  ;;  %v5980_v6 = vld [vmem:[%s7122_s19 + $0x138] sm:$0xff] }
 0x2a2   : > { %v1862_v11 = vpop.f32.mrf.mxu2  ;;  %2135 = vmatmul.f32.gmra.mxu0 %v5961_v12 }
 0x2a3   : > { %2344 = vmatmul.f32.gmra.mxu1 %v5962_v13  ;;  %v2071_v14 = vpop.f32.mrf.mxu3  ;;  %v1863_v15 = vadd.f32 %v1862_v11, %v1654_v9  ;;  %v5981_v9 = vld [vmem:[%s7122_s19 + $0x120] sm:$0xff] }
 0x2a5   : > { %v2072_v18 = vadd.f32 %v2071_v14, %v1863_v15  ;;  %v5983_v14 = vld [vmem:[%s7122_s19 + $0x150] sm:$0xff] }
 0x2a7   : > { %5594 = vst [vmem:[%s7296_s12 + $0x680] sm:$0xff] %v2072_v18  ;;  %2556 = vmatmul.f32.gmra.mxu2 %v5963_v19  ;;  %v1447_v20 = vpop.f32.mrf.mxu0 }
 0x2a8   : > { %v1656_v21 = vpop.f32.mrf.mxu1  ;;  %2765 = vmatmul.f32.gmra.mxu3 %v5964_v22 }
 0x2a9   : > { %v1657_v23 = vadd.f32 %v1656_v21, %v1447_v20  ;;  %v5985_v20 = vld [vmem:[%s7122_s19 + $0x140] sm:$0xff]  ;;  %v5986_v21 = vld [vmem:[%s7122_s19 + $0x148] sm:$0xff] }
 0x2aa   : > { %v1865_v24 = vpop.f32.mrf.mxu2  ;;  %2138 = vmatmul.f32.gmra.mxu0 %v5965_v25  ;;  %v5987_v25 = vld [vmem:[%s7122_s19 + $0x170] sm:$0xff] }
 0x2ab   : > { %2347 = vmatmul.f32.gmra.mxu1 %v5966_v26  ;;  %v2074_v27 = vpop.f32.mrf.mxu3  ;;  %v1866_v28 = vadd.f32 %v1865_v24, %v1657_v23 }
 0x2ad   : > { %v2075_v29 = vadd.f32 %v2074_v27, %v1866_v28  ;;  %v5988_v28 = vld [vmem:[%s7122_s19 + $0x178] sm:$0xff] }
 0x2af   : > { %5598 = vst [vmem:[%s7296_s12 + $0x6a0] sm:$0xff] %v2075_v29  ;;  %2559 = vmatmul.f32.gmra.mxu2 %v5967_v30  ;;  %v1450_v31 = vpop.f32.mrf.mxu0 }
 0x2b0   : > { %v1659_v32 = vpop.f32.mrf.mxu1  ;;  %2768 = vmatmul.f32.gmra.mxu3 %v5968_v33 }
 0x2b1   : > { %v1660_v34 = vadd.f32 %v1659_v32, %v1450_v31  ;;  %v5989_v31 = vld [vmem:[%s7122_s19 + $0x160] sm:$0xff]  ;;  %v5990_v32 = vld [vmem:[%s7122_s19 + $0x168] sm:$0xff] }
 0x2b2   : > { %v1868_v35 = vpop.f32.mrf.mxu2  ;;  %2141 = vmatmul.f32.gmra.mxu0 %v5969_v36  ;;  %v5991_v36 = vld [vmem:[%s7122_s19 + $0x190] sm:$0xff] }
 0x2b3   : > { %2350 = vmatmul.f32.gmra.mxu1 %v5970_v37  ;;  %v2077_v38 = vpop.f32.mrf.mxu3  ;;  %v1869_v39 = vadd.f32 %v1868_v35, %v1660_v34 }
 0x2b5   : > { %v2078_v40 = vadd.f32 %v2077_v38, %v1869_v39  ;;  %v5992_v39 = vld [vmem:[%s7122_s19 + $0x198] sm:$0xff] }
 0x2b7   : > { %5602 = vst [vmem:[%s7296_s12 + $0x6c0] sm:$0xff] %v2078_v40  ;;  %2562 = vmatmul.f32.gmra.mxu2 %v5971_v41  ;;  %v1453_v42 = vpop.f32.mrf.mxu0  ;;  %v1189_v40 = vld [vmem:[%s7129_s8 + $0x570] sm:$0xff] }
 0x2b8   : > { %v1662_v43 = vpop.f32.mrf.mxu1  ;;  %2771 = vmatmul.f32.gmra.mxu3 %v5972_v44  ;;  %3365 = vmatpush.msra.mxu2 %v1189_v40  ;;  %v5993_v44 = vld [vmem:[%s7122_s19 + $0x180] sm:$0xff] }
 0x2b9   : > { %v1663_v45 = vadd.f32 %v1662_v43, %v1453_v42  ;;  %v1253_v42 = vld [vmem:[%s7129_s8 + $0x770] sm:$0xff] }
 0x2ba   : > { %v1871_v46 = vpop.f32.mrf.mxu2  ;;  %2144 = vmatmul.f32.gmra.mxu0 %v5973_v47  ;;  %3574 = vmatpush.msra.mxu3 %v1253_v42  ;;  %v6014_v42 = vld [vmem:[%s7122_s19 + $0x228] sm:$0xff] }
 0x2bb   : > { %2353 = vmatmul.f32.gmra.mxu1 %v5974_v48  ;;  %v2080_v49 = vpop.f32.mrf.mxu3  ;;  %v1872_v50 = vadd.f32 %v1871_v46, %v1663_v45  ;;  %v5994_v45 = vld [vmem:[%s7122_s19 + $0x188] sm:$0xff]  ;;  %v1061_v48 = vld [vmem:[%s7129_s8 + $0x170] sm:$0xff] }
 0x2bc   : > { %2947 = vmatpush.msra.mxu0 %v1061_v48 }
 0x2bd   : > { %v2081_v51 = vadd.f32 %v2080_v49, %v1872_v50  ;;  %v1125_v49 = vld [vmem:[%s7129_s8 + $0x370] sm:$0xff] }
 0x2be   : > { %3156 = vmatpush.msra.mxu1 %v1125_v49  ;;  %v6016_v49 = vld [vmem:[%s7122_s19 + $0x258] sm:$0xff] }
 0x2bf   : > { %5606 = vst [vmem:[%s7296_s12 + $0x6e0] sm:$0xff] %v2081_v51  ;;  %2565 = vmatmul.f32.gmra.mxu2 %v5975_v52  ;;  %v1456_v53 = vpop.f32.mrf.mxu0  ;;  %v5995_v51 = vld [vmem:[%s7122_s19 + $0x1b0] sm:$0xff] }
 0x2c0   : > { %v1665_v54 = vpop.f32.mrf.mxu1  ;;  %2774 = vmatmul.f32.gmra.mxu3 %v5976_v55 }
 0x2c1   : > { %v1666_v57 = vadd.f32 %v1665_v54, %v1456_v53  ;;  %v5996_v54 = vld [vmem:[%s7122_s19 + $0x1b8] sm:$0xff] }
 0x2c2   : > { %v1874_v59 = vpop.f32.mrf.mxu2  ;;  %2147 = vmatmul.f32.gmra.mxu0 %v5977_v60 }
 0x2c3   : > { %2356 = vmatmul.f32.gmra.mxu1 %v5978_v61  ;;  %v2083_v62 = vpop.f32.mrf.mxu3  ;;  %v1875_v63 = vadd.f32 %v1874_v59, %v1666_v57  ;;  %v5997_v57 = vld [vmem:[%s7122_s19 + $0x1a0] sm:$0xff] }
 0x2c5   : > { %v2084_v2 = vadd.f32 %v2083_v62, %v1875_v63  ;;  %v5999_v62 = vld [vmem:[%s7122_s19 + $0x1d0] sm:$0xff] }
 0x2c7   : > { %5610 = vst [vmem:[%s7296_s12 + $0x700] sm:$0xff] %v2084_v2  ;;  %2568 = vmatmul.f32.gmra.mxu2 %v5979_v3  ;;  %v1459_v4 = vpop.f32.mrf.mxu0 }
 0x2c8   : > { %v1668_v5 = vpop.f32.mrf.mxu1  ;;  %2777 = vmatmul.f32.gmra.mxu3 %v5980_v6 }
 0x2c9   : > { %v1669_v7 = vadd.f32 %v1668_v5, %v1459_v4  ;;  %v6001_v4 = vld [vmem:[%s7122_s19 + $0x1c0] sm:$0xff]  ;;  %v6002_v5 = vld [vmem:[%s7122_s19 + $0x1c8] sm:$0xff] }
 0x2ca   : > { %v1877_v8 = vpop.f32.mrf.mxu2  ;;  %2150 = vmatmul.f32.gmra.mxu0 %v5981_v9  ;;  %v6003_v9 = vld [vmem:[%s7122_s19 + $0x1f0] sm:$0xff] }
 0x2cb   : > { %2359 = vmatmul.f32.gmra.mxu1 %v5982_v10  ;;  %v2086_v11 = vpop.f32.mrf.mxu3  ;;  %v1878_v12 = vadd.f32 %v1877_v8, %v1669_v7 }
 0x2cd   : > { %v2087_v13 = vadd.f32 %v2086_v11, %v1878_v12  ;;  %v6004_v12 = vld [vmem:[%s7122_s19 + $0x1f8] sm:$0xff] }
 0x2cf   : > { %5614 = vst [vmem:[%s7296_s12 + $0x720] sm:$0xff] %v2087_v13  ;;  %2571 = vmatmul.f32.gmra.mxu2 %v5983_v14  ;;  %v1462_v15 = vpop.f32.mrf.mxu0 }
 0x2d0   : > { %v1671_v16 = vpop.f32.mrf.mxu1  ;;  %2780 = vmatmul.f32.gmra.mxu3 %v5984_v17 }
 0x2d1   : > { %v1672_v18 = vadd.f32 %v1671_v16, %v1462_v15  ;;  %v6005_v15 = vld [vmem:[%s7122_s19 + $0x1e0] sm:$0xff]  ;;  %v6006_v16 = vld [vmem:[%s7122_s19 + $0x1e8] sm:$0xff] }
 0x2d2   : > { %v1880_v19 = vpop.f32.mrf.mxu2  ;;  %2153 = vmatmul.f32.gmra.mxu0 %v5985_v20  ;;  %v6007_v20 = vld [vmem:[%s7122_s19 + $0x210] sm:$0xff] }
 0x2d3   : > { %2362 = vmatmul.f32.gmra.mxu1 %v5986_v21  ;;  %v2089_v22 = vpop.f32.mrf.mxu3  ;;  %v1881_v23 = vadd.f32 %v1880_v19, %v1672_v18 }
 0x2d5   : > { %v2090_v24 = vadd.f32 %v2089_v22, %v1881_v23  ;;  %v6008_v23 = vld [vmem:[%s7122_s19 + $0x218] sm:$0xff] }
 0x2d7   : > { %5618 = vst [vmem:[%s7296_s12 + $0x740] sm:$0xff] %v2090_v24  ;;  %2574 = vmatmul.f32.gmra.mxu2 %v5987_v25  ;;  %v1465_v26 = vpop.f32.mrf.mxu0  ;;  %v1185_v24 = vld [vmem:[%s7129_s8 + $0x550] sm:$0xff] }
 0x2d8   : > { %v1674_v27 = vpop.f32.mrf.mxu1  ;;  %2783 = vmatmul.f32.gmra.mxu3 %v5988_v28  ;;  %3366 = vmatpush.msra.mxu2 %v1185_v24  ;;  %v6009_v28 = vld [vmem:[%s7122_s19 + $0x200] sm:$0xff] }
 0x2d9   : > { %v1675_v29 = vadd.f32 %v1674_v27, %v1465_v26  ;;  %v1249_v26 = vld [vmem:[%s7129_s8 + $0x750] sm:$0xff] }
 0x2da   : > { %v1883_v30 = vpop.f32.mrf.mxu2  ;;  %2156 = vmatmul.f32.gmra.mxu0 %v5989_v31  ;;  %3575 = vmatpush.msra.mxu3 %v1249_v26  ;;  %v6030_v26 = vld [vmem:[%s7122_s19 + $0x2a8] sm:$0xff] }
 0x2db   : > { %2365 = vmatmul.f32.gmra.mxu1 %v5990_v32  ;;  %v2092_v33 = vpop.f32.mrf.mxu3  ;;  %v1884_v34 = vadd.f32 %v1883_v30, %v1675_v29  ;;  %v6010_v29 = vld [vmem:[%s7122_s19 + $0x208] sm:$0xff]  ;;  %v1057_v32 = vld [vmem:[%s7129_s8 + $0x150] sm:$0xff] }
 0x2dc   : > { %2948 = vmatpush.msra.mxu0 %v1057_v32 }
 0x2dd   : > { %v2093_v35 = vadd.f32 %v2092_v33, %v1884_v34  ;;  %v1121_v33 = vld [vmem:[%s7129_s8 + $0x350] sm:$0xff] }
 0x2de   : > { %3157 = vmatpush.msra.mxu1 %v1121_v33  ;;  %v6032_v33 = vld [vmem:[%s7122_s19 + $0x2d8] sm:$0xff] }
 0x2df   : > { %5622 = vst [vmem:[%s7296_s12 + $0x760] sm:$0xff] %v2093_v35  ;;  %2577 = vmatmul.f32.gmra.mxu2 %v5991_v36  ;;  %v1468_v37 = vpop.f32.mrf.mxu0  ;;  %v6011_v35 = vld [vmem:[%s7122_s19 + $0x230] sm:$0xff] }
 0x2e0   : > { %v1677_v38 = vpop.f32.mrf.mxu1  ;;  %2786 = vmatmul.f32.gmra.mxu3 %v5992_v39 }
 0x2e1   : > { %v1678_v41 = vadd.f32 %v1677_v38, %v1468_v37  ;;  %v6012_v38 = vld [vmem:[%s7122_s19 + $0x238] sm:$0xff] }
 0x2e2   : > { %v1886_v43 = vpop.f32.mrf.mxu2  ;;  %2159 = vmatmul.f32.gmra.mxu0 %v5993_v44 }
 0x2e3   : > { %2368 = vmatmul.f32.gmra.mxu1 %v5994_v45  ;;  %v2095_v46 = vpop.f32.mrf.mxu3  ;;  %v1887_v47 = vadd.f32 %v1886_v43, %v1678_v41  ;;  %v6013_v41 = vld [vmem:[%s7122_s19 + $0x220] sm:$0xff] }
 0x2e5   : > { %v2096_v50 = vadd.f32 %v2095_v46, %v1887_v47  ;;  %v6015_v46 = vld [vmem:[%s7122_s19 + $0x250] sm:$0xff] }
 0x2e7   : > { %5626 = vst [vmem:[%s7296_s12 + $0x780] sm:$0xff] %v2096_v50  ;;  %2580 = vmatmul.f32.gmra.mxu2 %v5995_v51  ;;  %v1471_v52 = vpop.f32.mrf.mxu0 }
 0x2e8   : > { %v1680_v53 = vpop.f32.mrf.mxu1  ;;  %2789 = vmatmul.f32.gmra.mxu3 %v5996_v54 }
 0x2e9   : > { %v1681_v55 = vadd.f32 %v1680_v53, %v1471_v52  ;;  %v6017_v52 = vld [vmem:[%s7122_s19 + $0x240] sm:$0xff]  ;;  %v6018_v53 = vld [vmem:[%s7122_s19 + $0x248] sm:$0xff] }
 0x2ea   : > { %v1889_v56 = vpop.f32.mrf.mxu2  ;;  %2162 = vmatmul.f32.gmra.mxu0 %v5997_v57  ;;  %v6019_v57 = vld [vmem:[%s7122_s19 + $0x270] sm:$0xff] }
 0x2eb   : > { %2371 = vmatmul.f32.gmra.mxu1 %v5998_v58  ;;  %v2098_v59 = vpop.f32.mrf.mxu3  ;;  %v1890_v60 = vadd.f32 %v1889_v56, %v1681_v55 }
 0x2ed   : > { %v2099_v61 = vadd.f32 %v2098_v59, %v1890_v60  ;;  %v6020_v60 = vld [vmem:[%s7122_s19 + $0x278] sm:$0xff] }
 0x2ef   : > { %5630 = vst [vmem:[%s7296_s12 + $0x7a0] sm:$0xff] %v2099_v61  ;;  %2583 = vmatmul.f32.gmra.mxu2 %v5999_v62  ;;  %v1474_v63 = vpop.f32.mrf.mxu0 }
 0x2f0   : > { %v1683_v0 = vpop.f32.mrf.mxu1  ;;  %2792 = vmatmul.f32.gmra.mxu3 %v6000_v1 }
 0x2f1   : > { %v1684_v2 = vadd.f32 %v1683_v0, %v1474_v63  ;;  %v6021_v63 = vld [vmem:[%s7122_s19 + $0x260] sm:$0xff]  ;;  %v6022_v0 = vld [vmem:[%s7122_s19 + $0x268] sm:$0xff] }
 0x2f2   : > { %v1892_v3 = vpop.f32.mrf.mxu2  ;;  %2165 = vmatmul.f32.gmra.mxu0 %v6001_v4  ;;  %v6023_v4 = vld [vmem:[%s7122_s19 + $0x290] sm:$0xff] }
 0x2f3   : > { %2374 = vmatmul.f32.gmra.mxu1 %v6002_v5  ;;  %v2101_v6 = vpop.f32.mrf.mxu3  ;;  %v1893_v7 = vadd.f32 %v1892_v3, %v1684_v2 }
 0x2f5   : > { %v2102_v8 = vadd.f32 %v2101_v6, %v1893_v7  ;;  %v6024_v7 = vld [vmem:[%s7122_s19 + $0x298] sm:$0xff] }
 0x2f7   : > { %5634 = vst [vmem:[%s7296_s12 + $0x7c0] sm:$0xff] %v2102_v8  ;;  %2586 = vmatmul.f32.gmra.mxu2 %v6003_v9  ;;  %v1477_v10 = vpop.f32.mrf.mxu0  ;;  %v1181_v8 = vld [vmem:[%s7129_s8 + $0x530] sm:$0xff] }
 0x2f8   : > { %v1686_v11 = vpop.f32.mrf.mxu1  ;;  %2795 = vmatmul.f32.gmra.mxu3 %v6004_v12  ;;  %3367 = vmatpush.msra.mxu2 %v1181_v8  ;;  %v6025_v12 = vld [vmem:[%s7122_s19 + $0x280] sm:$0xff] }
 0x2f9   : > { %v1687_v13 = vadd.f32 %v1686_v11, %v1477_v10  ;;  %v1245_v10 = vld [vmem:[%s7129_s8 + $0x730] sm:$0xff] }
 0x2fa   : > { %v1895_v14 = vpop.f32.mrf.mxu2  ;;  %2168 = vmatmul.f32.gmra.mxu0 %v6005_v15  ;;  %3576 = vmatpush.msra.mxu3 %v1245_v10  ;;  %v6046_v10 = vld [vmem:[%s7122_s19 + $0x328] sm:$0xff] }
 0x2fb   : > { %2377 = vmatmul.f32.gmra.mxu1 %v6006_v16  ;;  %v2104_v17 = vpop.f32.mrf.mxu3  ;;  %v1896_v18 = vadd.f32 %v1895_v14, %v1687_v13  ;;  %v6026_v13 = vld [vmem:[%s7122_s19 + $0x288] sm:$0xff]  ;;  %v1053_v16 = vld [vmem:[%s7129_s8 + $0x130] sm:$0xff] }
 0x2fc   : > { %2949 = vmatpush.msra.mxu0 %v1053_v16 }
 0x2fd   : > { %v2105_v19 = vadd.f32 %v2104_v17, %v1896_v18  ;;  %v1117_v17 = vld [vmem:[%s7129_s8 + $0x330] sm:$0xff] }
 0x2fe   : > { %3158 = vmatpush.msra.mxu1 %v1117_v17  ;;  %v6048_v17 = vld [vmem:[%s7122_s19 + $0x358] sm:$0xff] }
 0x2ff   : > { %5638 = vst [vmem:[%s7296_s12 + $0x7e0] sm:$0xff] %v2105_v19  ;;  %2589 = vmatmul.f32.gmra.mxu2 %v6007_v20  ;;  %v2124_v21 = vpop.f32.mrf.mxu0  ;;  %v6027_v19 = vld [vmem:[%s7122_s19 + $0x2b0] sm:$0xff] }
 0x300   : > { %v2333_v22 = vpop.f32.mrf.mxu1  ;;  %2798 = vmatmul.f32.gmra.mxu3 %v6008_v23 }
 0x301   : > { %v2334_v25 = vadd.f32 %v2333_v22, %v2124_v21  ;;  %v6028_v22 = vld [vmem:[%s7122_s19 + $0x2b8] sm:$0xff] }
 0x302   : > { %v2542_v27 = vpop.f32.mrf.mxu2  ;;  %2171 = vmatmul.f32.gmra.mxu0 %v6009_v28 }
 0x303   : > { %2380 = vmatmul.f32.gmra.mxu1 %v6010_v29  ;;  %v2751_v30 = vpop.f32.mrf.mxu3  ;;  %v2543_v31 = vadd.f32 %v2542_v27, %v2334_v25  ;;  %v6029_v25 = vld [vmem:[%s7122_s19 + $0x2a0] sm:$0xff] }
 0x305   : > { %v2752_v34 = vadd.f32 %v2751_v30, %v2543_v31  ;;  %v6031_v30 = vld [vmem:[%s7122_s19 + $0x2d0] sm:$0xff] }
 0x307   : > { %5387 = vst [vmem:[%s7296_s12 + $0x8] sm:$0xff] %v2752_v34  ;;  %2592 = vmatmul.f32.gmra.mxu2 %v6011_v35  ;;  %v2127_v36 = vpop.f32.mrf.mxu0 }
 0x308   : > { %v2336_v37 = vpop.f32.mrf.mxu1  ;;  %2801 = vmatmul.f32.gmra.mxu3 %v6012_v38 }
 0x309   : > { %v2337_v39 = vadd.f32 %v2336_v37, %v2127_v36  ;;  %v6033_v36 = vld [vmem:[%s7122_s19 + $0x2c0] sm:$0xff]  ;;  %v6034_v37 = vld [vmem:[%s7122_s19 + $0x2c8] sm:$0xff] }
 0x30a   : > { %v2545_v40 = vpop.f32.mrf.mxu2  ;;  %2174 = vmatmul.f32.gmra.mxu0 %v6013_v41  ;;  %v6035_v41 = vld [vmem:[%s7122_s19 + $0x2f0] sm:$0xff] }
 0x30b   : > { %2383 = vmatmul.f32.gmra.mxu1 %v6014_v42  ;;  %v2754_v43 = vpop.f32.mrf.mxu3  ;;  %v2546_v44 = vadd.f32 %v2545_v40, %v2337_v39 }
 0x30d   : > { %v2755_v45 = vadd.f32 %v2754_v43, %v2546_v44  ;;  %v6036_v44 = vld [vmem:[%s7122_s19 + $0x2f8] sm:$0xff] }
 0x30f   : > { %5391 = vst [vmem:[%s7296_s12 + $0x28] sm:$0xff] %v2755_v45  ;;  %2595 = vmatmul.f32.gmra.mxu2 %v6015_v46  ;;  %v2130_v47 = vpop.f32.mrf.mxu0 }
 0x310   : > { %v2339_v48 = vpop.f32.mrf.mxu1  ;;  %2804 = vmatmul.f32.gmra.mxu3 %v6016_v49 }
 0x311   : > { %v2340_v50 = vadd.f32 %v2339_v48, %v2130_v47  ;;  %v6037_v47 = vld [vmem:[%s7122_s19 + $0x2e0] sm:$0xff]  ;;  %v6038_v48 = vld [vmem:[%s7122_s19 + $0x2e8] sm:$0xff] }
 0x312   : > { %v2548_v51 = vpop.f32.mrf.mxu2  ;;  %2177 = vmatmul.f32.gmra.mxu0 %v6017_v52  ;;  %v6039_v52 = vld [vmem:[%s7122_s19 + $0x310] sm:$0xff] }
 0x313   : > { %2386 = vmatmul.f32.gmra.mxu1 %v6018_v53  ;;  %v2757_v54 = vpop.f32.mrf.mxu3  ;;  %v2549_v55 = vadd.f32 %v2548_v51, %v2340_v50 }
 0x315   : > { %v2758_v56 = vadd.f32 %v2757_v54, %v2549_v55  ;;  %v6040_v55 = vld [vmem:[%s7122_s19 + $0x318] sm:$0xff] }
 0x317   : > { %5395 = vst [vmem:[%s7296_s12 + $0x48] sm:$0xff] %v2758_v56  ;;  %2598 = vmatmul.f32.gmra.mxu2 %v6019_v57  ;;  %v2133_v58 = vpop.f32.mrf.mxu0  ;;  %v1177_v56 = vld [vmem:[%s7129_s8 + $0x510] sm:$0xff] }
 0x318   : > { %v2342_v59 = vpop.f32.mrf.mxu1  ;;  %2807 = vmatmul.f32.gmra.mxu3 %v6020_v60  ;;  %3368 = vmatpush.msra.mxu2 %v1177_v56  ;;  %v6041_v60 = vld [vmem:[%s7122_s19 + $0x300] sm:$0xff] }
 0x319   : > { %v2343_v61 = vadd.f32 %v2342_v59, %v2133_v58  ;;  %v1241_v58 = vld [vmem:[%s7129_s8 + $0x710] sm:$0xff] }
 0x31a   : > { %v2551_v62 = vpop.f32.mrf.mxu2  ;;  %2180 = vmatmul.f32.gmra.mxu0 %v6021_v63  ;;  %3577 = vmatpush.msra.mxu3 %v1241_v58  ;;  %v6062_v58 = vld [vmem:[%s7122_s19 + $0x3a8] sm:$0xff] }
 0x31b   : > { %2389 = vmatmul.f32.gmra.mxu1 %v6022_v0  ;;  %v2760_v1 = vpop.f32.mrf.mxu3  ;;  %v2552_v2 = vadd.f32 %v2551_v62, %v2343_v61  ;;  %v6042_v61 = vld [vmem:[%s7122_s19 + $0x308] sm:$0xff]  ;;  %v1049_v0 = vld [vmem:[%s7129_s8 + $0x110] sm:$0xff] }
 0x31c   : > { %2950 = vmatpush.msra.mxu0 %v1049_v0 }
 0x31d   : > { %v2761_v3 = vadd.f32 %v2760_v1, %v2552_v2  ;;  %v1113_v1 = vld [vmem:[%s7129_s8 + $0x310] sm:$0xff] }
 0x31e   : > { %3159 = vmatpush.msra.mxu1 %v1113_v1  ;;  %v6064_v1 = vld [vmem:[%s7122_s19 + $0x3d8] sm:$0xff] }
 0x31f   : > { %5399 = vst [vmem:[%s7296_s12 + $0x68] sm:$0xff] %v2761_v3  ;;  %2601 = vmatmul.f32.gmra.mxu2 %v6023_v4  ;;  %v2136_v5 = vpop.f32.mrf.mxu0  ;;  %v6043_v3 = vld [vmem:[%s7122_s19 + $0x330] sm:$0xff] }
 0x320   : > { %v2345_v6 = vpop.f32.mrf.mxu1  ;;  %2810 = vmatmul.f32.gmra.mxu3 %v6024_v7 }
 0x321   : > { %v2346_v9 = vadd.f32 %v2345_v6, %v2136_v5  ;;  %v6044_v6 = vld [vmem:[%s7122_s19 + $0x338] sm:$0xff] }
 0x322   : > { %v2554_v11 = vpop.f32.mrf.mxu2  ;;  %2183 = vmatmul.f32.gmra.mxu0 %v6025_v12 }
 0x323   : > { %2392 = vmatmul.f32.gmra.mxu1 %v6026_v13  ;;  %v2763_v14 = vpop.f32.mrf.mxu3  ;;  %v2555_v15 = vadd.f32 %v2554_v11, %v2346_v9  ;;  %v6045_v9 = vld [vmem:[%s7122_s19 + $0x320] sm:$0xff] }
 0x325   : > { %v2764_v18 = vadd.f32 %v2763_v14, %v2555_v15  ;;  %v6047_v14 = vld [vmem:[%s7122_s19 + $0x350] sm:$0xff] }
 0x327   : > { %5403 = vst [vmem:[%s7296_s12 + $0x88] sm:$0xff] %v2764_v18  ;;  %2604 = vmatmul.f32.gmra.mxu2 %v6027_v19  ;;  %v2139_v20 = vpop.f32.mrf.mxu0 }
 0x328   : > { %v2348_v21 = vpop.f32.mrf.mxu1  ;;  %2813 = vmatmul.f32.gmra.mxu3 %v6028_v22 }
 0x329   : > { %v2349_v23 = vadd.f32 %v2348_v21, %v2139_v20  ;;  %v6049_v20 = vld [vmem:[%s7122_s19 + $0x340] sm:$0xff]  ;;  %v6050_v21 = vld [vmem:[%s7122_s19 + $0x348] sm:$0xff] }
 0x32a   : > { %v2557_v24 = vpop.f32.mrf.mxu2  ;;  %2186 = vmatmul.f32.gmra.mxu0 %v6029_v25  ;;  %v6051_v25 = vld [vmem:[%s7122_s19 + $0x370] sm:$0xff] }
 0x32b   : > { %2395 = vmatmul.f32.gmra.mxu1 %v6030_v26  ;;  %v2766_v27 = vpop.f32.mrf.mxu3  ;;  %v2558_v28 = vadd.f32 %v2557_v24, %v2349_v23 }
 0x32d   : > { %v2767_v29 = vadd.f32 %v2766_v27, %v2558_v28  ;;  %v6052_v28 = vld [vmem:[%s7122_s19 + $0x378] sm:$0xff] }
 0x32f   : > { %5407 = vst [vmem:[%s7296_s12 + $0xa8] sm:$0xff] %v2767_v29  ;;  %2607 = vmatmul.f32.gmra.mxu2 %v6031_v30  ;;  %v2142_v31 = vpop.f32.mrf.mxu0 }
 0x330   : > { %v2351_v32 = vpop.f32.mrf.mxu1  ;;  %2816 = vmatmul.f32.gmra.mxu3 %v6032_v33 }
 0x331   : > { %v2352_v34 = vadd.f32 %v2351_v32, %v2142_v31  ;;  %v6053_v31 = vld [vmem:[%s7122_s19 + $0x360] sm:$0xff]  ;;  %v6054_v32 = vld [vmem:[%s7122_s19 + $0x368] sm:$0xff] }
 0x332   : > { %v2560_v35 = vpop.f32.mrf.mxu2  ;;  %2189 = vmatmul.f32.gmra.mxu0 %v6033_v36  ;;  %v6055_v36 = vld [vmem:[%s7122_s19 + $0x390] sm:$0xff] }
 0x333   : > { %2398 = vmatmul.f32.gmra.mxu1 %v6034_v37  ;;  %v2769_v38 = vpop.f32.mrf.mxu3  ;;  %v2561_v39 = vadd.f32 %v2560_v35, %v2352_v34 }
 0x335   : > { %v2770_v40 = vadd.f32 %v2769_v38, %v2561_v39  ;;  %v6056_v39 = vld [vmem:[%s7122_s19 + $0x398] sm:$0xff] }
 0x337   : > { %5411 = vst [vmem:[%s7296_s12 + $0xc8] sm:$0xff] %v2770_v40  ;;  %2610 = vmatmul.f32.gmra.mxu2 %v6035_v41  ;;  %v2145_v42 = vpop.f32.mrf.mxu0  ;;  %v1173_v40 = vld [vmem:[%s7129_s8 + $0x4f0] sm:$0xff] }
 0x338   : > { %v2354_v43 = vpop.f32.mrf.mxu1  ;;  %2819 = vmatmul.f32.gmra.mxu3 %v6036_v44  ;;  %3369 = vmatpush.msra.mxu2 %v1173_v40  ;;  %v6057_v44 = vld [vmem:[%s7122_s19 + $0x380] sm:$0xff] }
 0x339   : > { %v2355_v45 = vadd.f32 %v2354_v43, %v2145_v42  ;;  %v1237_v42 = vld [vmem:[%s7129_s8 + $0x6f0] sm:$0xff] }
 0x33a   : > { %v2563_v46 = vpop.f32.mrf.mxu2  ;;  %2192 = vmatmul.f32.gmra.mxu0 %v6037_v47  ;;  %3578 = vmatpush.msra.mxu3 %v1237_v42  ;;  %v6078_v42 = vld [vmem:[%s7122_s19 + $0x428] sm:$0xff] }
 0x33b   : > { %2401 = vmatmul.f32.gmra.mxu1 %v6038_v48  ;;  %v2772_v49 = vpop.f32.mrf.mxu3  ;;  %v2564_v50 = vadd.f32 %v2563_v46, %v2355_v45  ;;  %v6058_v45 = vld [vmem:[%s7122_s19 + $0x388] sm:$0xff]  ;;  %v1045_v48 = vld [vmem:[%s7129_s8 + $0xf0] sm:$0xff] }
 0x33c   : > { %2951 = vmatpush.msra.mxu0 %v1045_v48 }
 0x33d   : > { %v2773_v51 = vadd.f32 %v2772_v49, %v2564_v50  ;;  %v1109_v49 = vld [vmem:[%s7129_s8 + $0x2f0] sm:$0xff] }
 0x33e   : > { %3160 = vmatpush.msra.mxu1 %v1109_v49  ;;  %v6080_v49 = vld [vmem:[%s7122_s19 + $0x458] sm:$0xff] }
 0x33f   : > { %5415 = vst [vmem:[%s7296_s12 + $0xe8] sm:$0xff] %v2773_v51  ;;  %2613 = vmatmul.f32.gmra.mxu2 %v6039_v52  ;;  %v2148_v53 = vpop.f32.mrf.mxu0  ;;  %v6059_v51 = vld [vmem:[%s7122_s19 + $0x3b0] sm:$0xff] }
 0x340   : > { %v2357_v54 = vpop.f32.mrf.mxu1  ;;  %2822 = vmatmul.f32.gmra.mxu3 %v6040_v55 }
 0x341   : > { %v2358_v57 = vadd.f32 %v2357_v54, %v2148_v53  ;;  %v6060_v54 = vld [vmem:[%s7122_s19 + $0x3b8] sm:$0xff] }
 0x342   : > { %v2566_v59 = vpop.f32.mrf.mxu2  ;;  %2195 = vmatmul.f32.gmra.mxu0 %v6041_v60 }
 0x343   : > { %2404 = vmatmul.f32.gmra.mxu1 %v6042_v61  ;;  %v2775_v62 = vpop.f32.mrf.mxu3  ;;  %v2567_v63 = vadd.f32 %v2566_v59, %v2358_v57  ;;  %v6061_v57 = vld [vmem:[%s7122_s19 + $0x3a0] sm:$0xff] }
 0x345   : > { %v2776_v2 = vadd.f32 %v2775_v62, %v2567_v63  ;;  %v6063_v62 = vld [vmem:[%s7122_s19 + $0x3d0] sm:$0xff] }
 0x347   : > { %5419 = vst [vmem:[%s7296_s12 + $0x108] sm:$0xff] %v2776_v2  ;;  %2616 = vmatmul.f32.gmra.mxu2 %v6043_v3  ;;  %v2151_v4 = vpop.f32.mrf.mxu0 }
 0x348   : > { %v2360_v5 = vpop.f32.mrf.mxu1  ;;  %2825 = vmatmul.f32.gmra.mxu3 %v6044_v6 }
 0x349   : > { %v2361_v7 = vadd.f32 %v2360_v5, %v2151_v4  ;;  %v6065_v4 = vld [vmem:[%s7122_s19 + $0x3c0] sm:$0xff]  ;;  %v6066_v5 = vld [vmem:[%s7122_s19 + $0x3c8] sm:$0xff] }
 0x34a   : > { %v2569_v8 = vpop.f32.mrf.mxu2  ;;  %2198 = vmatmul.f32.gmra.mxu0 %v6045_v9  ;;  %v6067_v9 = vld [vmem:[%s7122_s19 + $0x3f0] sm:$0xff] }
 0x34b   : > { %2407 = vmatmul.f32.gmra.mxu1 %v6046_v10  ;;  %v2778_v11 = vpop.f32.mrf.mxu3  ;;  %v2570_v12 = vadd.f32 %v2569_v8, %v2361_v7 }
 0x34d   : > { %v2779_v13 = vadd.f32 %v2778_v11, %v2570_v12  ;;  %v6068_v12 = vld [vmem:[%s7122_s19 + $0x3f8] sm:$0xff] }
 0x34f   : > { %5423 = vst [vmem:[%s7296_s12 + $0x128] sm:$0xff] %v2779_v13  ;;  %2619 = vmatmul.f32.gmra.mxu2 %v6047_v14  ;;  %v2154_v15 = vpop.f32.mrf.mxu0 }
 0x350   : > { %v2363_v16 = vpop.f32.mrf.mxu1  ;;  %2828 = vmatmul.f32.gmra.mxu3 %v6048_v17 }
 0x351   : > { %v2364_v18 = vadd.f32 %v2363_v16, %v2154_v15  ;;  %v6069_v15 = vld [vmem:[%s7122_s19 + $0x3e0] sm:$0xff]  ;;  %v6070_v16 = vld [vmem:[%s7122_s19 + $0x3e8] sm:$0xff] }
 0x352   : > { %v2572_v19 = vpop.f32.mrf.mxu2  ;;  %2201 = vmatmul.f32.gmra.mxu0 %v6049_v20  ;;  %v6071_v20 = vld [vmem:[%s7122_s19 + $0x410] sm:$0xff] }
 0x353   : > { %2410 = vmatmul.f32.gmra.mxu1 %v6050_v21  ;;  %v2781_v22 = vpop.f32.mrf.mxu3  ;;  %v2573_v23 = vadd.f32 %v2572_v19, %v2364_v18 }
 0x355   : > { %v2782_v24 = vadd.f32 %v2781_v22, %v2573_v23  ;;  %v6072_v23 = vld [vmem:[%s7122_s19 + $0x418] sm:$0xff] }
 0x357   : > { %5427 = vst [vmem:[%s7296_s12 + $0x148] sm:$0xff] %v2782_v24  ;;  %2622 = vmatmul.f32.gmra.mxu2 %v6051_v25  ;;  %v2157_v26 = vpop.f32.mrf.mxu0  ;;  %v1169_v24 = vld [vmem:[%s7129_s8 + $0x4d0] sm:$0xff] }
 0x358   : > { %v2366_v27 = vpop.f32.mrf.mxu1  ;;  %2831 = vmatmul.f32.gmra.mxu3 %v6052_v28  ;;  %3370 = vmatpush.msra.mxu2 %v1169_v24  ;;  %v6073_v28 = vld [vmem:[%s7122_s19 + $0x400] sm:$0xff] }
 0x359   : > { %v2367_v29 = vadd.f32 %v2366_v27, %v2157_v26  ;;  %v1233_v26 = vld [vmem:[%s7129_s8 + $0x6d0] sm:$0xff] }
 0x35a   : > { %v2575_v30 = vpop.f32.mrf.mxu2  ;;  %2204 = vmatmul.f32.gmra.mxu0 %v6053_v31  ;;  %3579 = vmatpush.msra.mxu3 %v1233_v26  ;;  %v6094_v26 = vld [vmem:[%s7122_s19 + $0x4a8] sm:$0xff] }
 0x35b   : > { %2413 = vmatmul.f32.gmra.mxu1 %v6054_v32  ;;  %v2784_v33 = vpop.f32.mrf.mxu3  ;;  %v2576_v34 = vadd.f32 %v2575_v30, %v2367_v29  ;;  %v6074_v29 = vld [vmem:[%s7122_s19 + $0x408] sm:$0xff]  ;;  %v1041_v32 = vld [vmem:[%s7129_s8 + $0xd0] sm:$0xff] }
 0x35c   : > { %2952 = vmatpush.msra.mxu0 %v1041_v32 }
 0x35d   : > { %v2785_v35 = vadd.f32 %v2784_v33, %v2576_v34  ;;  %v1105_v33 = vld [vmem:[%s7129_s8 + $0x2d0] sm:$0xff] }
 0x35e   : > { %3161 = vmatpush.msra.mxu1 %v1105_v33  ;;  %v6096_v33 = vld [vmem:[%s7122_s19 + $0x4d8] sm:$0xff] }
 0x35f   : > { %5431 = vst [vmem:[%s7296_s12 + $0x168] sm:$0xff] %v2785_v35  ;;  %2625 = vmatmul.f32.gmra.mxu2 %v6055_v36  ;;  %v2160_v37 = vpop.f32.mrf.mxu0  ;;  %v6075_v35 = vld [vmem:[%s7122_s19 + $0x430] sm:$0xff] }
 0x360   : > { %v2369_v38 = vpop.f32.mrf.mxu1  ;;  %2834 = vmatmul.f32.gmra.mxu3 %v6056_v39 }
 0x361   : > { %v2370_v41 = vadd.f32 %v2369_v38, %v2160_v37  ;;  %v6076_v38 = vld [vmem:[%s7122_s19 + $0x438] sm:$0xff] }
 0x362   : > { %v2578_v43 = vpop.f32.mrf.mxu2  ;;  %2207 = vmatmul.f32.gmra.mxu0 %v6057_v44 }
 0x363   : > { %2416 = vmatmul.f32.gmra.mxu1 %v6058_v45  ;;  %v2787_v46 = vpop.f32.mrf.mxu3  ;;  %v2579_v47 = vadd.f32 %v2578_v43, %v2370_v41  ;;  %v6077_v41 = vld [vmem:[%s7122_s19 + $0x420] sm:$0xff] }
 0x365   : > { %v2788_v50 = vadd.f32 %v2787_v46, %v2579_v47  ;;  %v6079_v46 = vld [vmem:[%s7122_s19 + $0x450] sm:$0xff] }
 0x367   : > { %5435 = vst [vmem:[%s7296_s12 + $0x188] sm:$0xff] %v2788_v50  ;;  %2628 = vmatmul.f32.gmra.mxu2 %v6059_v51  ;;  %v2163_v52 = vpop.f32.mrf.mxu0 }
 0x368   : > { %v2372_v53 = vpop.f32.mrf.mxu1  ;;  %2837 = vmatmul.f32.gmra.mxu3 %v6060_v54 }
 0x369   : > { %v2373_v55 = vadd.f32 %v2372_v53, %v2163_v52  ;;  %v6081_v52 = vld [vmem:[%s7122_s19 + $0x440] sm:$0xff]  ;;  %v6082_v53 = vld [vmem:[%s7122_s19 + $0x448] sm:$0xff] }
 0x36a   : > { %v2581_v56 = vpop.f32.mrf.mxu2  ;;  %2210 = vmatmul.f32.gmra.mxu0 %v6061_v57  ;;  %v6083_v57 = vld [vmem:[%s7122_s19 + $0x470] sm:$0xff] }
 0x36b   : > { %2419 = vmatmul.f32.gmra.mxu1 %v6062_v58  ;;  %v2790_v59 = vpop.f32.mrf.mxu3  ;;  %v2582_v60 = vadd.f32 %v2581_v56, %v2373_v55 }
 0x36d   : > { %v2791_v61 = vadd.f32 %v2790_v59, %v2582_v60  ;;  %v6084_v60 = vld [vmem:[%s7122_s19 + $0x478] sm:$0xff] }
 0x36f   : > { %5439 = vst [vmem:[%s7296_s12 + $0x1a8] sm:$0xff] %v2791_v61  ;;  %2631 = vmatmul.f32.gmra.mxu2 %v6063_v62  ;;  %v2166_v63 = vpop.f32.mrf.mxu0 }
 0x370   : > { %v2375_v0 = vpop.f32.mrf.mxu1  ;;  %2840 = vmatmul.f32.gmra.mxu3 %v6064_v1 }
 0x371   : > { %v2376_v2 = vadd.f32 %v2375_v0, %v2166_v63  ;;  %v6085_v63 = vld [vmem:[%s7122_s19 + $0x460] sm:$0xff]  ;;  %v6086_v0 = vld [vmem:[%s7122_s19 + $0x468] sm:$0xff] }
 0x372   : > { %v2584_v3 = vpop.f32.mrf.mxu2  ;;  %2213 = vmatmul.f32.gmra.mxu0 %v6065_v4  ;;  %v6087_v4 = vld [vmem:[%s7122_s19 + $0x490] sm:$0xff] }
 0x373   : > { %2422 = vmatmul.f32.gmra.mxu1 %v6066_v5  ;;  %v2793_v6 = vpop.f32.mrf.mxu3  ;;  %v2585_v7 = vadd.f32 %v2584_v3, %v2376_v2 }
 0x375   : > { %v2794_v8 = vadd.f32 %v2793_v6, %v2585_v7  ;;  %v6088_v7 = vld [vmem:[%s7122_s19 + $0x498] sm:$0xff] }
 0x377   : > { %5443 = vst [vmem:[%s7296_s12 + $0x1c8] sm:$0xff] %v2794_v8  ;;  %2634 = vmatmul.f32.gmra.mxu2 %v6067_v9  ;;  %v2169_v10 = vpop.f32.mrf.mxu0  ;;  %v1165_v8 = vld [vmem:[%s7129_s8 + $0x4b0] sm:$0xff] }
 0x378   : > { %v2378_v11 = vpop.f32.mrf.mxu1  ;;  %2843 = vmatmul.f32.gmra.mxu3 %v6068_v12  ;;  %3371 = vmatpush.msra.mxu2 %v1165_v8  ;;  %v6089_v12 = vld [vmem:[%s7122_s19 + $0x480] sm:$0xff] }
 0x379   : > { %v2379_v13 = vadd.f32 %v2378_v11, %v2169_v10  ;;  %v1229_v10 = vld [vmem:[%s7129_s8 + $0x6b0] sm:$0xff] }
 0x37a   : > { %v2587_v14 = vpop.f32.mrf.mxu2  ;;  %2216 = vmatmul.f32.gmra.mxu0 %v6069_v15  ;;  %3580 = vmatpush.msra.mxu3 %v1229_v10  ;;  %v6110_v10 = vld [vmem:[%s7122_s19 + $0x528] sm:$0xff] }
 0x37b   : > { %2425 = vmatmul.f32.gmra.mxu1 %v6070_v16  ;;  %v2796_v17 = vpop.f32.mrf.mxu3  ;;  %v2588_v18 = vadd.f32 %v2587_v14, %v2379_v13  ;;  %v6090_v13 = vld [vmem:[%s7122_s19 + $0x488] sm:$0xff]  ;;  %v1037_v16 = vld [vmem:[%s7129_s8 + $0xb0] sm:$0xff] }
 0x37c   : > { %2953 = vmatpush.msra.mxu0 %v1037_v16 }
 0x37d   : > { %v2797_v19 = vadd.f32 %v2796_v17, %v2588_v18  ;;  %v1101_v17 = vld [vmem:[%s7129_s8 + $0x2b0] sm:$0xff] }
 0x37e   : > { %3162 = vmatpush.msra.mxu1 %v1101_v17  ;;  %v6112_v17 = vld [vmem:[%s7122_s19 + $0x558] sm:$0xff] }
 0x37f   : > { %5447 = vst [vmem:[%s7296_s12 + $0x1e8] sm:$0xff] %v2797_v19  ;;  %2637 = vmatmul.f32.gmra.mxu2 %v6071_v20  ;;  %v2172_v21 = vpop.f32.mrf.mxu0  ;;  %v6091_v19 = vld [vmem:[%s7122_s19 + $0x4b0] sm:$0xff] }
 0x380   : > { %v2381_v22 = vpop.f32.mrf.mxu1  ;;  %2846 = vmatmul.f32.gmra.mxu3 %v6072_v23 }
 0x381   : > { %v2382_v25 = vadd.f32 %v2381_v22, %v2172_v21  ;;  %v6092_v22 = vld [vmem:[%s7122_s19 + $0x4b8] sm:$0xff] }
 0x382   : > { %v2590_v27 = vpop.f32.mrf.mxu2  ;;  %2219 = vmatmul.f32.gmra.mxu0 %v6073_v28 }
 0x383   : > { %2428 = vmatmul.f32.gmra.mxu1 %v6074_v29  ;;  %v2799_v30 = vpop.f32.mrf.mxu3  ;;  %v2591_v31 = vadd.f32 %v2590_v27, %v2382_v25  ;;  %v6093_v25 = vld [vmem:[%s7122_s19 + $0x4a0] sm:$0xff] }
 0x385   : > { %v2800_v34 = vadd.f32 %v2799_v30, %v2591_v31  ;;  %v6095_v30 = vld [vmem:[%s7122_s19 + $0x4d0] sm:$0xff] }
 0x387   : > { %5451 = vst [vmem:[%s7296_s12 + $0x208] sm:$0xff] %v2800_v34  ;;  %2640 = vmatmul.f32.gmra.mxu2 %v6075_v35  ;;  %v2175_v36 = vpop.f32.mrf.mxu0 }
 0x388   : > { %v2384_v37 = vpop.f32.mrf.mxu1  ;;  %2849 = vmatmul.f32.gmra.mxu3 %v6076_v38 }
 0x389   : > { %v2385_v39 = vadd.f32 %v2384_v37, %v2175_v36  ;;  %v6097_v36 = vld [vmem:[%s7122_s19 + $0x4c0] sm:$0xff]  ;;  %v6098_v37 = vld [vmem:[%s7122_s19 + $0x4c8] sm:$0xff] }
 0x38a   : > { %v2593_v40 = vpop.f32.mrf.mxu2  ;;  %2222 = vmatmul.f32.gmra.mxu0 %v6077_v41  ;;  %v6099_v41 = vld [vmem:[%s7122_s19 + $0x4f0] sm:$0xff] }
 0x38b   : > { %2431 = vmatmul.f32.gmra.mxu1 %v6078_v42  ;;  %v2802_v43 = vpop.f32.mrf.mxu3  ;;  %v2594_v44 = vadd.f32 %v2593_v40, %v2385_v39 }
 0x38d   : > { %v2803_v45 = vadd.f32 %v2802_v43, %v2594_v44  ;;  %v6100_v44 = vld [vmem:[%s7122_s19 + $0x4f8] sm:$0xff] }
 0x38f   : > { %5455 = vst [vmem:[%s7296_s12 + $0x228] sm:$0xff] %v2803_v45  ;;  %2643 = vmatmul.f32.gmra.mxu2 %v6079_v46  ;;  %v2178_v47 = vpop.f32.mrf.mxu0 }
 0x390   : > { %v2387_v48 = vpop.f32.mrf.mxu1  ;;  %2852 = vmatmul.f32.gmra.mxu3 %v6080_v49 }
 0x391   : > { %v2388_v50 = vadd.f32 %v2387_v48, %v2178_v47  ;;  %v6101_v47 = vld [vmem:[%s7122_s19 + $0x4e0] sm:$0xff]  ;;  %v6102_v48 = vld [vmem:[%s7122_s19 + $0x4e8] sm:$0xff] }
 0x392   : > { %v2596_v51 = vpop.f32.mrf.mxu2  ;;  %2225 = vmatmul.f32.gmra.mxu0 %v6081_v52  ;;  %v6103_v52 = vld [vmem:[%s7122_s19 + $0x510] sm:$0xff] }
 0x393   : > { %2434 = vmatmul.f32.gmra.mxu1 %v6082_v53  ;;  %v2805_v54 = vpop.f32.mrf.mxu3  ;;  %v2597_v55 = vadd.f32 %v2596_v51, %v2388_v50 }
 0x395   : > { %v2806_v56 = vadd.f32 %v2805_v54, %v2597_v55  ;;  %v6104_v55 = vld [vmem:[%s7122_s19 + $0x518] sm:$0xff] }
 0x397   : > { %5459 = vst [vmem:[%s7296_s12 + $0x248] sm:$0xff] %v2806_v56  ;;  %2646 = vmatmul.f32.gmra.mxu2 %v6083_v57  ;;  %v2181_v58 = vpop.f32.mrf.mxu0  ;;  %v1161_v56 = vld [vmem:[%s7129_s8 + $0x490] sm:$0xff] }
 0x398   : > { %v2390_v59 = vpop.f32.mrf.mxu1  ;;  %2855 = vmatmul.f32.gmra.mxu3 %v6084_v60  ;;  %3372 = vmatpush.msra.mxu2 %v1161_v56  ;;  %v6105_v60 = vld [vmem:[%s7122_s19 + $0x500] sm:$0xff] }
 0x399   : > { %v2391_v61 = vadd.f32 %v2390_v59, %v2181_v58  ;;  %v1225_v58 = vld [vmem:[%s7129_s8 + $0x690] sm:$0xff] }
 0x39a   : > { %v2599_v62 = vpop.f32.mrf.mxu2  ;;  %2228 = vmatmul.f32.gmra.mxu0 %v6085_v63  ;;  %3581 = vmatpush.msra.mxu3 %v1225_v58  ;;  %v6126_v58 = vld [vmem:[%s7122_s19 + $0x5a8] sm:$0xff] }
 0x39b   : > { %2437 = vmatmul.f32.gmra.mxu1 %v6086_v0  ;;  %v2808_v1 = vpop.f32.mrf.mxu3  ;;  %v2600_v2 = vadd.f32 %v2599_v62, %v2391_v61  ;;  %v6106_v61 = vld [vmem:[%s7122_s19 + $0x508] sm:$0xff]  ;;  %v1033_v0 = vld [vmem:[%s7129_s8 + $0x90] sm:$0xff] }
 0x39c   : > { %2954 = vmatpush.msra.mxu0 %v1033_v0 }
 0x39d   : > { %v2809_v3 = vadd.f32 %v2808_v1, %v2600_v2  ;;  %v1097_v1 = vld [vmem:[%s7129_s8 + $0x290] sm:$0xff] }
 0x39e   : > { %3163 = vmatpush.msra.mxu1 %v1097_v1  ;;  %v6128_v1 = vld [vmem:[%s7122_s19 + $0x5d8] sm:$0xff] }
 0x39f   : > { %5463 = vst [vmem:[%s7296_s12 + $0x268] sm:$0xff] %v2809_v3  ;;  %2649 = vmatmul.f32.gmra.mxu2 %v6087_v4  ;;  %v2184_v5 = vpop.f32.mrf.mxu0  ;;  %v6107_v3 = vld [vmem:[%s7122_s19 + $0x530] sm:$0xff] }
 0x3a0   : > { %v2393_v6 = vpop.f32.mrf.mxu1  ;;  %2858 = vmatmul.f32.gmra.mxu3 %v6088_v7 }
 0x3a1   : > { %v2394_v9 = vadd.f32 %v2393_v6, %v2184_v5  ;;  %v6108_v6 = vld [vmem:[%s7122_s19 + $0x538] sm:$0xff] }
 0x3a2   : > { %v2602_v11 = vpop.f32.mrf.mxu2  ;;  %2231 = vmatmul.f32.gmra.mxu0 %v6089_v12 }
 0x3a3   : > { %2440 = vmatmul.f32.gmra.mxu1 %v6090_v13  ;;  %v2811_v14 = vpop.f32.mrf.mxu3  ;;  %v2603_v15 = vadd.f32 %v2602_v11, %v2394_v9  ;;  %v6109_v9 = vld [vmem:[%s7122_s19 + $0x520] sm:$0xff] }
 0x3a5   : > { %v2812_v18 = vadd.f32 %v2811_v14, %v2603_v15  ;;  %v6111_v14 = vld [vmem:[%s7122_s19 + $0x550] sm:$0xff] }
 0x3a7   : > { %5467 = vst [vmem:[%s7296_s12 + $0x288] sm:$0xff] %v2812_v18  ;;  %2652 = vmatmul.f32.gmra.mxu2 %v6091_v19  ;;  %v2187_v20 = vpop.f32.mrf.mxu0 }
 0x3a8   : > { %v2396_v21 = vpop.f32.mrf.mxu1  ;;  %2861 = vmatmul.f32.gmra.mxu3 %v6092_v22 }
 0x3a9   : > { %v2397_v23 = vadd.f32 %v2396_v21, %v2187_v20  ;;  %v6113_v20 = vld [vmem:[%s7122_s19 + $0x540] sm:$0xff]  ;;  %v6114_v21 = vld [vmem:[%s7122_s19 + $0x548] sm:$0xff] }
 0x3aa   : > { %v2605_v24 = vpop.f32.mrf.mxu2  ;;  %2234 = vmatmul.f32.gmra.mxu0 %v6093_v25  ;;  %v6115_v25 = vld [vmem:[%s7122_s19 + $0x570] sm:$0xff] }
 0x3ab   : > { %2443 = vmatmul.f32.gmra.mxu1 %v6094_v26  ;;  %v2814_v27 = vpop.f32.mrf.mxu3  ;;  %v2606_v28 = vadd.f32 %v2605_v24, %v2397_v23 }
 0x3ad   : > { %v2815_v29 = vadd.f32 %v2814_v27, %v2606_v28  ;;  %v6116_v28 = vld [vmem:[%s7122_s19 + $0x578] sm:$0xff] }
 0x3af   : > { %5471 = vst [vmem:[%s7296_s12 + $0x2a8] sm:$0xff] %v2815_v29  ;;  %2655 = vmatmul.f32.gmra.mxu2 %v6095_v30  ;;  %v2190_v31 = vpop.f32.mrf.mxu0 }
 0x3b0   : > { %v2399_v32 = vpop.f32.mrf.mxu1  ;;  %2864 = vmatmul.f32.gmra.mxu3 %v6096_v33 }
 0x3b1   : > { %v2400_v34 = vadd.f32 %v2399_v32, %v2190_v31  ;;  %v6117_v31 = vld [vmem:[%s7122_s19 + $0x560] sm:$0xff]  ;;  %v6118_v32 = vld [vmem:[%s7122_s19 + $0x568] sm:$0xff] }
 0x3b2   : > { %v2608_v35 = vpop.f32.mrf.mxu2  ;;  %2237 = vmatmul.f32.gmra.mxu0 %v6097_v36  ;;  %v6119_v36 = vld [vmem:[%s7122_s19 + $0x590] sm:$0xff] }
 0x3b3   : > { %2446 = vmatmul.f32.gmra.mxu1 %v6098_v37  ;;  %v2817_v38 = vpop.f32.mrf.mxu3  ;;  %v2609_v39 = vadd.f32 %v2608_v35, %v2400_v34 }
 0x3b5   : > { %v2818_v40 = vadd.f32 %v2817_v38, %v2609_v39  ;;  %v6120_v39 = vld [vmem:[%s7122_s19 + $0x598] sm:$0xff] }
 0x3b7   : > { %5475 = vst [vmem:[%s7296_s12 + $0x2c8] sm:$0xff] %v2818_v40  ;;  %2658 = vmatmul.f32.gmra.mxu2 %v6099_v41  ;;  %v2193_v42 = vpop.f32.mrf.mxu0  ;;  %v1157_v40 = vld [vmem:[%s7129_s8 + $0x470] sm:$0xff] }
 0x3b8   : > { %v2402_v43 = vpop.f32.mrf.mxu1  ;;  %2867 = vmatmul.f32.gmra.mxu3 %v6100_v44  ;;  %3373 = vmatpush.msra.mxu2 %v1157_v40  ;;  %v6121_v44 = vld [vmem:[%s7122_s19 + $0x580] sm:$0xff] }
 0x3b9   : > { %v2403_v45 = vadd.f32 %v2402_v43, %v2193_v42  ;;  %v1221_v42 = vld [vmem:[%s7129_s8 + $0x670] sm:$0xff] }
 0x3ba   : > { %v2611_v46 = vpop.f32.mrf.mxu2  ;;  %2240 = vmatmul.f32.gmra.mxu0 %v6101_v47  ;;  %3582 = vmatpush.msra.mxu3 %v1221_v42  ;;  %v6142_v42 = vld [vmem:[%s7122_s19 + $0x628] sm:$0xff] }
 0x3bb   : > { %2449 = vmatmul.f32.gmra.mxu1 %v6102_v48  ;;  %v2820_v49 = vpop.f32.mrf.mxu3  ;;  %v2612_v50 = vadd.f32 %v2611_v46, %v2403_v45  ;;  %v6122_v45 = vld [vmem:[%s7122_s19 + $0x588] sm:$0xff]  ;;  %v1029_v48 = vld [vmem:[%s7129_s8 + $0x70] sm:$0xff] }
 0x3bc   : > { %2955 = vmatpush.msra.mxu0 %v1029_v48 }
 0x3bd   : > { %v2821_v51 = vadd.f32 %v2820_v49, %v2612_v50  ;;  %v1093_v49 = vld [vmem:[%s7129_s8 + $0x270] sm:$0xff] }
 0x3be   : > { %3164 = vmatpush.msra.mxu1 %v1093_v49  ;;  %v6144_v49 = vld [vmem:[%s7122_s19 + $0x658] sm:$0xff] }
 0x3bf   : > { %5479 = vst [vmem:[%s7296_s12 + $0x2e8] sm:$0xff] %v2821_v51  ;;  %2661 = vmatmul.f32.gmra.mxu2 %v6103_v52  ;;  %v2196_v53 = vpop.f32.mrf.mxu0  ;;  %v6123_v51 = vld [vmem:[%s7122_s19 + $0x5b0] sm:$0xff] }
 0x3c0   : > { %v2405_v54 = vpop.f32.mrf.mxu1  ;;  %2870 = vmatmul.f32.gmra.mxu3 %v6104_v55 }
 0x3c1   : > { %v2406_v57 = vadd.f32 %v2405_v54, %v2196_v53  ;;  %v6124_v54 = vld [vmem:[%s7122_s19 + $0x5b8] sm:$0xff] }
 0x3c2   : > { %v2614_v59 = vpop.f32.mrf.mxu2  ;;  %2243 = vmatmul.f32.gmra.mxu0 %v6105_v60 }
 0x3c3   : > { %2452 = vmatmul.f32.gmra.mxu1 %v6106_v61  ;;  %v2823_v62 = vpop.f32.mrf.mxu3  ;;  %v2615_v63 = vadd.f32 %v2614_v59, %v2406_v57  ;;  %v6125_v57 = vld [vmem:[%s7122_s19 + $0x5a0] sm:$0xff] }
 0x3c5   : > { %v2824_v2 = vadd.f32 %v2823_v62, %v2615_v63  ;;  %v6127_v62 = vld [vmem:[%s7122_s19 + $0x5d0] sm:$0xff] }
 0x3c7   : > { %5483 = vst [vmem:[%s7296_s12 + $0x308] sm:$0xff] %v2824_v2  ;;  %2664 = vmatmul.f32.gmra.mxu2 %v6107_v3  ;;  %v2199_v4 = vpop.f32.mrf.mxu0 }
 0x3c8   : > { %v2408_v5 = vpop.f32.mrf.mxu1  ;;  %2873 = vmatmul.f32.gmra.mxu3 %v6108_v6 }
 0x3c9   : > { %v2409_v7 = vadd.f32 %v2408_v5, %v2199_v4  ;;  %v6129_v4 = vld [vmem:[%s7122_s19 + $0x5c0] sm:$0xff]  ;;  %v6130_v5 = vld [vmem:[%s7122_s19 + $0x5c8] sm:$0xff] }
 0x3ca   : > { %v2617_v8 = vpop.f32.mrf.mxu2  ;;  %2246 = vmatmul.f32.gmra.mxu0 %v6109_v9  ;;  %v6131_v9 = vld [vmem:[%s7122_s19 + $0x5f0] sm:$0xff] }
 0x3cb   : > { %2455 = vmatmul.f32.gmra.mxu1 %v6110_v10  ;;  %v2826_v11 = vpop.f32.mrf.mxu3  ;;  %v2618_v12 = vadd.f32 %v2617_v8, %v2409_v7 }
 0x3cd   : > { %v2827_v13 = vadd.f32 %v2826_v11, %v2618_v12  ;;  %v6132_v12 = vld [vmem:[%s7122_s19 + $0x5f8] sm:$0xff] }
 0x3cf   : > { %5487 = vst [vmem:[%s7296_s12 + $0x328] sm:$0xff] %v2827_v13  ;;  %2667 = vmatmul.f32.gmra.mxu2 %v6111_v14  ;;  %v2202_v15 = vpop.f32.mrf.mxu0 }
 0x3d0   : > { %v2411_v16 = vpop.f32.mrf.mxu1  ;;  %2876 = vmatmul.f32.gmra.mxu3 %v6112_v17 }
 0x3d1   : > { %v2412_v18 = vadd.f32 %v2411_v16, %v2202_v15  ;;  %v6133_v15 = vld [vmem:[%s7122_s19 + $0x5e0] sm:$0xff]  ;;  %v6134_v16 = vld [vmem:[%s7122_s19 + $0x5e8] sm:$0xff] }
 0x3d2   : > { %v2620_v19 = vpop.f32.mrf.mxu2  ;;  %2249 = vmatmul.f32.gmra.mxu0 %v6113_v20  ;;  %v6135_v20 = vld [vmem:[%s7122_s19 + $0x610] sm:$0xff] }
 0x3d3   : > { %2458 = vmatmul.f32.gmra.mxu1 %v6114_v21  ;;  %v2829_v22 = vpop.f32.mrf.mxu3  ;;  %v2621_v23 = vadd.f32 %v2620_v19, %v2412_v18 }
 0x3d5   : > { %v2830_v24 = vadd.f32 %v2829_v22, %v2621_v23  ;;  %v6136_v23 = vld [vmem:[%s7122_s19 + $0x618] sm:$0xff] }
 0x3d7   : > { %5491 = vst [vmem:[%s7296_s12 + $0x348] sm:$0xff] %v2830_v24  ;;  %2670 = vmatmul.f32.gmra.mxu2 %v6115_v25  ;;  %v2205_v26 = vpop.f32.mrf.mxu0  ;;  %v1153_v24 = vld [vmem:[%s7129_s8 + $0x450] sm:$0xff] }
 0x3d8   : > { %v2414_v27 = vpop.f32.mrf.mxu1  ;;  %2879 = vmatmul.f32.gmra.mxu3 %v6116_v28  ;;  %3374 = vmatpush.msra.mxu2 %v1153_v24  ;;  %v6137_v28 = vld [vmem:[%s7122_s19 + $0x600] sm:$0xff] }
 0x3d9   : > { %v2415_v29 = vadd.f32 %v2414_v27, %v2205_v26  ;;  %v1217_v26 = vld [vmem:[%s7129_s8 + $0x650] sm:$0xff] }
 0x3da   : > { %v2623_v30 = vpop.f32.mrf.mxu2  ;;  %2252 = vmatmul.f32.gmra.mxu0 %v6117_v31  ;;  %3583 = vmatpush.msra.mxu3 %v1217_v26  ;;  %v6158_v26 = vld [vmem:[%s7122_s19 + $0x6a8] sm:$0xff] }
 0x3db   : > { %2461 = vmatmul.f32.gmra.mxu1 %v6118_v32  ;;  %v2832_v33 = vpop.f32.mrf.mxu3  ;;  %v2624_v34 = vadd.f32 %v2623_v30, %v2415_v29  ;;  %v6138_v29 = vld [vmem:[%s7122_s19 + $0x608] sm:$0xff]  ;;  %v1025_v32 = vld [vmem:[%s7129_s8 + $0x50] sm:$0xff] }
 0x3dc   : > { %2956 = vmatpush.msra.mxu0 %v1025_v32 }
 0x3dd   : > { %v2833_v35 = vadd.f32 %v2832_v33, %v2624_v34  ;;  %v1089_v33 = vld [vmem:[%s7129_s8 + $0x250] sm:$0xff] }
 0x3de   : > { %3165 = vmatpush.msra.mxu1 %v1089_v33  ;;  %v6160_v33 = vld [vmem:[%s7122_s19 + $0x6d8] sm:$0xff] }
 0x3df   : > { %5495 = vst [vmem:[%s7296_s12 + $0x368] sm:$0xff] %v2833_v35  ;;  %2673 = vmatmul.f32.gmra.mxu2 %v6119_v36  ;;  %v2208_v37 = vpop.f32.mrf.mxu0  ;;  %v6139_v35 = vld [vmem:[%s7122_s19 + $0x630] sm:$0xff] }
 0x3e0   : > { %v2417_v38 = vpop.f32.mrf.mxu1  ;;  %2882 = vmatmul.f32.gmra.mxu3 %v6120_v39 }
 0x3e1   : > { %v2418_v41 = vadd.f32 %v2417_v38, %v2208_v37  ;;  %v6140_v38 = vld [vmem:[%s7122_s19 + $0x638] sm:$0xff] }
 0x3e2   : > { %v2626_v43 = vpop.f32.mrf.mxu2  ;;  %2255 = vmatmul.f32.gmra.mxu0 %v6121_v44 }
 0x3e3   : > { %2464 = vmatmul.f32.gmra.mxu1 %v6122_v45  ;;  %v2835_v46 = vpop.f32.mrf.mxu3  ;;  %v2627_v47 = vadd.f32 %v2626_v43, %v2418_v41  ;;  %v6141_v41 = vld [vmem:[%s7122_s19 + $0x620] sm:$0xff] }
 0x3e5   : > { %v2836_v50 = vadd.f32 %v2835_v46, %v2627_v47  ;;  %v6143_v46 = vld [vmem:[%s7122_s19 + $0x650] sm:$0xff] }
 0x3e7   : > { %5499 = vst [vmem:[%s7296_s12 + $0x388] sm:$0xff] %v2836_v50  ;;  %2676 = vmatmul.f32.gmra.mxu2 %v6123_v51  ;;  %v2211_v52 = vpop.f32.mrf.mxu0 }
 0x3e8   : > { %v2420_v53 = vpop.f32.mrf.mxu1  ;;  %2885 = vmatmul.f32.gmra.mxu3 %v6124_v54 }
 0x3e9   : > { %v2421_v55 = vadd.f32 %v2420_v53, %v2211_v52  ;;  %v6145_v52 = vld [vmem:[%s7122_s19 + $0x640] sm:$0xff]  ;;  %v6146_v53 = vld [vmem:[%s7122_s19 + $0x648] sm:$0xff] }
 0x3ea   : > { %v2629_v56 = vpop.f32.mrf.mxu2  ;;  %2258 = vmatmul.f32.gmra.mxu0 %v6125_v57  ;;  %v6147_v57 = vld [vmem:[%s7122_s19 + $0x670] sm:$0xff] }
 0x3eb   : > { %2467 = vmatmul.f32.gmra.mxu1 %v6126_v58  ;;  %v2838_v59 = vpop.f32.mrf.mxu3  ;;  %v2630_v60 = vadd.f32 %v2629_v56, %v2421_v55 }
 0x3ed   : > { %v2839_v61 = vadd.f32 %v2838_v59, %v2630_v60  ;;  %v6148_v60 = vld [vmem:[%s7122_s19 + $0x678] sm:$0xff] }
 0x3ef   : > { %5503 = vst [vmem:[%s7296_s12 + $0x3a8] sm:$0xff] %v2839_v61  ;;  %2679 = vmatmul.f32.gmra.mxu2 %v6127_v62  ;;  %v2214_v63 = vpop.f32.mrf.mxu0 }
 0x3f0   : > { %v2423_v0 = vpop.f32.mrf.mxu1  ;;  %2888 = vmatmul.f32.gmra.mxu3 %v6128_v1 }
 0x3f1   : > { %v2424_v2 = vadd.f32 %v2423_v0, %v2214_v63  ;;  %v6149_v63 = vld [vmem:[%s7122_s19 + $0x660] sm:$0xff]  ;;  %v6150_v0 = vld [vmem:[%s7122_s19 + $0x668] sm:$0xff] }
 0x3f2   : > { %v2632_v3 = vpop.f32.mrf.mxu2  ;;  %2261 = vmatmul.f32.gmra.mxu0 %v6129_v4  ;;  %v6151_v4 = vld [vmem:[%s7122_s19 + $0x690] sm:$0xff] }
 0x3f3   : > { %2470 = vmatmul.f32.gmra.mxu1 %v6130_v5  ;;  %v2841_v6 = vpop.f32.mrf.mxu3  ;;  %v2633_v7 = vadd.f32 %v2632_v3, %v2424_v2 }
 0x3f5   : > { %v2842_v8 = vadd.f32 %v2841_v6, %v2633_v7  ;;  %v6152_v7 = vld [vmem:[%s7122_s19 + $0x698] sm:$0xff] }
 0x3f7   : > { %5507 = vst [vmem:[%s7296_s12 + $0x3c8] sm:$0xff] %v2842_v8  ;;  %2682 = vmatmul.f32.gmra.mxu2 %v6131_v9  ;;  %v2217_v10 = vpop.f32.mrf.mxu0  ;;  %v1149_v8 = vld [vmem:[%s7129_s8 + $0x430] sm:$0xff] }
 0x3f8   : > { %v2426_v11 = vpop.f32.mrf.mxu1  ;;  %2891 = vmatmul.f32.gmra.mxu3 %v6132_v12  ;;  %3375 = vmatpush.msra.mxu2 %v1149_v8  ;;  %v6153_v12 = vld [vmem:[%s7122_s19 + $0x680] sm:$0xff] }
 0x3f9   : > { %v2427_v13 = vadd.f32 %v2426_v11, %v2217_v10  ;;  %v1213_v10 = vld [vmem:[%s7129_s8 + $0x630] sm:$0xff] }
 0x3fa   : > { %v2635_v14 = vpop.f32.mrf.mxu2  ;;  %2264 = vmatmul.f32.gmra.mxu0 %v6133_v15  ;;  %3584 = vmatpush.msra.mxu3 %v1213_v10  ;;  %v6174_v10 = vld [vmem:[%s7122_s19 + $0x728] sm:$0xff] }
 0x3fb   : > { %2473 = vmatmul.f32.gmra.mxu1 %v6134_v16  ;;  %v2844_v17 = vpop.f32.mrf.mxu3  ;;  %v2636_v18 = vadd.f32 %v2635_v14, %v2427_v13  ;;  %v6154_v13 = vld [vmem:[%s7122_s19 + $0x688] sm:$0xff]  ;;  %v1021_v16 = vld [vmem:[%s7129_s8 + $0x30] sm:$0xff] }
 0x3fc   : > { %2957 = vmatpush.msra.mxu0 %v1021_v16 }
 0x3fd   : > { %v2845_v19 = vadd.f32 %v2844_v17, %v2636_v18  ;;  %v1085_v17 = vld [vmem:[%s7129_s8 + $0x230] sm:$0xff] }
 0x3fe   : > { %3166 = vmatpush.msra.mxu1 %v1085_v17  ;;  %v6176_v17 = vld [vmem:[%s7122_s19 + $0x758] sm:$0xff] }
 0x3ff   : > { %5511 = vst [vmem:[%s7296_s12 + $0x3e8] sm:$0xff] %v2845_v19  ;;  %2685 = vmatmul.f32.gmra.mxu2 %v6135_v20  ;;  %v2220_v21 = vpop.f32.mrf.mxu0  ;;  %v6155_v19 = vld [vmem:[%s7122_s19 + $0x6b0] sm:$0xff] }
 0x400   : > { %v2429_v22 = vpop.f32.mrf.mxu1  ;;  %2894 = vmatmul.f32.gmra.mxu3 %v6136_v23 }
 0x401   : > { %v2430_v25 = vadd.f32 %v2429_v22, %v2220_v21  ;;  %v6156_v22 = vld [vmem:[%s7122_s19 + $0x6b8] sm:$0xff] }
 0x402   : > { %v2638_v27 = vpop.f32.mrf.mxu2  ;;  %2267 = vmatmul.f32.gmra.mxu0 %v6137_v28 }
 0x403   : > { %2476 = vmatmul.f32.gmra.mxu1 %v6138_v29  ;;  %v2847_v30 = vpop.f32.mrf.mxu3  ;;  %v2639_v31 = vadd.f32 %v2638_v27, %v2430_v25  ;;  %v6157_v25 = vld [vmem:[%s7122_s19 + $0x6a0] sm:$0xff] }
 0x405   : > { %v2848_v34 = vadd.f32 %v2847_v30, %v2639_v31  ;;  %v6159_v30 = vld [vmem:[%s7122_s19 + $0x6d0] sm:$0xff] }
 0x407   : > { %5515 = vst [vmem:[%s7296_s12 + $0x408] sm:$0xff] %v2848_v34  ;;  %2688 = vmatmul.f32.gmra.mxu2 %v6139_v35  ;;  %v2223_v36 = vpop.f32.mrf.mxu0 }
 0x408   : > { %v2432_v37 = vpop.f32.mrf.mxu1  ;;  %2897 = vmatmul.f32.gmra.mxu3 %v6140_v38 }
 0x409   : > { %v2433_v39 = vadd.f32 %v2432_v37, %v2223_v36  ;;  %v6161_v36 = vld [vmem:[%s7122_s19 + $0x6c0] sm:$0xff]  ;;  %v6162_v37 = vld [vmem:[%s7122_s19 + $0x6c8] sm:$0xff] }
 0x40a   : > { %v2641_v40 = vpop.f32.mrf.mxu2  ;;  %2270 = vmatmul.f32.gmra.mxu0 %v6141_v41  ;;  %v6163_v41 = vld [vmem:[%s7122_s19 + $0x6f0] sm:$0xff] }
 0x40b   : > { %2479 = vmatmul.f32.gmra.mxu1 %v6142_v42  ;;  %v2850_v43 = vpop.f32.mrf.mxu3  ;;  %v2642_v44 = vadd.f32 %v2641_v40, %v2433_v39 }
 0x40d   : > { %v2851_v45 = vadd.f32 %v2850_v43, %v2642_v44  ;;  %v6164_v44 = vld [vmem:[%s7122_s19 + $0x6f8] sm:$0xff] }
 0x40f   : > { %5519 = vst [vmem:[%s7296_s12 + $0x428] sm:$0xff] %v2851_v45  ;;  %2691 = vmatmul.f32.gmra.mxu2 %v6143_v46  ;;  %v2226_v47 = vpop.f32.mrf.mxu0 }
 0x410   : > { %v2435_v48 = vpop.f32.mrf.mxu1  ;;  %2900 = vmatmul.f32.gmra.mxu3 %v6144_v49 }
 0x411   : > { %v2436_v50 = vadd.f32 %v2435_v48, %v2226_v47  ;;  %v6165_v47 = vld [vmem:[%s7122_s19 + $0x6e0] sm:$0xff]  ;;  %v6166_v48 = vld [vmem:[%s7122_s19 + $0x6e8] sm:$0xff] }
 0x412   : > { %v2644_v51 = vpop.f32.mrf.mxu2  ;;  %2273 = vmatmul.f32.gmra.mxu0 %v6145_v52  ;;  %v6167_v52 = vld [vmem:[%s7122_s19 + $0x710] sm:$0xff] }
 0x413   : > { %2482 = vmatmul.f32.gmra.mxu1 %v6146_v53  ;;  %v2853_v54 = vpop.f32.mrf.mxu3  ;;  %v2645_v55 = vadd.f32 %v2644_v51, %v2436_v50 }
 0x415   : > { %v2854_v56 = vadd.f32 %v2853_v54, %v2645_v55  ;;  %v6168_v55 = vld [vmem:[%s7122_s19 + $0x718] sm:$0xff] }
 0x417   : > { %5523 = vst [vmem:[%s7296_s12 + $0x448] sm:$0xff] %v2854_v56  ;;  %2694 = vmatmul.f32.gmra.mxu2 %v6147_v57  ;;  %v2229_v58 = vpop.f32.mrf.mxu0  ;;  %v1145_v56 = vld [vmem:[%s7129_s8 + $0x410] sm:$0xff] }
 0x418   : > { %v2438_v59 = vpop.f32.mrf.mxu1  ;;  %2903 = vmatmul.f32.gmra.mxu3 %v6148_v60  ;;  %3376 = vmatpush.msra.mxu2 %v1145_v56  ;;  %v6169_v60 = vld [vmem:[%s7122_s19 + $0x700] sm:$0xff] }
 0x419   : > { %v2439_v61 = vadd.f32 %v2438_v59, %v2229_v58  ;;  %v1209_v58 = vld [vmem:[%s7129_s8 + $0x610] sm:$0xff] }
 0x41a   : > { %v2647_v62 = vpop.f32.mrf.mxu2  ;;  %2276 = vmatmul.f32.gmra.mxu0 %v6149_v63  ;;  %3585 = vmatpush.msra.mxu3 %v1209_v58  ;;  %v6190_v58 = vld [vmem:[%s7122_s19 + $0x7a8] sm:$0xff] }
 0x41b   : > { %2485 = vmatmul.f32.gmra.mxu1 %v6150_v0  ;;  %v2856_v1 = vpop.f32.mrf.mxu3  ;;  %v2648_v2 = vadd.f32 %v2647_v62, %v2439_v61  ;;  %v6170_v61 = vld [vmem:[%s7122_s19 + $0x708] sm:$0xff]  ;;  %v1017_v0 = vld [vmem:[%s7129_s8 + $0x10] sm:$0xff] }
 0x41c   : > { %2958 = vmatpush.msra.mxu0 %v1017_v0 }
 0x41d   : > { %v2857_v3 = vadd.f32 %v2856_v1, %v2648_v2  ;;  %v1081_v1 = vld [vmem:[%s7129_s8 + $0x210] sm:$0xff] }
 0x41e   : > { %3167 = vmatpush.msra.mxu1 %v1081_v1  ;;  %v6192_v1 = vld [vmem:[%s7122_s19 + $0x7d8] sm:$0xff] }
 0x41f   : > { %5527 = vst [vmem:[%s7296_s12 + $0x468] sm:$0xff] %v2857_v3  ;;  %2697 = vmatmul.f32.gmra.mxu2 %v6151_v4  ;;  %v2232_v5 = vpop.f32.mrf.mxu0  ;;  %v6171_v3 = vld [vmem:[%s7122_s19 + $0x730] sm:$0xff] }
 0x420   : > { %v2441_v6 = vpop.f32.mrf.mxu1  ;;  %2906 = vmatmul.f32.gmra.mxu3 %v6152_v7 }
 0x421   : > { %v2442_v9 = vadd.f32 %v2441_v6, %v2232_v5  ;;  %v6172_v6 = vld [vmem:[%s7122_s19 + $0x738] sm:$0xff] }
 0x422   : > { %v2650_v11 = vpop.f32.mrf.mxu2  ;;  %2279 = vmatmul.f32.gmra.mxu0 %v6153_v12 }
 0x423   : > { %2488 = vmatmul.f32.gmra.mxu1 %v6154_v13  ;;  %v2859_v14 = vpop.f32.mrf.mxu3  ;;  %v2651_v15 = vadd.f32 %v2650_v11, %v2442_v9  ;;  %v6173_v9 = vld [vmem:[%s7122_s19 + $0x720] sm:$0xff] }
 0x425   : > { %v2860_v18 = vadd.f32 %v2859_v14, %v2651_v15  ;;  %v6175_v14 = vld [vmem:[%s7122_s19 + $0x750] sm:$0xff] }
 0x427   : > { %5531 = vst [vmem:[%s7296_s12 + $0x488] sm:$0xff] %v2860_v18  ;;  %2700 = vmatmul.f32.gmra.mxu2 %v6155_v19  ;;  %v2235_v20 = vpop.f32.mrf.mxu0 }
 0x428   : > { %v2444_v21 = vpop.f32.mrf.mxu1  ;;  %2909 = vmatmul.f32.gmra.mxu3 %v6156_v22 }
 0x429   : > { %v2445_v23 = vadd.f32 %v2444_v21, %v2235_v20  ;;  %v6177_v20 = vld [vmem:[%s7122_s19 + $0x740] sm:$0xff]  ;;  %v6178_v21 = vld [vmem:[%s7122_s19 + $0x748] sm:$0xff] }
 0x42a   : > { %v2653_v24 = vpop.f32.mrf.mxu2  ;;  %2282 = vmatmul.f32.gmra.mxu0 %v6157_v25  ;;  %v6179_v25 = vld [vmem:[%s7122_s19 + $0x770] sm:$0xff] }
 0x42b   : > { %2491 = vmatmul.f32.gmra.mxu1 %v6158_v26  ;;  %v2862_v27 = vpop.f32.mrf.mxu3  ;;  %v2654_v28 = vadd.f32 %v2653_v24, %v2445_v23 }
 0x42d   : > { %v2863_v29 = vadd.f32 %v2862_v27, %v2654_v28  ;;  %v6180_v28 = vld [vmem:[%s7122_s19 + $0x778] sm:$0xff] }
 0x42f   : > { %5535 = vst [vmem:[%s7296_s12 + $0x4a8] sm:$0xff] %v2863_v29  ;;  %2703 = vmatmul.f32.gmra.mxu2 %v6159_v30  ;;  %v2238_v31 = vpop.f32.mrf.mxu0 }
 0x430   : > { %v2447_v32 = vpop.f32.mrf.mxu1  ;;  %2912 = vmatmul.f32.gmra.mxu3 %v6160_v33 }
 0x431   : > { %v2448_v34 = vadd.f32 %v2447_v32, %v2238_v31  ;;  %v6181_v31 = vld [vmem:[%s7122_s19 + $0x760] sm:$0xff]  ;;  %v6182_v32 = vld [vmem:[%s7122_s19 + $0x768] sm:$0xff] }
 0x432   : > { %v2656_v35 = vpop.f32.mrf.mxu2  ;;  %2285 = vmatmul.f32.gmra.mxu0 %v6161_v36  ;;  %v6183_v36 = vld [vmem:[%s7122_s19 + $0x790] sm:$0xff] }
 0x433   : > { %2494 = vmatmul.f32.gmra.mxu1 %v6162_v37  ;;  %v2865_v38 = vpop.f32.mrf.mxu3  ;;  %v2657_v39 = vadd.f32 %v2656_v35, %v2448_v34 }
 0x435   : > { %v2866_v40 = vadd.f32 %v2865_v38, %v2657_v39  ;;  %v6184_v39 = vld [vmem:[%s7122_s19 + $0x798] sm:$0xff] }
 0x437   : > { %5539 = vst [vmem:[%s7296_s12 + $0x4c8] sm:$0xff] %v2866_v40  ;;  %2706 = vmatmul.f32.gmra.mxu2 %v6163_v41  ;;  %v2241_v42 = vpop.f32.mrf.mxu0  ;;  %v1206_v40 = vld [vmem:[%s7129_s8 + $0x5f8] sm:$0xff] }
 0x438   : > { %v2450_v43 = vpop.f32.mrf.mxu1  ;;  %2915 = vmatmul.f32.gmra.mxu3 %v6164_v44  ;;  %4197 = vmatpush.msrb.mxu2 %v1206_v40  ;;  %v6185_v44 = vld [vmem:[%s7122_s19 + $0x780] sm:$0xff] }
 0x439   : > { %v2451_v45 = vadd.f32 %v2450_v43, %v2241_v42  ;;  %v1270_v42 = vld [vmem:[%s7129_s8 + $0x7f8] sm:$0xff] }
 0x43a   : > { %v2659_v46 = vpop.f32.mrf.mxu2  ;;  %2288 = vmatmul.f32.gmra.mxu0 %v6165_v47  ;;  %4406 = vmatpush.msrb.mxu3 %v1270_v42  ;;  %v6206_v42 = vld [vmem:[%s7122_s19 + $0x28] sm:$0xff] }
 0x43b   : > { %2497 = vmatmul.f32.gmra.mxu1 %v6166_v48  ;;  %v2868_v49 = vpop.f32.mrf.mxu3  ;;  %v2660_v50 = vadd.f32 %v2659_v46, %v2451_v45  ;;  %v6186_v45 = vld [vmem:[%s7122_s19 + $0x788] sm:$0xff]  ;;  %v1078_v48 = vld [vmem:[%s7129_s8 + $0x1f8] sm:$0xff] }
 0x43c   : > { %3779 = vmatpush.msrb.mxu0 %v1078_v48 }
 0x43d   : > { %v2869_v51 = vadd.f32 %v2868_v49, %v2660_v50  ;;  %v1142_v49 = vld [vmem:[%s7129_s8 + $0x3f8] sm:$0xff] }
 0x43e   : > { %3988 = vmatpush.msrb.mxu1 %v1142_v49  ;;  %v6208_v49 = vld [vmem:[%s7122_s19 + $0x58] sm:$0xff] }
 0x43f   : > { %5543 = vst [vmem:[%s7296_s12 + $0x4e8] sm:$0xff] %v2869_v51  ;;  %2709 = vmatmul.f32.gmra.mxu2 %v6167_v52  ;;  %v2244_v53 = vpop.f32.mrf.mxu0  ;;  %v6187_v51 = vld [vmem:[%s7122_s19 + $0x7b0] sm:$0xff] }
 0x440   : > { %v2453_v54 = vpop.f32.mrf.mxu1  ;;  %2918 = vmatmul.f32.gmra.mxu3 %v6168_v55 }
 0x441   : > { %v2454_v57 = vadd.f32 %v2453_v54, %v2244_v53  ;;  %v6188_v54 = vld [vmem:[%s7122_s19 + $0x7b8] sm:$0xff] }
 0x442   : > { %v2662_v59 = vpop.f32.mrf.mxu2  ;;  %2291 = vmatmul.f32.gmra.mxu0 %v6169_v60 }
 0x443   : > { %2500 = vmatmul.f32.gmra.mxu1 %v6170_v61  ;;  %v2871_v62 = vpop.f32.mrf.mxu3  ;;  %v2663_v63 = vadd.f32 %v2662_v59, %v2454_v57  ;;  %v6189_v57 = vld [vmem:[%s7122_s19 + $0x7a0] sm:$0xff] }
 0x445   : > { %v2872_v2 = vadd.f32 %v2871_v62, %v2663_v63  ;;  %v6191_v62 = vld [vmem:[%s7122_s19 + $0x7d0] sm:$0xff] }
 0x447   : > { %5547 = vst [vmem:[%s7296_s12 + $0x508] sm:$0xff] %v2872_v2  ;;  %2712 = vmatmul.f32.gmra.mxu2 %v6171_v3  ;;  %v2247_v4 = vpop.f32.mrf.mxu0 }
 0x448   : > { %v2456_v5 = vpop.f32.mrf.mxu1  ;;  %2921 = vmatmul.f32.gmra.mxu3 %v6172_v6 }
 0x449   : > { %v2457_v7 = vadd.f32 %v2456_v5, %v2247_v4  ;;  %v6193_v4 = vld [vmem:[%s7122_s19 + $0x7c0] sm:$0xff]  ;;  %v6194_v5 = vld [vmem:[%s7122_s19 + $0x7c8] sm:$0xff] }
 0x44a   : > { %v2665_v8 = vpop.f32.mrf.mxu2  ;;  %2294 = vmatmul.f32.gmra.mxu0 %v6173_v9  ;;  %v6195_v9 = vld [vmem:[%s7122_s19 + $0x7f0] sm:$0xff] }
 0x44b   : > { %2503 = vmatmul.f32.gmra.mxu1 %v6174_v10  ;;  %v2874_v11 = vpop.f32.mrf.mxu3  ;;  %v2666_v12 = vadd.f32 %v2665_v8, %v2457_v7 }
 0x44d   : > { %v2875_v13 = vadd.f32 %v2874_v11, %v2666_v12  ;;  %v6196_v12 = vld [vmem:[%s7122_s19 + $0x7f8] sm:$0xff] }
 0x44f   : > { %5551 = vst [vmem:[%s7296_s12 + $0x528] sm:$0xff] %v2875_v13  ;;  %2715 = vmatmul.f32.gmra.mxu2 %v6175_v14  ;;  %v2250_v15 = vpop.f32.mrf.mxu0 }
 0x450   : > { %v2459_v16 = vpop.f32.mrf.mxu1  ;;  %2924 = vmatmul.f32.gmra.mxu3 %v6176_v17 }
 0x451   : > { %v2460_v18 = vadd.f32 %v2459_v16, %v2250_v15  ;;  %v6197_v15 = vld [vmem:[%s7122_s19 + $0x7e0] sm:$0xff]  ;;  %v6198_v16 = vld [vmem:[%s7122_s19 + $0x7e8] sm:$0xff] }
 0x452   : > { %v2668_v19 = vpop.f32.mrf.mxu2  ;;  %2297 = vmatmul.f32.gmra.mxu0 %v6177_v20  ;;  %v6199_v20 = vld [vmem:[%s7122_s19 + $0x10] sm:$0xff] }
 0x453   : > { %2506 = vmatmul.f32.gmra.mxu1 %v6178_v21  ;;  %v2877_v22 = vpop.f32.mrf.mxu3  ;;  %v2669_v23 = vadd.f32 %v2668_v19, %v2460_v18 }
 0x455   : > { %v2878_v24 = vadd.f32 %v2877_v22, %v2669_v23  ;;  %v6200_v23 = vld [vmem:[%s7122_s19 + $0x18] sm:$0xff] }
 0x457   : > { %5555 = vst [vmem:[%s7296_s12 + $0x548] sm:$0xff] %v2878_v24  ;;  %2718 = vmatmul.f32.gmra.mxu2 %v6179_v25  ;;  %v2253_v26 = vpop.f32.mrf.mxu0  ;;  %v1202_v24 = vld [vmem:[%s7129_s8 + $0x5d8] sm:$0xff] }
 0x458   : > { %v2462_v27 = vpop.f32.mrf.mxu1  ;;  %2927 = vmatmul.f32.gmra.mxu3 %v6180_v28  ;;  %4198 = vmatpush.msrb.mxu2 %v1202_v24  ;;  %v6201_v28 = vld [vmem:[%s7122_s19] sm:$0xff] }
 0x459   : > { %v2463_v29 = vadd.f32 %v2462_v27, %v2253_v26  ;;  %v1266_v26 = vld [vmem:[%s7129_s8 + $0x7d8] sm:$0xff] }
 0x45a   : > { %v2671_v30 = vpop.f32.mrf.mxu2  ;;  %2300 = vmatmul.f32.gmra.mxu0 %v6181_v31  ;;  %4407 = vmatpush.msrb.mxu3 %v1266_v26  ;;  %v6222_v26 = vld [vmem:[%s7122_s19 + $0xa8] sm:$0xff] }
 0x45b   : > { %2509 = vmatmul.f32.gmra.mxu1 %v6182_v32  ;;  %v2880_v33 = vpop.f32.mrf.mxu3  ;;  %v2672_v34 = vadd.f32 %v2671_v30, %v2463_v29  ;;  %v6202_v29 = vld [vmem:[%s7122_s19 + $0x8] sm:$0xff]  ;;  %v1074_v32 = vld [vmem:[%s7129_s8 + $0x1d8] sm:$0xff] }
 0x45c   : > { %3780 = vmatpush.msrb.mxu0 %v1074_v32 }
 0x45d   : > { %v2881_v35 = vadd.f32 %v2880_v33, %v2672_v34  ;;  %v1138_v33 = vld [vmem:[%s7129_s8 + $0x3d8] sm:$0xff] }
 0x45e   : > { %3989 = vmatpush.msrb.mxu1 %v1138_v33  ;;  %v6224_v33 = vld [vmem:[%s7122_s19 + $0xd8] sm:$0xff] }
 0x45f   : > { %5559 = vst [vmem:[%s7296_s12 + $0x568] sm:$0xff] %v2881_v35  ;;  %2721 = vmatmul.f32.gmra.mxu2 %v6183_v36  ;;  %v2256_v37 = vpop.f32.mrf.mxu0  ;;  %v6203_v35 = vld [vmem:[%s7122_s19 + $0x30] sm:$0xff] }
 0x460   : > { %v2465_v38 = vpop.f32.mrf.mxu1  ;;  %2930 = vmatmul.f32.gmra.mxu3 %v6184_v39 }
 0x461   : > { %v2466_v41 = vadd.f32 %v2465_v38, %v2256_v37  ;;  %v6204_v38 = vld [vmem:[%s7122_s19 + $0x38] sm:$0xff] }
 0x462   : > { %v2674_v43 = vpop.f32.mrf.mxu2  ;;  %2303 = vmatmul.f32.gmra.mxu0 %v6185_v44 }
 0x463   : > { %2512 = vmatmul.f32.gmra.mxu1 %v6186_v45  ;;  %v2883_v46 = vpop.f32.mrf.mxu3  ;;  %v2675_v47 = vadd.f32 %v2674_v43, %v2466_v41  ;;  %v6205_v41 = vld [vmem:[%s7122_s19 + $0x20] sm:$0xff] }
 0x465   : > { %v2884_v50 = vadd.f32 %v2883_v46, %v2675_v47  ;;  %v6207_v46 = vld [vmem:[%s7122_s19 + $0x50] sm:$0xff] }
 0x467   : > { %5563 = vst [vmem:[%s7296_s12 + $0x588] sm:$0xff] %v2884_v50  ;;  %2724 = vmatmul.f32.gmra.mxu2 %v6187_v51  ;;  %v2259_v52 = vpop.f32.mrf.mxu0 }
 0x468   : > { %v2468_v53 = vpop.f32.mrf.mxu1  ;;  %2933 = vmatmul.f32.gmra.mxu3 %v6188_v54 }
 0x469   : > { %v2469_v55 = vadd.f32 %v2468_v53, %v2259_v52  ;;  %v6209_v52 = vld [vmem:[%s7122_s19 + $0x40] sm:$0xff]  ;;  %v6210_v53 = vld [vmem:[%s7122_s19 + $0x48] sm:$0xff] }
 0x46a   : > { %v2677_v56 = vpop.f32.mrf.mxu2  ;;  %2306 = vmatmul.f32.gmra.mxu0 %v6189_v57  ;;  %v6211_v57 = vld [vmem:[%s7122_s19 + $0x70] sm:$0xff] }
 0x46b   : > { %2515 = vmatmul.f32.gmra.mxu1 %v6190_v58  ;;  %v2886_v59 = vpop.f32.mrf.mxu3  ;;  %v2678_v60 = vadd.f32 %v2677_v56, %v2469_v55 }
 0x46d   : > { %v2887_v61 = vadd.f32 %v2886_v59, %v2678_v60  ;;  %v6212_v60 = vld [vmem:[%s7122_s19 + $0x78] sm:$0xff] }
 0x46f   : > { %5567 = vst [vmem:[%s7296_s12 + $0x5a8] sm:$0xff] %v2887_v61  ;;  %2727 = vmatmul.f32.gmra.mxu2 %v6191_v62  ;;  %v2262_v63 = vpop.f32.mrf.mxu0 }
 0x470   : > { %v2471_v0 = vpop.f32.mrf.mxu1  ;;  %2936 = vmatmul.f32.gmra.mxu3 %v6192_v1 }
 0x471   : > { %v2472_v2 = vadd.f32 %v2471_v0, %v2262_v63  ;;  %v6213_v63 = vld [vmem:[%s7122_s19 + $0x60] sm:$0xff]  ;;  %v6214_v0 = vld [vmem:[%s7122_s19 + $0x68] sm:$0xff] }
 0x472   : > { %v2680_v3 = vpop.f32.mrf.mxu2  ;;  %2309 = vmatmul.f32.gmra.mxu0 %v6193_v4  ;;  %v6215_v4 = vld [vmem:[%s7122_s19 + $0x90] sm:$0xff] }
 0x473   : > { %2518 = vmatmul.f32.gmra.mxu1 %v6194_v5  ;;  %v2889_v6 = vpop.f32.mrf.mxu3  ;;  %v2681_v7 = vadd.f32 %v2680_v3, %v2472_v2 }
 0x475   : > { %v2890_v8 = vadd.f32 %v2889_v6, %v2681_v7  ;;  %v6216_v7 = vld [vmem:[%s7122_s19 + $0x98] sm:$0xff] }
 0x477   : > { %5571 = vst [vmem:[%s7296_s12 + $0x5c8] sm:$0xff] %v2890_v8  ;;  %2730 = vmatmul.f32.gmra.mxu2 %v6195_v9  ;;  %v2265_v10 = vpop.f32.mrf.mxu0  ;;  %v1198_v8 = vld [vmem:[%s7129_s8 + $0x5b8] sm:$0xff] }
 0x478   : > { %v2474_v11 = vpop.f32.mrf.mxu1  ;;  %2939 = vmatmul.f32.gmra.mxu3 %v6196_v12  ;;  %4199 = vmatpush.msrb.mxu2 %v1198_v8  ;;  %v6217_v12 = vld [vmem:[%s7122_s19 + $0x80] sm:$0xff] }
 0x479   : > { %v2475_v13 = vadd.f32 %v2474_v11, %v2265_v10  ;;  %v1262_v10 = vld [vmem:[%s7129_s8 + $0x7b8] sm:$0xff] }
 0x47a   : > { %v2683_v14 = vpop.f32.mrf.mxu2  ;;  %2312 = vmatmul.f32.gmra.mxu0 %v6197_v15  ;;  %4408 = vmatpush.msrb.mxu3 %v1262_v10  ;;  %v6238_v10 = vld [vmem:[%s7122_s19 + $0x128] sm:$0xff] }
 0x47b   : > { %2521 = vmatmul.f32.gmra.mxu1 %v6198_v16  ;;  %v2892_v17 = vpop.f32.mrf.mxu3  ;;  %v2684_v18 = vadd.f32 %v2683_v14, %v2475_v13  ;;  %v6218_v13 = vld [vmem:[%s7122_s19 + $0x88] sm:$0xff]  ;;  %v1070_v16 = vld [vmem:[%s7129_s8 + $0x1b8] sm:$0xff] }
 0x47c   : > { %3781 = vmatpush.msrb.mxu0 %v1070_v16 }
 0x47d   : > { %v2893_v19 = vadd.f32 %v2892_v17, %v2684_v18  ;;  %v1134_v17 = vld [vmem:[%s7129_s8 + $0x3b8] sm:$0xff] }
 0x47e   : > { %3990 = vmatpush.msrb.mxu1 %v1134_v17  ;;  %v6240_v17 = vld [vmem:[%s7122_s19 + $0x158] sm:$0xff] }
 0x47f   : > { %5575 = vst [vmem:[%s7296_s12 + $0x5e8] sm:$0xff] %v2893_v19  ;;  %3377 = vmatmul.f32.vlgmr.msra.gmra.mxu2 %v6199_v20  ;;  %v2268_v21 = vpop.f32.mrf.mxu0  ;;  %v6219_v19 = vld [vmem:[%s7122_s19 + $0xb0] sm:$0xff] }
 0x480   : > { %v2477_v22 = vpop.f32.mrf.mxu1  ;;  %3586 = vmatmul.f32.vlgmr.msra.gmra.mxu3 %v6200_v23 }
 0x481   : > { %v2478_v25 = vadd.f32 %v2477_v22, %v2268_v21  ;;  %v6220_v22 = vld [vmem:[%s7122_s19 + $0xb8] sm:$0xff] }
 0x482   : > { %v2686_v27 = vpop.f32.mrf.mxu2  ;;  %2959 = vmatmul.f32.vlgmr.msra.gmra.mxu0 %v6201_v28 }
 0x483   : > { %3168 = vmatmul.f32.vlgmr.msra.gmra.mxu1 %v6202_v29  ;;  %v2895_v30 = vpop.f32.mrf.mxu3  ;;  %v2687_v31 = vadd.f32 %v2686_v27, %v2478_v25  ;;  %v6221_v25 = vld [vmem:[%s7122_s19 + $0xa0] sm:$0xff] }
 0x485   : > { %v2896_v34 = vadd.f32 %v2895_v30, %v2687_v31  ;;  %v6223_v30 = vld [vmem:[%s7122_s19 + $0xd0] sm:$0xff] }
 0x487   : > { %5579 = vst [vmem:[%s7296_s12 + $0x608] sm:$0xff] %v2896_v34  ;;  %3380 = vmatmul.f32.gmra.mxu2 %v6203_v35  ;;  %v2271_v36 = vpop.f32.mrf.mxu0 }
 0x488   : > { %v2480_v37 = vpop.f32.mrf.mxu1  ;;  %3589 = vmatmul.f32.gmra.mxu3 %v6204_v38 }
 0x489   : > { %v2481_v39 = vadd.f32 %v2480_v37, %v2271_v36  ;;  %v6225_v36 = vld [vmem:[%s7122_s19 + $0xc0] sm:$0xff]  ;;  %v6226_v37 = vld [vmem:[%s7122_s19 + $0xc8] sm:$0xff] }
 0x48a   : > { %v2689_v40 = vpop.f32.mrf.mxu2  ;;  %2962 = vmatmul.f32.gmra.mxu0 %v6205_v41  ;;  %v6227_v41 = vld [vmem:[%s7122_s19 + $0xf0] sm:$0xff] }
 0x48b   : > { %3171 = vmatmul.f32.gmra.mxu1 %v6206_v42  ;;  %v2898_v43 = vpop.f32.mrf.mxu3  ;;  %v2690_v44 = vadd.f32 %v2689_v40, %v2481_v39 }
 0x48d   : > { %v2899_v45 = vadd.f32 %v2898_v43, %v2690_v44  ;;  %v6228_v44 = vld [vmem:[%s7122_s19 + $0xf8] sm:$0xff] }
 0x48f   : > { %5583 = vst [vmem:[%s7296_s12 + $0x628] sm:$0xff] %v2899_v45  ;;  %3383 = vmatmul.f32.gmra.mxu2 %v6207_v46  ;;  %v2274_v47 = vpop.f32.mrf.mxu0 }
 0x490   : > { %v2483_v48 = vpop.f32.mrf.mxu1  ;;  %3592 = vmatmul.f32.gmra.mxu3 %v6208_v49 }
 0x491   : > { %v2484_v50 = vadd.f32 %v2483_v48, %v2274_v47  ;;  %v6229_v47 = vld [vmem:[%s7122_s19 + $0xe0] sm:$0xff]  ;;  %v6230_v48 = vld [vmem:[%s7122_s19 + $0xe8] sm:$0xff] }
 0x492   : > { %v2692_v51 = vpop.f32.mrf.mxu2  ;;  %2965 = vmatmul.f32.gmra.mxu0 %v6209_v52  ;;  %v6231_v52 = vld [vmem:[%s7122_s19 + $0x110] sm:$0xff] }
 0x493   : > { %3174 = vmatmul.f32.gmra.mxu1 %v6210_v53  ;;  %v2901_v54 = vpop.f32.mrf.mxu3  ;;  %v2693_v55 = vadd.f32 %v2692_v51, %v2484_v50 }
 0x495   : > { %v2902_v56 = vadd.f32 %v2901_v54, %v2693_v55  ;;  %v6232_v55 = vld [vmem:[%s7122_s19 + $0x118] sm:$0xff] }
 0x497   : > { %5587 = vst [vmem:[%s7296_s12 + $0x648] sm:$0xff] %v2902_v56  ;;  %3386 = vmatmul.f32.gmra.mxu2 %v6211_v57  ;;  %v2277_v58 = vpop.f32.mrf.mxu0  ;;  %v1194_v56 = vld [vmem:[%s7129_s8 + $0x598] sm:$0xff] }
 0x498   : > { %v2486_v59 = vpop.f32.mrf.mxu1  ;;  %3595 = vmatmul.f32.gmra.mxu3 %v6212_v60  ;;  %4200 = vmatpush.msrb.mxu2 %v1194_v56  ;;  %v6233_v60 = vld [vmem:[%s7122_s19 + $0x100] sm:$0xff] }
 0x499   : > { %v2487_v61 = vadd.f32 %v2486_v59, %v2277_v58  ;;  %v1258_v58 = vld [vmem:[%s7129_s8 + $0x798] sm:$0xff] }
 0x49a   : > { %v2695_v62 = vpop.f32.mrf.mxu2  ;;  %2968 = vmatmul.f32.gmra.mxu0 %v6213_v63  ;;  %4409 = vmatpush.msrb.mxu3 %v1258_v58  ;;  %v6254_v58 = vld [vmem:[%s7122_s19 + $0x1a8] sm:$0xff] }
 0x49b   : > { %3177 = vmatmul.f32.gmra.mxu1 %v6214_v0  ;;  %v2904_v1 = vpop.f32.mrf.mxu3  ;;  %v2696_v2 = vadd.f32 %v2695_v62, %v2487_v61  ;;  %v6234_v61 = vld [vmem:[%s7122_s19 + $0x108] sm:$0xff]  ;;  %v1066_v0 = vld [vmem:[%s7129_s8 + $0x198] sm:$0xff] }
 0x49c   : > { %3782 = vmatpush.msrb.mxu0 %v1066_v0 }
 0x49d   : > { %v2905_v3 = vadd.f32 %v2904_v1, %v2696_v2  ;;  %v1130_v1 = vld [vmem:[%s7129_s8 + $0x398] sm:$0xff] }
 0x49e   : > { %3991 = vmatpush.msrb.mxu1 %v1130_v1  ;;  %v6256_v1 = vld [vmem:[%s7122_s19 + $0x1d8] sm:$0xff] }
 0x49f   : > { %5591 = vst [vmem:[%s7296_s12 + $0x668] sm:$0xff] %v2905_v3  ;;  %3389 = vmatmul.f32.gmra.mxu2 %v6215_v4  ;;  %v2280_v5 = vpop.f32.mrf.mxu0  ;;  %v6235_v3 = vld [vmem:[%s7122_s19 + $0x130] sm:$0xff] }
 0x4a0   : > { %v2489_v6 = vpop.f32.mrf.mxu1  ;;  %3598 = vmatmul.f32.gmra.mxu3 %v6216_v7 }
 0x4a1   : > { %v2490_v9 = vadd.f32 %v2489_v6, %v2280_v5  ;;  %v6236_v6 = vld [vmem:[%s7122_s19 + $0x138] sm:$0xff] }
 0x4a2   : > { %v2698_v11 = vpop.f32.mrf.mxu2  ;;  %2971 = vmatmul.f32.gmra.mxu0 %v6217_v12 }
 0x4a3   : > { %3180 = vmatmul.f32.gmra.mxu1 %v6218_v13  ;;  %v2907_v14 = vpop.f32.mrf.mxu3  ;;  %v2699_v15 = vadd.f32 %v2698_v11, %v2490_v9  ;;  %v6237_v9 = vld [vmem:[%s7122_s19 + $0x120] sm:$0xff] }
 0x4a5   : > { %v2908_v18 = vadd.f32 %v2907_v14, %v2699_v15  ;;  %v6239_v14 = vld [vmem:[%s7122_s19 + $0x150] sm:$0xff] }
 0x4a7   : > { %5595 = vst [vmem:[%s7296_s12 + $0x688] sm:$0xff] %v2908_v18  ;;  %3392 = vmatmul.f32.gmra.mxu2 %v6219_v19  ;;  %v2283_v20 = vpop.f32.mrf.mxu0 }
 0x4a8   : > { %v2492_v21 = vpop.f32.mrf.mxu1  ;;  %3601 = vmatmul.f32.gmra.mxu3 %v6220_v22 }
 0x4a9   : > { %v2493_v23 = vadd.f32 %v2492_v21, %v2283_v20  ;;  %v6241_v20 = vld [vmem:[%s7122_s19 + $0x140] sm:$0xff]  ;;  %v6242_v21 = vld [vmem:[%s7122_s19 + $0x148] sm:$0xff] }
 0x4aa   : > { %v2701_v24 = vpop.f32.mrf.mxu2  ;;  %2974 = vmatmul.f32.gmra.mxu0 %v6221_v25  ;;  %v6243_v25 = vld [vmem:[%s7122_s19 + $0x170] sm:$0xff] }
 0x4ab   : > { %3183 = vmatmul.f32.gmra.mxu1 %v6222_v26  ;;  %v2910_v27 = vpop.f32.mrf.mxu3  ;;  %v2702_v28 = vadd.f32 %v2701_v24, %v2493_v23 }
 0x4ad   : > { %v2911_v29 = vadd.f32 %v2910_v27, %v2702_v28  ;;  %v6244_v28 = vld [vmem:[%s7122_s19 + $0x178] sm:$0xff] }
 0x4af   : > { %5599 = vst [vmem:[%s7296_s12 + $0x6a8] sm:$0xff] %v2911_v29  ;;  %3395 = vmatmul.f32.gmra.mxu2 %v6223_v30  ;;  %v2286_v31 = vpop.f32.mrf.mxu0 }
 0x4b0   : > { %v2495_v32 = vpop.f32.mrf.mxu1  ;;  %3604 = vmatmul.f32.gmra.mxu3 %v6224_v33 }
 0x4b1   : > { %v2496_v34 = vadd.f32 %v2495_v32, %v2286_v31  ;;  %v6245_v31 = vld [vmem:[%s7122_s19 + $0x160] sm:$0xff]  ;;  %v6246_v32 = vld [vmem:[%s7122_s19 + $0x168] sm:$0xff] }
 0x4b2   : > { %v2704_v35 = vpop.f32.mrf.mxu2  ;;  %2977 = vmatmul.f32.gmra.mxu0 %v6225_v36  ;;  %v6247_v36 = vld [vmem:[%s7122_s19 + $0x190] sm:$0xff] }
 0x4b3   : > { %3186 = vmatmul.f32.gmra.mxu1 %v6226_v37  ;;  %v2913_v38 = vpop.f32.mrf.mxu3  ;;  %v2705_v39 = vadd.f32 %v2704_v35, %v2496_v34 }
 0x4b5   : > { %v2914_v40 = vadd.f32 %v2913_v38, %v2705_v39  ;;  %v6248_v39 = vld [vmem:[%s7122_s19 + $0x198] sm:$0xff] }
 0x4b7   : > { %5603 = vst [vmem:[%s7296_s12 + $0x6c8] sm:$0xff] %v2914_v40  ;;  %3398 = vmatmul.f32.gmra.mxu2 %v6227_v41  ;;  %v2289_v42 = vpop.f32.mrf.mxu0  ;;  %v1190_v40 = vld [vmem:[%s7129_s8 + $0x578] sm:$0xff] }
 0x4b8   : > { %v2498_v43 = vpop.f32.mrf.mxu1  ;;  %3607 = vmatmul.f32.gmra.mxu3 %v6228_v44  ;;  %4201 = vmatpush.msrb.mxu2 %v1190_v40  ;;  %v6249_v44 = vld [vmem:[%s7122_s19 + $0x180] sm:$0xff] }
 0x4b9   : > { %v2499_v45 = vadd.f32 %v2498_v43, %v2289_v42  ;;  %v1254_v42 = vld [vmem:[%s7129_s8 + $0x778] sm:$0xff] }
 0x4ba   : > { %v2707_v46 = vpop.f32.mrf.mxu2  ;;  %2980 = vmatmul.f32.gmra.mxu0 %v6229_v47  ;;  %4410 = vmatpush.msrb.mxu3 %v1254_v42  ;;  %v6270_v42 = vld [vmem:[%s7122_s19 + $0x228] sm:$0xff] }
 0x4bb   : > { %3189 = vmatmul.f32.gmra.mxu1 %v6230_v48  ;;  %v2916_v49 = vpop.f32.mrf.mxu3  ;;  %v2708_v50 = vadd.f32 %v2707_v46, %v2499_v45  ;;  %v6250_v45 = vld [vmem:[%s7122_s19 + $0x188] sm:$0xff]  ;;  %v1062_v48 = vld [vmem:[%s7129_s8 + $0x178] sm:$0xff] }
 0x4bc   : > { %3783 = vmatpush.msrb.mxu0 %v1062_v48 }
 0x4bd   : > { %v2917_v51 = vadd.f32 %v2916_v49, %v2708_v50  ;;  %v1126_v49 = vld [vmem:[%s7129_s8 + $0x378] sm:$0xff] }
 0x4be   : > { %3992 = vmatpush.msrb.mxu1 %v1126_v49  ;;  %v6272_v49 = vld [vmem:[%s7122_s19 + $0x258] sm:$0xff] }
 0x4bf   : > { %5607 = vst [vmem:[%s7296_s12 + $0x6e8] sm:$0xff] %v2917_v51  ;;  %3401 = vmatmul.f32.gmra.mxu2 %v6231_v52  ;;  %v2292_v53 = vpop.f32.mrf.mxu0  ;;  %v6251_v51 = vld [vmem:[%s7122_s19 + $0x1b0] sm:$0xff] }
 0x4c0   : > { %v2501_v54 = vpop.f32.mrf.mxu1  ;;  %3610 = vmatmul.f32.gmra.mxu3 %v6232_v55 }
 0x4c1   : > { %v2502_v57 = vadd.f32 %v2501_v54, %v2292_v53  ;;  %v6252_v54 = vld [vmem:[%s7122_s19 + $0x1b8] sm:$0xff] }
 0x4c2   : > { %v2710_v59 = vpop.f32.mrf.mxu2  ;;  %2983 = vmatmul.f32.gmra.mxu0 %v6233_v60 }
 0x4c3   : > { %3192 = vmatmul.f32.gmra.mxu1 %v6234_v61  ;;  %v2919_v62 = vpop.f32.mrf.mxu3  ;;  %v2711_v63 = vadd.f32 %v2710_v59, %v2502_v57  ;;  %v6253_v57 = vld [vmem:[%s7122_s19 + $0x1a0] sm:$0xff] }
 0x4c5   : > { %v2920_v2 = vadd.f32 %v2919_v62, %v2711_v63  ;;  %v6255_v62 = vld [vmem:[%s7122_s19 + $0x1d0] sm:$0xff] }
 0x4c7   : > { %5611 = vst [vmem:[%s7296_s12 + $0x708] sm:$0xff] %v2920_v2  ;;  %3404 = vmatmul.f32.gmra.mxu2 %v6235_v3  ;;  %v2295_v4 = vpop.f32.mrf.mxu0 }
 0x4c8   : > { %v2504_v5 = vpop.f32.mrf.mxu1  ;;  %3613 = vmatmul.f32.gmra.mxu3 %v6236_v6 }
 0x4c9   : > { %v2505_v7 = vadd.f32 %v2504_v5, %v2295_v4  ;;  %v6257_v4 = vld [vmem:[%s7122_s19 + $0x1c0] sm:$0xff]  ;;  %v6258_v5 = vld [vmem:[%s7122_s19 + $0x1c8] sm:$0xff] }
 0x4ca   : > { %v2713_v8 = vpop.f32.mrf.mxu2  ;;  %2986 = vmatmul.f32.gmra.mxu0 %v6237_v9  ;;  %v6259_v9 = vld [vmem:[%s7122_s19 + $0x1f0] sm:$0xff] }
 0x4cb   : > { %3195 = vmatmul.f32.gmra.mxu1 %v6238_v10  ;;  %v2922_v11 = vpop.f32.mrf.mxu3  ;;  %v2714_v12 = vadd.f32 %v2713_v8, %v2505_v7 }
 0x4cd   : > { %v2923_v13 = vadd.f32 %v2922_v11, %v2714_v12  ;;  %v6260_v12 = vld [vmem:[%s7122_s19 + $0x1f8] sm:$0xff] }
 0x4cf   : > { %5615 = vst [vmem:[%s7296_s12 + $0x728] sm:$0xff] %v2923_v13  ;;  %3407 = vmatmul.f32.gmra.mxu2 %v6239_v14  ;;  %v2298_v15 = vpop.f32.mrf.mxu0 }
 0x4d0   : > { %v2507_v16 = vpop.f32.mrf.mxu1  ;;  %3616 = vmatmul.f32.gmra.mxu3 %v6240_v17 }
 0x4d1   : > { %v2508_v18 = vadd.f32 %v2507_v16, %v2298_v15  ;;  %v6261_v15 = vld [vmem:[%s7122_s19 + $0x1e0] sm:$0xff]  ;;  %v6262_v16 = vld [vmem:[%s7122_s19 + $0x1e8] sm:$0xff] }
 0x4d2   : > { %v2716_v19 = vpop.f32.mrf.mxu2  ;;  %2989 = vmatmul.f32.gmra.mxu0 %v6241_v20  ;;  %v6263_v20 = vld [vmem:[%s7122_s19 + $0x210] sm:$0xff] }
 0x4d3   : > { %3198 = vmatmul.f32.gmra.mxu1 %v6242_v21  ;;  %v2925_v22 = vpop.f32.mrf.mxu3  ;;  %v2717_v23 = vadd.f32 %v2716_v19, %v2508_v18 }
 0x4d5   : > { %v2926_v24 = vadd.f32 %v2925_v22, %v2717_v23  ;;  %v6264_v23 = vld [vmem:[%s7122_s19 + $0x218] sm:$0xff] }
 0x4d7   : > { %5619 = vst [vmem:[%s7296_s12 + $0x748] sm:$0xff] %v2926_v24  ;;  %3410 = vmatmul.f32.gmra.mxu2 %v6243_v25  ;;  %v2301_v26 = vpop.f32.mrf.mxu0  ;;  %v1186_v24 = vld [vmem:[%s7129_s8 + $0x558] sm:$0xff] }
 0x4d8   : > { %v2510_v27 = vpop.f32.mrf.mxu1  ;;  %3619 = vmatmul.f32.gmra.mxu3 %v6244_v28  ;;  %4202 = vmatpush.msrb.mxu2 %v1186_v24  ;;  %v6265_v28 = vld [vmem:[%s7122_s19 + $0x200] sm:$0xff] }
 0x4d9   : > { %v2511_v29 = vadd.f32 %v2510_v27, %v2301_v26  ;;  %v1250_v26 = vld [vmem:[%s7129_s8 + $0x758] sm:$0xff] }
 0x4da   : > { %v2719_v30 = vpop.f32.mrf.mxu2  ;;  %2992 = vmatmul.f32.gmra.mxu0 %v6245_v31  ;;  %4411 = vmatpush.msrb.mxu3 %v1250_v26  ;;  %v6286_v26 = vld [vmem:[%s7122_s19 + $0x2a8] sm:$0xff] }
 0x4db   : > { %3201 = vmatmul.f32.gmra.mxu1 %v6246_v32  ;;  %v2928_v33 = vpop.f32.mrf.mxu3  ;;  %v2720_v34 = vadd.f32 %v2719_v30, %v2511_v29  ;;  %v6266_v29 = vld [vmem:[%s7122_s19 + $0x208] sm:$0xff]  ;;  %v1058_v32 = vld [vmem:[%s7129_s8 + $0x158] sm:$0xff] }
 0x4dc   : > { %3784 = vmatpush.msrb.mxu0 %v1058_v32 }
 0x4dd   : > { %v2929_v35 = vadd.f32 %v2928_v33, %v2720_v34  ;;  %v1122_v33 = vld [vmem:[%s7129_s8 + $0x358] sm:$0xff] }
 0x4de   : > { %3993 = vmatpush.msrb.mxu1 %v1122_v33  ;;  %v6288_v33 = vld [vmem:[%s7122_s19 + $0x2d8] sm:$0xff] }
 0x4df   : > { %5623 = vst [vmem:[%s7296_s12 + $0x768] sm:$0xff] %v2929_v35  ;;  %3413 = vmatmul.f32.gmra.mxu2 %v6247_v36  ;;  %v2304_v37 = vpop.f32.mrf.mxu0  ;;  %v6267_v35 = vld [vmem:[%s7122_s19 + $0x230] sm:$0xff] }
 0x4e0   : > { %v2513_v38 = vpop.f32.mrf.mxu1  ;;  %3622 = vmatmul.f32.gmra.mxu3 %v6248_v39 }
 0x4e1   : > { %v2514_v41 = vadd.f32 %v2513_v38, %v2304_v37  ;;  %v6268_v38 = vld [vmem:[%s7122_s19 + $0x238] sm:$0xff] }
 0x4e2   : > { %v2722_v43 = vpop.f32.mrf.mxu2  ;;  %2995 = vmatmul.f32.gmra.mxu0 %v6249_v44 }
 0x4e3   : > { %3204 = vmatmul.f32.gmra.mxu1 %v6250_v45  ;;  %v2931_v46 = vpop.f32.mrf.mxu3  ;;  %v2723_v47 = vadd.f32 %v2722_v43, %v2514_v41  ;;  %v6269_v41 = vld [vmem:[%s7122_s19 + $0x220] sm:$0xff] }
 0x4e5   : > { %v2932_v50 = vadd.f32 %v2931_v46, %v2723_v47  ;;  %v6271_v46 = vld [vmem:[%s7122_s19 + $0x250] sm:$0xff] }
 0x4e7   : > { %5627 = vst [vmem:[%s7296_s12 + $0x788] sm:$0xff] %v2932_v50  ;;  %3416 = vmatmul.f32.gmra.mxu2 %v6251_v51  ;;  %v2307_v52 = vpop.f32.mrf.mxu0 }
 0x4e8   : > { %v2516_v53 = vpop.f32.mrf.mxu1  ;;  %3625 = vmatmul.f32.gmra.mxu3 %v6252_v54 }
 0x4e9   : > { %v2517_v55 = vadd.f32 %v2516_v53, %v2307_v52  ;;  %v6273_v52 = vld [vmem:[%s7122_s19 + $0x240] sm:$0xff]  ;;  %v6274_v53 = vld [vmem:[%s7122_s19 + $0x248] sm:$0xff] }
 0x4ea   : > { %v2725_v56 = vpop.f32.mrf.mxu2  ;;  %2998 = vmatmul.f32.gmra.mxu0 %v6253_v57  ;;  %v6275_v57 = vld [vmem:[%s7122_s19 + $0x270] sm:$0xff] }
 0x4eb   : > { %3207 = vmatmul.f32.gmra.mxu1 %v6254_v58  ;;  %v2934_v59 = vpop.f32.mrf.mxu3  ;;  %v2726_v60 = vadd.f32 %v2725_v56, %v2517_v55 }
 0x4ed   : > { %v2935_v61 = vadd.f32 %v2934_v59, %v2726_v60  ;;  %v6276_v60 = vld [vmem:[%s7122_s19 + $0x278] sm:$0xff] }
 0x4ef   : > { %5631 = vst [vmem:[%s7296_s12 + $0x7a8] sm:$0xff] %v2935_v61  ;;  %3419 = vmatmul.f32.gmra.mxu2 %v6255_v62  ;;  %v2310_v63 = vpop.f32.mrf.mxu0 }
 0x4f0   : > { %v2519_v0 = vpop.f32.mrf.mxu1  ;;  %3628 = vmatmul.f32.gmra.mxu3 %v6256_v1 }
 0x4f1   : > { %v2520_v2 = vadd.f32 %v2519_v0, %v2310_v63  ;;  %v6277_v63 = vld [vmem:[%s7122_s19 + $0x260] sm:$0xff]  ;;  %v6278_v0 = vld [vmem:[%s7122_s19 + $0x268] sm:$0xff] }
 0x4f2   : > { %v2728_v3 = vpop.f32.mrf.mxu2  ;;  %3001 = vmatmul.f32.gmra.mxu0 %v6257_v4  ;;  %v6279_v4 = vld [vmem:[%s7122_s19 + $0x290] sm:$0xff] }
 0x4f3   : > { %3210 = vmatmul.f32.gmra.mxu1 %v6258_v5  ;;  %v2937_v6 = vpop.f32.mrf.mxu3  ;;  %v2729_v7 = vadd.f32 %v2728_v3, %v2520_v2 }
 0x4f5   : > { %v2938_v8 = vadd.f32 %v2937_v6, %v2729_v7  ;;  %v6280_v7 = vld [vmem:[%s7122_s19 + $0x298] sm:$0xff] }
 0x4f7   : > { %5635 = vst [vmem:[%s7296_s12 + $0x7c8] sm:$0xff] %v2938_v8  ;;  %3422 = vmatmul.f32.gmra.mxu2 %v6259_v9  ;;  %v2313_v10 = vpop.f32.mrf.mxu0  ;;  %v1182_v8 = vld [vmem:[%s7129_s8 + $0x538] sm:$0xff] }
 0x4f8   : > { %v2522_v11 = vpop.f32.mrf.mxu1  ;;  %3631 = vmatmul.f32.gmra.mxu3 %v6260_v12  ;;  %4203 = vmatpush.msrb.mxu2 %v1182_v8  ;;  %v6281_v12 = vld [vmem:[%s7122_s19 + $0x280] sm:$0xff] }
 0x4f9   : > { %v2523_v13 = vadd.f32 %v2522_v11, %v2313_v10  ;;  %v1246_v10 = vld [vmem:[%s7129_s8 + $0x738] sm:$0xff] }
 0x4fa   : > { %v2731_v14 = vpop.f32.mrf.mxu2  ;;  %3004 = vmatmul.f32.gmra.mxu0 %v6261_v15  ;;  %4412 = vmatpush.msrb.mxu3 %v1246_v10  ;;  %v6302_v10 = vld [vmem:[%s7122_s19 + $0x328] sm:$0xff] }
 0x4fb   : > { %3213 = vmatmul.f32.gmra.mxu1 %v6262_v16  ;;  %v2940_v17 = vpop.f32.mrf.mxu3  ;;  %v2732_v18 = vadd.f32 %v2731_v14, %v2523_v13  ;;  %v6282_v13 = vld [vmem:[%s7122_s19 + $0x288] sm:$0xff]  ;;  %v1054_v16 = vld [vmem:[%s7129_s8 + $0x138] sm:$0xff] }
 0x4fc   : > { %3785 = vmatpush.msrb.mxu0 %v1054_v16 }
 0x4fd   : > { %v2941_v19 = vadd.f32 %v2940_v17, %v2732_v18  ;;  %v1118_v17 = vld [vmem:[%s7129_s8 + $0x338] sm:$0xff] }
 0x4fe   : > { %3994 = vmatpush.msrb.mxu1 %v1118_v17  ;;  %v6304_v17 = vld [vmem:[%s7122_s19 + $0x358] sm:$0xff] }
 0x4ff   : > { %5639 = vst [vmem:[%s7296_s12 + $0x7e8] sm:$0xff] %v2941_v19  ;;  %3425 = vmatmul.f32.gmra.mxu2 %v6263_v20  ;;  %v2960_v21 = vpop.f32.mrf.mxu0  ;;  %v6283_v19 = vld [vmem:[%s7122_s19 + $0x2b0] sm:$0xff] }
 0x500   : > { %v3169_v22 = vpop.f32.mrf.mxu1  ;;  %3634 = vmatmul.f32.gmra.mxu3 %v6264_v23 }
 0x501   : > { %v3170_v25 = vadd.f32 %v3169_v22, %v2960_v21  ;;  %v6284_v22 = vld [vmem:[%s7122_s19 + $0x2b8] sm:$0xff] }
 0x502   : > { %v3378_v27 = vpop.f32.mrf.mxu2  ;;  %3007 = vmatmul.f32.gmra.mxu0 %v6265_v28 }
 0x503   : > { %3216 = vmatmul.f32.gmra.mxu1 %v6266_v29  ;;  %v3587_v30 = vpop.f32.mrf.mxu3  ;;  %v3379_v31 = vadd.f32 %v3378_v27, %v3170_v25  ;;  %v6285_v25 = vld [vmem:[%s7122_s19 + $0x2a0] sm:$0xff] }
 0x505   : > { %v3588_v34 = vadd.f32 %v3587_v30, %v3379_v31  ;;  %v6287_v30 = vld [vmem:[%s7122_s19 + $0x2d0] sm:$0xff] }
 0x507   : > { %5388 = vst [vmem:[%s7296_s12 + $0x10] sm:$0xff] %v3588_v34  ;;  %3428 = vmatmul.f32.gmra.mxu2 %v6267_v35  ;;  %v2963_v36 = vpop.f32.mrf.mxu0 }
 0x508   : > { %v3172_v37 = vpop.f32.mrf.mxu1  ;;  %3637 = vmatmul.f32.gmra.mxu3 %v6268_v38 }
 0x509   : > { %v3173_v39 = vadd.f32 %v3172_v37, %v2963_v36  ;;  %v6289_v36 = vld [vmem:[%s7122_s19 + $0x2c0] sm:$0xff]  ;;  %v6290_v37 = vld [vmem:[%s7122_s19 + $0x2c8] sm:$0xff] }
 0x50a   : > { %v3381_v40 = vpop.f32.mrf.mxu2  ;;  %3010 = vmatmul.f32.gmra.mxu0 %v6269_v41  ;;  %v6291_v41 = vld [vmem:[%s7122_s19 + $0x2f0] sm:$0xff] }
 0x50b   : > { %3219 = vmatmul.f32.gmra.mxu1 %v6270_v42  ;;  %v3590_v43 = vpop.f32.mrf.mxu3  ;;  %v3382_v44 = vadd.f32 %v3381_v40, %v3173_v39 }
 0x50d   : > { %v3591_v45 = vadd.f32 %v3590_v43, %v3382_v44  ;;  %v6292_v44 = vld [vmem:[%s7122_s19 + $0x2f8] sm:$0xff] }
 0x50f   : > { %5392 = vst [vmem:[%s7296_s12 + $0x30] sm:$0xff] %v3591_v45  ;;  %3431 = vmatmul.f32.gmra.mxu2 %v6271_v46  ;;  %v2966_v47 = vpop.f32.mrf.mxu0 }
 0x510   : > { %v3175_v48 = vpop.f32.mrf.mxu1  ;;  %3640 = vmatmul.f32.gmra.mxu3 %v6272_v49 }
 0x511   : > { %v3176_v50 = vadd.f32 %v3175_v48, %v2966_v47  ;;  %v6293_v47 = vld [vmem:[%s7122_s19 + $0x2e0] sm:$0xff]  ;;  %v6294_v48 = vld [vmem:[%s7122_s19 + $0x2e8] sm:$0xff] }
 0x512   : > { %v3384_v51 = vpop.f32.mrf.mxu2  ;;  %3013 = vmatmul.f32.gmra.mxu0 %v6273_v52  ;;  %v6295_v52 = vld [vmem:[%s7122_s19 + $0x310] sm:$0xff] }
 0x513   : > { %3222 = vmatmul.f32.gmra.mxu1 %v6274_v53  ;;  %v3593_v54 = vpop.f32.mrf.mxu3  ;;  %v3385_v55 = vadd.f32 %v3384_v51, %v3176_v50 }
 0x515   : > { %v3594_v56 = vadd.f32 %v3593_v54, %v3385_v55  ;;  %v6296_v55 = vld [vmem:[%s7122_s19 + $0x318] sm:$0xff] }
 0x517   : > { %5396 = vst [vmem:[%s7296_s12 + $0x50] sm:$0xff] %v3594_v56  ;;  %3434 = vmatmul.f32.gmra.mxu2 %v6275_v57  ;;  %v2969_v58 = vpop.f32.mrf.mxu0  ;;  %v1178_v56 = vld [vmem:[%s7129_s8 + $0x518] sm:$0xff] }
 0x518   : > { %v3178_v59 = vpop.f32.mrf.mxu1  ;;  %3643 = vmatmul.f32.gmra.mxu3 %v6276_v60  ;;  %4204 = vmatpush.msrb.mxu2 %v1178_v56  ;;  %v6297_v60 = vld [vmem:[%s7122_s19 + $0x300] sm:$0xff] }
 0x519   : > { %v3179_v61 = vadd.f32 %v3178_v59, %v2969_v58  ;;  %v1242_v58 = vld [vmem:[%s7129_s8 + $0x718] sm:$0xff] }
 0x51a   : > { %v3387_v62 = vpop.f32.mrf.mxu2  ;;  %3016 = vmatmul.f32.gmra.mxu0 %v6277_v63  ;;  %4413 = vmatpush.msrb.mxu3 %v1242_v58  ;;  %v6318_v58 = vld [vmem:[%s7122_s19 + $0x3a8] sm:$0xff] }
 0x51b   : > { %3225 = vmatmul.f32.gmra.mxu1 %v6278_v0  ;;  %v3596_v1 = vpop.f32.mrf.mxu3  ;;  %v3388_v2 = vadd.f32 %v3387_v62, %v3179_v61  ;;  %v6298_v61 = vld [vmem:[%s7122_s19 + $0x308] sm:$0xff]  ;;  %v1050_v0 = vld [vmem:[%s7129_s8 + $0x118] sm:$0xff] }
 0x51c   : > { %3786 = vmatpush.msrb.mxu0 %v1050_v0 }
 0x51d   : > { %v3597_v3 = vadd.f32 %v3596_v1, %v3388_v2  ;;  %v1114_v1 = vld [vmem:[%s7129_s8 + $0x318] sm:$0xff] }
 0x51e   : > { %3995 = vmatpush.msrb.mxu1 %v1114_v1  ;;  %v6320_v1 = vld [vmem:[%s7122_s19 + $0x3d8] sm:$0xff] }
 0x51f   : > { %5400 = vst [vmem:[%s7296_s12 + $0x70] sm:$0xff] %v3597_v3  ;;  %3437 = vmatmul.f32.gmra.mxu2 %v6279_v4  ;;  %v2972_v5 = vpop.f32.mrf.mxu0  ;;  %v6299_v3 = vld [vmem:[%s7122_s19 + $0x330] sm:$0xff] }
 0x520   : > { %v3181_v6 = vpop.f32.mrf.mxu1  ;;  %3646 = vmatmul.f32.gmra.mxu3 %v6280_v7 }
 0x521   : > { %v3182_v9 = vadd.f32 %v3181_v6, %v2972_v5  ;;  %v6300_v6 = vld [vmem:[%s7122_s19 + $0x338] sm:$0xff] }
 0x522   : > { %v3390_v11 = vpop.f32.mrf.mxu2  ;;  %3019 = vmatmul.f32.gmra.mxu0 %v6281_v12 }
 0x523   : > { %3228 = vmatmul.f32.gmra.mxu1 %v6282_v13  ;;  %v3599_v14 = vpop.f32.mrf.mxu3  ;;  %v3391_v15 = vadd.f32 %v3390_v11, %v3182_v9  ;;  %v6301_v9 = vld [vmem:[%s7122_s19 + $0x320] sm:$0xff] }
 0x525   : > { %v3600_v18 = vadd.f32 %v3599_v14, %v3391_v15  ;;  %v6303_v14 = vld [vmem:[%s7122_s19 + $0x350] sm:$0xff] }
 0x527   : > { %5404 = vst [vmem:[%s7296_s12 + $0x90] sm:$0xff] %v3600_v18  ;;  %3440 = vmatmul.f32.gmra.mxu2 %v6283_v19  ;;  %v2975_v20 = vpop.f32.mrf.mxu0 }
 0x528   : > { %v3184_v21 = vpop.f32.mrf.mxu1  ;;  %3649 = vmatmul.f32.gmra.mxu3 %v6284_v22 }
 0x529   : > { %v3185_v23 = vadd.f32 %v3184_v21, %v2975_v20  ;;  %v6305_v20 = vld [vmem:[%s7122_s19 + $0x340] sm:$0xff]  ;;  %v6306_v21 = vld [vmem:[%s7122_s19 + $0x348] sm:$0xff] }
 0x52a   : > { %v3393_v24 = vpop.f32.mrf.mxu2  ;;  %3022 = vmatmul.f32.gmra.mxu0 %v6285_v25  ;;  %v6307_v25 = vld [vmem:[%s7122_s19 + $0x370] sm:$0xff] }
 0x52b   : > { %3231 = vmatmul.f32.gmra.mxu1 %v6286_v26  ;;  %v3602_v27 = vpop.f32.mrf.mxu3  ;;  %v3394_v28 = vadd.f32 %v3393_v24, %v3185_v23 }
 0x52d   : > { %v3603_v29 = vadd.f32 %v3602_v27, %v3394_v28  ;;  %v6308_v28 = vld [vmem:[%s7122_s19 + $0x378] sm:$0xff] }
 0x52f   : > { %5408 = vst [vmem:[%s7296_s12 + $0xb0] sm:$0xff] %v3603_v29  ;;  %3443 = vmatmul.f32.gmra.mxu2 %v6287_v30  ;;  %v2978_v31 = vpop.f32.mrf.mxu0 }
 0x530   : > { %v3187_v32 = vpop.f32.mrf.mxu1  ;;  %3652 = vmatmul.f32.gmra.mxu3 %v6288_v33 }
 0x531   : > { %v3188_v34 = vadd.f32 %v3187_v32, %v2978_v31  ;;  %v6309_v31 = vld [vmem:[%s7122_s19 + $0x360] sm:$0xff]  ;;  %v6310_v32 = vld [vmem:[%s7122_s19 + $0x368] sm:$0xff] }
 0x532   : > { %v3396_v35 = vpop.f32.mrf.mxu2  ;;  %3025 = vmatmul.f32.gmra.mxu0 %v6289_v36  ;;  %v6311_v36 = vld [vmem:[%s7122_s19 + $0x390] sm:$0xff] }
 0x533   : > { %3234 = vmatmul.f32.gmra.mxu1 %v6290_v37  ;;  %v3605_v38 = vpop.f32.mrf.mxu3  ;;  %v3397_v39 = vadd.f32 %v3396_v35, %v3188_v34 }
 0x535   : > { %v3606_v40 = vadd.f32 %v3605_v38, %v3397_v39  ;;  %v6312_v39 = vld [vmem:[%s7122_s19 + $0x398] sm:$0xff] }
 0x537   : > { %5412 = vst [vmem:[%s7296_s12 + $0xd0] sm:$0xff] %v3606_v40  ;;  %3446 = vmatmul.f32.gmra.mxu2 %v6291_v41  ;;  %v2981_v42 = vpop.f32.mrf.mxu0  ;;  %v1174_v40 = vld [vmem:[%s7129_s8 + $0x4f8] sm:$0xff] }
 0x538   : > { %v3190_v43 = vpop.f32.mrf.mxu1  ;;  %3655 = vmatmul.f32.gmra.mxu3 %v6292_v44  ;;  %4205 = vmatpush.msrb.mxu2 %v1174_v40  ;;  %v6313_v44 = vld [vmem:[%s7122_s19 + $0x380] sm:$0xff] }
 0x539   : > { %v3191_v45 = vadd.f32 %v3190_v43, %v2981_v42  ;;  %v1238_v42 = vld [vmem:[%s7129_s8 + $0x6f8] sm:$0xff] }
 0x53a   : > { %v3399_v46 = vpop.f32.mrf.mxu2  ;;  %3028 = vmatmul.f32.gmra.mxu0 %v6293_v47  ;;  %4414 = vmatpush.msrb.mxu3 %v1238_v42  ;;  %v6334_v42 = vld [vmem:[%s7122_s19 + $0x428] sm:$0xff] }
 0x53b   : > { %3237 = vmatmul.f32.gmra.mxu1 %v6294_v48  ;;  %v3608_v49 = vpop.f32.mrf.mxu3  ;;  %v3400_v50 = vadd.f32 %v3399_v46, %v3191_v45  ;;  %v6314_v45 = vld [vmem:[%s7122_s19 + $0x388] sm:$0xff]  ;;  %v1046_v48 = vld [vmem:[%s7129_s8 + $0xf8] sm:$0xff] }
 0x53c   : > { %3787 = vmatpush.msrb.mxu0 %v1046_v48 }
 0x53d   : > { %v3609_v51 = vadd.f32 %v3608_v49, %v3400_v50  ;;  %v1110_v49 = vld [vmem:[%s7129_s8 + $0x2f8] sm:$0xff] }
 0x53e   : > { %3996 = vmatpush.msrb.mxu1 %v1110_v49  ;;  %v6336_v49 = vld [vmem:[%s7122_s19 + $0x458] sm:$0xff] }
 0x53f   : > { %5416 = vst [vmem:[%s7296_s12 + $0xf0] sm:$0xff] %v3609_v51  ;;  %3449 = vmatmul.f32.gmra.mxu2 %v6295_v52  ;;  %v2984_v53 = vpop.f32.mrf.mxu0  ;;  %v6315_v51 = vld [vmem:[%s7122_s19 + $0x3b0] sm:$0xff] }
 0x540   : > { %v3193_v54 = vpop.f32.mrf.mxu1  ;;  %3658 = vmatmul.f32.gmra.mxu3 %v6296_v55 }
 0x541   : > { %v3194_v57 = vadd.f32 %v3193_v54, %v2984_v53  ;;  %v6316_v54 = vld [vmem:[%s7122_s19 + $0x3b8] sm:$0xff] }
 0x542   : > { %v3402_v59 = vpop.f32.mrf.mxu2  ;;  %3031 = vmatmul.f32.gmra.mxu0 %v6297_v60 }
 0x543   : > { %3240 = vmatmul.f32.gmra.mxu1 %v6298_v61  ;;  %v3611_v62 = vpop.f32.mrf.mxu3  ;;  %v3403_v63 = vadd.f32 %v3402_v59, %v3194_v57  ;;  %v6317_v57 = vld [vmem:[%s7122_s19 + $0x3a0] sm:$0xff] }
 0x545   : > { %v3612_v2 = vadd.f32 %v3611_v62, %v3403_v63  ;;  %v6319_v62 = vld [vmem:[%s7122_s19 + $0x3d0] sm:$0xff] }
 0x547   : > { %5420 = vst [vmem:[%s7296_s12 + $0x110] sm:$0xff] %v3612_v2  ;;  %3452 = vmatmul.f32.gmra.mxu2 %v6299_v3  ;;  %v2987_v4 = vpop.f32.mrf.mxu0 }
 0x548   : > { %v3196_v5 = vpop.f32.mrf.mxu1  ;;  %3661 = vmatmul.f32.gmra.mxu3 %v6300_v6 }
 0x549   : > { %v3197_v7 = vadd.f32 %v3196_v5, %v2987_v4  ;;  %v6321_v4 = vld [vmem:[%s7122_s19 + $0x3c0] sm:$0xff]  ;;  %v6322_v5 = vld [vmem:[%s7122_s19 + $0x3c8] sm:$0xff] }
 0x54a   : > { %v3405_v8 = vpop.f32.mrf.mxu2  ;;  %3034 = vmatmul.f32.gmra.mxu0 %v6301_v9  ;;  %v6323_v9 = vld [vmem:[%s7122_s19 + $0x3f0] sm:$0xff] }
 0x54b   : > { %3243 = vmatmul.f32.gmra.mxu1 %v6302_v10  ;;  %v3614_v11 = vpop.f32.mrf.mxu3  ;;  %v3406_v12 = vadd.f32 %v3405_v8, %v3197_v7 }
 0x54d   : > { %v3615_v13 = vadd.f32 %v3614_v11, %v3406_v12  ;;  %v6324_v12 = vld [vmem:[%s7122_s19 + $0x3f8] sm:$0xff] }
 0x54f   : > { %5424 = vst [vmem:[%s7296_s12 + $0x130] sm:$0xff] %v3615_v13  ;;  %3455 = vmatmul.f32.gmra.mxu2 %v6303_v14  ;;  %v2990_v15 = vpop.f32.mrf.mxu0 }
 0x550   : > { %v3199_v16 = vpop.f32.mrf.mxu1  ;;  %3664 = vmatmul.f32.gmra.mxu3 %v6304_v17 }
 0x551   : > { %v3200_v18 = vadd.f32 %v3199_v16, %v2990_v15  ;;  %v6325_v15 = vld [vmem:[%s7122_s19 + $0x3e0] sm:$0xff]  ;;  %v6326_v16 = vld [vmem:[%s7122_s19 + $0x3e8] sm:$0xff] }
 0x552   : > { %v3408_v19 = vpop.f32.mrf.mxu2  ;;  %3037 = vmatmul.f32.gmra.mxu0 %v6305_v20  ;;  %v6327_v20 = vld [vmem:[%s7122_s19 + $0x410] sm:$0xff] }
 0x553   : > { %3246 = vmatmul.f32.gmra.mxu1 %v6306_v21  ;;  %v3617_v22 = vpop.f32.mrf.mxu3  ;;  %v3409_v23 = vadd.f32 %v3408_v19, %v3200_v18 }
 0x555   : > { %v3618_v24 = vadd.f32 %v3617_v22, %v3409_v23  ;;  %v6328_v23 = vld [vmem:[%s7122_s19 + $0x418] sm:$0xff] }
 0x557   : > { %5428 = vst [vmem:[%s7296_s12 + $0x150] sm:$0xff] %v3618_v24  ;;  %3458 = vmatmul.f32.gmra.mxu2 %v6307_v25  ;;  %v2993_v26 = vpop.f32.mrf.mxu0  ;;  %v1170_v24 = vld [vmem:[%s7129_s8 + $0x4d8] sm:$0xff] }
 0x558   : > { %v3202_v27 = vpop.f32.mrf.mxu1  ;;  %3667 = vmatmul.f32.gmra.mxu3 %v6308_v28  ;;  %4206 = vmatpush.msrb.mxu2 %v1170_v24  ;;  %v6329_v28 = vld [vmem:[%s7122_s19 + $0x400] sm:$0xff] }
 0x559   : > { %v3203_v29 = vadd.f32 %v3202_v27, %v2993_v26  ;;  %v1234_v26 = vld [vmem:[%s7129_s8 + $0x6d8] sm:$0xff] }
 0x55a   : > { %v3411_v30 = vpop.f32.mrf.mxu2  ;;  %3040 = vmatmul.f32.gmra.mxu0 %v6309_v31  ;;  %4415 = vmatpush.msrb.mxu3 %v1234_v26  ;;  %v6350_v26 = vld [vmem:[%s7122_s19 + $0x4a8] sm:$0xff] }
 0x55b   : > { %3249 = vmatmul.f32.gmra.mxu1 %v6310_v32  ;;  %v3620_v33 = vpop.f32.mrf.mxu3  ;;  %v3412_v34 = vadd.f32 %v3411_v30, %v3203_v29  ;;  %v6330_v29 = vld [vmem:[%s7122_s19 + $0x408] sm:$0xff]  ;;  %v1042_v32 = vld [vmem:[%s7129_s8 + $0xd8] sm:$0xff] }
 0x55c   : > { %3788 = vmatpush.msrb.mxu0 %v1042_v32 }
 0x55d   : > { %v3621_v35 = vadd.f32 %v3620_v33, %v3412_v34  ;;  %v1106_v33 = vld [vmem:[%s7129_s8 + $0x2d8] sm:$0xff] }
 0x55e   : > { %3997 = vmatpush.msrb.mxu1 %v1106_v33  ;;  %v6352_v33 = vld [vmem:[%s7122_s19 + $0x4d8] sm:$0xff] }
 0x55f   : > { %5432 = vst [vmem:[%s7296_s12 + $0x170] sm:$0xff] %v3621_v35  ;;  %3461 = vmatmul.f32.gmra.mxu2 %v6311_v36  ;;  %v2996_v37 = vpop.f32.mrf.mxu0  ;;  %v6331_v35 = vld [vmem:[%s7122_s19 + $0x430] sm:$0xff] }
 0x560   : > { %v3205_v38 = vpop.f32.mrf.mxu1  ;;  %3670 = vmatmul.f32.gmra.mxu3 %v6312_v39 }
 0x561   : > { %v3206_v41 = vadd.f32 %v3205_v38, %v2996_v37  ;;  %v6332_v38 = vld [vmem:[%s7122_s19 + $0x438] sm:$0xff] }
 0x562   : > { %v3414_v43 = vpop.f32.mrf.mxu2  ;;  %3043 = vmatmul.f32.gmra.mxu0 %v6313_v44 }
 0x563   : > { %3252 = vmatmul.f32.gmra.mxu1 %v6314_v45  ;;  %v3623_v46 = vpop.f32.mrf.mxu3  ;;  %v3415_v47 = vadd.f32 %v3414_v43, %v3206_v41  ;;  %v6333_v41 = vld [vmem:[%s7122_s19 + $0x420] sm:$0xff] }
 0x565   : > { %v3624_v50 = vadd.f32 %v3623_v46, %v3415_v47  ;;  %v6335_v46 = vld [vmem:[%s7122_s19 + $0x450] sm:$0xff] }
 0x567   : > { %5436 = vst [vmem:[%s7296_s12 + $0x190] sm:$0xff] %v3624_v50  ;;  %3464 = vmatmul.f32.gmra.mxu2 %v6315_v51  ;;  %v2999_v52 = vpop.f32.mrf.mxu0 }
 0x568   : > { %v3208_v53 = vpop.f32.mrf.mxu1  ;;  %3673 = vmatmul.f32.gmra.mxu3 %v6316_v54 }
 0x569   : > { %v3209_v55 = vadd.f32 %v3208_v53, %v2999_v52  ;;  %v6337_v52 = vld [vmem:[%s7122_s19 + $0x440] sm:$0xff]  ;;  %v6338_v53 = vld [vmem:[%s7122_s19 + $0x448] sm:$0xff] }
 0x56a   : > { %v3417_v56 = vpop.f32.mrf.mxu2  ;;  %3046 = vmatmul.f32.gmra.mxu0 %v6317_v57  ;;  %v6339_v57 = vld [vmem:[%s7122_s19 + $0x470] sm:$0xff] }
 0x56b   : > { %3255 = vmatmul.f32.gmra.mxu1 %v6318_v58  ;;  %v3626_v59 = vpop.f32.mrf.mxu3  ;;  %v3418_v60 = vadd.f32 %v3417_v56, %v3209_v55 }
 0x56d   : > { %v3627_v61 = vadd.f32 %v3626_v59, %v3418_v60  ;;  %v6340_v60 = vld [vmem:[%s7122_s19 + $0x478] sm:$0xff] }
 0x56f   : > { %5440 = vst [vmem:[%s7296_s12 + $0x1b0] sm:$0xff] %v3627_v61  ;;  %3467 = vmatmul.f32.gmra.mxu2 %v6319_v62  ;;  %v3002_v63 = vpop.f32.mrf.mxu0 }
 0x570   : > { %v3211_v0 = vpop.f32.mrf.mxu1  ;;  %3676 = vmatmul.f32.gmra.mxu3 %v6320_v1 }
 0x571   : > { %v3212_v2 = vadd.f32 %v3211_v0, %v3002_v63  ;;  %v6341_v63 = vld [vmem:[%s7122_s19 + $0x460] sm:$0xff]  ;;  %v6342_v0 = vld [vmem:[%s7122_s19 + $0x468] sm:$0xff] }
 0x572   : > { %v3420_v3 = vpop.f32.mrf.mxu2  ;;  %3049 = vmatmul.f32.gmra.mxu0 %v6321_v4  ;;  %v6343_v4 = vld [vmem:[%s7122_s19 + $0x490] sm:$0xff] }
 0x573   : > { %3258 = vmatmul.f32.gmra.mxu1 %v6322_v5  ;;  %v3629_v6 = vpop.f32.mrf.mxu3  ;;  %v3421_v7 = vadd.f32 %v3420_v3, %v3212_v2 }
 0x575   : > { %v3630_v8 = vadd.f32 %v3629_v6, %v3421_v7  ;;  %v6344_v7 = vld [vmem:[%s7122_s19 + $0x498] sm:$0xff] }
 0x577   : > { %5444 = vst [vmem:[%s7296_s12 + $0x1d0] sm:$0xff] %v3630_v8  ;;  %3470 = vmatmul.f32.gmra.mxu2 %v6323_v9  ;;  %v3005_v10 = vpop.f32.mrf.mxu0  ;;  %v1166_v8 = vld [vmem:[%s7129_s8 + $0x4b8] sm:$0xff] }
 0x578   : > { %v3214_v11 = vpop.f32.mrf.mxu1  ;;  %3679 = vmatmul.f32.gmra.mxu3 %v6324_v12  ;;  %4207 = vmatpush.msrb.mxu2 %v1166_v8  ;;  %v6345_v12 = vld [vmem:[%s7122_s19 + $0x480] sm:$0xff] }
 0x579   : > { %v3215_v13 = vadd.f32 %v3214_v11, %v3005_v10  ;;  %v1230_v10 = vld [vmem:[%s7129_s8 + $0x6b8] sm:$0xff] }
 0x57a   : > { %v3423_v14 = vpop.f32.mrf.mxu2  ;;  %3052 = vmatmul.f32.gmra.mxu0 %v6325_v15  ;;  %4416 = vmatpush.msrb.mxu3 %v1230_v10  ;;  %v6366_v10 = vld [vmem:[%s7122_s19 + $0x528] sm:$0xff] }
 0x57b   : > { %3261 = vmatmul.f32.gmra.mxu1 %v6326_v16  ;;  %v3632_v17 = vpop.f32.mrf.mxu3  ;;  %v3424_v18 = vadd.f32 %v3423_v14, %v3215_v13  ;;  %v6346_v13 = vld [vmem:[%s7122_s19 + $0x488] sm:$0xff]  ;;  %v1038_v16 = vld [vmem:[%s7129_s8 + $0xb8] sm:$0xff] }
 0x57c   : > { %3789 = vmatpush.msrb.mxu0 %v1038_v16 }
 0x57d   : > { %v3633_v19 = vadd.f32 %v3632_v17, %v3424_v18  ;;  %v1102_v17 = vld [vmem:[%s7129_s8 + $0x2b8] sm:$0xff] }
 0x57e   : > { %3998 = vmatpush.msrb.mxu1 %v1102_v17  ;;  %v6368_v17 = vld [vmem:[%s7122_s19 + $0x558] sm:$0xff] }
 0x57f   : > { %5448 = vst [vmem:[%s7296_s12 + $0x1f0] sm:$0xff] %v3633_v19  ;;  %3473 = vmatmul.f32.gmra.mxu2 %v6327_v20  ;;  %v3008_v21 = vpop.f32.mrf.mxu0  ;;  %v6347_v19 = vld [vmem:[%s7122_s19 + $0x4b0] sm:$0xff] }
 0x580   : > { %v3217_v22 = vpop.f32.mrf.mxu1  ;;  %3682 = vmatmul.f32.gmra.mxu3 %v6328_v23 }
 0x581   : > { %v3218_v25 = vadd.f32 %v3217_v22, %v3008_v21  ;;  %v6348_v22 = vld [vmem:[%s7122_s19 + $0x4b8] sm:$0xff] }
 0x582   : > { %v3426_v27 = vpop.f32.mrf.mxu2  ;;  %3055 = vmatmul.f32.gmra.mxu0 %v6329_v28 }
 0x583   : > { %3264 = vmatmul.f32.gmra.mxu1 %v6330_v29  ;;  %v3635_v30 = vpop.f32.mrf.mxu3  ;;  %v3427_v31 = vadd.f32 %v3426_v27, %v3218_v25  ;;  %v6349_v25 = vld [vmem:[%s7122_s19 + $0x4a0] sm:$0xff] }
 0x585   : > { %v3636_v34 = vadd.f32 %v3635_v30, %v3427_v31  ;;  %v6351_v30 = vld [vmem:[%s7122_s19 + $0x4d0] sm:$0xff] }
 0x587   : > { %5452 = vst [vmem:[%s7296_s12 + $0x210] sm:$0xff] %v3636_v34  ;;  %3476 = vmatmul.f32.gmra.mxu2 %v6331_v35  ;;  %v3011_v36 = vpop.f32.mrf.mxu0 }
 0x588   : > { %v3220_v37 = vpop.f32.mrf.mxu1  ;;  %3685 = vmatmul.f32.gmra.mxu3 %v6332_v38 }
 0x589   : > { %v3221_v39 = vadd.f32 %v3220_v37, %v3011_v36  ;;  %v6353_v36 = vld [vmem:[%s7122_s19 + $0x4c0] sm:$0xff]  ;;  %v6354_v37 = vld [vmem:[%s7122_s19 + $0x4c8] sm:$0xff] }
 0x58a   : > { %v3429_v40 = vpop.f32.mrf.mxu2  ;;  %3058 = vmatmul.f32.gmra.mxu0 %v6333_v41  ;;  %v6355_v41 = vld [vmem:[%s7122_s19 + $0x4f0] sm:$0xff] }
 0x58b   : > { %3267 = vmatmul.f32.gmra.mxu1 %v6334_v42  ;;  %v3638_v43 = vpop.f32.mrf.mxu3  ;;  %v3430_v44 = vadd.f32 %v3429_v40, %v3221_v39 }
 0x58d   : > { %v3639_v45 = vadd.f32 %v3638_v43, %v3430_v44  ;;  %v6356_v44 = vld [vmem:[%s7122_s19 + $0x4f8] sm:$0xff] }
 0x58f   : > { %5456 = vst [vmem:[%s7296_s12 + $0x230] sm:$0xff] %v3639_v45  ;;  %3479 = vmatmul.f32.gmra.mxu2 %v6335_v46  ;;  %v3014_v47 = vpop.f32.mrf.mxu0 }
 0x590   : > { %v3223_v48 = vpop.f32.mrf.mxu1  ;;  %3688 = vmatmul.f32.gmra.mxu3 %v6336_v49 }
 0x591   : > { %v3224_v50 = vadd.f32 %v3223_v48, %v3014_v47  ;;  %v6357_v47 = vld [vmem:[%s7122_s19 + $0x4e0] sm:$0xff]  ;;  %v6358_v48 = vld [vmem:[%s7122_s19 + $0x4e8] sm:$0xff] }
 0x592   : > { %v3432_v51 = vpop.f32.mrf.mxu2  ;;  %3061 = vmatmul.f32.gmra.mxu0 %v6337_v52  ;;  %v6359_v52 = vld [vmem:[%s7122_s19 + $0x510] sm:$0xff] }
 0x593   : > { %3270 = vmatmul.f32.gmra.mxu1 %v6338_v53  ;;  %v3641_v54 = vpop.f32.mrf.mxu3  ;;  %v3433_v55 = vadd.f32 %v3432_v51, %v3224_v50 }
 0x595   : > { %v3642_v56 = vadd.f32 %v3641_v54, %v3433_v55  ;;  %v6360_v55 = vld [vmem:[%s7122_s19 + $0x518] sm:$0xff] }
 0x597   : > { %5460 = vst [vmem:[%s7296_s12 + $0x250] sm:$0xff] %v3642_v56  ;;  %3482 = vmatmul.f32.gmra.mxu2 %v6339_v57  ;;  %v3017_v58 = vpop.f32.mrf.mxu0  ;;  %v1162_v56 = vld [vmem:[%s7129_s8 + $0x498] sm:$0xff] }
 0x598   : > { %v3226_v59 = vpop.f32.mrf.mxu1  ;;  %3691 = vmatmul.f32.gmra.mxu3 %v6340_v60  ;;  %4208 = vmatpush.msrb.mxu2 %v1162_v56  ;;  %v6361_v60 = vld [vmem:[%s7122_s19 + $0x500] sm:$0xff] }
 0x599   : > { %v3227_v61 = vadd.f32 %v3226_v59, %v3017_v58  ;;  %v1226_v58 = vld [vmem:[%s7129_s8 + $0x698] sm:$0xff] }
 0x59a   : > { %v3435_v62 = vpop.f32.mrf.mxu2  ;;  %3064 = vmatmul.f32.gmra.mxu0 %v6341_v63  ;;  %4417 = vmatpush.msrb.mxu3 %v1226_v58  ;;  %v6382_v58 = vld [vmem:[%s7122_s19 + $0x5a8] sm:$0xff] }
 0x59b   : > { %3273 = vmatmul.f32.gmra.mxu1 %v6342_v0  ;;  %v3644_v1 = vpop.f32.mrf.mxu3  ;;  %v3436_v2 = vadd.f32 %v3435_v62, %v3227_v61  ;;  %v6362_v61 = vld [vmem:[%s7122_s19 + $0x508] sm:$0xff]  ;;  %v1034_v0 = vld [vmem:[%s7129_s8 + $0x98] sm:$0xff] }
 0x59c   : > { %3790 = vmatpush.msrb.mxu0 %v1034_v0 }
 0x59d   : > { %v3645_v3 = vadd.f32 %v3644_v1, %v3436_v2  ;;  %v1098_v1 = vld [vmem:[%s7129_s8 + $0x298] sm:$0xff] }
 0x59e   : > { %3999 = vmatpush.msrb.mxu1 %v1098_v1  ;;  %v6384_v1 = vld [vmem:[%s7122_s19 + $0x5d8] sm:$0xff] }
 0x59f   : > { %5464 = vst [vmem:[%s7296_s12 + $0x270] sm:$0xff] %v3645_v3  ;;  %3485 = vmatmul.f32.gmra.mxu2 %v6343_v4  ;;  %v3020_v5 = vpop.f32.mrf.mxu0  ;;  %v6363_v3 = vld [vmem:[%s7122_s19 + $0x530] sm:$0xff] }
 0x5a0   : > { %v3229_v6 = vpop.f32.mrf.mxu1  ;;  %3694 = vmatmul.f32.gmra.mxu3 %v6344_v7 }
 0x5a1   : > { %v3230_v9 = vadd.f32 %v3229_v6, %v3020_v5  ;;  %v6364_v6 = vld [vmem:[%s7122_s19 + $0x538] sm:$0xff] }
 0x5a2   : > { %v3438_v11 = vpop.f32.mrf.mxu2  ;;  %3067 = vmatmul.f32.gmra.mxu0 %v6345_v12 }
 0x5a3   : > { %3276 = vmatmul.f32.gmra.mxu1 %v6346_v13  ;;  %v3647_v14 = vpop.f32.mrf.mxu3  ;;  %v3439_v15 = vadd.f32 %v3438_v11, %v3230_v9  ;;  %v6365_v9 = vld [vmem:[%s7122_s19 + $0x520] sm:$0xff] }
 0x5a5   : > { %v3648_v18 = vadd.f32 %v3647_v14, %v3439_v15  ;;  %v6367_v14 = vld [vmem:[%s7122_s19 + $0x550] sm:$0xff] }
 0x5a7   : > { %5468 = vst [vmem:[%s7296_s12 + $0x290] sm:$0xff] %v3648_v18  ;;  %3488 = vmatmul.f32.gmra.mxu2 %v6347_v19  ;;  %v3023_v20 = vpop.f32.mrf.mxu0 }
 0x5a8   : > { %v3232_v21 = vpop.f32.mrf.mxu1  ;;  %3697 = vmatmul.f32.gmra.mxu3 %v6348_v22 }
 0x5a9   : > { %v3233_v23 = vadd.f32 %v3232_v21, %v3023_v20  ;;  %v6369_v20 = vld [vmem:[%s7122_s19 + $0x540] sm:$0xff]  ;;  %v6370_v21 = vld [vmem:[%s7122_s19 + $0x548] sm:$0xff] }
 0x5aa   : > { %v3441_v24 = vpop.f32.mrf.mxu2  ;;  %3070 = vmatmul.f32.gmra.mxu0 %v6349_v25  ;;  %v6371_v25 = vld [vmem:[%s7122_s19 + $0x570] sm:$0xff] }
 0x5ab   : > { %3279 = vmatmul.f32.gmra.mxu1 %v6350_v26  ;;  %v3650_v27 = vpop.f32.mrf.mxu3  ;;  %v3442_v28 = vadd.f32 %v3441_v24, %v3233_v23 }
 0x5ad   : > { %v3651_v29 = vadd.f32 %v3650_v27, %v3442_v28  ;;  %v6372_v28 = vld [vmem:[%s7122_s19 + $0x578] sm:$0xff] }
 0x5af   : > { %5472 = vst [vmem:[%s7296_s12 + $0x2b0] sm:$0xff] %v3651_v29  ;;  %3491 = vmatmul.f32.gmra.mxu2 %v6351_v30  ;;  %v3026_v31 = vpop.f32.mrf.mxu0 }
 0x5b0   : > { %v3235_v32 = vpop.f32.mrf.mxu1  ;;  %3700 = vmatmul.f32.gmra.mxu3 %v6352_v33 }
 0x5b1   : > { %v3236_v34 = vadd.f32 %v3235_v32, %v3026_v31  ;;  %v6373_v31 = vld [vmem:[%s7122_s19 + $0x560] sm:$0xff]  ;;  %v6374_v32 = vld [vmem:[%s7122_s19 + $0x568] sm:$0xff] }
 0x5b2   : > { %v3444_v35 = vpop.f32.mrf.mxu2  ;;  %3073 = vmatmul.f32.gmra.mxu0 %v6353_v36  ;;  %v6375_v36 = vld [vmem:[%s7122_s19 + $0x590] sm:$0xff] }
 0x5b3   : > { %3282 = vmatmul.f32.gmra.mxu1 %v6354_v37  ;;  %v3653_v38 = vpop.f32.mrf.mxu3  ;;  %v3445_v39 = vadd.f32 %v3444_v35, %v3236_v34 }
 0x5b5   : > { %v3654_v40 = vadd.f32 %v3653_v38, %v3445_v39  ;;  %v6376_v39 = vld [vmem:[%s7122_s19 + $0x598] sm:$0xff] }
 0x5b7   : > { %5476 = vst [vmem:[%s7296_s12 + $0x2d0] sm:$0xff] %v3654_v40  ;;  %3494 = vmatmul.f32.gmra.mxu2 %v6355_v41  ;;  %v3029_v42 = vpop.f32.mrf.mxu0  ;;  %v1158_v40 = vld [vmem:[%s7129_s8 + $0x478] sm:$0xff] }
 0x5b8   : > { %v3238_v43 = vpop.f32.mrf.mxu1  ;;  %3703 = vmatmul.f32.gmra.mxu3 %v6356_v44  ;;  %4209 = vmatpush.msrb.mxu2 %v1158_v40  ;;  %v6377_v44 = vld [vmem:[%s7122_s19 + $0x580] sm:$0xff] }
 0x5b9   : > { %v3239_v45 = vadd.f32 %v3238_v43, %v3029_v42  ;;  %v1222_v42 = vld [vmem:[%s7129_s8 + $0x678] sm:$0xff] }
 0x5ba   : > { %v3447_v46 = vpop.f32.mrf.mxu2  ;;  %3076 = vmatmul.f32.gmra.mxu0 %v6357_v47  ;;  %4418 = vmatpush.msrb.mxu3 %v1222_v42  ;;  %v6398_v42 = vld [vmem:[%s7122_s19 + $0x628] sm:$0xff] }
 0x5bb   : > { %3285 = vmatmul.f32.gmra.mxu1 %v6358_v48  ;;  %v3656_v49 = vpop.f32.mrf.mxu3  ;;  %v3448_v50 = vadd.f32 %v3447_v46, %v3239_v45  ;;  %v6378_v45 = vld [vmem:[%s7122_s19 + $0x588] sm:$0xff]  ;;  %v1030_v48 = vld [vmem:[%s7129_s8 + $0x78] sm:$0xff] }
 0x5bc   : > { %3791 = vmatpush.msrb.mxu0 %v1030_v48 }
 0x5bd   : > { %v3657_v51 = vadd.f32 %v3656_v49, %v3448_v50  ;;  %v1094_v49 = vld [vmem:[%s7129_s8 + $0x278] sm:$0xff] }
 0x5be   : > { %4000 = vmatpush.msrb.mxu1 %v1094_v49  ;;  %v6400_v49 = vld [vmem:[%s7122_s19 + $0x658] sm:$0xff] }
 0x5bf   : > { %5480 = vst [vmem:[%s7296_s12 + $0x2f0] sm:$0xff] %v3657_v51  ;;  %3497 = vmatmul.f32.gmra.mxu2 %v6359_v52  ;;  %v3032_v53 = vpop.f32.mrf.mxu0  ;;  %v6379_v51 = vld [vmem:[%s7122_s19 + $0x5b0] sm:$0xff] }
 0x5c0   : > { %v3241_v54 = vpop.f32.mrf.mxu1  ;;  %3706 = vmatmul.f32.gmra.mxu3 %v6360_v55 }
 0x5c1   : > { %v3242_v57 = vadd.f32 %v3241_v54, %v3032_v53  ;;  %v6380_v54 = vld [vmem:[%s7122_s19 + $0x5b8] sm:$0xff] }
 0x5c2   : > { %v3450_v59 = vpop.f32.mrf.mxu2  ;;  %3079 = vmatmul.f32.gmra.mxu0 %v6361_v60 }
 0x5c3   : > { %3288 = vmatmul.f32.gmra.mxu1 %v6362_v61  ;;  %v3659_v62 = vpop.f32.mrf.mxu3  ;;  %v3451_v63 = vadd.f32 %v3450_v59, %v3242_v57  ;;  %v6381_v57 = vld [vmem:[%s7122_s19 + $0x5a0] sm:$0xff] }
 0x5c5   : > { %v3660_v2 = vadd.f32 %v3659_v62, %v3451_v63  ;;  %v6383_v62 = vld [vmem:[%s7122_s19 + $0x5d0] sm:$0xff] }
 0x5c7   : > { %5484 = vst [vmem:[%s7296_s12 + $0x310] sm:$0xff] %v3660_v2  ;;  %3500 = vmatmul.f32.gmra.mxu2 %v6363_v3  ;;  %v3035_v4 = vpop.f32.mrf.mxu0 }
 0x5c8   : > { %v3244_v5 = vpop.f32.mrf.mxu1  ;;  %3709 = vmatmul.f32.gmra.mxu3 %v6364_v6 }
 0x5c9   : > { %v3245_v7 = vadd.f32 %v3244_v5, %v3035_v4  ;;  %v6385_v4 = vld [vmem:[%s7122_s19 + $0x5c0] sm:$0xff]  ;;  %v6386_v5 = vld [vmem:[%s7122_s19 + $0x5c8] sm:$0xff] }
 0x5ca   : > { %v3453_v8 = vpop.f32.mrf.mxu2  ;;  %3082 = vmatmul.f32.gmra.mxu0 %v6365_v9  ;;  %v6387_v9 = vld [vmem:[%s7122_s19 + $0x5f0] sm:$0xff] }
 0x5cb   : > { %3291 = vmatmul.f32.gmra.mxu1 %v6366_v10  ;;  %v3662_v11 = vpop.f32.mrf.mxu3  ;;  %v3454_v12 = vadd.f32 %v3453_v8, %v3245_v7 }
 0x5cd   : > { %v3663_v13 = vadd.f32 %v3662_v11, %v3454_v12  ;;  %v6388_v12 = vld [vmem:[%s7122_s19 + $0x5f8] sm:$0xff] }
 0x5cf   : > { %5488 = vst [vmem:[%s7296_s12 + $0x330] sm:$0xff] %v3663_v13  ;;  %3503 = vmatmul.f32.gmra.mxu2 %v6367_v14  ;;  %v3038_v15 = vpop.f32.mrf.mxu0 }
 0x5d0   : > { %v3247_v16 = vpop.f32.mrf.mxu1  ;;  %3712 = vmatmul.f32.gmra.mxu3 %v6368_v17 }
 0x5d1   : > { %v3248_v18 = vadd.f32 %v3247_v16, %v3038_v15  ;;  %v6389_v15 = vld [vmem:[%s7122_s19 + $0x5e0] sm:$0xff]  ;;  %v6390_v16 = vld [vmem:[%s7122_s19 + $0x5e8] sm:$0xff] }
 0x5d2   : > { %v3456_v19 = vpop.f32.mrf.mxu2  ;;  %3085 = vmatmul.f32.gmra.mxu0 %v6369_v20  ;;  %v6391_v20 = vld [vmem:[%s7122_s19 + $0x610] sm:$0xff] }
 0x5d3   : > { %3294 = vmatmul.f32.gmra.mxu1 %v6370_v21  ;;  %v3665_v22 = vpop.f32.mrf.mxu3  ;;  %v3457_v23 = vadd.f32 %v3456_v19, %v3248_v18 }
 0x5d5   : > { %v3666_v24 = vadd.f32 %v3665_v22, %v3457_v23  ;;  %v6392_v23 = vld [vmem:[%s7122_s19 + $0x618] sm:$0xff] }
 0x5d7   : > { %5492 = vst [vmem:[%s7296_s12 + $0x350] sm:$0xff] %v3666_v24  ;;  %3506 = vmatmul.f32.gmra.mxu2 %v6371_v25  ;;  %v3041_v26 = vpop.f32.mrf.mxu0  ;;  %v1154_v24 = vld [vmem:[%s7129_s8 + $0x458] sm:$0xff] }
 0x5d8   : > { %v3250_v27 = vpop.f32.mrf.mxu1  ;;  %3715 = vmatmul.f32.gmra.mxu3 %v6372_v28  ;;  %4210 = vmatpush.msrb.mxu2 %v1154_v24  ;;  %v6393_v28 = vld [vmem:[%s7122_s19 + $0x600] sm:$0xff] }
 0x5d9   : > { %v3251_v29 = vadd.f32 %v3250_v27, %v3041_v26  ;;  %v1218_v26 = vld [vmem:[%s7129_s8 + $0x658] sm:$0xff] }
 0x5da   : > { %v3459_v30 = vpop.f32.mrf.mxu2  ;;  %3088 = vmatmul.f32.gmra.mxu0 %v6373_v31  ;;  %4419 = vmatpush.msrb.mxu3 %v1218_v26  ;;  %v6414_v26 = vld [vmem:[%s7122_s19 + $0x6a8] sm:$0xff] }
 0x5db   : > { %3297 = vmatmul.f32.gmra.mxu1 %v6374_v32  ;;  %v3668_v33 = vpop.f32.mrf.mxu3  ;;  %v3460_v34 = vadd.f32 %v3459_v30, %v3251_v29  ;;  %v6394_v29 = vld [vmem:[%s7122_s19 + $0x608] sm:$0xff]  ;;  %v1026_v32 = vld [vmem:[%s7129_s8 + $0x58] sm:$0xff] }
 0x5dc   : > { %3792 = vmatpush.msrb.mxu0 %v1026_v32 }
 0x5dd   : > { %v3669_v35 = vadd.f32 %v3668_v33, %v3460_v34  ;;  %v1090_v33 = vld [vmem:[%s7129_s8 + $0x258] sm:$0xff] }
 0x5de   : > { %4001 = vmatpush.msrb.mxu1 %v1090_v33  ;;  %v6416_v33 = vld [vmem:[%s7122_s19 + $0x6d8] sm:$0xff] }
 0x5df   : > { %5496 = vst [vmem:[%s7296_s12 + $0x370] sm:$0xff] %v3669_v35  ;;  %3509 = vmatmul.f32.gmra.mxu2 %v6375_v36  ;;  %v3044_v37 = vpop.f32.mrf.mxu0  ;;  %v6395_v35 = vld [vmem:[%s7122_s19 + $0x630] sm:$0xff] }
 0x5e0   : > { %v3253_v38 = vpop.f32.mrf.mxu1  ;;  %3718 = vmatmul.f32.gmra.mxu3 %v6376_v39 }
 0x5e1   : > { %v3254_v41 = vadd.f32 %v3253_v38, %v3044_v37  ;;  %v6396_v38 = vld [vmem:[%s7122_s19 + $0x638] sm:$0xff] }
 0x5e2   : > { %v3462_v43 = vpop.f32.mrf.mxu2  ;;  %3091 = vmatmul.f32.gmra.mxu0 %v6377_v44 }
 0x5e3   : > { %3300 = vmatmul.f32.gmra.mxu1 %v6378_v45  ;;  %v3671_v46 = vpop.f32.mrf.mxu3  ;;  %v3463_v47 = vadd.f32 %v3462_v43, %v3254_v41  ;;  %v6397_v41 = vld [vmem:[%s7122_s19 + $0x620] sm:$0xff] }
 0x5e5   : > { %v3672_v50 = vadd.f32 %v3671_v46, %v3463_v47  ;;  %v6399_v46 = vld [vmem:[%s7122_s19 + $0x650] sm:$0xff] }
 0x5e7   : > { %5500 = vst [vmem:[%s7296_s12 + $0x390] sm:$0xff] %v3672_v50  ;;  %3512 = vmatmul.f32.gmra.mxu2 %v6379_v51  ;;  %v3047_v52 = vpop.f32.mrf.mxu0 }
 0x5e8   : > { %v3256_v53 = vpop.f32.mrf.mxu1  ;;  %3721 = vmatmul.f32.gmra.mxu3 %v6380_v54 }
 0x5e9   : > { %v3257_v55 = vadd.f32 %v3256_v53, %v3047_v52  ;;  %v6401_v52 = vld [vmem:[%s7122_s19 + $0x640] sm:$0xff]  ;;  %v6402_v53 = vld [vmem:[%s7122_s19 + $0x648] sm:$0xff] }
 0x5ea   : > { %v3465_v56 = vpop.f32.mrf.mxu2  ;;  %3094 = vmatmul.f32.gmra.mxu0 %v6381_v57  ;;  %v6403_v57 = vld [vmem:[%s7122_s19 + $0x670] sm:$0xff] }
 0x5eb   : > { %3303 = vmatmul.f32.gmra.mxu1 %v6382_v58  ;;  %v3674_v59 = vpop.f32.mrf.mxu3  ;;  %v3466_v60 = vadd.f32 %v3465_v56, %v3257_v55 }
 0x5ed   : > { %v3675_v61 = vadd.f32 %v3674_v59, %v3466_v60  ;;  %v6404_v60 = vld [vmem:[%s7122_s19 + $0x678] sm:$0xff] }
 0x5ef   : > { %5504 = vst [vmem:[%s7296_s12 + $0x3b0] sm:$0xff] %v3675_v61  ;;  %3515 = vmatmul.f32.gmra.mxu2 %v6383_v62  ;;  %v3050_v63 = vpop.f32.mrf.mxu0 }
 0x5f0   : > { %v3259_v0 = vpop.f32.mrf.mxu1  ;;  %3724 = vmatmul.f32.gmra.mxu3 %v6384_v1 }
 0x5f1   : > { %v3260_v2 = vadd.f32 %v3259_v0, %v3050_v63  ;;  %v6405_v63 = vld [vmem:[%s7122_s19 + $0x660] sm:$0xff]  ;;  %v6406_v0 = vld [vmem:[%s7122_s19 + $0x668] sm:$0xff] }
 0x5f2   : > { %v3468_v3 = vpop.f32.mrf.mxu2  ;;  %3097 = vmatmul.f32.gmra.mxu0 %v6385_v4  ;;  %v6407_v4 = vld [vmem:[%s7122_s19 + $0x690] sm:$0xff] }
 0x5f3   : > { %3306 = vmatmul.f32.gmra.mxu1 %v6386_v5  ;;  %v3677_v6 = vpop.f32.mrf.mxu3  ;;  %v3469_v7 = vadd.f32 %v3468_v3, %v3260_v2 }
 0x5f5   : > { %v3678_v8 = vadd.f32 %v3677_v6, %v3469_v7  ;;  %v6408_v7 = vld [vmem:[%s7122_s19 + $0x698] sm:$0xff] }
 0x5f7   : > { %5508 = vst [vmem:[%s7296_s12 + $0x3d0] sm:$0xff] %v3678_v8  ;;  %3518 = vmatmul.f32.gmra.mxu2 %v6387_v9  ;;  %v3053_v10 = vpop.f32.mrf.mxu0  ;;  %v1150_v8 = vld [vmem:[%s7129_s8 + $0x438] sm:$0xff] }
 0x5f8   : > { %v3262_v11 = vpop.f32.mrf.mxu1  ;;  %3727 = vmatmul.f32.gmra.mxu3 %v6388_v12  ;;  %4211 = vmatpush.msrb.mxu2 %v1150_v8  ;;  %v6409_v12 = vld [vmem:[%s7122_s19 + $0x680] sm:$0xff] }
 0x5f9   : > { %v3263_v13 = vadd.f32 %v3262_v11, %v3053_v10  ;;  %v1214_v10 = vld [vmem:[%s7129_s8 + $0x638] sm:$0xff] }
 0x5fa   : > { %v3471_v14 = vpop.f32.mrf.mxu2  ;;  %3100 = vmatmul.f32.gmra.mxu0 %v6389_v15  ;;  %4420 = vmatpush.msrb.mxu3 %v1214_v10  ;;  %v6430_v10 = vld [vmem:[%s7122_s19 + $0x728] sm:$0xff] }
 0x5fb   : > { %3309 = vmatmul.f32.gmra.mxu1 %v6390_v16  ;;  %v3680_v17 = vpop.f32.mrf.mxu3  ;;  %v3472_v18 = vadd.f32 %v3471_v14, %v3263_v13  ;;  %v6410_v13 = vld [vmem:[%s7122_s19 + $0x688] sm:$0xff]  ;;  %v1022_v16 = vld [vmem:[%s7129_s8 + $0x38] sm:$0xff] }
 0x5fc   : > { %3793 = vmatpush.msrb.mxu0 %v1022_v16 }
 0x5fd   : > { %v3681_v19 = vadd.f32 %v3680_v17, %v3472_v18  ;;  %v1086_v17 = vld [vmem:[%s7129_s8 + $0x238] sm:$0xff] }
 0x5fe   : > { %4002 = vmatpush.msrb.mxu1 %v1086_v17  ;;  %v6432_v17 = vld [vmem:[%s7122_s19 + $0x758] sm:$0xff] }
 0x5ff   : > { %5512 = vst [vmem:[%s7296_s12 + $0x3f0] sm:$0xff] %v3681_v19  ;;  %3521 = vmatmul.f32.gmra.mxu2 %v6391_v20  ;;  %v3056_v21 = vpop.f32.mrf.mxu0  ;;  %v6411_v19 = vld [vmem:[%s7122_s19 + $0x6b0] sm:$0xff] }
 0x600   : > { %v3265_v22 = vpop.f32.mrf.mxu1  ;;  %3730 = vmatmul.f32.gmra.mxu3 %v6392_v23 }
 0x601   : > { %v3266_v25 = vadd.f32 %v3265_v22, %v3056_v21  ;;  %v6412_v22 = vld [vmem:[%s7122_s19 + $0x6b8] sm:$0xff] }
 0x602   : > { %v3474_v27 = vpop.f32.mrf.mxu2  ;;  %3103 = vmatmul.f32.gmra.mxu0 %v6393_v28 }
 0x603   : > { %3312 = vmatmul.f32.gmra.mxu1 %v6394_v29  ;;  %v3683_v30 = vpop.f32.mrf.mxu3  ;;  %v3475_v31 = vadd.f32 %v3474_v27, %v3266_v25  ;;  %v6413_v25 = vld [vmem:[%s7122_s19 + $0x6a0] sm:$0xff] }
 0x605   : > { %v3684_v34 = vadd.f32 %v3683_v30, %v3475_v31  ;;  %v6415_v30 = vld [vmem:[%s7122_s19 + $0x6d0] sm:$0xff] }
 0x607   : > { %5516 = vst [vmem:[%s7296_s12 + $0x410] sm:$0xff] %v3684_v34  ;;  %3524 = vmatmul.f32.gmra.mxu2 %v6395_v35  ;;  %v3059_v36 = vpop.f32.mrf.mxu0 }
 0x608   : > { %v3268_v37 = vpop.f32.mrf.mxu1  ;;  %3733 = vmatmul.f32.gmra.mxu3 %v6396_v38 }
 0x609   : > { %v3269_v39 = vadd.f32 %v3268_v37, %v3059_v36  ;;  %v6417_v36 = vld [vmem:[%s7122_s19 + $0x6c0] sm:$0xff]  ;;  %v6418_v37 = vld [vmem:[%s7122_s19 + $0x6c8] sm:$0xff] }
 0x60a   : > { %v3477_v40 = vpop.f32.mrf.mxu2  ;;  %3106 = vmatmul.f32.gmra.mxu0 %v6397_v41  ;;  %v6419_v41 = vld [vmem:[%s7122_s19 + $0x6f0] sm:$0xff] }
 0x60b   : > { %3315 = vmatmul.f32.gmra.mxu1 %v6398_v42  ;;  %v3686_v43 = vpop.f32.mrf.mxu3  ;;  %v3478_v44 = vadd.f32 %v3477_v40, %v3269_v39 }
 0x60d   : > { %v3687_v45 = vadd.f32 %v3686_v43, %v3478_v44  ;;  %v6420_v44 = vld [vmem:[%s7122_s19 + $0x6f8] sm:$0xff] }
 0x60f   : > { %5520 = vst [vmem:[%s7296_s12 + $0x430] sm:$0xff] %v3687_v45  ;;  %3527 = vmatmul.f32.gmra.mxu2 %v6399_v46  ;;  %v3062_v47 = vpop.f32.mrf.mxu0 }
 0x610   : > { %v3271_v48 = vpop.f32.mrf.mxu1  ;;  %3736 = vmatmul.f32.gmra.mxu3 %v6400_v49 }
 0x611   : > { %v3272_v50 = vadd.f32 %v3271_v48, %v3062_v47  ;;  %v6421_v47 = vld [vmem:[%s7122_s19 + $0x6e0] sm:$0xff]  ;;  %v6422_v48 = vld [vmem:[%s7122_s19 + $0x6e8] sm:$0xff] }
 0x612   : > { %v3480_v51 = vpop.f32.mrf.mxu2  ;;  %3109 = vmatmul.f32.gmra.mxu0 %v6401_v52  ;;  %v6423_v52 = vld [vmem:[%s7122_s19 + $0x710] sm:$0xff] }
 0x613   : > { %3318 = vmatmul.f32.gmra.mxu1 %v6402_v53  ;;  %v3689_v54 = vpop.f32.mrf.mxu3  ;;  %v3481_v55 = vadd.f32 %v3480_v51, %v3272_v50 }
 0x615   : > { %v3690_v56 = vadd.f32 %v3689_v54, %v3481_v55  ;;  %v6424_v55 = vld [vmem:[%s7122_s19 + $0x718] sm:$0xff] }
 0x617   : > { %5524 = vst [vmem:[%s7296_s12 + $0x450] sm:$0xff] %v3690_v56  ;;  %3530 = vmatmul.f32.gmra.mxu2 %v6403_v57  ;;  %v3065_v58 = vpop.f32.mrf.mxu0  ;;  %v1146_v56 = vld [vmem:[%s7129_s8 + $0x418] sm:$0xff] }
 0x618   : > { %v3274_v59 = vpop.f32.mrf.mxu1  ;;  %3739 = vmatmul.f32.gmra.mxu3 %v6404_v60  ;;  %4212 = vmatpush.msrb.mxu2 %v1146_v56  ;;  %v6425_v60 = vld [vmem:[%s7122_s19 + $0x700] sm:$0xff] }
 0x619   : > { %v3275_v61 = vadd.f32 %v3274_v59, %v3065_v58  ;;  %v1210_v58 = vld [vmem:[%s7129_s8 + $0x618] sm:$0xff] }
 0x61a   : > { %v3483_v62 = vpop.f32.mrf.mxu2  ;;  %3112 = vmatmul.f32.gmra.mxu0 %v6405_v63  ;;  %4421 = vmatpush.msrb.mxu3 %v1210_v58  ;;  %v6447_v58 = vld [vmem:[%s7122_s19 + $0x7d0] sm:$0xff] }
 0x61b   : > { %3321 = vmatmul.f32.gmra.mxu1 %v6406_v0  ;;  %v3692_v1 = vpop.f32.mrf.mxu3  ;;  %v3484_v2 = vadd.f32 %v3483_v62, %v3275_v61  ;;  %v6426_v61 = vld [vmem:[%s7122_s19 + $0x708] sm:$0xff]  ;;  %v1018_v0 = vld [vmem:[%s7129_s8 + $0x18] sm:$0xff] }
 0x61c   : > { %3794 = vmatpush.msrb.mxu0 %v1018_v0  ;;  %v6449_v0 = vld [vmem:[%s7122_s19 + $0x7c0] sm:$0xff] }
 0x61d   : > { %v3693_v3 = vadd.f32 %v3692_v1, %v3484_v2  ;;  %v1082_v1 = vld [vmem:[%s7129_s8 + $0x218] sm:$0xff]  ;;  %s6787_s8 = scalar_lea.hbm %s6786_s4, 2048 }
 0x61e   : > { %4003 = vmatpush.msrb.mxu1 %v1082_v1  ;;  %v6450_v1 = vld [vmem:[%s7122_s19 + $0x7c8] sm:$0xff]  ;;  %p6788_p6 = scmp.ne.s32.totalorder %s6786_s4, %s6787_s8  ;;  %p6793_p8 = scmp.lt.s32.totalorder %s6791_s7, %s6787_s8 }
 0x61f   : > { %5528 = vst [vmem:[%s7296_s12 + $0x470] sm:$0xff] %v3693_v3  ;;  %3533 = vmatmul.f32.gmra.mxu2 %v6407_v4  ;;  %v3068_v5 = vpop.f32.mrf.mxu0  ;;  %v6427_v3 = vld [vmem:[%s7122_s19 + $0x730] sm:$0xff] }
 0x620   : > { %v3277_v6 = vpop.f32.mrf.mxu1  ;;  %3742 = vmatmul.f32.gmra.mxu3 %v6408_v7  ;;  %p6789_p7 = pnand %p6788_p6, %p7090_p1  ;;  %p6794_p9 = por %p6793_p8, %p6792_p2 }
 0x621   : > { %v3278_v9 = vadd.f32 %v3277_v6, %v3068_v5  ;;  %v6428_v6 = vld [vmem:[%s7122_s19 + $0x738] sm:$0xff] }
 0x622   : > { %v3486_v11 = vpop.f32.mrf.mxu2  ;;  %3115 = vmatmul.f32.gmra.mxu0 %v6409_v12  ;;  %p6790_p11 = pneg %p6789_p7 }
 0x623   : > { %3324 = vmatmul.f32.gmra.mxu1 %v6410_v13  ;;  %v3695_v14 = vpop.f32.mrf.mxu3  ;;  %v3487_v15 = vadd.f32 %v3486_v11, %v3278_v9  ;;  %v6429_v9 = vld [vmem:[%s7122_s19 + $0x720] sm:$0xff] }
 0x624   : > { %p6795_p10 = pnand %p6794_p9, %p6790_p11 }
 0x625   : > { %v3696_v18 = vadd.f32 %v3695_v14, %v3487_v15  ;;  %v6431_v14 = vld [vmem:[%s7122_s19 + $0x750] sm:$0xff] }
 0x627   : > { %5532 = vst [vmem:[%s7296_s12 + $0x490] sm:$0xff] %v3696_v18  ;;  %3536 = vmatmul.f32.gmra.mxu2 %v6411_v19  ;;  %v3071_v20 = vpop.f32.mrf.mxu0 }
 0x628   : > { %v3280_v21 = vpop.f32.mrf.mxu1  ;;  %3745 = vmatmul.f32.gmra.mxu3 %v6412_v22 }
 0x629   : > { %v3281_v23 = vadd.f32 %v3280_v21, %v3071_v20  ;;  %v6433_v20 = vld [vmem:[%s7122_s19 + $0x740] sm:$0xff]  ;;  %v6434_v21 = vld [vmem:[%s7122_s19 + $0x748] sm:$0xff] }
 0x62a   : > { %v3489_v24 = vpop.f32.mrf.mxu2  ;;  %3118 = vmatmul.f32.gmra.mxu0 %v6413_v25  ;;  %v6435_v25 = vld [vmem:[%s7122_s19 + $0x770] sm:$0xff] }
 0x62b   : > { %3327 = vmatmul.f32.gmra.mxu1 %v6414_v26  ;;  %v3698_v27 = vpop.f32.mrf.mxu3  ;;  %v3490_v28 = vadd.f32 %v3489_v24, %v3281_v23 }
 0x62d   : > { %v3699_v29 = vadd.f32 %v3698_v27, %v3490_v28  ;;  %v6436_v28 = vld [vmem:[%s7122_s19 + $0x778] sm:$0xff] }
 0x62f   : > { %5536 = vst [vmem:[%s7296_s12 + $0x4b0] sm:$0xff] %v3699_v29  ;;  %3539 = vmatmul.f32.gmra.mxu2 %v6415_v30  ;;  %v3074_v31 = vpop.f32.mrf.mxu0 }
 0x630   : > { %v3283_v32 = vpop.f32.mrf.mxu1  ;;  %3748 = vmatmul.f32.gmra.mxu3 %v6416_v33 }
 0x631   : > { %v3284_v34 = vadd.f32 %v3283_v32, %v3074_v31  ;;  %v6437_v31 = vld [vmem:[%s7122_s19 + $0x760] sm:$0xff]  ;;  %v6438_v32 = vld [vmem:[%s7122_s19 + $0x768] sm:$0xff] }
 0x632   : > { %v3492_v35 = vpop.f32.mrf.mxu2  ;;  %3121 = vmatmul.f32.gmra.mxu0 %v6417_v36  ;;  %v6439_v36 = vld [vmem:[%s7122_s19 + $0x790] sm:$0xff] }
 0x633   : > { %3330 = vmatmul.f32.gmra.mxu1 %v6418_v37  ;;  %v3701_v38 = vpop.f32.mrf.mxu3  ;;  %v3493_v39 = vadd.f32 %v3492_v35, %v3284_v34 }
 0x635   : > { %v3702_v40 = vadd.f32 %v3701_v38, %v3493_v39  ;;  %v6440_v39 = vld [vmem:[%s7122_s19 + $0x798] sm:$0xff] }
 0x637   : > { %5540 = vst [vmem:[%s7296_s12 + $0x4d0] sm:$0xff] %v3702_v40  ;;  %3542 = vmatmul.f32.gmra.mxu2 %v6419_v41  ;;  %v3077_v42 = vpop.f32.mrf.mxu0 }
 0x638   : > { %v3286_v43 = vpop.f32.mrf.mxu1  ;;  %3751 = vmatmul.f32.gmra.mxu3 %v6420_v44 }
 0x639   : > { %v3287_v45 = vadd.f32 %v3286_v43, %v3077_v42  ;;  %v6441_v42 = vld [vmem:[%s7122_s19 + $0x780] sm:$0xff]  ;;  %v6442_v43 = vld [vmem:[%s7122_s19 + $0x788] sm:$0xff] }
 0x63a   : > { %v3495_v46 = vpop.f32.mrf.mxu2  ;;  %3124 = vmatmul.f32.gmra.mxu0 %v6421_v47  ;;  %v6443_v47 = vld [vmem:[%s7122_s19 + $0x7b0] sm:$0xff] }
 0x63b   : > { %3333 = vmatmul.f32.gmra.mxu1 %v6422_v48  ;;  %v3704_v49 = vpop.f32.mrf.mxu3  ;;  %v3496_v50 = vadd.f32 %v3495_v46, %v3287_v45 }
 0x63d   : > { %v3705_v51 = vadd.f32 %v3704_v49, %v3496_v50  ;;  %v6444_v50 = vld [vmem:[%s7122_s19 + $0x7b8] sm:$0xff] }
 0x63f   : > { %5544 = vst [vmem:[%s7296_s12 + $0x4f0] sm:$0xff] %v3705_v51  ;;  %3545 = vmatmul.f32.gmra.mxu2 %v6423_v52  ;;  %v3080_v53 = vpop.f32.mrf.mxu0 }
 0x640   : > { %v3289_v54 = vpop.f32.mrf.mxu1  ;;  %3754 = vmatmul.f32.gmra.mxu3 %v6424_v55 }
 0x641   : > { %v3290_v57 = vadd.f32 %v3289_v54, %v3080_v53  ;;  %v6445_v53 = vld [vmem:[%s7122_s19 + $0x7a0] sm:$0xff]  ;;  %v6446_v54 = vld [vmem:[%s7122_s19 + $0x7a8] sm:$0xff] }
 0x642   : > { %v3498_v59 = vpop.f32.mrf.mxu2  ;;  %3127 = vmatmul.f32.gmra.mxu0 %v6425_v60 }
 0x643   : > { %3336 = vmatmul.f32.gmra.mxu1 %v6426_v61  ;;  %v3707_v62 = vpop.f32.mrf.mxu3  ;;  %v3499_v63 = vadd.f32 %v3498_v59, %v3290_v57  ;;  %v6448_v61 = vld [vmem:[%s7122_s19 + $0x7d8] sm:$0xff] }
 0x645   : > { %v3708_v2 = vadd.f32 %v3707_v62, %v3499_v63 }
 0x647   : > { %5548 = vst [vmem:[%s7296_s12 + $0x510] sm:$0xff] %v3708_v2  ;;  %3548 = vmatmul.f32.gmra.mxu2 %v6427_v3  ;;  %v3083_v4 = vpop.f32.mrf.mxu0 }
 0x648   : > { %v3292_v5 = vpop.f32.mrf.mxu1  ;;  %3757 = vmatmul.f32.gmra.mxu3 %v6428_v6 }
 0x649   : > { %v3293_v7 = vadd.f32 %v3292_v5, %v3083_v4  ;;  %v6451_v5 = vld [vmem:[%s7122_s19 + $0x7f0] sm:$0xff] }
 0x64a   : > { %v3501_v8 = vpop.f32.mrf.mxu2  ;;  %3130 = vmatmul.f32.gmra.mxu0 %v6429_v9 }
 0x64b   : > { %3339 = vmatmul.f32.gmra.mxu1 %v6430_v10  ;;  %v3710_v11 = vpop.f32.mrf.mxu3  ;;  %v3502_v12 = vadd.f32 %v3501_v8, %v3293_v7  ;;  %v6452_v8 = vld [vmem:[%s7122_s19 + $0x7f8] sm:$0xff] }
 0x64d   : > { %v3711_v13 = vadd.f32 %v3710_v11, %v3502_v12  ;;  %v6453_v11 = vld [vmem:[%s7122_s19 + $0x7e0] sm:$0xff]  ;;  %v6454_v12 = vld [vmem:[%s7122_s19 + $0x7e8] sm:$0xff] }
 0x64f   : > { %5552 = vst [vmem:[%s7296_s12 + $0x530] sm:$0xff] %v3711_v13  ;;  %3551 = vmatmul.f32.gmra.mxu2 %v6431_v14  ;;  %v3086_v15 = vpop.f32.mrf.mxu0 }
 0x650   : > { %v3295_v16 = vpop.f32.mrf.mxu1  ;;  %3760 = vmatmul.f32.gmra.mxu3 %v6432_v17 }
 0x651   : > { %v3296_v18 = vadd.f32 %v3295_v16, %v3086_v15  ;;  %v6455_v16 = vld [vmem:[%s7122_s19 + $0x10] sm:$0xff] }
 0x652   : > { %v3504_v19 = vpop.f32.mrf.mxu2  ;;  %3133 = vmatmul.f32.gmra.mxu0 %v6433_v20 }
 0x653   : > { %3342 = vmatmul.f32.gmra.mxu1 %v6434_v21  ;;  %v3713_v22 = vpop.f32.mrf.mxu3  ;;  %v3505_v23 = vadd.f32 %v3504_v19, %v3296_v18  ;;  %v6456_v19 = vld [vmem:[%s7122_s19 + $0x18] sm:$0xff] }
 0x655   : > { %v3714_v24 = vadd.f32 %v3713_v22, %v3505_v23  ;;  %v6457_v22 = vld [vmem:[%s7122_s19] sm:$0xff]  ;;  %v6458_v23 = vld [vmem:[%s7122_s19 + $0x8] sm:$0xff] }
 0x657   : > { %5556 = vst [vmem:[%s7296_s12 + $0x550] sm:$0xff] %v3714_v24  ;;  %3554 = vmatmul.f32.gmra.mxu2 %v6435_v25  ;;  %v3089_v26 = vpop.f32.mrf.mxu0 }
 0x658   : > { %v3298_v27 = vpop.f32.mrf.mxu1  ;;  %3763 = vmatmul.f32.gmra.mxu3 %v6436_v28 }
 0x659   : > { %v3299_v29 = vadd.f32 %v3298_v27, %v3089_v26  ;;  %v6459_v27 = vld [vmem:[%s7122_s19 + $0x30] sm:$0xff] }
 0x65a   : > { %v3507_v30 = vpop.f32.mrf.mxu2  ;;  %3136 = vmatmul.f32.gmra.mxu0 %v6437_v31 }
 0x65b   : > { %3345 = vmatmul.f32.gmra.mxu1 %v6438_v32  ;;  %v3716_v33 = vpop.f32.mrf.mxu3  ;;  %v3508_v34 = vadd.f32 %v3507_v30, %v3299_v29  ;;  %v6460_v30 = vld [vmem:[%s7122_s19 + $0x38] sm:$0xff] }
 0x65d   : > { %v3717_v35 = vadd.f32 %v3716_v33, %v3508_v34  ;;  %v6461_v33 = vld [vmem:[%s7122_s19 + $0x20] sm:$0xff]  ;;  %v6462_v34 = vld [vmem:[%s7122_s19 + $0x28] sm:$0xff] }
 0x65f   : > { %5560 = vst [vmem:[%s7296_s12 + $0x570] sm:$0xff] %v3717_v35  ;;  %3557 = vmatmul.f32.gmra.mxu2 %v6439_v36  ;;  %v3092_v37 = vpop.f32.mrf.mxu0 }
 0x660   : > { %v3301_v38 = vpop.f32.mrf.mxu1  ;;  %3766 = vmatmul.f32.gmra.mxu3 %v6440_v39 }
 0x661   : > { %v3302_v40 = vadd.f32 %v3301_v38, %v3092_v37  ;;  %v6463_v38 = vld [vmem:[%s7122_s19 + $0x50] sm:$0xff] }
 0x662   : > { %v3510_v41 = vpop.f32.mrf.mxu2  ;;  %3139 = vmatmul.f32.gmra.mxu0 %v6441_v42 }
 0x663   : > { %3348 = vmatmul.f32.gmra.mxu1 %v6442_v43  ;;  %v3719_v44 = vpop.f32.mrf.mxu3  ;;  %v3511_v45 = vadd.f32 %v3510_v41, %v3302_v40  ;;  %v6464_v41 = vld [vmem:[%s7122_s19 + $0x58] sm:$0xff] }
 0x665   : > { %v3720_v46 = vadd.f32 %v3719_v44, %v3511_v45  ;;  %v6465_v44 = vld [vmem:[%s7122_s19 + $0x40] sm:$0xff]  ;;  %v6466_v45 = vld [vmem:[%s7122_s19 + $0x48] sm:$0xff] }
 0x667   : > { %5564 = vst [vmem:[%s7296_s12 + $0x590] sm:$0xff] %v3720_v46  ;;  %3560 = vmatmul.f32.gmra.mxu2 %v6443_v47  ;;  %v3095_v48 = vpop.f32.mrf.mxu0 }
 0x668   : > { %v3304_v49 = vpop.f32.mrf.mxu1  ;;  %3769 = vmatmul.f32.gmra.mxu3 %v6444_v50 }
 0x669   : > { %v3305_v51 = vadd.f32 %v3304_v49, %v3095_v48  ;;  %v6467_v49 = vld [vmem:[%s7122_s19 + $0x70] sm:$0xff] }
 0x66a   : > { %v3513_v52 = vpop.f32.mrf.mxu2  ;;  %3142 = vmatmul.f32.gmra.mxu0 %v6445_v53 }
 0x66b   : > { %3351 = vmatmul.f32.gmra.mxu1 %v6446_v54  ;;  %v3722_v55 = vpop.f32.mrf.mxu3  ;;  %v3514_v56 = vadd.f32 %v3513_v52, %v3305_v51  ;;  %v6468_v52 = vld [vmem:[%s7122_s19 + $0x78] sm:$0xff] }
 0x66d   : > { %v3723_v57 = vadd.f32 %v3722_v55, %v3514_v56  ;;  %v6469_v55 = vld [vmem:[%s7122_s19 + $0x60] sm:$0xff]  ;;  %v6470_v56 = vld [vmem:[%s7122_s19 + $0x68] sm:$0xff] }
 0x66f   : > { %5568 = vst [vmem:[%s7296_s12 + $0x5b0] sm:$0xff] %v3723_v57  ;;  %3563 = vmatmul.f32.gmra.mxu2 %v6447_v58  ;;  %v3098_v59 = vpop.f32.mrf.mxu0 }
 0x670   : > { %v3307_v60 = vpop.f32.mrf.mxu1  ;;  %3772 = vmatmul.f32.gmra.mxu3 %v6448_v61 }
 0x671   : > { %v3308_v62 = vadd.f32 %v3307_v60, %v3098_v59  ;;  %v6471_v60 = vld [vmem:[%s7122_s19 + $0x90] sm:$0xff] }
 0x672   : > { %v3516_v63 = vpop.f32.mrf.mxu2  ;;  %3145 = vmatmul.f32.gmra.mxu0 %v6449_v0 }
 0x673   : > { %3354 = vmatmul.f32.gmra.mxu1 %v6450_v1  ;;  %v3725_v2 = vpop.f32.mrf.mxu3  ;;  %v3517_v3 = vadd.f32 %v3516_v63, %v3308_v62  ;;  %v6472_v63 = vld [vmem:[%s7122_s19 + $0x98] sm:$0xff] }
 0x675   : > { %v3726_v4 = vadd.f32 %v3725_v2, %v3517_v3  ;;  %v6473_v2 = vld [vmem:[%s7122_s19 + $0x80] sm:$0xff]  ;;  %v6474_v3 = vld [vmem:[%s7122_s19 + $0x88] sm:$0xff] }
 0x677   : > { %5572 = vst [vmem:[%s7296_s12 + $0x5d0] sm:$0xff] %v3726_v4  ;;  %3566 = vmatmul.f32.gmra.mxu2 %v6451_v5  ;;  %v3101_v6 = vpop.f32.mrf.mxu0 }
 0x678   : > { %v3310_v7 = vpop.f32.mrf.mxu1  ;;  %3775 = vmatmul.f32.gmra.mxu3 %v6452_v8 }
 0x679   : > { %v3311_v9 = vadd.f32 %v3310_v7, %v3101_v6  ;;  %v6475_v7 = vld [vmem:[%s7122_s19 + $0xb0] sm:$0xff] }
 0x67a   : > { %v3519_v10 = vpop.f32.mrf.mxu2  ;;  %3148 = vmatmul.f32.gmra.mxu0 %v6453_v11 }
 0x67b   : > { %3357 = vmatmul.f32.gmra.mxu1 %v6454_v12  ;;  %v3728_v13 = vpop.f32.mrf.mxu3  ;;  %v3520_v14 = vadd.f32 %v3519_v10, %v3311_v9  ;;  %v6476_v10 = vld [vmem:[%s7122_s19 + $0xb8] sm:$0xff] }
 0x67d   : > { %v3729_v15 = vadd.f32 %v3728_v13, %v3520_v14  ;;  %v6477_v13 = vld [vmem:[%s7122_s19 + $0xa0] sm:$0xff]  ;;  %v6478_v14 = vld [vmem:[%s7122_s19 + $0xa8] sm:$0xff] }
 0x67f   : > { %5576 = vst [vmem:[%s7296_s12 + $0x5f0] sm:$0xff] %v3729_v15  ;;  %4213 = vmatmul.f32.vlgmr.msrb.gmra.mxu2 %v6455_v16  ;;  %v3104_v17 = vpop.f32.mrf.mxu0 }
 0x680   : > { %v3313_v18 = vpop.f32.mrf.mxu1  ;;  %4422 = vmatmul.f32.vlgmr.msrb.gmra.mxu3 %v6456_v19 }
 0x681   : > { %v3314_v20 = vadd.f32 %v3313_v18, %v3104_v17  ;;  %v6479_v18 = vld [vmem:[%s7122_s19 + $0xd0] sm:$0xff] }
 0x682   : > { %v3522_v21 = vpop.f32.mrf.mxu2  ;;  %3795 = vmatmul.f32.vlgmr.msrb.gmra.mxu0 %v6457_v22 }
 0x683   : > { %4004 = vmatmul.f32.vlgmr.msrb.gmra.mxu1 %v6458_v23  ;;  %v3731_v24 = vpop.f32.mrf.mxu3  ;;  %v3523_v25 = vadd.f32 %v3522_v21, %v3314_v20  ;;  %v6480_v21 = vld [vmem:[%s7122_s19 + $0xd8] sm:$0xff] }
 0x685   : > { %v3732_v26 = vadd.f32 %v3731_v24, %v3523_v25  ;;  %v6481_v24 = vld [vmem:[%s7122_s19 + $0xc0] sm:$0xff]  ;;  %v6482_v25 = vld [vmem:[%s7122_s19 + $0xc8] sm:$0xff] }
 0x687   : > { %5580 = vst [vmem:[%s7296_s12 + $0x610] sm:$0xff] %v3732_v26  ;;  %4216 = vmatmul.f32.gmra.mxu2 %v6459_v27  ;;  %v3107_v28 = vpop.f32.mrf.mxu0 }
 0x688   : > { %v3316_v29 = vpop.f32.mrf.mxu1  ;;  %4425 = vmatmul.f32.gmra.mxu3 %v6460_v30 }
 0x689   : > { %v3317_v31 = vadd.f32 %v3316_v29, %v3107_v28  ;;  %v6483_v29 = vld [vmem:[%s7122_s19 + $0xf0] sm:$0xff] }
 0x68a   : > { %v3525_v32 = vpop.f32.mrf.mxu2  ;;  %3798 = vmatmul.f32.gmra.mxu0 %v6461_v33 }
 0x68b   : > { %4007 = vmatmul.f32.gmra.mxu1 %v6462_v34  ;;  %v3734_v35 = vpop.f32.mrf.mxu3  ;;  %v3526_v36 = vadd.f32 %v3525_v32, %v3317_v31  ;;  %v6484_v32 = vld [vmem:[%s7122_s19 + $0xf8] sm:$0xff] }
 0x68d   : > { %v3735_v37 = vadd.f32 %v3734_v35, %v3526_v36  ;;  %v6485_v35 = vld [vmem:[%s7122_s19 + $0xe0] sm:$0xff]  ;;  %v6486_v36 = vld [vmem:[%s7122_s19 + $0xe8] sm:$0xff] }
 0x68f   : > { %5584 = vst [vmem:[%s7296_s12 + $0x630] sm:$0xff] %v3735_v37  ;;  %4219 = vmatmul.f32.gmra.mxu2 %v6463_v38  ;;  %v3110_v39 = vpop.f32.mrf.mxu0 }
 0x690   : > { %v3319_v40 = vpop.f32.mrf.mxu1  ;;  %4428 = vmatmul.f32.gmra.mxu3 %v6464_v41 }
 0x691   : > { %v3320_v42 = vadd.f32 %v3319_v40, %v3110_v39  ;;  %v6487_v40 = vld [vmem:[%s7122_s19 + $0x110] sm:$0xff] }
 0x692   : > { %v3528_v43 = vpop.f32.mrf.mxu2  ;;  %3801 = vmatmul.f32.gmra.mxu0 %v6465_v44 }
 0x693   : > { %4010 = vmatmul.f32.gmra.mxu1 %v6466_v45  ;;  %v3737_v46 = vpop.f32.mrf.mxu3  ;;  %v3529_v47 = vadd.f32 %v3528_v43, %v3320_v42  ;;  %v6488_v43 = vld [vmem:[%s7122_s19 + $0x118] sm:$0xff] }
 0x695   : > { %v3738_v48 = vadd.f32 %v3737_v46, %v3529_v47  ;;  %v6489_v46 = vld [vmem:[%s7122_s19 + $0x100] sm:$0xff]  ;;  %v6490_v47 = vld [vmem:[%s7122_s19 + $0x108] sm:$0xff] }
 0x697   : > { %5588 = vst [vmem:[%s7296_s12 + $0x650] sm:$0xff] %v3738_v48  ;;  %4222 = vmatmul.f32.gmra.mxu2 %v6467_v49  ;;  %v3113_v50 = vpop.f32.mrf.mxu0 }
 0x698   : > { %v3322_v51 = vpop.f32.mrf.mxu1  ;;  %4431 = vmatmul.f32.gmra.mxu3 %v6468_v52 }
 0x699   : > { %v3323_v53 = vadd.f32 %v3322_v51, %v3113_v50  ;;  %v6491_v51 = vld [vmem:[%s7122_s19 + $0x130] sm:$0xff] }
 0x69a   : > { %v3531_v54 = vpop.f32.mrf.mxu2  ;;  %3804 = vmatmul.f32.gmra.mxu0 %v6469_v55 }
 0x69b   : > { %4013 = vmatmul.f32.gmra.mxu1 %v6470_v56  ;;  %v3740_v57 = vpop.f32.mrf.mxu3  ;;  %v3532_v58 = vadd.f32 %v3531_v54, %v3323_v53  ;;  %v6492_v54 = vld [vmem:[%s7122_s19 + $0x138] sm:$0xff] }
 0x69d   : > { %v3741_v59 = vadd.f32 %v3740_v57, %v3532_v58  ;;  %v6493_v57 = vld [vmem:[%s7122_s19 + $0x120] sm:$0xff]  ;;  %v6494_v58 = vld [vmem:[%s7122_s19 + $0x128] sm:$0xff] }
 0x69f   : > { %5592 = vst [vmem:[%s7296_s12 + $0x670] sm:$0xff] %v3741_v59  ;;  %4225 = vmatmul.f32.gmra.mxu2 %v6471_v60  ;;  %v3116_v61 = vpop.f32.mrf.mxu0 }
 0x6a0   : > { %v3325_v62 = vpop.f32.mrf.mxu1  ;;  %4434 = vmatmul.f32.gmra.mxu3 %v6472_v63 }
 0x6a1   : > { %v3326_v0 = vadd.f32 %v3325_v62, %v3116_v61  ;;  %v6495_v62 = vld [vmem:[%s7122_s19 + $0x150] sm:$0xff] }
 0x6a2   : > { %v3534_v1 = vpop.f32.mrf.mxu2  ;;  %3807 = vmatmul.f32.gmra.mxu0 %v6473_v2 }
 0x6a3   : > { %4016 = vmatmul.f32.gmra.mxu1 %v6474_v3  ;;  %v3743_v4 = vpop.f32.mrf.mxu3  ;;  %v3535_v5 = vadd.f32 %v3534_v1, %v3326_v0  ;;  %v6496_v1 = vld [vmem:[%s7122_s19 + $0x158] sm:$0xff] }
 0x6a5   : > { %v3744_v6 = vadd.f32 %v3743_v4, %v3535_v5  ;;  %v6497_v4 = vld [vmem:[%s7122_s19 + $0x140] sm:$0xff]  ;;  %v6498_v5 = vld [vmem:[%s7122_s19 + $0x148] sm:$0xff] }
 0x6a7   : > { %5596 = vst [vmem:[%s7296_s12 + $0x690] sm:$0xff] %v3744_v6  ;;  %4228 = vmatmul.f32.gmra.mxu2 %v6475_v7  ;;  %v3119_v8 = vpop.f32.mrf.mxu0 }
 0x6a8   : > { %v3328_v9 = vpop.f32.mrf.mxu1  ;;  %4437 = vmatmul.f32.gmra.mxu3 %v6476_v10 }
 0x6a9   : > { %v3329_v11 = vadd.f32 %v3328_v9, %v3119_v8  ;;  %v6499_v9 = vld [vmem:[%s7122_s19 + $0x170] sm:$0xff] }
 0x6aa   : > { %v3537_v12 = vpop.f32.mrf.mxu2  ;;  %3810 = vmatmul.f32.gmra.mxu0 %v6477_v13 }
 0x6ab   : > { %4019 = vmatmul.f32.gmra.mxu1 %v6478_v14  ;;  %v3746_v15 = vpop.f32.mrf.mxu3  ;;  %v3538_v16 = vadd.f32 %v3537_v12, %v3329_v11  ;;  %v6500_v12 = vld [vmem:[%s7122_s19 + $0x178] sm:$0xff] }
 0x6ad   : > { %v3747_v17 = vadd.f32 %v3746_v15, %v3538_v16  ;;  %v6501_v15 = vld [vmem:[%s7122_s19 + $0x160] sm:$0xff]  ;;  %v6502_v16 = vld [vmem:[%s7122_s19 + $0x168] sm:$0xff] }
 0x6af   : > { %5600 = vst [vmem:[%s7296_s12 + $0x6b0] sm:$0xff] %v3747_v17  ;;  %4231 = vmatmul.f32.gmra.mxu2 %v6479_v18  ;;  %v3122_v19 = vpop.f32.mrf.mxu0 }
 0x6b0   : > { %v3331_v20 = vpop.f32.mrf.mxu1  ;;  %4440 = vmatmul.f32.gmra.mxu3 %v6480_v21 }
 0x6b1   : > { %v3332_v22 = vadd.f32 %v3331_v20, %v3122_v19  ;;  %v6503_v20 = vld [vmem:[%s7122_s19 + $0x190] sm:$0xff] }
 0x6b2   : > { %v3540_v23 = vpop.f32.mrf.mxu2  ;;  %3813 = vmatmul.f32.gmra.mxu0 %v6481_v24 }
 0x6b3   : > { %4022 = vmatmul.f32.gmra.mxu1 %v6482_v25  ;;  %v3749_v26 = vpop.f32.mrf.mxu3  ;;  %v3541_v27 = vadd.f32 %v3540_v23, %v3332_v22  ;;  %v6504_v23 = vld [vmem:[%s7122_s19 + $0x198] sm:$0xff] }
 0x6b5   : > { %v3750_v28 = vadd.f32 %v3749_v26, %v3541_v27  ;;  %v6505_v26 = vld [vmem:[%s7122_s19 + $0x180] sm:$0xff]  ;;  %v6506_v27 = vld [vmem:[%s7122_s19 + $0x188] sm:$0xff] }
 0x6b7   : > { %5604 = vst [vmem:[%s7296_s12 + $0x6d0] sm:$0xff] %v3750_v28  ;;  %4234 = vmatmul.f32.gmra.mxu2 %v6483_v29  ;;  %v3125_v30 = vpop.f32.mrf.mxu0 }
 0x6b8   : > { %v3334_v31 = vpop.f32.mrf.mxu1  ;;  %4443 = vmatmul.f32.gmra.mxu3 %v6484_v32 }
 0x6b9   : > { %v3335_v33 = vadd.f32 %v3334_v31, %v3125_v30  ;;  %v6507_v31 = vld [vmem:[%s7122_s19 + $0x1b0] sm:$0xff] }
 0x6ba   : > { %v3543_v34 = vpop.f32.mrf.mxu2  ;;  %3816 = vmatmul.f32.gmra.mxu0 %v6485_v35 }
 0x6bb   : > { %4025 = vmatmul.f32.gmra.mxu1 %v6486_v36  ;;  %v3752_v37 = vpop.f32.mrf.mxu3  ;;  %v3544_v38 = vadd.f32 %v3543_v34, %v3335_v33  ;;  %v6508_v34 = vld [vmem:[%s7122_s19 + $0x1b8] sm:$0xff] }
 0x6bd   : > { %v3753_v39 = vadd.f32 %v3752_v37, %v3544_v38  ;;  %v6509_v37 = vld [vmem:[%s7122_s19 + $0x1a0] sm:$0xff]  ;;  %v6510_v38 = vld [vmem:[%s7122_s19 + $0x1a8] sm:$0xff] }
 0x6bf   : > { %5608 = vst [vmem:[%s7296_s12 + $0x6f0] sm:$0xff] %v3753_v39  ;;  %4237 = vmatmul.f32.gmra.mxu2 %v6487_v40  ;;  %v3128_v41 = vpop.f32.mrf.mxu0 }
 0x6c0   : > { %v3337_v42 = vpop.f32.mrf.mxu1  ;;  %4446 = vmatmul.f32.gmra.mxu3 %v6488_v43 }
 0x6c1   : > { %v3338_v44 = vadd.f32 %v3337_v42, %v3128_v41  ;;  %v6511_v42 = vld [vmem:[%s7122_s19 + $0x1d0] sm:$0xff] }
 0x6c2   : > { %v3546_v45 = vpop.f32.mrf.mxu2  ;;  %3819 = vmatmul.f32.gmra.mxu0 %v6489_v46 }
 0x6c3   : > { %4028 = vmatmul.f32.gmra.mxu1 %v6490_v47  ;;  %v3755_v48 = vpop.f32.mrf.mxu3  ;;  %v3547_v49 = vadd.f32 %v3546_v45, %v3338_v44  ;;  %v6512_v45 = vld [vmem:[%s7122_s19 + $0x1d8] sm:$0xff] }
 0x6c5   : > { %v3756_v50 = vadd.f32 %v3755_v48, %v3547_v49  ;;  %v6513_v48 = vld [vmem:[%s7122_s19 + $0x1c0] sm:$0xff]  ;;  %v6514_v49 = vld [vmem:[%s7122_s19 + $0x1c8] sm:$0xff] }
 0x6c7   : > { %5612 = vst [vmem:[%s7296_s12 + $0x710] sm:$0xff] %v3756_v50  ;;  %4240 = vmatmul.f32.gmra.mxu2 %v6491_v51  ;;  %v3131_v52 = vpop.f32.mrf.mxu0 }
 0x6c8   : > { %v3340_v53 = vpop.f32.mrf.mxu1  ;;  %4449 = vmatmul.f32.gmra.mxu3 %v6492_v54 }
 0x6c9   : > { %v3341_v55 = vadd.f32 %v3340_v53, %v3131_v52  ;;  %v6515_v53 = vld [vmem:[%s7122_s19 + $0x1f0] sm:$0xff] }
 0x6ca   : > { %v3549_v56 = vpop.f32.mrf.mxu2  ;;  %3822 = vmatmul.f32.gmra.mxu0 %v6493_v57 }
 0x6cb   : > { %4031 = vmatmul.f32.gmra.mxu1 %v6494_v58  ;;  %v3758_v59 = vpop.f32.mrf.mxu3  ;;  %v3550_v60 = vadd.f32 %v3549_v56, %v3341_v55  ;;  %v6516_v56 = vld [vmem:[%s7122_s19 + $0x1f8] sm:$0xff] }
 0x6cd   : > { %v3759_v61 = vadd.f32 %v3758_v59, %v3550_v60  ;;  %v6517_v59 = vld [vmem:[%s7122_s19 + $0x1e0] sm:$0xff]  ;;  %v6518_v60 = vld [vmem:[%s7122_s19 + $0x1e8] sm:$0xff] }
 0x6cf   : > { %5616 = vst [vmem:[%s7296_s12 + $0x730] sm:$0xff] %v3759_v61  ;;  %4243 = vmatmul.f32.gmra.mxu2 %v6495_v62  ;;  %v3134_v63 = vpop.f32.mrf.mxu0 }
 0x6d0   : > { %v3343_v0 = vpop.f32.mrf.mxu1  ;;  %4452 = vmatmul.f32.gmra.mxu3 %v6496_v1 }
 0x6d1   : > { %v3344_v2 = vadd.f32 %v3343_v0, %v3134_v63  ;;  %v6519_v0 = vld [vmem:[%s7122_s19 + $0x210] sm:$0xff] }
 0x6d2   : > { %v3552_v3 = vpop.f32.mrf.mxu2  ;;  %3825 = vmatmul.f32.gmra.mxu0 %v6497_v4 }
 0x6d3   : > { %4034 = vmatmul.f32.gmra.mxu1 %v6498_v5  ;;  %v3761_v6 = vpop.f32.mrf.mxu3  ;;  %v3553_v7 = vadd.f32 %v3552_v3, %v3344_v2  ;;  %v6520_v3 = vld [vmem:[%s7122_s19 + $0x218] sm:$0xff] }
 0x6d5   : > { %v3762_v8 = vadd.f32 %v3761_v6, %v3553_v7  ;;  %v6521_v6 = vld [vmem:[%s7122_s19 + $0x200] sm:$0xff]  ;;  %v6522_v7 = vld [vmem:[%s7122_s19 + $0x208] sm:$0xff] }
 0x6d7   : > { %5620 = vst [vmem:[%s7296_s12 + $0x750] sm:$0xff] %v3762_v8  ;;  %4246 = vmatmul.f32.gmra.mxu2 %v6499_v9  ;;  %v3137_v10 = vpop.f32.mrf.mxu0 }
 0x6d8   : > { %v3346_v11 = vpop.f32.mrf.mxu1  ;;  %4455 = vmatmul.f32.gmra.mxu3 %v6500_v12 }
 0x6d9   : > { %v3347_v13 = vadd.f32 %v3346_v11, %v3137_v10  ;;  %v6523_v11 = vld [vmem:[%s7122_s19 + $0x230] sm:$0xff] }
 0x6da   : > { %v3555_v14 = vpop.f32.mrf.mxu2  ;;  %3828 = vmatmul.f32.gmra.mxu0 %v6501_v15 }
 0x6db   : > { %4037 = vmatmul.f32.gmra.mxu1 %v6502_v16  ;;  %v3764_v17 = vpop.f32.mrf.mxu3  ;;  %v3556_v18 = vadd.f32 %v3555_v14, %v3347_v13  ;;  %v6524_v14 = vld [vmem:[%s7122_s19 + $0x238] sm:$0xff] }
 0x6dd   : > { %v3765_v19 = vadd.f32 %v3764_v17, %v3556_v18  ;;  %v6525_v17 = vld [vmem:[%s7122_s19 + $0x220] sm:$0xff]  ;;  %v6526_v18 = vld [vmem:[%s7122_s19 + $0x228] sm:$0xff] }
 0x6df   : > { %5624 = vst [vmem:[%s7296_s12 + $0x770] sm:$0xff] %v3765_v19  ;;  %4249 = vmatmul.f32.gmra.mxu2 %v6503_v20  ;;  %v3140_v21 = vpop.f32.mrf.mxu0 }
 0x6e0   : > { %v3349_v22 = vpop.f32.mrf.mxu1  ;;  %4458 = vmatmul.f32.gmra.mxu3 %v6504_v23 }
 0x6e1   : > { %v3350_v24 = vadd.f32 %v3349_v22, %v3140_v21  ;;  %v6527_v22 = vld [vmem:[%s7122_s19 + $0x250] sm:$0xff] }
 0x6e2   : > { %v3558_v25 = vpop.f32.mrf.mxu2  ;;  %3831 = vmatmul.f32.gmra.mxu0 %v6505_v26 }
 0x6e3   : > { %4040 = vmatmul.f32.gmra.mxu1 %v6506_v27  ;;  %v3767_v28 = vpop.f32.mrf.mxu3  ;;  %v3559_v29 = vadd.f32 %v3558_v25, %v3350_v24  ;;  %v6528_v25 = vld [vmem:[%s7122_s19 + $0x258] sm:$0xff] }
 0x6e5   : > { %v3768_v30 = vadd.f32 %v3767_v28, %v3559_v29  ;;  %v6529_v28 = vld [vmem:[%s7122_s19 + $0x240] sm:$0xff]  ;;  %v6530_v29 = vld [vmem:[%s7122_s19 + $0x248] sm:$0xff] }
 0x6e7   : > { %5628 = vst [vmem:[%s7296_s12 + $0x790] sm:$0xff] %v3768_v30  ;;  %4252 = vmatmul.f32.gmra.mxu2 %v6507_v31  ;;  %v3143_v32 = vpop.f32.mrf.mxu0 }
 0x6e8   : > { %v3352_v33 = vpop.f32.mrf.mxu1  ;;  %4461 = vmatmul.f32.gmra.mxu3 %v6508_v34 }
 0x6e9   : > { %v3353_v35 = vadd.f32 %v3352_v33, %v3143_v32  ;;  %v6531_v33 = vld [vmem:[%s7122_s19 + $0x270] sm:$0xff] }
 0x6ea   : > { %v3561_v36 = vpop.f32.mrf.mxu2  ;;  %3834 = vmatmul.f32.gmra.mxu0 %v6509_v37 }
 0x6eb   : > { %4043 = vmatmul.f32.gmra.mxu1 %v6510_v38  ;;  %v3770_v39 = vpop.f32.mrf.mxu3  ;;  %v3562_v40 = vadd.f32 %v3561_v36, %v3353_v35  ;;  %v6532_v36 = vld [vmem:[%s7122_s19 + $0x278] sm:$0xff] }
 0x6ed   : > { %v3771_v41 = vadd.f32 %v3770_v39, %v3562_v40  ;;  %v6533_v39 = vld [vmem:[%s7122_s19 + $0x260] sm:$0xff]  ;;  %v6534_v40 = vld [vmem:[%s7122_s19 + $0x268] sm:$0xff] }
 0x6ef   : > { %5632 = vst [vmem:[%s7296_s12 + $0x7b0] sm:$0xff] %v3771_v41  ;;  %4255 = vmatmul.f32.gmra.mxu2 %v6511_v42  ;;  %v3146_v43 = vpop.f32.mrf.mxu0 }
 0x6f0   : > { %v3355_v44 = vpop.f32.mrf.mxu1  ;;  %4464 = vmatmul.f32.gmra.mxu3 %v6512_v45 }
 0x6f1   : > { %v3356_v46 = vadd.f32 %v3355_v44, %v3146_v43  ;;  %v6535_v44 = vld [vmem:[%s7122_s19 + $0x290] sm:$0xff] }
 0x6f2   : > { %v3564_v47 = vpop.f32.mrf.mxu2  ;;  %3837 = vmatmul.f32.gmra.mxu0 %v6513_v48 }
 0x6f3   : > { %4046 = vmatmul.f32.gmra.mxu1 %v6514_v49  ;;  %v3773_v50 = vpop.f32.mrf.mxu3  ;;  %v3565_v51 = vadd.f32 %v3564_v47, %v3356_v46  ;;  %v6536_v47 = vld [vmem:[%s7122_s19 + $0x298] sm:$0xff] }
 0x6f5   : > { %v3774_v52 = vadd.f32 %v3773_v50, %v3565_v51  ;;  %v6537_v50 = vld [vmem:[%s7122_s19 + $0x280] sm:$0xff]  ;;  %v6538_v51 = vld [vmem:[%s7122_s19 + $0x288] sm:$0xff] }
 0x6f7   : > { %5636 = vst [vmem:[%s7296_s12 + $0x7d0] sm:$0xff] %v3774_v52  ;;  %4258 = vmatmul.f32.gmra.mxu2 %v6515_v53  ;;  %v3149_v54 = vpop.f32.mrf.mxu0 }
 0x6f8   : > { %v3358_v55 = vpop.f32.mrf.mxu1  ;;  %4467 = vmatmul.f32.gmra.mxu3 %v6516_v56 }
 0x6f9   : > { %v3359_v57 = vadd.f32 %v3358_v55, %v3149_v54  ;;  %v6539_v55 = vld [vmem:[%s7122_s19 + $0x2b0] sm:$0xff] }
 0x6fa   : > { %v3567_v58 = vpop.f32.mrf.mxu2  ;;  %3840 = vmatmul.f32.gmra.mxu0 %v6517_v59 }
 0x6fb   : > { %4049 = vmatmul.f32.gmra.mxu1 %v6518_v60  ;;  %v3776_v61 = vpop.f32.mrf.mxu3  ;;  %v3568_v62 = vadd.f32 %v3567_v58, %v3359_v57  ;;  %v6540_v58 = vld [vmem:[%s7122_s19 + $0x2b8] sm:$0xff] }
 0x6fd   : > { %v3777_v63 = vadd.f32 %v3776_v61, %v3568_v62  ;;  %v6541_v61 = vld [vmem:[%s7122_s19 + $0x2a0] sm:$0xff]  ;;  %v6542_v62 = vld [vmem:[%s7122_s19 + $0x2a8] sm:$0xff] }
 0x6ff   : > { %5640 = vst [vmem:[%s7296_s12 + $0x7f0] sm:$0xff] %v3777_v63  ;;  %4261 = vmatmul.f32.gmra.mxu2 %v6519_v0  ;;  %v3796_v1 = vpop.f32.mrf.mxu0 }
 0x700   : > { %v4005_v2 = vpop.f32.mrf.mxu1  ;;  %4470 = vmatmul.f32.gmra.mxu3 %v6520_v3 }
 0x701   : > { %v4006_v4 = vadd.f32 %v4005_v2, %v3796_v1  ;;  %v6543_v2 = vld [vmem:[%s7122_s19 + $0x2d0] sm:$0xff] }
 0x702   : > { %v4214_v5 = vpop.f32.mrf.mxu2  ;;  %3843 = vmatmul.f32.gmra.mxu0 %v6521_v6 }
 0x703   : > { %4052 = vmatmul.f32.gmra.mxu1 %v6522_v7  ;;  %v4423_v8 = vpop.f32.mrf.mxu3  ;;  %v4215_v9 = vadd.f32 %v4214_v5, %v4006_v4  ;;  %v6544_v5 = vld [vmem:[%s7122_s19 + $0x2d8] sm:$0xff] }
 0x705   : > { %v4424_v10 = vadd.f32 %v4423_v8, %v4215_v9  ;;  %v6545_v8 = vld [vmem:[%s7122_s19 + $0x2c0] sm:$0xff]  ;;  %v6546_v9 = vld [vmem:[%s7122_s19 + $0x2c8] sm:$0xff] }
 0x707   : > { %5389 = vst [vmem:[%s7296_s12 + $0x18] sm:$0xff] %v4424_v10  ;;  %4264 = vmatmul.f32.gmra.mxu2 %v6523_v11  ;;  %v3799_v12 = vpop.f32.mrf.mxu0 }
 0x708   : > { %v4008_v13 = vpop.f32.mrf.mxu1  ;;  %4473 = vmatmul.f32.gmra.mxu3 %v6524_v14 }
 0x709   : > { %v4009_v15 = vadd.f32 %v4008_v13, %v3799_v12  ;;  %v6547_v13 = vld [vmem:[%s7122_s19 + $0x2f0] sm:$0xff] }
 0x70a   : > { %v4217_v16 = vpop.f32.mrf.mxu2  ;;  %3846 = vmatmul.f32.gmra.mxu0 %v6525_v17 }
 0x70b   : > { %4055 = vmatmul.f32.gmra.mxu1 %v6526_v18  ;;  %v4426_v19 = vpop.f32.mrf.mxu3  ;;  %v4218_v20 = vadd.f32 %v4217_v16, %v4009_v15  ;;  %v6548_v16 = vld [vmem:[%s7122_s19 + $0x2f8] sm:$0xff] }
 0x70d   : > { %v4427_v21 = vadd.f32 %v4426_v19, %v4218_v20  ;;  %v6549_v19 = vld [vmem:[%s7122_s19 + $0x2e0] sm:$0xff]  ;;  %v6550_v20 = vld [vmem:[%s7122_s19 + $0x2e8] sm:$0xff] }
 0x70f   : > { %5393 = vst [vmem:[%s7296_s12 + $0x38] sm:$0xff] %v4427_v21  ;;  %4267 = vmatmul.f32.gmra.mxu2 %v6527_v22  ;;  %v3802_v23 = vpop.f32.mrf.mxu0 }
 0x710   : > { %v4011_v24 = vpop.f32.mrf.mxu1  ;;  %4476 = vmatmul.f32.gmra.mxu3 %v6528_v25 }
 0x711   : > { %v4012_v26 = vadd.f32 %v4011_v24, %v3802_v23  ;;  %v6551_v24 = vld [vmem:[%s7122_s19 + $0x310] sm:$0xff] }
 0x712   : > { %v4220_v27 = vpop.f32.mrf.mxu2  ;;  %3849 = vmatmul.f32.gmra.mxu0 %v6529_v28 }
 0x713   : > { %4058 = vmatmul.f32.gmra.mxu1 %v6530_v29  ;;  %v4429_v30 = vpop.f32.mrf.mxu3  ;;  %v4221_v31 = vadd.f32 %v4220_v27, %v4012_v26  ;;  %v6552_v27 = vld [vmem:[%s7122_s19 + $0x318] sm:$0xff] }
 0x715   : > { %v4430_v32 = vadd.f32 %v4429_v30, %v4221_v31  ;;  %v6553_v30 = vld [vmem:[%s7122_s19 + $0x300] sm:$0xff]  ;;  %v6554_v31 = vld [vmem:[%s7122_s19 + $0x308] sm:$0xff] }
 0x717   : > { %5397 = vst [vmem:[%s7296_s12 + $0x58] sm:$0xff] %v4430_v32  ;;  %4270 = vmatmul.f32.gmra.mxu2 %v6531_v33  ;;  %v3805_v34 = vpop.f32.mrf.mxu0 }
 0x718   : > { %v4014_v35 = vpop.f32.mrf.mxu1  ;;  %4479 = vmatmul.f32.gmra.mxu3 %v6532_v36 }
 0x719   : > { %v4015_v37 = vadd.f32 %v4014_v35, %v3805_v34  ;;  %v6555_v35 = vld [vmem:[%s7122_s19 + $0x330] sm:$0xff] }
 0x71a   : > { %v4223_v38 = vpop.f32.mrf.mxu2  ;;  %3852 = vmatmul.f32.gmra.mxu0 %v6533_v39 }
 0x71b   : > { %4061 = vmatmul.f32.gmra.mxu1 %v6534_v40  ;;  %v4432_v41 = vpop.f32.mrf.mxu3  ;;  %v4224_v42 = vadd.f32 %v4223_v38, %v4015_v37  ;;  %v6556_v38 = vld [vmem:[%s7122_s19 + $0x338] sm:$0xff] }
 0x71d   : > { %v4433_v43 = vadd.f32 %v4432_v41, %v4224_v42  ;;  %v6557_v41 = vld [vmem:[%s7122_s19 + $0x320] sm:$0xff]  ;;  %v6558_v42 = vld [vmem:[%s7122_s19 + $0x328] sm:$0xff] }
 0x71f   : > { %5401 = vst [vmem:[%s7296_s12 + $0x78] sm:$0xff] %v4433_v43  ;;  %4273 = vmatmul.f32.gmra.mxu2 %v6535_v44  ;;  %v3808_v45 = vpop.f32.mrf.mxu0 }
 0x720   : > { %v4017_v46 = vpop.f32.mrf.mxu1  ;;  %4482 = vmatmul.f32.gmra.mxu3 %v6536_v47 }
 0x721   : > { %v4018_v48 = vadd.f32 %v4017_v46, %v3808_v45  ;;  %v6559_v46 = vld [vmem:[%s7122_s19 + $0x350] sm:$0xff] }
 0x722   : > { %v4226_v49 = vpop.f32.mrf.mxu2  ;;  %3855 = vmatmul.f32.gmra.mxu0 %v6537_v50 }
 0x723   : > { %4064 = vmatmul.f32.gmra.mxu1 %v6538_v51  ;;  %v4435_v52 = vpop.f32.mrf.mxu3  ;;  %v4227_v53 = vadd.f32 %v4226_v49, %v4018_v48  ;;  %v6560_v49 = vld [vmem:[%s7122_s19 + $0x358] sm:$0xff] }
 0x725   : > { %v4436_v54 = vadd.f32 %v4435_v52, %v4227_v53  ;;  %v6561_v52 = vld [vmem:[%s7122_s19 + $0x340] sm:$0xff]  ;;  %v6562_v53 = vld [vmem:[%s7122_s19 + $0x348] sm:$0xff] }
 0x727   : > { %5405 = vst [vmem:[%s7296_s12 + $0x98] sm:$0xff] %v4436_v54  ;;  %4276 = vmatmul.f32.gmra.mxu2 %v6539_v55  ;;  %v3811_v56 = vpop.f32.mrf.mxu0 }
 0x728   : > { %v4020_v57 = vpop.f32.mrf.mxu1  ;;  %4485 = vmatmul.f32.gmra.mxu3 %v6540_v58 }
 0x729   : > { %v4021_v59 = vadd.f32 %v4020_v57, %v3811_v56  ;;  %v6563_v57 = vld [vmem:[%s7122_s19 + $0x370] sm:$0xff] }
 0x72a   : > { %v4229_v60 = vpop.f32.mrf.mxu2  ;;  %3858 = vmatmul.f32.gmra.mxu0 %v6541_v61 }
 0x72b   : > { %4067 = vmatmul.f32.gmra.mxu1 %v6542_v62  ;;  %v4438_v63 = vpop.f32.mrf.mxu3  ;;  %v4230_v0 = vadd.f32 %v4229_v60, %v4021_v59  ;;  %v6564_v60 = vld [vmem:[%s7122_s19 + $0x378] sm:$0xff] }
 0x72d   : > { %v4439_v1 = vadd.f32 %v4438_v63, %v4230_v0  ;;  %v6565_v63 = vld [vmem:[%s7122_s19 + $0x360] sm:$0xff]  ;;  %v6566_v0 = vld [vmem:[%s7122_s19 + $0x368] sm:$0xff] }
 0x72f   : > { %5409 = vst [vmem:[%s7296_s12 + $0xb8] sm:$0xff] %v4439_v1  ;;  %4279 = vmatmul.f32.gmra.mxu2 %v6543_v2  ;;  %v3814_v3 = vpop.f32.mrf.mxu0 }
 0x730   : > { %v4023_v4 = vpop.f32.mrf.mxu1  ;;  %4488 = vmatmul.f32.gmra.mxu3 %v6544_v5 }
 0x731   : > { %v4024_v6 = vadd.f32 %v4023_v4, %v3814_v3  ;;  %v6567_v4 = vld [vmem:[%s7122_s19 + $0x390] sm:$0xff] }
 0x732   : > { %v4232_v7 = vpop.f32.mrf.mxu2  ;;  %3861 = vmatmul.f32.gmra.mxu0 %v6545_v8 }
 0x733   : > { %4070 = vmatmul.f32.gmra.mxu1 %v6546_v9  ;;  %v4441_v10 = vpop.f32.mrf.mxu3  ;;  %v4233_v11 = vadd.f32 %v4232_v7, %v4024_v6  ;;  %v6568_v7 = vld [vmem:[%s7122_s19 + $0x398] sm:$0xff] }
 0x735   : > { %v4442_v12 = vadd.f32 %v4441_v10, %v4233_v11  ;;  %v6569_v10 = vld [vmem:[%s7122_s19 + $0x380] sm:$0xff]  ;;  %v6570_v11 = vld [vmem:[%s7122_s19 + $0x388] sm:$0xff] }
 0x737   : > { %5413 = vst [vmem:[%s7296_s12 + $0xd8] sm:$0xff] %v4442_v12  ;;  %4282 = vmatmul.f32.gmra.mxu2 %v6547_v13  ;;  %v3817_v14 = vpop.f32.mrf.mxu0 }
 0x738   : > { %v4026_v15 = vpop.f32.mrf.mxu1  ;;  %4491 = vmatmul.f32.gmra.mxu3 %v6548_v16 }
 0x739   : > { %v4027_v17 = vadd.f32 %v4026_v15, %v3817_v14  ;;  %v6571_v15 = vld [vmem:[%s7122_s19 + $0x3b0] sm:$0xff] }
 0x73a   : > { %v4235_v18 = vpop.f32.mrf.mxu2  ;;  %3864 = vmatmul.f32.gmra.mxu0 %v6549_v19 }
 0x73b   : > { %4073 = vmatmul.f32.gmra.mxu1 %v6550_v20  ;;  %v4444_v21 = vpop.f32.mrf.mxu3  ;;  %v4236_v22 = vadd.f32 %v4235_v18, %v4027_v17  ;;  %v6572_v18 = vld [vmem:[%s7122_s19 + $0x3b8] sm:$0xff] }
 0x73d   : > { %v4445_v23 = vadd.f32 %v4444_v21, %v4236_v22  ;;  %v6573_v21 = vld [vmem:[%s7122_s19 + $0x3a0] sm:$0xff]  ;;  %v6574_v22 = vld [vmem:[%s7122_s19 + $0x3a8] sm:$0xff] }
 0x73f   : > { %5417 = vst [vmem:[%s7296_s12 + $0xf8] sm:$0xff] %v4445_v23  ;;  %4285 = vmatmul.f32.gmra.mxu2 %v6551_v24  ;;  %v3820_v25 = vpop.f32.mrf.mxu0 }
 0x740   : > { %v4029_v26 = vpop.f32.mrf.mxu1  ;;  %4494 = vmatmul.f32.gmra.mxu3 %v6552_v27 }
 0x741   : > { %v4030_v28 = vadd.f32 %v4029_v26, %v3820_v25  ;;  %v6575_v26 = vld [vmem:[%s7122_s19 + $0x3d0] sm:$0xff] }
 0x742   : > { %v4238_v29 = vpop.f32.mrf.mxu2  ;;  %3867 = vmatmul.f32.gmra.mxu0 %v6553_v30 }
 0x743   : > { %4076 = vmatmul.f32.gmra.mxu1 %v6554_v31  ;;  %v4447_v32 = vpop.f32.mrf.mxu3  ;;  %v4239_v33 = vadd.f32 %v4238_v29, %v4030_v28  ;;  %v6576_v29 = vld [vmem:[%s7122_s19 + $0x3d8] sm:$0xff] }
 0x745   : > { %v4448_v34 = vadd.f32 %v4447_v32, %v4239_v33  ;;  %v6577_v32 = vld [vmem:[%s7122_s19 + $0x3c0] sm:$0xff]  ;;  %v6578_v33 = vld [vmem:[%s7122_s19 + $0x3c8] sm:$0xff] }
 0x747   : > { %5421 = vst [vmem:[%s7296_s12 + $0x118] sm:$0xff] %v4448_v34  ;;  %4288 = vmatmul.f32.gmra.mxu2 %v6555_v35  ;;  %v3823_v36 = vpop.f32.mrf.mxu0 }
 0x748   : > { %v4032_v37 = vpop.f32.mrf.mxu1  ;;  %4497 = vmatmul.f32.gmra.mxu3 %v6556_v38 }
 0x749   : > { %v4033_v39 = vadd.f32 %v4032_v37, %v3823_v36  ;;  %v6579_v37 = vld [vmem:[%s7122_s19 + $0x3f0] sm:$0xff] }
 0x74a   : > { %v4241_v40 = vpop.f32.mrf.mxu2  ;;  %3870 = vmatmul.f32.gmra.mxu0 %v6557_v41 }
 0x74b   : > { %4079 = vmatmul.f32.gmra.mxu1 %v6558_v42  ;;  %v4450_v43 = vpop.f32.mrf.mxu3  ;;  %v4242_v44 = vadd.f32 %v4241_v40, %v4033_v39  ;;  %v6580_v40 = vld [vmem:[%s7122_s19 + $0x3f8] sm:$0xff] }
 0x74d   : > { %v4451_v45 = vadd.f32 %v4450_v43, %v4242_v44  ;;  %v6581_v43 = vld [vmem:[%s7122_s19 + $0x3e0] sm:$0xff]  ;;  %v6582_v44 = vld [vmem:[%s7122_s19 + $0x3e8] sm:$0xff] }
 0x74f   : > { %5425 = vst [vmem:[%s7296_s12 + $0x138] sm:$0xff] %v4451_v45  ;;  %4291 = vmatmul.f32.gmra.mxu2 %v6559_v46  ;;  %v3826_v47 = vpop.f32.mrf.mxu0 }
 0x750   : > { %v4035_v48 = vpop.f32.mrf.mxu1  ;;  %4500 = vmatmul.f32.gmra.mxu3 %v6560_v49 }
 0x751   : > { %v4036_v50 = vadd.f32 %v4035_v48, %v3826_v47  ;;  %v6583_v48 = vld [vmem:[%s7122_s19 + $0x410] sm:$0xff] }
 0x752   : > { %v4244_v51 = vpop.f32.mrf.mxu2  ;;  %3873 = vmatmul.f32.gmra.mxu0 %v6561_v52 }
 0x753   : > { %4082 = vmatmul.f32.gmra.mxu1 %v6562_v53  ;;  %v4453_v54 = vpop.f32.mrf.mxu3  ;;  %v4245_v55 = vadd.f32 %v4244_v51, %v4036_v50  ;;  %v6584_v51 = vld [vmem:[%s7122_s19 + $0x418] sm:$0xff] }
 0x755   : > { %v4454_v56 = vadd.f32 %v4453_v54, %v4245_v55  ;;  %v6585_v54 = vld [vmem:[%s7122_s19 + $0x400] sm:$0xff]  ;;  %v6586_v55 = vld [vmem:[%s7122_s19 + $0x408] sm:$0xff] }
 0x757   : > { %5429 = vst [vmem:[%s7296_s12 + $0x158] sm:$0xff] %v4454_v56  ;;  %4294 = vmatmul.f32.gmra.mxu2 %v6563_v57  ;;  %v3829_v58 = vpop.f32.mrf.mxu0 }
 0x758   : > { %v4038_v59 = vpop.f32.mrf.mxu1  ;;  %4503 = vmatmul.f32.gmra.mxu3 %v6564_v60 }
 0x759   : > { %v4039_v61 = vadd.f32 %v4038_v59, %v3829_v58  ;;  %v6587_v59 = vld [vmem:[%s7122_s19 + $0x430] sm:$0xff] }
 0x75a   : > { %v4247_v62 = vpop.f32.mrf.mxu2  ;;  %3876 = vmatmul.f32.gmra.mxu0 %v6565_v63 }
 0x75b   : > { %4085 = vmatmul.f32.gmra.mxu1 %v6566_v0  ;;  %v4456_v1 = vpop.f32.mrf.mxu3  ;;  %v4248_v2 = vadd.f32 %v4247_v62, %v4039_v61  ;;  %v6588_v62 = vld [vmem:[%s7122_s19 + $0x438] sm:$0xff] }
 0x75d   : > { %v4457_v3 = vadd.f32 %v4456_v1, %v4248_v2  ;;  %v6589_v1 = vld [vmem:[%s7122_s19 + $0x420] sm:$0xff]  ;;  %v6590_v2 = vld [vmem:[%s7122_s19 + $0x428] sm:$0xff] }
 0x75f   : > { %5433 = vst [vmem:[%s7296_s12 + $0x178] sm:$0xff] %v4457_v3  ;;  %4297 = vmatmul.f32.gmra.mxu2 %v6567_v4  ;;  %v3832_v5 = vpop.f32.mrf.mxu0 }
 0x760   : > { %v4041_v6 = vpop.f32.mrf.mxu1  ;;  %4506 = vmatmul.f32.gmra.mxu3 %v6568_v7 }
 0x761   : > { %v4042_v8 = vadd.f32 %v4041_v6, %v3832_v5  ;;  %v6591_v6 = vld [vmem:[%s7122_s19 + $0x450] sm:$0xff] }
 0x762   : > { %v4250_v9 = vpop.f32.mrf.mxu2  ;;  %3879 = vmatmul.f32.gmra.mxu0 %v6569_v10 }
 0x763   : > { %4088 = vmatmul.f32.gmra.mxu1 %v6570_v11  ;;  %v4459_v12 = vpop.f32.mrf.mxu3  ;;  %v4251_v13 = vadd.f32 %v4250_v9, %v4042_v8  ;;  %v6592_v9 = vld [vmem:[%s7122_s19 + $0x458] sm:$0xff] }
 0x765   : > { %v4460_v14 = vadd.f32 %v4459_v12, %v4251_v13  ;;  %v6593_v12 = vld [vmem:[%s7122_s19 + $0x440] sm:$0xff]  ;;  %v6594_v13 = vld [vmem:[%s7122_s19 + $0x448] sm:$0xff] }
 0x767   : > { %5437 = vst [vmem:[%s7296_s12 + $0x198] sm:$0xff] %v4460_v14  ;;  %4300 = vmatmul.f32.gmra.mxu2 %v6571_v15  ;;  %v3835_v16 = vpop.f32.mrf.mxu0 }
 0x768   : > { %v4044_v17 = vpop.f32.mrf.mxu1  ;;  %4509 = vmatmul.f32.gmra.mxu3 %v6572_v18 }
 0x769   : > { %v4045_v19 = vadd.f32 %v4044_v17, %v3835_v16  ;;  %v6595_v17 = vld [vmem:[%s7122_s19 + $0x470] sm:$0xff] }
 0x76a   : > { %v4253_v20 = vpop.f32.mrf.mxu2  ;;  %3882 = vmatmul.f32.gmra.mxu0 %v6573_v21 }
 0x76b   : > { %4091 = vmatmul.f32.gmra.mxu1 %v6574_v22  ;;  %v4462_v23 = vpop.f32.mrf.mxu3  ;;  %v4254_v24 = vadd.f32 %v4253_v20, %v4045_v19  ;;  %v6596_v20 = vld [vmem:[%s7122_s19 + $0x478] sm:$0xff] }
 0x76d   : > { %v4463_v25 = vadd.f32 %v4462_v23, %v4254_v24  ;;  %v6597_v23 = vld [vmem:[%s7122_s19 + $0x460] sm:$0xff]  ;;  %v6598_v24 = vld [vmem:[%s7122_s19 + $0x468] sm:$0xff] }
 0x76f   : > { %5441 = vst [vmem:[%s7296_s12 + $0x1b8] sm:$0xff] %v4463_v25  ;;  %4303 = vmatmul.f32.gmra.mxu2 %v6575_v26  ;;  %v3838_v27 = vpop.f32.mrf.mxu0 }
 0x770   : > { %v4047_v28 = vpop.f32.mrf.mxu1  ;;  %4512 = vmatmul.f32.gmra.mxu3 %v6576_v29 }
 0x771   : > { %v4048_v30 = vadd.f32 %v4047_v28, %v3838_v27  ;;  %v6599_v28 = vld [vmem:[%s7122_s19 + $0x490] sm:$0xff] }
 0x772   : > { %v4256_v31 = vpop.f32.mrf.mxu2  ;;  %3885 = vmatmul.f32.gmra.mxu0 %v6577_v32 }
 0x773   : > { %4094 = vmatmul.f32.gmra.mxu1 %v6578_v33  ;;  %v4465_v34 = vpop.f32.mrf.mxu3  ;;  %v4257_v35 = vadd.f32 %v4256_v31, %v4048_v30  ;;  %v6600_v31 = vld [vmem:[%s7122_s19 + $0x498] sm:$0xff] }
 0x775   : > { %v4466_v36 = vadd.f32 %v4465_v34, %v4257_v35  ;;  %v6601_v34 = vld [vmem:[%s7122_s19 + $0x480] sm:$0xff]  ;;  %v6602_v35 = vld [vmem:[%s7122_s19 + $0x488] sm:$0xff] }
 0x777   : > { %5445 = vst [vmem:[%s7296_s12 + $0x1d8] sm:$0xff] %v4466_v36  ;;  %4306 = vmatmul.f32.gmra.mxu2 %v6579_v37  ;;  %v3841_v38 = vpop.f32.mrf.mxu0 }
 0x778   : > { %v4050_v39 = vpop.f32.mrf.mxu1  ;;  %4515 = vmatmul.f32.gmra.mxu3 %v6580_v40 }
 0x779   : > { %v4051_v41 = vadd.f32 %v4050_v39, %v3841_v38  ;;  %v6603_v39 = vld [vmem:[%s7122_s19 + $0x4b0] sm:$0xff] }
 0x77a   : > { %v4259_v42 = vpop.f32.mrf.mxu2  ;;  %3888 = vmatmul.f32.gmra.mxu0 %v6581_v43 }
 0x77b   : > { %4097 = vmatmul.f32.gmra.mxu1 %v6582_v44  ;;  %v4468_v45 = vpop.f32.mrf.mxu3  ;;  %v4260_v46 = vadd.f32 %v4259_v42, %v4051_v41  ;;  %v6604_v42 = vld [vmem:[%s7122_s19 + $0x4b8] sm:$0xff] }
 0x77d   : > { %v4469_v47 = vadd.f32 %v4468_v45, %v4260_v46  ;;  %v6605_v45 = vld [vmem:[%s7122_s19 + $0x4a0] sm:$0xff]  ;;  %v6606_v46 = vld [vmem:[%s7122_s19 + $0x4a8] sm:$0xff] }
 0x77f   : > { %5449 = vst [vmem:[%s7296_s12 + $0x1f8] sm:$0xff] %v4469_v47  ;;  %4309 = vmatmul.f32.gmra.mxu2 %v6583_v48  ;;  %v3844_v49 = vpop.f32.mrf.mxu0 }
 0x780   : > { %v4053_v50 = vpop.f32.mrf.mxu1  ;;  %4518 = vmatmul.f32.gmra.mxu3 %v6584_v51 }
 0x781   : > { %v4054_v52 = vadd.f32 %v4053_v50, %v3844_v49  ;;  %v6607_v50 = vld [vmem:[%s7122_s19 + $0x4d0] sm:$0xff] }
 0x782   : > { %v4262_v53 = vpop.f32.mrf.mxu2  ;;  %3891 = vmatmul.f32.gmra.mxu0 %v6585_v54 }
 0x783   : > { %4100 = vmatmul.f32.gmra.mxu1 %v6586_v55  ;;  %v4471_v56 = vpop.f32.mrf.mxu3  ;;  %v4263_v57 = vadd.f32 %v4262_v53, %v4054_v52  ;;  %v6608_v53 = vld [vmem:[%s7122_s19 + $0x4d8] sm:$0xff] }
 0x785   : > { %v4472_v58 = vadd.f32 %v4471_v56, %v4263_v57  ;;  %v6609_v56 = vld [vmem:[%s7122_s19 + $0x4c0] sm:$0xff]  ;;  %v6610_v57 = vld [vmem:[%s7122_s19 + $0x4c8] sm:$0xff] }
 0x787   : > { %5453 = vst [vmem:[%s7296_s12 + $0x218] sm:$0xff] %v4472_v58  ;;  %4312 = vmatmul.f32.gmra.mxu2 %v6587_v59  ;;  %v3847_v60 = vpop.f32.mrf.mxu0 }
 0x788   : > { %v4056_v61 = vpop.f32.mrf.mxu1  ;;  %4521 = vmatmul.f32.gmra.mxu3 %v6588_v62 }
 0x789   : > { %v4057_v63 = vadd.f32 %v4056_v61, %v3847_v60  ;;  %v6611_v61 = vld [vmem:[%s7122_s19 + $0x4f0] sm:$0xff] }
 0x78a   : > { %v4265_v0 = vpop.f32.mrf.mxu2  ;;  %3894 = vmatmul.f32.gmra.mxu0 %v6589_v1 }
 0x78b   : > { %4103 = vmatmul.f32.gmra.mxu1 %v6590_v2  ;;  %v4474_v3 = vpop.f32.mrf.mxu3  ;;  %v4266_v4 = vadd.f32 %v4265_v0, %v4057_v63  ;;  %v6612_v0 = vld [vmem:[%s7122_s19 + $0x4f8] sm:$0xff] }
 0x78d   : > { %v4475_v5 = vadd.f32 %v4474_v3, %v4266_v4  ;;  %v6613_v3 = vld [vmem:[%s7122_s19 + $0x4e0] sm:$0xff]  ;;  %v6614_v4 = vld [vmem:[%s7122_s19 + $0x4e8] sm:$0xff] }
 0x78f   : > { %5457 = vst [vmem:[%s7296_s12 + $0x238] sm:$0xff] %v4475_v5  ;;  %4315 = vmatmul.f32.gmra.mxu2 %v6591_v6  ;;  %v3850_v7 = vpop.f32.mrf.mxu0 }
 0x790   : > { %v4059_v8 = vpop.f32.mrf.mxu1  ;;  %4524 = vmatmul.f32.gmra.mxu3 %v6592_v9 }
 0x791   : > { %v4060_v10 = vadd.f32 %v4059_v8, %v3850_v7  ;;  %v6615_v8 = vld [vmem:[%s7122_s19 + $0x510] sm:$0xff] }
 0x792   : > { %v4268_v11 = vpop.f32.mrf.mxu2  ;;  %3897 = vmatmul.f32.gmra.mxu0 %v6593_v12 }
 0x793   : > { %4106 = vmatmul.f32.gmra.mxu1 %v6594_v13  ;;  %v4477_v14 = vpop.f32.mrf.mxu3  ;;  %v4269_v15 = vadd.f32 %v4268_v11, %v4060_v10  ;;  %v6616_v11 = vld [vmem:[%s7122_s19 + $0x518] sm:$0xff] }
 0x795   : > { %v4478_v16 = vadd.f32 %v4477_v14, %v4269_v15  ;;  %v6617_v14 = vld [vmem:[%s7122_s19 + $0x500] sm:$0xff]  ;;  %v6618_v15 = vld [vmem:[%s7122_s19 + $0x508] sm:$0xff] }
 0x797   : > { %5461 = vst [vmem:[%s7296_s12 + $0x258] sm:$0xff] %v4478_v16  ;;  %4318 = vmatmul.f32.gmra.mxu2 %v6595_v17  ;;  %v3853_v18 = vpop.f32.mrf.mxu0 }
 0x798   : > { %v4062_v19 = vpop.f32.mrf.mxu1  ;;  %4527 = vmatmul.f32.gmra.mxu3 %v6596_v20 }
 0x799   : > { %v4063_v21 = vadd.f32 %v4062_v19, %v3853_v18  ;;  %v6619_v19 = vld [vmem:[%s7122_s19 + $0x530] sm:$0xff] }
 0x79a   : > { %v4271_v22 = vpop.f32.mrf.mxu2  ;;  %3900 = vmatmul.f32.gmra.mxu0 %v6597_v23 }
 0x79b   : > { %4109 = vmatmul.f32.gmra.mxu1 %v6598_v24  ;;  %v4480_v25 = vpop.f32.mrf.mxu3  ;;  %v4272_v26 = vadd.f32 %v4271_v22, %v4063_v21  ;;  %v6620_v22 = vld [vmem:[%s7122_s19 + $0x538] sm:$0xff] }
 0x79d   : > { %v4481_v27 = vadd.f32 %v4480_v25, %v4272_v26  ;;  %v6621_v25 = vld [vmem:[%s7122_s19 + $0x520] sm:$0xff]  ;;  %v6622_v26 = vld [vmem:[%s7122_s19 + $0x528] sm:$0xff] }
 0x79f   : > { %5465 = vst [vmem:[%s7296_s12 + $0x278] sm:$0xff] %v4481_v27  ;;  %4321 = vmatmul.f32.gmra.mxu2 %v6599_v28  ;;  %v3856_v29 = vpop.f32.mrf.mxu0 }
 0x7a0   : > { %v4065_v30 = vpop.f32.mrf.mxu1  ;;  %4530 = vmatmul.f32.gmra.mxu3 %v6600_v31 }
 0x7a1   : > { %v4066_v32 = vadd.f32 %v4065_v30, %v3856_v29  ;;  %v6623_v30 = vld [vmem:[%s7122_s19 + $0x550] sm:$0xff] }
 0x7a2   : > { %v4274_v33 = vpop.f32.mrf.mxu2  ;;  %3903 = vmatmul.f32.gmra.mxu0 %v6601_v34 }
 0x7a3   : > { %4112 = vmatmul.f32.gmra.mxu1 %v6602_v35  ;;  %v4483_v36 = vpop.f32.mrf.mxu3  ;;  %v4275_v37 = vadd.f32 %v4274_v33, %v4066_v32  ;;  %v6624_v33 = vld [vmem:[%s7122_s19 + $0x558] sm:$0xff] }
 0x7a5   : > { %v4484_v38 = vadd.f32 %v4483_v36, %v4275_v37  ;;  %v6625_v36 = vld [vmem:[%s7122_s19 + $0x540] sm:$0xff]  ;;  %v6626_v37 = vld [vmem:[%s7122_s19 + $0x548] sm:$0xff] }
 0x7a7   : > { %5469 = vst [vmem:[%s7296_s12 + $0x298] sm:$0xff] %v4484_v38  ;;  %4324 = vmatmul.f32.gmra.mxu2 %v6603_v39  ;;  %v3859_v40 = vpop.f32.mrf.mxu0 }
 0x7a8   : > { %v4068_v41 = vpop.f32.mrf.mxu1  ;;  %4533 = vmatmul.f32.gmra.mxu3 %v6604_v42 }
 0x7a9   : > { %v4069_v43 = vadd.f32 %v4068_v41, %v3859_v40  ;;  %v6627_v41 = vld [vmem:[%s7122_s19 + $0x570] sm:$0xff] }
 0x7aa   : > { %v4277_v44 = vpop.f32.mrf.mxu2  ;;  %3906 = vmatmul.f32.gmra.mxu0 %v6605_v45 }
 0x7ab   : > { %4115 = vmatmul.f32.gmra.mxu1 %v6606_v46  ;;  %v4486_v47 = vpop.f32.mrf.mxu3  ;;  %v4278_v48 = vadd.f32 %v4277_v44, %v4069_v43  ;;  %v6628_v44 = vld [vmem:[%s7122_s19 + $0x578] sm:$0xff] }
 0x7ad   : > { %v4487_v49 = vadd.f32 %v4486_v47, %v4278_v48  ;;  %v6629_v47 = vld [vmem:[%s7122_s19 + $0x560] sm:$0xff]  ;;  %v6630_v48 = vld [vmem:[%s7122_s19 + $0x568] sm:$0xff] }
 0x7af   : > { %5473 = vst [vmem:[%s7296_s12 + $0x2b8] sm:$0xff] %v4487_v49  ;;  %4327 = vmatmul.f32.gmra.mxu2 %v6607_v50  ;;  %v3862_v51 = vpop.f32.mrf.mxu0 }
 0x7b0   : > { %v4071_v52 = vpop.f32.mrf.mxu1  ;;  %4536 = vmatmul.f32.gmra.mxu3 %v6608_v53 }
 0x7b1   : > { %v4072_v54 = vadd.f32 %v4071_v52, %v3862_v51  ;;  %v6631_v52 = vld [vmem:[%s7122_s19 + $0x590] sm:$0xff] }
 0x7b2   : > { %v4280_v55 = vpop.f32.mrf.mxu2  ;;  %3909 = vmatmul.f32.gmra.mxu0 %v6609_v56 }
 0x7b3   : > { %4118 = vmatmul.f32.gmra.mxu1 %v6610_v57  ;;  %v4489_v58 = vpop.f32.mrf.mxu3  ;;  %v4281_v59 = vadd.f32 %v4280_v55, %v4072_v54  ;;  %v6632_v55 = vld [vmem:[%s7122_s19 + $0x598] sm:$0xff] }
 0x7b5   : > { %v4490_v60 = vadd.f32 %v4489_v58, %v4281_v59  ;;  %v6633_v58 = vld [vmem:[%s7122_s19 + $0x580] sm:$0xff]  ;;  %v6634_v59 = vld [vmem:[%s7122_s19 + $0x588] sm:$0xff] }
 0x7b7   : > { %5477 = vst [vmem:[%s7296_s12 + $0x2d8] sm:$0xff] %v4490_v60  ;;  %4330 = vmatmul.f32.gmra.mxu2 %v6611_v61  ;;  %v3865_v62 = vpop.f32.mrf.mxu0 }
 0x7b8   : > { %v4074_v63 = vpop.f32.mrf.mxu1  ;;  %4539 = vmatmul.f32.gmra.mxu3 %v6612_v0 }
 0x7b9   : > { %v4075_v1 = vadd.f32 %v4074_v63, %v3865_v62  ;;  %v6635_v63 = vld [vmem:[%s7122_s19 + $0x5b0] sm:$0xff] }
 0x7ba   : > { %v4283_v2 = vpop.f32.mrf.mxu2  ;;  %3912 = vmatmul.f32.gmra.mxu0 %v6613_v3 }
 0x7bb   : > { %4121 = vmatmul.f32.gmra.mxu1 %v6614_v4  ;;  %v4492_v5 = vpop.f32.mrf.mxu3  ;;  %v4284_v6 = vadd.f32 %v4283_v2, %v4075_v1  ;;  %v6636_v2 = vld [vmem:[%s7122_s19 + $0x5b8] sm:$0xff] }
 0x7bd   : > { %v4493_v7 = vadd.f32 %v4492_v5, %v4284_v6  ;;  %v6637_v5 = vld [vmem:[%s7122_s19 + $0x5a0] sm:$0xff]  ;;  %v6638_v6 = vld [vmem:[%s7122_s19 + $0x5a8] sm:$0xff] }
 0x7bf   : > { %5481 = vst [vmem:[%s7296_s12 + $0x2f8] sm:$0xff] %v4493_v7  ;;  %4333 = vmatmul.f32.gmra.mxu2 %v6615_v8  ;;  %v3868_v9 = vpop.f32.mrf.mxu0 }
 0x7c0   : > { %v4077_v10 = vpop.f32.mrf.mxu1  ;;  %4542 = vmatmul.f32.gmra.mxu3 %v6616_v11 }
 0x7c1   : > { %v4078_v12 = vadd.f32 %v4077_v10, %v3868_v9  ;;  %v6639_v10 = vld [vmem:[%s7122_s19 + $0x5d0] sm:$0xff] }
 0x7c2   : > { %v4286_v13 = vpop.f32.mrf.mxu2  ;;  %3915 = vmatmul.f32.gmra.mxu0 %v6617_v14 }
 0x7c3   : > { %4124 = vmatmul.f32.gmra.mxu1 %v6618_v15  ;;  %v4495_v16 = vpop.f32.mrf.mxu3  ;;  %v4287_v17 = vadd.f32 %v4286_v13, %v4078_v12  ;;  %v6640_v13 = vld [vmem:[%s7122_s19 + $0x5d8] sm:$0xff] }
 0x7c5   : > { %v4496_v18 = vadd.f32 %v4495_v16, %v4287_v17  ;;  %v6641_v16 = vld [vmem:[%s7122_s19 + $0x5c0] sm:$0xff]  ;;  %v6642_v17 = vld [vmem:[%s7122_s19 + $0x5c8] sm:$0xff] }
 0x7c7   : > { %5485 = vst [vmem:[%s7296_s12 + $0x318] sm:$0xff] %v4496_v18  ;;  %4336 = vmatmul.f32.gmra.mxu2 %v6619_v19  ;;  %v3871_v20 = vpop.f32.mrf.mxu0 }
 0x7c8   : > { %v4080_v21 = vpop.f32.mrf.mxu1  ;;  %4545 = vmatmul.f32.gmra.mxu3 %v6620_v22 }
 0x7c9   : > { %v4081_v23 = vadd.f32 %v4080_v21, %v3871_v20  ;;  %v6643_v21 = vld [vmem:[%s7122_s19 + $0x5f0] sm:$0xff] }
 0x7ca   : > { %v4289_v24 = vpop.f32.mrf.mxu2  ;;  %3918 = vmatmul.f32.gmra.mxu0 %v6621_v25 }
 0x7cb   : > { %4127 = vmatmul.f32.gmra.mxu1 %v6622_v26  ;;  %v4498_v27 = vpop.f32.mrf.mxu3  ;;  %v4290_v28 = vadd.f32 %v4289_v24, %v4081_v23  ;;  %v6644_v24 = vld [vmem:[%s7122_s19 + $0x5f8] sm:$0xff] }
 0x7cd   : > { %v4499_v29 = vadd.f32 %v4498_v27, %v4290_v28  ;;  %v6645_v27 = vld [vmem:[%s7122_s19 + $0x5e0] sm:$0xff]  ;;  %v6646_v28 = vld [vmem:[%s7122_s19 + $0x5e8] sm:$0xff] }
 0x7cf   : > { %5489 = vst [vmem:[%s7296_s12 + $0x338] sm:$0xff] %v4499_v29  ;;  %4339 = vmatmul.f32.gmra.mxu2 %v6623_v30  ;;  %v3874_v31 = vpop.f32.mrf.mxu0 }
 0x7d0   : > { %v4083_v32 = vpop.f32.mrf.mxu1  ;;  %4548 = vmatmul.f32.gmra.mxu3 %v6624_v33 }
 0x7d1   : > { %v4084_v34 = vadd.f32 %v4083_v32, %v3874_v31  ;;  %v6647_v32 = vld [vmem:[%s7122_s19 + $0x610] sm:$0xff] }
 0x7d2   : > { %v4292_v35 = vpop.f32.mrf.mxu2  ;;  %3921 = vmatmul.f32.gmra.mxu0 %v6625_v36 }
 0x7d3   : > { %4130 = vmatmul.f32.gmra.mxu1 %v6626_v37  ;;  %v4501_v38 = vpop.f32.mrf.mxu3  ;;  %v4293_v39 = vadd.f32 %v4292_v35, %v4084_v34  ;;  %v6648_v35 = vld [vmem:[%s7122_s19 + $0x618] sm:$0xff] }
 0x7d5   : > { %v4502_v40 = vadd.f32 %v4501_v38, %v4293_v39  ;;  %v6649_v38 = vld [vmem:[%s7122_s19 + $0x600] sm:$0xff]  ;;  %v6650_v39 = vld [vmem:[%s7122_s19 + $0x608] sm:$0xff] }
 0x7d7   : > { %5493 = vst [vmem:[%s7296_s12 + $0x358] sm:$0xff] %v4502_v40  ;;  %4342 = vmatmul.f32.gmra.mxu2 %v6627_v41  ;;  %v3877_v42 = vpop.f32.mrf.mxu0 }
 0x7d8   : > { %v4086_v43 = vpop.f32.mrf.mxu1  ;;  %4551 = vmatmul.f32.gmra.mxu3 %v6628_v44 }
 0x7d9   : > { %v4087_v45 = vadd.f32 %v4086_v43, %v3877_v42  ;;  %v6651_v43 = vld [vmem:[%s7122_s19 + $0x630] sm:$0xff] }
 0x7da   : > { %v4295_v46 = vpop.f32.mrf.mxu2  ;;  %3924 = vmatmul.f32.gmra.mxu0 %v6629_v47 }
 0x7db   : > { %4133 = vmatmul.f32.gmra.mxu1 %v6630_v48  ;;  %v4504_v49 = vpop.f32.mrf.mxu3  ;;  %v4296_v50 = vadd.f32 %v4295_v46, %v4087_v45  ;;  %v6652_v46 = vld [vmem:[%s7122_s19 + $0x638] sm:$0xff] }
 0x7dd   : > { %v4505_v51 = vadd.f32 %v4504_v49, %v4296_v50  ;;  %v6653_v49 = vld [vmem:[%s7122_s19 + $0x620] sm:$0xff]  ;;  %v6654_v50 = vld [vmem:[%s7122_s19 + $0x628] sm:$0xff] }
 0x7df   : > { %5497 = vst [vmem:[%s7296_s12 + $0x378] sm:$0xff] %v4505_v51  ;;  %4345 = vmatmul.f32.gmra.mxu2 %v6631_v52  ;;  %v3880_v53 = vpop.f32.mrf.mxu0 }
 0x7e0   : > { %v4089_v54 = vpop.f32.mrf.mxu1  ;;  %4554 = vmatmul.f32.gmra.mxu3 %v6632_v55 }
 0x7e1   : > { %v4090_v56 = vadd.f32 %v4089_v54, %v3880_v53  ;;  %v6655_v54 = vld [vmem:[%s7122_s19 + $0x650] sm:$0xff] }
 0x7e2   : > { %v4298_v57 = vpop.f32.mrf.mxu2  ;;  %3927 = vmatmul.f32.gmra.mxu0 %v6633_v58 }
 0x7e3   : > { %4136 = vmatmul.f32.gmra.mxu1 %v6634_v59  ;;  %v4507_v60 = vpop.f32.mrf.mxu3  ;;  %v4299_v61 = vadd.f32 %v4298_v57, %v4090_v56  ;;  %v6656_v57 = vld [vmem:[%s7122_s19 + $0x658] sm:$0xff] }
 0x7e5   : > { %v4508_v62 = vadd.f32 %v4507_v60, %v4299_v61  ;;  %v6657_v60 = vld [vmem:[%s7122_s19 + $0x640] sm:$0xff]  ;;  %v6658_v61 = vld [vmem:[%s7122_s19 + $0x648] sm:$0xff] }
 0x7e7   : > { %5501 = vst [vmem:[%s7296_s12 + $0x398] sm:$0xff] %v4508_v62  ;;  %4348 = vmatmul.f32.gmra.mxu2 %v6635_v63  ;;  %v3883_v0 = vpop.f32.mrf.mxu0 }
 0x7e8   : > { %v4092_v1 = vpop.f32.mrf.mxu1  ;;  %4557 = vmatmul.f32.gmra.mxu3 %v6636_v2 }
 0x7e9   : > { %v4093_v3 = vadd.f32 %v4092_v1, %v3883_v0  ;;  %v6659_v1 = vld [vmem:[%s7122_s19 + $0x670] sm:$0xff] }
 0x7ea   : > { %v4301_v4 = vpop.f32.mrf.mxu2  ;;  %3930 = vmatmul.f32.gmra.mxu0 %v6637_v5 }
 0x7eb   : > { %4139 = vmatmul.f32.gmra.mxu1 %v6638_v6  ;;  %v4510_v7 = vpop.f32.mrf.mxu3  ;;  %v4302_v8 = vadd.f32 %v4301_v4, %v4093_v3  ;;  %v6660_v4 = vld [vmem:[%s7122_s19 + $0x678] sm:$0xff] }
 0x7ed   : > { %v4511_v9 = vadd.f32 %v4510_v7, %v4302_v8  ;;  %v6661_v7 = vld [vmem:[%s7122_s19 + $0x660] sm:$0xff]  ;;  %v6662_v8 = vld [vmem:[%s7122_s19 + $0x668] sm:$0xff] }
 0x7ef   : > { %5505 = vst [vmem:[%s7296_s12 + $0x3b8] sm:$0xff] %v4511_v9  ;;  %4351 = vmatmul.f32.gmra.mxu2 %v6639_v10  ;;  %v3886_v11 = vpop.f32.mrf.mxu0 }
 0x7f0   : > { %v4095_v12 = vpop.f32.mrf.mxu1  ;;  %4560 = vmatmul.f32.gmra.mxu3 %v6640_v13 }
 0x7f1   : > { %v4096_v14 = vadd.f32 %v4095_v12, %v3886_v11  ;;  %v6663_v12 = vld [vmem:[%s7122_s19 + $0x690] sm:$0xff] }
 0x7f2   : > { %v4304_v15 = vpop.f32.mrf.mxu2  ;;  %3933 = vmatmul.f32.gmra.mxu0 %v6641_v16 }
 0x7f3   : > { %4142 = vmatmul.f32.gmra.mxu1 %v6642_v17  ;;  %v4513_v18 = vpop.f32.mrf.mxu3  ;;  %v4305_v19 = vadd.f32 %v4304_v15, %v4096_v14  ;;  %v6664_v15 = vld [vmem:[%s7122_s19 + $0x698] sm:$0xff] }
 0x7f5   : > { %v4514_v20 = vadd.f32 %v4513_v18, %v4305_v19  ;;  %v6665_v18 = vld [vmem:[%s7122_s19 + $0x680] sm:$0xff]  ;;  %v6666_v19 = vld [vmem:[%s7122_s19 + $0x688] sm:$0xff] }
 0x7f7   : > { %5509 = vst [vmem:[%s7296_s12 + $0x3d8] sm:$0xff] %v4514_v20  ;;  %4354 = vmatmul.f32.gmra.mxu2 %v6643_v21  ;;  %v3889_v22 = vpop.f32.mrf.mxu0 }
 0x7f8   : > { %v4098_v23 = vpop.f32.mrf.mxu1  ;;  %4563 = vmatmul.f32.gmra.mxu3 %v6644_v24 }
 0x7f9   : > { %v4099_v25 = vadd.f32 %v4098_v23, %v3889_v22  ;;  %v6667_v23 = vld [vmem:[%s7122_s19 + $0x6b0] sm:$0xff] }
 0x7fa   : > { %v4307_v26 = vpop.f32.mrf.mxu2  ;;  %3936 = vmatmul.f32.gmra.mxu0 %v6645_v27 }
 0x7fb   : > { %4145 = vmatmul.f32.gmra.mxu1 %v6646_v28  ;;  %v4516_v29 = vpop.f32.mrf.mxu3  ;;  %v4308_v30 = vadd.f32 %v4307_v26, %v4099_v25  ;;  %v6668_v26 = vld [vmem:[%s7122_s19 + $0x6b8] sm:$0xff] }
 0x7fd   : > { %v4517_v31 = vadd.f32 %v4516_v29, %v4308_v30  ;;  %v6669_v29 = vld [vmem:[%s7122_s19 + $0x6a0] sm:$0xff]  ;;  %v6670_v30 = vld [vmem:[%s7122_s19 + $0x6a8] sm:$0xff] }
 0x7ff   : > { %5513 = vst [vmem:[%s7296_s12 + $0x3f8] sm:$0xff] %v4517_v31  ;;  %4357 = vmatmul.f32.gmra.mxu2 %v6647_v32  ;;  %v3892_v33 = vpop.f32.mrf.mxu0 }
 0x800   : > { %v4101_v34 = vpop.f32.mrf.mxu1  ;;  %4566 = vmatmul.f32.gmra.mxu3 %v6648_v35 }
 0x801   : > { %v4102_v36 = vadd.f32 %v4101_v34, %v3892_v33  ;;  %v6671_v34 = vld [vmem:[%s7122_s19 + $0x6d0] sm:$0xff] }
 0x802   : > { %v4310_v37 = vpop.f32.mrf.mxu2  ;;  %3939 = vmatmul.f32.gmra.mxu0 %v6649_v38 }
 0x803   : > { %4148 = vmatmul.f32.gmra.mxu1 %v6650_v39  ;;  %v4519_v40 = vpop.f32.mrf.mxu3  ;;  %v4311_v41 = vadd.f32 %v4310_v37, %v4102_v36  ;;  %v6672_v37 = vld [vmem:[%s7122_s19 + $0x6d8] sm:$0xff] }
 0x805   : > { %v4520_v42 = vadd.f32 %v4519_v40, %v4311_v41  ;;  %v6673_v40 = vld [vmem:[%s7122_s19 + $0x6c0] sm:$0xff]  ;;  %v6674_v41 = vld [vmem:[%s7122_s19 + $0x6c8] sm:$0xff] }
 0x807   : > { %5517 = vst [vmem:[%s7296_s12 + $0x418] sm:$0xff] %v4520_v42  ;;  %4360 = vmatmul.f32.gmra.mxu2 %v6651_v43  ;;  %v3895_v44 = vpop.f32.mrf.mxu0 }
 0x808   : > { %v4104_v45 = vpop.f32.mrf.mxu1  ;;  %4569 = vmatmul.f32.gmra.mxu3 %v6652_v46 }
 0x809   : > { %v4105_v47 = vadd.f32 %v4104_v45, %v3895_v44  ;;  %v6675_v45 = vld [vmem:[%s7122_s19 + $0x6f0] sm:$0xff] }
 0x80a   : > { %v4313_v48 = vpop.f32.mrf.mxu2  ;;  %3942 = vmatmul.f32.gmra.mxu0 %v6653_v49 }
 0x80b   : > { %4151 = vmatmul.f32.gmra.mxu1 %v6654_v50  ;;  %v4522_v51 = vpop.f32.mrf.mxu3  ;;  %v4314_v52 = vadd.f32 %v4313_v48, %v4105_v47  ;;  %v6676_v48 = vld [vmem:[%s7122_s19 + $0x6f8] sm:$0xff] }
 0x80d   : > { %v4523_v53 = vadd.f32 %v4522_v51, %v4314_v52  ;;  %v6677_v51 = vld [vmem:[%s7122_s19 + $0x6e0] sm:$0xff]  ;;  %v6678_v52 = vld [vmem:[%s7122_s19 + $0x6e8] sm:$0xff] }
 0x80f   : > { %5521 = vst [vmem:[%s7296_s12 + $0x438] sm:$0xff] %v4523_v53  ;;  %4363 = vmatmul.f32.gmra.mxu2 %v6655_v54  ;;  %v3898_v55 = vpop.f32.mrf.mxu0 }
 0x810   : > { %v4107_v56 = vpop.f32.mrf.mxu1  ;;  %4572 = vmatmul.f32.gmra.mxu3 %v6656_v57 }
 0x811   : > { %v4108_v58 = vadd.f32 %v4107_v56, %v3898_v55  ;;  %v6679_v56 = vld [vmem:[%s7122_s19 + $0x710] sm:$0xff] }
 0x812   : > { %v4316_v59 = vpop.f32.mrf.mxu2  ;;  %3945 = vmatmul.f32.gmra.mxu0 %v6657_v60 }
 0x813   : > { %4154 = vmatmul.f32.gmra.mxu1 %v6658_v61  ;;  %v4525_v62 = vpop.f32.mrf.mxu3  ;;  %v4317_v63 = vadd.f32 %v4316_v59, %v4108_v58  ;;  %v6680_v59 = vld [vmem:[%s7122_s19 + $0x718] sm:$0xff] }
 0x815   : > { %v4526_v0 = vadd.f32 %v4525_v62, %v4317_v63  ;;  %v6681_v62 = vld [vmem:[%s7122_s19 + $0x700] sm:$0xff]  ;;  %v6682_v63 = vld [vmem:[%s7122_s19 + $0x708] sm:$0xff] }
 0x817   : > { %5525 = vst [vmem:[%s7296_s12 + $0x458] sm:$0xff] %v4526_v0  ;;  %4366 = vmatmul.f32.gmra.mxu2 %v6659_v1  ;;  %v3901_v2 = vpop.f32.mrf.mxu0 }
 0x818   : > { %v4110_v3 = vpop.f32.mrf.mxu1  ;;  %4575 = vmatmul.f32.gmra.mxu3 %v6660_v4 }
 0x819   : > { %v4111_v5 = vadd.f32 %v4110_v3, %v3901_v2  ;;  %v6683_v3 = vld [vmem:[%s7122_s19 + $0x730] sm:$0xff] }
 0x81a   : > { %v4319_v6 = vpop.f32.mrf.mxu2  ;;  %3948 = vmatmul.f32.gmra.mxu0 %v6661_v7 }
 0x81b   : > { %4157 = vmatmul.f32.gmra.mxu1 %v6662_v8  ;;  %v4528_v9 = vpop.f32.mrf.mxu3  ;;  %v4320_v10 = vadd.f32 %v4319_v6, %v4111_v5  ;;  %v6684_v6 = vld [vmem:[%s7122_s19 + $0x738] sm:$0xff] }
 0x81d   : > { %v4529_v11 = vadd.f32 %v4528_v9, %v4320_v10  ;;  %v6685_v9 = vld [vmem:[%s7122_s19 + $0x720] sm:$0xff]  ;;  %v6686_v10 = vld [vmem:[%s7122_s19 + $0x728] sm:$0xff] }
 0x81f   : > { %5529 = vst [vmem:[%s7296_s12 + $0x478] sm:$0xff] %v4529_v11  ;;  %4369 = vmatmul.f32.gmra.mxu2 %v6663_v12  ;;  %v3904_v13 = vpop.f32.mrf.mxu0 }
 0x820   : > { %v4113_v14 = vpop.f32.mrf.mxu1  ;;  %4578 = vmatmul.f32.gmra.mxu3 %v6664_v15 }
 0x821   : > { %v4114_v16 = vadd.f32 %v4113_v14, %v3904_v13  ;;  %v6687_v14 = vld [vmem:[%s7122_s19 + $0x750] sm:$0xff] }
 0x822   : > { %v4322_v17 = vpop.f32.mrf.mxu2  ;;  %3951 = vmatmul.f32.gmra.mxu0 %v6665_v18 }
 0x823   : > { %4160 = vmatmul.f32.gmra.mxu1 %v6666_v19  ;;  %v4531_v20 = vpop.f32.mrf.mxu3  ;;  %v4323_v21 = vadd.f32 %v4322_v17, %v4114_v16  ;;  %v6688_v17 = vld [vmem:[%s7122_s19 + $0x758] sm:$0xff] }
 0x825   : > { %v4532_v22 = vadd.f32 %v4531_v20, %v4323_v21  ;;  %v6689_v20 = vld [vmem:[%s7122_s19 + $0x740] sm:$0xff]  ;;  %v6690_v21 = vld [vmem:[%s7122_s19 + $0x748] sm:$0xff] }
 0x827   : > { %5533 = vst [vmem:[%s7296_s12 + $0x498] sm:$0xff] %v4532_v22  ;;  %4372 = vmatmul.f32.gmra.mxu2 %v6667_v23  ;;  %v3907_v24 = vpop.f32.mrf.mxu0 }
 0x828   : > { %v4116_v25 = vpop.f32.mrf.mxu1  ;;  %4581 = vmatmul.f32.gmra.mxu3 %v6668_v26 }
 0x829   : > { %v4117_v27 = vadd.f32 %v4116_v25, %v3907_v24  ;;  %v6691_v25 = vld [vmem:[%s7122_s19 + $0x770] sm:$0xff] }
 0x82a   : > { %v4325_v28 = vpop.f32.mrf.mxu2  ;;  %3954 = vmatmul.f32.gmra.mxu0 %v6669_v29 }
 0x82b   : > { %4163 = vmatmul.f32.gmra.mxu1 %v6670_v30  ;;  %v4534_v31 = vpop.f32.mrf.mxu3  ;;  %v4326_v32 = vadd.f32 %v4325_v28, %v4117_v27  ;;  %v6692_v28 = vld [vmem:[%s7122_s19 + $0x778] sm:$0xff] }
 0x82d   : > { %v4535_v33 = vadd.f32 %v4534_v31, %v4326_v32  ;;  %v6693_v31 = vld [vmem:[%s7122_s19 + $0x760] sm:$0xff]  ;;  %v6694_v32 = vld [vmem:[%s7122_s19 + $0x768] sm:$0xff] }
 0x82f   : > { %5537 = vst [vmem:[%s7296_s12 + $0x4b8] sm:$0xff] %v4535_v33  ;;  %4375 = vmatmul.f32.gmra.mxu2 %v6671_v34  ;;  %v3910_v35 = vpop.f32.mrf.mxu0 }
 0x830   : > { %v4119_v36 = vpop.f32.mrf.mxu1  ;;  %4584 = vmatmul.f32.gmra.mxu3 %v6672_v37 }
 0x831   : > { %v4120_v38 = vadd.f32 %v4119_v36, %v3910_v35  ;;  %v6695_v36 = vld [vmem:[%s7122_s19 + $0x790] sm:$0xff] }
 0x832   : > { %v4328_v39 = vpop.f32.mrf.mxu2  ;;  %3957 = vmatmul.f32.gmra.mxu0 %v6673_v40 }
 0x833   : > { %4166 = vmatmul.f32.gmra.mxu1 %v6674_v41  ;;  %v4537_v42 = vpop.f32.mrf.mxu3  ;;  %v4329_v43 = vadd.f32 %v4328_v39, %v4120_v38  ;;  %v6696_v39 = vld [vmem:[%s7122_s19 + $0x798] sm:$0xff] }
 0x835   : > { %v4538_v44 = vadd.f32 %v4537_v42, %v4329_v43  ;;  %v6697_v42 = vld [vmem:[%s7122_s19 + $0x780] sm:$0xff]  ;;  %v6698_v43 = vld [vmem:[%s7122_s19 + $0x788] sm:$0xff] }
 0x837   : > { %5541 = vst [vmem:[%s7296_s12 + $0x4d8] sm:$0xff] %v4538_v44  ;;  %4378 = vmatmul.f32.gmra.mxu2 %v6675_v45  ;;  %v3913_v46 = vpop.f32.mrf.mxu0 }
 0x838   : > { %v4122_v47 = vpop.f32.mrf.mxu1  ;;  %4587 = vmatmul.f32.gmra.mxu3 %v6676_v48 }
 0x839   : > { %v4123_v49 = vadd.f32 %v4122_v47, %v3913_v46  ;;  %v6699_v47 = vld [vmem:[%s7122_s19 + $0x7b0] sm:$0xff] }
 0x83a   : > { %v4331_v50 = vpop.f32.mrf.mxu2  ;;  %3960 = vmatmul.f32.gmra.mxu0 %v6677_v51 }
 0x83b   : > { %4169 = vmatmul.f32.gmra.mxu1 %v6678_v52  ;;  %v4540_v53 = vpop.f32.mrf.mxu3  ;;  %v4332_v54 = vadd.f32 %v4331_v50, %v4123_v49  ;;  %v6700_v50 = vld [vmem:[%s7122_s19 + $0x7b8] sm:$0xff] }
 0x83d   : > { %v4541_v55 = vadd.f32 %v4540_v53, %v4332_v54  ;;  %v6701_v53 = vld [vmem:[%s7122_s19 + $0x7a0] sm:$0xff]  ;;  %v6702_v54 = vld [vmem:[%s7122_s19 + $0x7a8] sm:$0xff] }
 0x83f   : > { %5545 = vst [vmem:[%s7296_s12 + $0x4f8] sm:$0xff] %v4541_v55  ;;  %4381 = vmatmul.f32.gmra.mxu2 %v6679_v56  ;;  %v3916_v57 = vpop.f32.mrf.mxu0 }
 0x840   : > { %v4125_v58 = vpop.f32.mrf.mxu1  ;;  %4590 = vmatmul.f32.gmra.mxu3 %v6680_v59 }
 0x841   : > { %v4126_v60 = vadd.f32 %v4125_v58, %v3916_v57  ;;  %v6703_v58 = vld [vmem:[%s7122_s19 + $0x7d0] sm:$0xff] }
 0x842   : > { %v4334_v61 = vpop.f32.mrf.mxu2  ;;  %3963 = vmatmul.f32.gmra.mxu0 %v6681_v62 }
 0x843   : > { %4172 = vmatmul.f32.gmra.mxu1 %v6682_v63  ;;  %v4543_v0 = vpop.f32.mrf.mxu3  ;;  %v4335_v1 = vadd.f32 %v4334_v61, %v4126_v60  ;;  %v6704_v61 = vld [vmem:[%s7122_s19 + $0x7d8] sm:$0xff] }
 0x845   : > { %v4544_v2 = vadd.f32 %v4543_v0, %v4335_v1  ;;  %v6705_v0 = vld [vmem:[%s7122_s19 + $0x7c0] sm:$0xff]  ;;  %v6706_v1 = vld [vmem:[%s7122_s19 + $0x7c8] sm:$0xff] }
 0x847   : > { %5549 = vst [vmem:[%s7296_s12 + $0x518] sm:$0xff] %v4544_v2  ;;  %4384 = vmatmul.f32.gmra.mxu2 %v6683_v3  ;;  %v3919_v4 = vpop.f32.mrf.mxu0 }
 0x848   : > { %v4128_v5 = vpop.f32.mrf.mxu1  ;;  %4593 = vmatmul.f32.gmra.mxu3 %v6684_v6 }
 0x849   : > { %v4129_v7 = vadd.f32 %v4128_v5, %v3919_v4  ;;  %v6707_v5 = vld [vmem:[%s7122_s19 + $0x7f0] sm:$0xff] }
 0x84a   : > { %v4337_v8 = vpop.f32.mrf.mxu2  ;;  %3966 = vmatmul.f32.gmra.mxu0 %v6685_v9 }
 0x84b   : > { %4175 = vmatmul.f32.gmra.mxu1 %v6686_v10  ;;  %v4546_v11 = vpop.f32.mrf.mxu3  ;;  %v4338_v12 = vadd.f32 %v4337_v8, %v4129_v7  ;;  %v6708_v8 = vld [vmem:[%s7122_s19 + $0x7f8] sm:$0xff] }
 0x84d   : > { %v4547_v13 = vadd.f32 %v4546_v11, %v4338_v12  ;;  %v6709_v11 = vld [vmem:[%s7122_s19 + $0x7e0] sm:$0xff]  ;;  %v6710_v12 = vld [vmem:[%s7122_s19 + $0x7e8] sm:$0xff]  ;;  %s5658_s19 = sshll.u32 %s7296_s12, 4  ;;  %s5659_s19 = int_to_ptr.vmem [resolvable:$true] %s5658_s19 }
 0x84f   : > { %5553 = vst [vmem:[%s7296_s12 + $0x538] sm:$0xff] %v4547_v13  ;;  %4387 = vmatmul.f32.gmra.mxu2 %v6687_v14  ;;  %v3922_v15 = vpop.f32.mrf.mxu0 }
 0x850   : > { %v4131_v16 = vpop.f32.mrf.mxu1  ;;  %4596 = vmatmul.f32.gmra.mxu3 %v6688_v17 }
 0x851   : > { %v4132_v18 = vadd.f32 %v4131_v16, %v3922_v15 }
 0x852   : > { %v4340_v19 = vpop.f32.mrf.mxu2  ;;  %3969 = vmatmul.f32.gmra.mxu0 %v6689_v20 }
 0x853   : > { %4178 = vmatmul.f32.gmra.mxu1 %v6690_v21  ;;  %v4549_v22 = vpop.f32.mrf.mxu3  ;;  %v4341_v23 = vadd.f32 %v4340_v19, %v4132_v18 }
 0x855   : > { %v4550_v24 = vadd.f32 %v4549_v22, %v4341_v23 }
 0x857   : > { %5557 = vst [vmem:[%s7296_s12 + $0x558] sm:$0xff] %v4550_v24  ;;  %4390 = vmatmul.f32.gmra.mxu2 %v6691_v25  ;;  %v3925_v26 = vpop.f32.mrf.mxu0 }
 0x858   : > { %v4134_v27 = vpop.f32.mrf.mxu1  ;;  %4599 = vmatmul.f32.gmra.mxu3 %v6692_v28 }
 0x859   : > { %v4135_v29 = vadd.f32 %v4134_v27, %v3925_v26 }
 0x85a   : > { %v4343_v30 = vpop.f32.mrf.mxu2  ;;  %3972 = vmatmul.f32.gmra.mxu0 %v6693_v31 }
 0x85b   : > { %4181 = vmatmul.f32.gmra.mxu1 %v6694_v32  ;;  %v4552_v33 = vpop.f32.mrf.mxu3  ;;  %v4344_v34 = vadd.f32 %v4343_v30, %v4135_v29 }
 0x85d   : > { %v4553_v35 = vadd.f32 %v4552_v33, %v4344_v34 }
 0x85f   : > { %5561 = vst [vmem:[%s7296_s12 + $0x578] sm:$0xff] %v4553_v35  ;;  %4393 = vmatmul.f32.gmra.mxu2 %v6695_v36  ;;  %v3928_v37 = vpop.f32.mrf.mxu0 }
 0x860   : > { %v4137_v38 = vpop.f32.mrf.mxu1  ;;  %4602 = vmatmul.f32.gmra.mxu3 %v6696_v39 }
 0x861   : > { %v4138_v40 = vadd.f32 %v4137_v38, %v3928_v37 }
 0x862   : > { %v4346_v41 = vpop.f32.mrf.mxu2  ;;  %3975 = vmatmul.f32.gmra.mxu0 %v6697_v42 }
 0x863   : > { %4184 = vmatmul.f32.gmra.mxu1 %v6698_v43  ;;  %v4555_v44 = vpop.f32.mrf.mxu3  ;;  %v4347_v45 = vadd.f32 %v4346_v41, %v4138_v40 }
 0x865   : > { %v4556_v46 = vadd.f32 %v4555_v44, %v4347_v45 }
 0x867   : > { %5565 = vst [vmem:[%s7296_s12 + $0x598] sm:$0xff] %v4556_v46  ;;  %4396 = vmatmul.f32.gmra.mxu2 %v6699_v47  ;;  %v3931_v48 = vpop.f32.mrf.mxu0 }
 0x868   : > { %v4140_v49 = vpop.f32.mrf.mxu1  ;;  %4605 = vmatmul.f32.gmra.mxu3 %v6700_v50 }
 0x869   : > { %v4141_v51 = vadd.f32 %v4140_v49, %v3931_v48 }
 0x86a   : > { %v4349_v52 = vpop.f32.mrf.mxu2  ;;  %3978 = vmatmul.f32.gmra.mxu0 %v6701_v53 }
 0x86b   : > { %4187 = vmatmul.f32.gmra.mxu1 %v6702_v54  ;;  %v4558_v55 = vpop.f32.mrf.mxu3  ;;  %v4350_v56 = vadd.f32 %v4349_v52, %v4141_v51 }
 0x86d   : > { %v4559_v57 = vadd.f32 %v4558_v55, %v4350_v56 }
 0x86f   : > { %5569 = vst [vmem:[%s7296_s12 + $0x5b8] sm:$0xff] %v4559_v57  ;;  %4399 = vmatmul.f32.gmra.mxu2 %v6703_v58  ;;  %v3934_v59 = vpop.f32.mrf.mxu0 }
 0x870   : > { %v4143_v60 = vpop.f32.mrf.mxu1  ;;  %4608 = vmatmul.f32.gmra.mxu3 %v6704_v61 }
 0x871   : > { %v4144_v62 = vadd.f32 %v4143_v60, %v3934_v59 }
 0x872   : > { %v4352_v63 = vpop.f32.mrf.mxu2  ;;  %3981 = vmatmul.f32.gmra.mxu0 %v6705_v0 }
 0x873   : > { %4190 = vmatmul.f32.gmra.mxu1 %v6706_v1  ;;  %v4561_v2 = vpop.f32.mrf.mxu3  ;;  %v4353_v3 = vadd.f32 %v4352_v63, %v4144_v62 }
 0x875   : > { %v4562_v4 = vadd.f32 %v4561_v2, %v4353_v3 }
 0x877   : > { %5573 = vst [vmem:[%s7296_s12 + $0x5d8] sm:$0xff] %v4562_v4  ;;  %4402 = vmatmul.f32.gmra.mxu2 %v6707_v5  ;;  %v3937_v6 = vpop.f32.mrf.mxu0 }
 0x878   : > { %v4146_v7 = vpop.f32.mrf.mxu1  ;;  %4611 = vmatmul.f32.gmra.mxu3 %v6708_v8 }
 0x879   : > { %v4147_v9 = vadd.f32 %v4146_v7, %v3937_v6 }
 0x87a   : > { %v4355_v10 = vpop.f32.mrf.mxu2  ;;  %3984 = vmatmul.f32.gmra.mxu0 %v6709_v11 }
 0x87b   : > { %4193 = vmatmul.f32.gmra.mxu1 %v6710_v12  ;;  %v4564_v13 = vpop.f32.mrf.mxu3  ;;  %v4356_v14 = vadd.f32 %v4355_v10, %v4147_v9 }
 0x87d   : > { %v4565_v15 = vadd.f32 %v4564_v13, %v4356_v14 }
 0x87f   : > { %5577 = vst [vmem:[%s7296_s12 + $0x5f8] sm:$0xff] %v4565_v15  ;;  %v3940_v16 = vpop.f32.mrf.mxu0 }
 0x880   : > { %v4149_v17 = vpop.f32.mrf.mxu1 }
 0x881   : > { %v4150_v18 = vadd.f32 %v4149_v17, %v3940_v16 }
 0x882   : > { %v4358_v19 = vpop.f32.mrf.mxu2 }
 0x883   : > { %v4567_v20 = vpop.f32.mrf.mxu3  ;;  %v4359_v21 = vadd.f32 %v4358_v19, %v4150_v18 }
 0x885   : > { %v4568_v22 = vadd.f32 %v4567_v20, %v4359_v21 }
 0x887   : > { %5581 = vst [vmem:[%s7296_s12 + $0x618] sm:$0xff] %v4568_v22  ;;  %v3943_v23 = vpop.f32.mrf.mxu0 }
 0x888   : > { %v4152_v24 = vpop.f32.mrf.mxu1 }
 0x889   : > { %v4153_v25 = vadd.f32 %v4152_v24, %v3943_v23 }
 0x88a   : > { %v4361_v26 = vpop.f32.mrf.mxu2 }
 0x88b   : > { %v4570_v27 = vpop.f32.mrf.mxu3  ;;  %v4362_v28 = vadd.f32 %v4361_v26, %v4153_v25 }
 0x88d   : > { %v4571_v29 = vadd.f32 %v4570_v27, %v4362_v28 }
 0x88f   : > { %5585 = vst [vmem:[%s7296_s12 + $0x638] sm:$0xff] %v4571_v29  ;;  %v3946_v30 = vpop.f32.mrf.mxu0 }
 0x890   : > { %v4155_v31 = vpop.f32.mrf.mxu1 }
 0x891   : > { %v4156_v32 = vadd.f32 %v4155_v31, %v3946_v30 }
 0x892   : > { %v4364_v33 = vpop.f32.mrf.mxu2 }
 0x893   : > { %v4573_v34 = vpop.f32.mrf.mxu3  ;;  %v4365_v35 = vadd.f32 %v4364_v33, %v4156_v32 }
 0x895   : > { %v4574_v36 = vadd.f32 %v4573_v34, %v4365_v35 }
 0x897   : > { %5589 = vst [vmem:[%s7296_s12 + $0x658] sm:$0xff] %v4574_v36  ;;  %v3949_v37 = vpop.f32.mrf.mxu0 }
 0x898   : > { %v4158_v38 = vpop.f32.mrf.mxu1 }
 0x899   : > { %v4159_v39 = vadd.f32 %v4158_v38, %v3949_v37 }
 0x89a   : > { %v4367_v40 = vpop.f32.mrf.mxu2 }
 0x89b   : > { %v4576_v41 = vpop.f32.mrf.mxu3  ;;  %v4368_v42 = vadd.f32 %v4367_v40, %v4159_v39 }
 0x89d   : > { %v4577_v43 = vadd.f32 %v4576_v41, %v4368_v42 }
 0x89f   : > { %5593 = vst [vmem:[%s7296_s12 + $0x678] sm:$0xff] %v4577_v43  ;;  %v3952_v44 = vpop.f32.mrf.mxu0 }
 0x8a0   : > { %v4161_v45 = vpop.f32.mrf.mxu1 }
 0x8a1   : > { %v4162_v46 = vadd.f32 %v4161_v45, %v3952_v44 }
 0x8a2   : > { %v4370_v47 = vpop.f32.mrf.mxu2 }
 0x8a3   : > { %v4579_v48 = vpop.f32.mrf.mxu3  ;;  %v4371_v49 = vadd.f32 %v4370_v47, %v4162_v46 }
 0x8a5   : > { %v4580_v50 = vadd.f32 %v4579_v48, %v4371_v49 }
 0x8a7   : > { %5597 = vst [vmem:[%s7296_s12 + $0x698] sm:$0xff] %v4580_v50  ;;  %v3955_v51 = vpop.f32.mrf.mxu0 }
 0x8a8   : > { %v4164_v52 = vpop.f32.mrf.mxu1 }
 0x8a9   : > { %v4165_v53 = vadd.f32 %v4164_v52, %v3955_v51 }
 0x8aa   : > { %v4373_v54 = vpop.f32.mrf.mxu2 }
 0x8ab   : > { %v4582_v55 = vpop.f32.mrf.mxu3  ;;  %v4374_v56 = vadd.f32 %v4373_v54, %v4165_v53 }
 0x8ad   : > { %v4583_v57 = vadd.f32 %v4582_v55, %v4374_v56 }
 0x8af   : > { %5601 = vst [vmem:[%s7296_s12 + $0x6b8] sm:$0xff] %v4583_v57  ;;  %v3958_v58 = vpop.f32.mrf.mxu0 }
 0x8b0   : > { %v4167_v59 = vpop.f32.mrf.mxu1 }
 0x8b1   : > { %v4168_v60 = vadd.f32 %v4167_v59, %v3958_v58 }
 0x8b2   : > { %v4376_v61 = vpop.f32.mrf.mxu2 }
 0x8b3   : > { %v4585_v62 = vpop.f32.mrf.mxu3  ;;  %v4377_v63 = vadd.f32 %v4376_v61, %v4168_v60 }
 0x8b5   : > { %v4586_v0 = vadd.f32 %v4585_v62, %v4377_v63 }
 0x8b7   : > { %5605 = vst [vmem:[%s7296_s12 + $0x6d8] sm:$0xff] %v4586_v0  ;;  %v3961_v1 = vpop.f32.mrf.mxu0 }
 0x8b8   : > { %v4170_v2 = vpop.f32.mrf.mxu1 }
 0x8b9   : > { %v4171_v3 = vadd.f32 %v4170_v2, %v3961_v1 }
 0x8ba   : > { %v4379_v4 = vpop.f32.mrf.mxu2 }
 0x8bb   : > { %v4588_v5 = vpop.f32.mrf.mxu3  ;;  %v4380_v6 = vadd.f32 %v4379_v4, %v4171_v3 }
 0x8bd   : > { %v4589_v7 = vadd.f32 %v4588_v5, %v4380_v6 }
 0x8bf   : > { %5609 = vst [vmem:[%s7296_s12 + $0x6f8] sm:$0xff] %v4589_v7  ;;  %v3964_v8 = vpop.f32.mrf.mxu0 }
 0x8c0   : > { %v4173_v9 = vpop.f32.mrf.mxu1 }
 0x8c1   : > { %v4174_v10 = vadd.f32 %v4173_v9, %v3964_v8 }
 0x8c2   : > { %v4382_v11 = vpop.f32.mrf.mxu2 }
 0x8c3   : > { %v4591_v12 = vpop.f32.mrf.mxu3  ;;  %v4383_v13 = vadd.f32 %v4382_v11, %v4174_v10 }
 0x8c5   : > { %v4592_v14 = vadd.f32 %v4591_v12, %v4383_v13 }
 0x8c7   : > { %5613 = vst [vmem:[%s7296_s12 + $0x718] sm:$0xff] %v4592_v14  ;;  %v3967_v15 = vpop.f32.mrf.mxu0 }
 0x8c8   : > { %v4176_v16 = vpop.f32.mrf.mxu1 }
 0x8c9   : > { %v4177_v17 = vadd.f32 %v4176_v16, %v3967_v15 }
 0x8ca   : > { %v4385_v18 = vpop.f32.mrf.mxu2 }
 0x8cb   : > { %v4594_v19 = vpop.f32.mrf.mxu3  ;;  %v4386_v20 = vadd.f32 %v4385_v18, %v4177_v17 }
 0x8cd   : > { %v4595_v21 = vadd.f32 %v4594_v19, %v4386_v20 }
 0x8cf   : > { %5617 = vst [vmem:[%s7296_s12 + $0x738] sm:$0xff] %v4595_v21  ;;  %v3970_v22 = vpop.f32.mrf.mxu0 }
 0x8d0   : > { %v4179_v23 = vpop.f32.mrf.mxu1 }
 0x8d1   : > { %v4180_v24 = vadd.f32 %v4179_v23, %v3970_v22 }
 0x8d2   : > { %v4388_v25 = vpop.f32.mrf.mxu2 }
 0x8d3   : > { %v4597_v26 = vpop.f32.mrf.mxu3  ;;  %v4389_v27 = vadd.f32 %v4388_v25, %v4180_v24 }
 0x8d5   : > { %v4598_v28 = vadd.f32 %v4597_v26, %v4389_v27 }
 0x8d7   : > { %5621 = vst [vmem:[%s7296_s12 + $0x758] sm:$0xff] %v4598_v28  ;;  %v3973_v29 = vpop.f32.mrf.mxu0 }
 0x8d8   : > { %v4182_v30 = vpop.f32.mrf.mxu1 }
 0x8d9   : > { %v4183_v31 = vadd.f32 %v4182_v30, %v3973_v29 }
 0x8da   : > { %v4391_v32 = vpop.f32.mrf.mxu2 }
 0x8db   : > { %v4600_v33 = vpop.f32.mrf.mxu3  ;;  %v4392_v34 = vadd.f32 %v4391_v32, %v4183_v31 }
 0x8dd   : > { %v4601_v35 = vadd.f32 %v4600_v33, %v4392_v34 }
 0x8df   : > { %5625 = vst [vmem:[%s7296_s12 + $0x778] sm:$0xff] %v4601_v35  ;;  %v3976_v36 = vpop.f32.mrf.mxu0 }
 0x8e0   : > { %v4185_v37 = vpop.f32.mrf.mxu1 }
 0x8e1   : > { %v4186_v38 = vadd.f32 %v4185_v37, %v3976_v36 }
 0x8e2   : > { %v4394_v39 = vpop.f32.mrf.mxu2 }
 0x8e3   : > { %v4603_v40 = vpop.f32.mrf.mxu3  ;;  %v4395_v41 = vadd.f32 %v4394_v39, %v4186_v38 }
 0x8e5   : > { %v4604_v42 = vadd.f32 %v4603_v40, %v4395_v41 }
 0x8e7   : > { %5629 = vst [vmem:[%s7296_s12 + $0x798] sm:$0xff] %v4604_v42  ;;  %v3979_v43 = vpop.f32.mrf.mxu0 }
 0x8e8   : > { %v4188_v44 = vpop.f32.mrf.mxu1 }
 0x8e9   : > { %v4189_v45 = vadd.f32 %v4188_v44, %v3979_v43 }
 0x8ea   : > { %v4397_v46 = vpop.f32.mrf.mxu2 }
 0x8eb   : > { %v4606_v47 = vpop.f32.mrf.mxu3  ;;  %v4398_v48 = vadd.f32 %v4397_v46, %v4189_v45 }
 0x8ed   : > { %v4607_v49 = vadd.f32 %v4606_v47, %v4398_v48 }
 0x8ef   : > { %5633 = vst [vmem:[%s7296_s12 + $0x7b8] sm:$0xff] %v4607_v49  ;;  %v3982_v50 = vpop.f32.mrf.mxu0 }
 0x8f0   : > { %v4191_v51 = vpop.f32.mrf.mxu1 }
 0x8f1   : > { %v4192_v52 = vadd.f32 %v4191_v51, %v3982_v50 }
 0x8f2   : > { %v4400_v53 = vpop.f32.mrf.mxu2 }
 0x8f3   : > { %v4609_v54 = vpop.f32.mrf.mxu3  ;;  %v4401_v55 = vadd.f32 %v4400_v53, %v4192_v52 }
 0x8f5   : > { %v4610_v56 = vadd.f32 %v4609_v54, %v4401_v55 }
 0x8f7   : > { %5637 = vst [vmem:[%s7296_s12 + $0x7d8] sm:$0xff] %v4610_v56  ;;  %v3985_v57 = vpop.f32.mrf.mxu0 }
 0x8f8   : > { %v4194_v58 = vpop.f32.mrf.mxu1 }
 0x8f9   : > { %v4195_v59 = vadd.f32 %v4194_v58, %v3985_v57 }
 0x8fa   : > { %v4403_v60 = vpop.f32.mrf.mxu2 }
 0x8fb   : > { %v4612_v61 = vpop.f32.mrf.mxu3  ;;  %v4404_v62 = vadd.f32 %v4403_v60, %v4195_v59 }
 0x8fd   : > { %v4613_v63 = vadd.f32 %v4612_v61, %v4404_v62 }
 0x8ff   : > { %5641 = vst [vmem:[%s7296_s12 + $0x7f8] sm:$0xff] %v4613_v63 }
 0x900   : > { %6798 = shalt.err (!%p6795_p10)
}
 0x901   : > { %s6926_s28 = smov 512   ;;  %s6927_s12 = smov 1024  }
 0x902   : > { %s6928_s29 = smov 32  }
 0x903   : > { %5810 = dma.vmem_to_hbm [thread:$0]  (%p7090_p1), %s5659_s19, 32768, %s5661_s24, %s5643_s15, %s6926_s28, %s6927_s12, %s6928_s29  }
 0x904 PF: > { %p5824_p12 = scmp.ge.s32.totalorder %s6921_s22, 2  ;;  %s5675_s26 = sand.u32 1, %s6869_s9  }
 0x905   : > { %s5676_s21 = scalar_lea.sflag [#allocation5], %s5675_s26 }
 0x906   : > { %p5820_p3 = pnand %p5824_p12, %p7105_p5 }
 0x908   : > { %p5821_p13 = pneg %p5820_p3 }
 0x90a   : > { %6864 = dma.done.wait (%p5821_p13), %s5676_s21, 32768  }
 0x90b   : > { %6866 = vsyncadd (%p5821_p13), %s5676_s21, 4294934528  ;;  %s21_s22 = sadd.s32 1, %s6921_s22   ;;  %s8780_s18 = sld [smem:[#allocation16_spill]] }
 0x90c   : > { %p8699_p0 = scmp.ge.s32.totalorder %s21_s22, 6   ;;  %s8781_s19 = sld [smem:[#allocation13_spill]] }
 0x90d   : > { %s8782_s27 = sld [smem:[#allocation14_spill]]  ;;  %s8784_s9 = smov %s6873_s10 }
 0x90e   : > { %s8783_s21 = sld [smem:[#allocation15_spill]]  ;;  %s8785_s10 = smov %s6877_s11 }
 0x90f   : > { %s8786_s11 = smov %s7102_s6  ;;  %s8787_s12 = smov %s6885_s13 }
 0x910   : > { %s8788_s13 = smov %s6889_s14  ;;  %s8790_s15 = smov %s6897_s16 }
 0x911   : > { %s8789_s14 = smov %s8780_s18  ;;  %s8791_s16 = smov %s6901_s17 }
 0x912   : > { %s8792_s17 = smov %s7099_s0  ;;  %s8793_s18 = smov %s6913_s20 }
 0x913   : > { %s8794_s20 = smov %s8782_s27  ;;  %20 = sbr.rel (!%p8699_p0) target bundleno = 15 (0xf), region = 94 }
 0x918   :  { %5682 = vsyncpa [#allocation4], 1 }
 0x919   :  { %5684 = vsyncpa [#allocation4 + $0x1], 1 }
 0x91a   :  { %5685 = vsyncpa [#allocation7], 1 }
 0x91b   :  { %5687 = vsyncpa [#allocation7 + $0x1], 1 }
 0x91c   :  { %5688 = vsyncpa [#allocation5], 1 }
 0x91d   :  { %5690 = vsyncpa [#allocation5 + $0x1], 1 }

</bundles_post_ra>
